<compile_context>
chip_gen: v7x
topology: tpu7x:2x2x1
jax: 0.10.0
libtpu: 0.0.40
codegen_flags: <defaults>
</compile_context>

<pallas_src>
import numpy as np
import jax
import jax.numpy as jnp
from jax import lax
from jax.experimental import pallas as pl
from jax.experimental.pallas import tpu as pltpu


# ----------------------------------------------------------------------------
# Kernel 1: fused Conv3x3 (BN-folded) -> bias -> ReLU -> MaxPool2x2
# ----------------------------------------------------------------------------
def _make_conv_pool_kernel(tq, Mq, Cin, Cout):
    """Kernel over one (batch, time-tile) block.

    xq_ref: (1, 4, R, Cin)   4 pooling-phase tiles of the zero-padded input,
                             each flattened over (time, mel) with row stride
                             MS = Mq+1 and R = (tq+2)*(Mq+1) rows.
    w_ref : (9*Cin, Cout)    BN-scale-folded conv weights, rows (kt, km, cin).
    b_ref : (1, Cout)        folded bias = beta + (conv_bias - mean) * scale.
    o_ref : (1, 1, Rout, Cout) pooled activations, Rout = tq*(Mq+1)
                               (mel column Mq is junk, dropped by the wrapper).
    """
    MS = Mq + 1
    Rout = tq * MS

    def kernel(xq_ref, w_ref, b_ref, o_ref):
        w_all = w_ref[...]                                        # (9*Cin, Cout)

        def conv_phase(dt, dm):
            """Scale-folded conv output at positions (2*tp+dt, 2*mp+dm)."""
            if Cin == 1:
                # Layer 1: K=1 contraction -> do it on the VPU (9 shifted
                # multiply-adds) instead of starving the MXU.
                wf = w_all.astype(jnp.float32)                    # (9, Cout)
                acc = jnp.zeros((Rout, Cout), jnp.float32)
                for kt in range(3):
                    for km in range(3):
                        u, v = dt + kt, dm + km
                        p = 2 * (u % 2) + (v % 2)
                        off = (u // 2) * MS + (v // 2)
                        col = xq_ref[0, p, off:off + Rout, :].astype(jnp.float32)
                        acc = acc + col * wf[kt * 3 + km:kt * 3 + km + 1, :]
                return acc
            # Cin >= 64: in-VMEM im2col (9 statically-offset windows concatenated
            # along K) + one MXU matmul per pooling phase, f32 accumulation.
            parts = []
            for kt in range(3):
                for km in range(3):
                    u, v = dt + kt, dm + km
                    p = 2 * (u % 2) + (v % 2)
                    off = (u // 2) * MS + (v // 2)
                    parts.append(xq_ref[0, p, off:off + Rout, :])  # (Rout, Cin)
            lhs = jnp.concatenate(parts, axis=-1)                  # (Rout, 9*Cin)
            return jnp.dot(lhs, w_all, preferred_element_type=jnp.float32)

        pooled = conv_phase(0, 0)
        for dt, dm in ((0, 1), (1, 0), (1, 1)):
            pooled = jnp.maximum(pooled, conv_phase(dt, dm))
        y = jnp.maximum(pooled + b_ref[...], 0.0)                  # bias + ReLU (f32)
        o_ref[0, 0] = y.astype(o_ref.dtype)

    return kernel


def conv_bn_relu_pool(x, w_hwio, bias, *, tq=64):
    """x: (B, T, M, Cin); w_hwio: (3,3,Cin,Cout) with (kh=mel tap, kw=time tap);
    bias: (Cout,) folded BN bias.  Returns bf16 (B, T//2, M//2, Cout)."""
    B, T, M, Cin = x.shape
    Cout = w_hwio.shape[-1]
    assert M % 2 == 0, "n_mels must stay even at every pooling stage (n_mels % 8 == 0)"
    Mq = M // 2
    t_out = T // 2                      # MaxPool2d(2) floors, like PyTorch
    tq = max(1, min(tq, t_out))         # pooled time rows per tile
    n_t = -(-t_out // tq)

    # ---- XLA-side glue (~1x traffic): pad, 2x2 phase-decimate, time-tile ----
    TP = 2 * n_t * tq + 4               # padded time length (conv pad + tile slack)
    xpad = jnp.pad(x, ((0, 0), (1, TP - T - 1), (1, 1), (0, 0)))
    # phases[b, 2*et+em, i, j, c] = xpad[b, 2i+et, 2j+em, c]
    phases = jnp.stack([xpad[:, et::2, em::2, :] for et in (0, 1) for em in (0, 1)],
                       axis=1)
    # time tiles with a 2-phase-row halo (tile n covers pooled rows [n*tq, (n+1)*tq))
    tiles = jnp.stack([phases[:, :, n * tq:n * tq + tq + 2, :, :] for n in range(n_t)],
                      axis=1)           # (B, n_t, 4, tq+2, Mq+1, Cin)
    R = (tq + 2) * (Mq + 1)
    xq = tiles.reshape(B, n_t * 4, R, Cin).astype(jnp.bfloat16)

    # Weights with BN scale already folded in; rows ordered (kt=time, km=mel, cin).
    wmat = jnp.transpose(w_hwio, (1, 0, 2, 3)).reshape(9 * Cin, Cout).astype(jnp.bfloat16)
    bias2 = bias.reshape(1, Cout).astype(jnp.float32)

    Rout = tq * (Mq + 1)
    out = pl.pallas_call(
        _make_conv_pool_kernel(tq, Mq, Cin, Cout),
        grid=(B, n_t),
        in_specs=[
            pl.BlockSpec((1, 4, R, Cin), lambda b, n: (b, n, 0, 0)),
            pl.BlockSpec((9 * Cin, Cout), lambda b, n: (0, 0)),
            pl.BlockSpec((1, Cout), lambda b, n: (0, 0)),
        ],
        out_specs=pl.BlockSpec((1, 1, Rout, Cout), lambda b, n: (b, n, 0, 0)),
        out_shape=jax.ShapeDtypeStruct((B, n_t, Rout, Cout), jnp.bfloat16),
        compiler_params=pltpu.CompilerParams(
            dimension_semantics=("parallel", "parallel"),
            vmem_limit_bytes=32 * 1024 * 1024,
        ),
    )(xq, wmat, bias2)

    # Drop the per-tile junk mel column and any junk time rows of the last tile.
    out = out.reshape(B, n_t, tq, Mq + 1, Cout)[:, :, :, :Mq, :]
    out = out.reshape(B, n_t * tq, Mq, Cout)[:, :t_out]
    return out


# ----------------------------------------------------------------------------
# Kernel 2: fc head  Linear -> ReLU -> (Dropout=identity, eval) -> Linear -> ReLU
# ----------------------------------------------------------------------------
def _fc_kernel(x_ref, w1_ref, b1_ref, w2_ref, b2_ref, o_ref):
    h = jnp.dot(x_ref[...], w1_ref[...], preferred_element_type=jnp.float32) + b1_ref[...]
    h = jnp.maximum(h, 0.0)
    # TODO(synk): Dropout(p=0.3) is identity here (eval-mode semantics).
    o = jnp.dot(h.astype(jnp.bfloat16), w2_ref[...],
                preferred_element_type=jnp.float32) + b2_ref[...]
    o_ref[...] = jnp.maximum(o, 0.0)


def fc_forward(x2d, w1, b1, w2, b2, *, tn=256):
    N, F = x2d.shape
    d = w1.shape[1]
    dp = -(-d // 128) * 128             # pad d to a lane-dense multiple of 128
    tn = max(8, min(tn, -(-N // 8) * 8))
    Np = -(-N // tn) * tn

    xp = jnp.pad(x2d, ((0, Np - N), (0, 0))).astype(jnp.bfloat16)
    w1p = jnp.pad(w1, ((0, 0), (0, dp - d))).astype(jnp.bfloat16)
    b1p = jnp.pad(b1, (0, dp - d)).reshape(1, dp).astype(jnp.float32)
    w2p = jnp.pad(w2, ((0, dp - d), (0, dp - d))).astype(jnp.bfloat16)
    b2p = jnp.pad(b2, (0, dp - d)).reshape(1, dp).astype(jnp.float32)

    out = pl.pallas_call(
        _fc_kernel,
        grid=(Np // tn,),
        in_specs=[
            pl.BlockSpec((tn, F), lambda i: (i, 0)),
            pl.BlockSpec((F, dp), lambda i: (0, 0)),   # weights resident across tiles
            pl.BlockSpec((1, dp), lambda i: (0, 0)),
            pl.BlockSpec((dp, dp), lambda i: (0, 0)),
            pl.BlockSpec((1, dp), lambda i: (0, 0)),
        ],
        out_specs=pl.BlockSpec((tn, dp), lambda i: (i, 0)),
        out_shape=jax.ShapeDtypeStruct((Np, dp), jnp.float32),
        compiler_params=pltpu.CompilerParams(
            dimension_semantics=("parallel",),
            vmem_limit_bytes=32 * 1024 * 1024,
        ),
    )(xp, w1p, b1p, w2p, b2p)
    return out[:N, :d]


# ----------------------------------------------------------------------------
# Parameter init (deterministic, synthetic), BN folding and full forward
# ----------------------------------------------------------------------------
def init_params(key, n_mels, d):
    ks = jax.random.split(key, 4)
    params = {}
    cin = 1
    for i in range(3):
        kw, kb, kg, kbeta, km, kv = jax.random.split(ks[i], 6)
        fan_in = 9 * cin
        params[f"conv{i}_w"] = jax.random.normal(kw, (3, 3, cin, 64), jnp.float32) / np.sqrt(fan_in)
        params[f"conv{i}_b"] = 0.1 * jax.random.normal(kb, (64,), jnp.float32)
        params[f"bn{i}_gamma"] = 1.0 + 0.1 * jax.random.normal(kg, (64,), jnp.float32)
        params[f"bn{i}_beta"] = 0.05 * jax.random.normal(kbeta, (64,), jnp.float32)
        params[f"bn{i}_mean"] = 0.02 * jax.random.normal(km, (64,), jnp.float32)
        params[f"bn{i}_var"] = jax.random.uniform(kv, (64,), jnp.float32, 0.5, 1.5)
        cin = 64
    F = 64 * (n_mels // 2 ** 3)
    k1, k2, k3, k4 = jax.random.split(ks[3], 4)
    params["fc1_w"] = jax.random.normal(k1, (F, d), jnp.float32) / np.sqrt(F)
    params["fc1_b"] = 0.1 * jax.random.normal(k2, (d,), jnp.float32)
    params["fc2_w"] = jax.random.normal(k3, (d, d), jnp.float32) / np.sqrt(d)
    params["fc2_b"] = 0.1 * jax.random.normal(k4, (d,), jnp.float32)
    return params


def _folded_conv_params(params, i, eps=1e-5):
    """Fold eval-mode BatchNorm (and conv bias) into the conv weight/bias."""
    s = params[f"bn{i}_gamma"] / jnp.sqrt(params[f"bn{i}_var"] + eps)
    w = params[f"conv{i}_w"] * s
    b = params[f"bn{i}_beta"] + (params[f"conv{i}_b"] - params[f"bn{i}_mean"]) * s
    return w, b


def audio_ntt2020_task6_forward(x_nchw, params):
    # x_nchw: (B, 1, n_mels, T) -- PyTorch NCHW convention
    x = jnp.transpose(x_nchw, (0, 3, 2, 1)).astype(jnp.float32)     # (B, T, n_mels, 1)
    for i in range(3):
        w, b = _folded_conv_params(params, i)
        x = conv_bn_relu_pool(x, w, b, tq=32 if x.shape[-1] == 1 else 64)
    B, T8, M8, C = x.shape                                          # T8=T//8, M8=n_mels//8
    # PyTorch: NCHW features -> permute(0,3,2,1) -> (B, T', H', C) -> reshape(B, T', H'*C)
    feats = x.reshape(B * T8, M8 * C)
    d = params["fc2_w"].shape[1]
    y = fc_forward(feats, params["fc1_w"], params["fc1_b"],
                   params["fc2_w"], params["fc2_b"])
    return y.reshape(B, T8, d)


# ----------------------------------------------------------------------------
# Pure-JAX reference (mirrors the PyTorch module in eval mode; rounds inputs /
# weights / hidden activations to bf16 at the same points the Pallas path does,
# so the comparison isolates the kernel indexing & matmul math)
# ----------------------------------------------------------------------------
def reference_forward(x_nchw, params):
    def r(v):
        return v.astype(jnp.bfloat16).astype(jnp.float32)

    x = jnp.transpose(x_nchw, (0, 2, 3, 1)).astype(jnp.float32)     # NHWC (B, n_mels, T, 1)
    for i in range(3):
        w, b = _folded_conv_params(params, i)
        y = lax.conv_general_dilated(r(x), r(w), (1, 1), "SAME",
                                     dimension_numbers=("NHWC", "HWIO", "NHWC"))
        y = jnp.maximum(y + b, 0.0)
        x = lax.reduce_window(y, -jnp.inf, lax.max, (1, 2, 2, 1), (1, 2, 2, 1), "VALID")
    B, H8, T8, C = x.shape
    x = jnp.transpose(x, (0, 2, 1, 3)).reshape(B, T8, H8 * C)
    h = jnp.maximum(r(x) @ r(params["fc1_w"]) + params["fc1_b"], 0.0)
    return jnp.maximum(r(h) @ r(params["fc2_w"]) + params["fc2_b"], 0.0)


if __name__ == "__main__":
    B, n_mels, T, d = 2, 16, 32, 32
    key = jax.random.PRNGKey(0)
    kx, kp = jax.random.split(key)
    x = jax.random.normal(kx, (B, 1, n_mels, T), jnp.float32)
    params = init_params(kp, n_mels, d)

    out = audio_ntt2020_task6_forward(x, params)
    out = jax.block_until_ready(out)
    assert out.shape == (B, T // 8, d), out.shape

    ref = reference_forward(x, params)
    np.testing.assert_allclose(np.asarray(out), np.asarray(ref), rtol=2e-2, atol=2e-2)

    print("KERNEL_OK")
</pallas_src>

<mosaic_0001>
module attributes {stable_mosaic.version = 11 : i64} {
  func.func @kernel(%arg0: i32, %arg1: i32, %arg2: memref<1x4x162x1xbf16, #tpu.memory_space<vmem>>, %arg3: memref<9x64xbf16, #tpu.memory_space<vmem>>, %arg4: memref<1x64xf32, #tpu.memory_space<vmem>>, %arg5: memref<1x1x144x64xbf16, #tpu.memory_space<vmem>>) attributes {dimension_semantics = [#tpu.dimension_semantics<parallel>, #tpu.dimension_semantics<parallel>], iteration_bounds = array<i64: 2, 1>, scalar_prefetch = 0 : i64, scratch_operands = 0 : i64, tpu.core_type = #tpu.core_type<tc>, window_params = [{transform_indices = @transform_0, window_bounds = array<i64: 1, 4, 162, 1>}, {pipeline_mode = #tpu.pipeline_mode<synchronous>, transform_indices = @transform_1, window_bounds = array<i64: 9, 64>}, {pipeline_mode = #tpu.pipeline_mode<synchronous>, transform_indices = @transform_2, window_bounds = array<i64: 1, 64>}, {transform_indices = @transform_3, window_bounds = array<i64: 1, 1, 144, 64>}]} {
    %c0 = arith.constant 0 : index
    %c0_0 = arith.constant 0 : index
    %0 = vector.load %arg3[%c0, %c0_0] : memref<9x64xbf16, #tpu.memory_space<vmem>>, vector<9x64xbf16>
    %1 = arith.extf %0 : vector<9x64xbf16> to vector<9x64xf32>
    %cst = arith.constant 0.000000e+00 : f32
    %2 = vector.broadcast %cst : f32 to vector<144x64xf32>
    %c0_1 = arith.constant 0 : index
    %c0_2 = arith.constant 0 : index
    %c0_3 = arith.constant 0 : index
    %c0_4 = arith.constant 0 : index
    %3 = vector.load %arg2[%c0_1, %c0_2, %c0_3, %c0_4] : memref<1x4x162x1xbf16, #tpu.memory_space<vmem>>, vector<1x1x144x1xbf16>
    %4 = vector.shape_cast %3 : vector<1x1x144x1xbf16> to vector<144x1xbf16>
    %5 = arith.extf %4 : vector<144x1xbf16> to vector<144x1xf32>
    %6 = vector.extract_strided_slice %1 {offsets = [0, 0], sizes = [1, 64], strides = [1, 1]} : vector<9x64xf32> to vector<1x64xf32>
    %7 = vector.broadcast %5 : vector<144x1xf32> to vector<144x64xf32>
    %8 = vector.broadcast %6 : vector<1x64xf32> to vector<144x64xf32>
    %9 = arith.mulf %7, %8 : vector<144x64xf32>
    %10 = arith.addf %2, %9 : vector<144x64xf32>
    %c0_5 = arith.constant 0 : index
    %c1 = arith.constant 1 : index
    %c0_6 = arith.constant 0 : index
    %c0_7 = arith.constant 0 : index
    %11 = vector.load %arg2[%c0_5, %c1, %c0_6, %c0_7] : memref<1x4x162x1xbf16, #tpu.memory_space<vmem>>, vector<1x1x144x1xbf16>
    %12 = vector.shape_cast %11 : vector<1x1x144x1xbf16> to vector<144x1xbf16>
    %13 = arith.extf %12 : vector<144x1xbf16> to vector<144x1xf32>
    %14 = vector.extract_strided_slice %1 {offsets = [1, 0], sizes = [1, 64], strides = [1, 1]} : vector<9x64xf32> to vector<1x64xf32>
    %15 = vector.broadcast %13 : vector<144x1xf32> to vector<144x64xf32>
    %16 = vector.broadcast %14 : vector<1x64xf32> to vector<144x64xf32>
    %17 = arith.mulf %15, %16 : vector<144x64xf32>
    %18 = arith.addf %10, %17 : vector<144x64xf32>
    %c0_8 = arith.constant 0 : index
    %c0_9 = arith.constant 0 : index
    %c1_10 = arith.constant 1 : index
    %c0_11 = arith.constant 0 : index
    %19 = vector.load %arg2[%c0_8, %c0_9, %c1_10, %c0_11] : memref<1x4x162x1xbf16, #tpu.memory_space<vmem>>, vector<1x1x144x1xbf16>
    %20 = vector.shape_cast %19 : vector<1x1x144x1xbf16> to vector<144x1xbf16>
    %21 = arith.extf %20 : vector<144x1xbf16> to vector<144x1xf32>
    %22 = vector.extract_strided_slice %1 {offsets = [2, 0], sizes = [1, 64], strides = [1, 1]} : vector<9x64xf32> to vector<1x64xf32>
    %23 = vector.broadcast %21 : vector<144x1xf32> to vector<144x64xf32>
    %24 = vector.broadcast %22 : vector<1x64xf32> to vector<144x64xf32>
    %25 = arith.mulf %23, %24 : vector<144x64xf32>
    %26 = arith.addf %18, %25 : vector<144x64xf32>
    %c0_12 = arith.constant 0 : index
    %c2 = arith.constant 2 : index
    %c0_13 = arith.constant 0 : index
    %c0_14 = arith.constant 0 : index
    %27 = vector.load %arg2[%c0_12, %c2, %c0_13, %c0_14] : memref<1x4x162x1xbf16, #tpu.memory_space<vmem>>, vector<1x1x144x1xbf16>
    %28 = vector.shape_cast %27 : vector<1x1x144x1xbf16> to vector<144x1xbf16>
    %29 = arith.extf %28 : vector<144x1xbf16> to vector<144x1xf32>
    %30 = vector.extract_strided_slice %1 {offsets = [3, 0], sizes = [1, 64], strides = [1, 1]} : vector<9x64xf32> to vector<1x64xf32>
    %31 = vector.broadcast %29 : vector<144x1xf32> to vector<144x64xf32>
    %32 = vector.broadcast %30 : vector<1x64xf32> to vector<144x64xf32>
    %33 = arith.mulf %31, %32 : vector<144x64xf32>
    %34 = arith.addf %26, %33 : vector<144x64xf32>
    %c0_15 = arith.constant 0 : index
    %c3 = arith.constant 3 : index
    %c0_16 = arith.constant 0 : index
    %c0_17 = arith.constant 0 : index
    %35 = vector.load %arg2[%c0_15, %c3, %c0_16, %c0_17] : memref<1x4x162x1xbf16, #tpu.memory_space<vmem>>, vector<1x1x144x1xbf16>
    %36 = vector.shape_cast %35 : vector<1x1x144x1xbf16> to vector<144x1xbf16>
    %37 = arith.extf %36 : vector<144x1xbf16> to vector<144x1xf32>
    %38 = vector.extract_strided_slice %1 {offsets = [4, 0], sizes = [1, 64], strides = [1, 1]} : vector<9x64xf32> to vector<1x64xf32>
    %39 = vector.broadcast %37 : vector<144x1xf32> to vector<144x64xf32>
    %40 = vector.broadcast %38 : vector<1x64xf32> to vector<144x64xf32>
    %41 = arith.mulf %39, %40 : vector<144x64xf32>
    %42 = arith.addf %34, %41 : vector<144x64xf32>
    %c0_18 = arith.constant 0 : index
    %c2_19 = arith.constant 2 : index
    %c1_20 = arith.constant 1 : index
    %c0_21 = arith.constant 0 : index
    %43 = vector.load %arg2[%c0_18, %c2_19, %c1_20, %c0_21] : memref<1x4x162x1xbf16, #tpu.memory_space<vmem>>, vector<1x1x144x1xbf16>
    %44 = vector.shape_cast %43 : vector<1x1x144x1xbf16> to vector<144x1xbf16>
    %45 = arith.extf %44 : vector<144x1xbf16> to vector<144x1xf32>
    %46 = vector.extract_strided_slice %1 {offsets = [5, 0], sizes = [1, 64], strides = [1, 1]} : vector<9x64xf32> to vector<1x64xf32>
    %47 = vector.broadcast %45 : vector<144x1xf32> to vector<144x64xf32>
    %48 = vector.broadcast %46 : vector<1x64xf32> to vector<144x64xf32>
    %49 = arith.mulf %47, %48 : vector<144x64xf32>
    %50 = arith.addf %42, %49 : vector<144x64xf32>
    %c0_22 = arith.constant 0 : index
    %c0_23 = arith.constant 0 : index
    %c9 = arith.constant 9 : index
    %c0_24 = arith.constant 0 : index
    %51 = vector.load %arg2[%c0_22, %c0_23, %c9, %c0_24] : memref<1x4x162x1xbf16, #tpu.memory_space<vmem>>, vector<1x1x144x1xbf16>
    %52 = vector.shape_cast %51 : vector<1x1x144x1xbf16> to vector<144x1xbf16>
    %53 = arith.extf %52 : vector<144x1xbf16> to vector<144x1xf32>
    %54 = vector.extract_strided_slice %1 {offsets = [6, 0], sizes = [1, 64], strides = [1, 1]} : vector<9x64xf32> to vector<1x64xf32>
    %55 = vector.broadcast %53 : vector<144x1xf32> to vector<144x64xf32>
    %56 = vector.broadcast %54 : vector<1x64xf32> to vector<144x64xf32>
    %57 = arith.mulf %55, %56 : vector<144x64xf32>
    %58 = arith.addf %50, %57 : vector<144x64xf32>
    %c0_25 = arith.constant 0 : index
    %c1_26 = arith.constant 1 : index
    %c9_27 = arith.constant 9 : index
    %c0_28 = arith.constant 0 : index
    %59 = vector.load %arg2[%c0_25, %c1_26, %c9_27, %c0_28] : memref<1x4x162x1xbf16, #tpu.memory_space<vmem>>, vector<1x1x144x1xbf16>
    %60 = vector.shape_cast %59 : vector<1x1x144x1xbf16> to vector<144x1xbf16>
    %61 = arith.extf %60 : vector<144x1xbf16> to vector<144x1xf32>
    %62 = vector.extract_strided_slice %1 {offsets = [7, 0], sizes = [1, 64], strides = [1, 1]} : vector<9x64xf32> to vector<1x64xf32>
    %63 = vector.broadcast %61 : vector<144x1xf32> to vector<144x64xf32>
    %64 = vector.broadcast %62 : vector<1x64xf32> to vector<144x64xf32>
    %65 = arith.mulf %63, %64 : vector<144x64xf32>
    %66 = arith.addf %58, %65 : vector<144x64xf32>
    %c0_29 = arith.constant 0 : index
    %c0_30 = arith.constant 0 : index
    %c10 = arith.constant 10 : index
    %c0_31 = arith.constant 0 : index
    %67 = vector.load %arg2[%c0_29, %c0_30, %c10, %c0_31] : memref<1x4x162x1xbf16, #tpu.memory_space<vmem>>, vector<1x1x144x1xbf16>
    %68 = vector.shape_cast %67 : vector<1x1x144x1xbf16> to vector<144x1xbf16>
    %69 = arith.extf %68 : vector<144x1xbf16> to vector<144x1xf32>
    %70 = vector.extract_strided_slice %1 {offsets = [8, 0], sizes = [1, 64], strides = [1, 1]} : vector<9x64xf32> to vector<1x64xf32>
    %71 = vector.broadcast %69 : vector<144x1xf32> to vector<144x64xf32>
    %72 = vector.broadcast %70 : vector<1x64xf32> to vector<144x64xf32>
    %73 = arith.mulf %71, %72 : vector<144x64xf32>
    %74 = arith.addf %66, %73 : vector<144x64xf32>
    %75 = arith.extf %0 : vector<9x64xbf16> to vector<9x64xf32>
    %cst_32 = arith.constant 0.000000e+00 : f32
    %76 = vector.broadcast %cst_32 : f32 to vector<144x64xf32>
    %c0_33 = arith.constant 0 : index
    %c1_34 = arith.constant 1 : index
    %c0_35 = arith.constant 0 : index
    %c0_36 = arith.constant 0 : index
    %77 = vector.load %arg2[%c0_33, %c1_34, %c0_35, %c0_36] : memref<1x4x162x1xbf16, #tpu.memory_space<vmem>>, vector<1x1x144x1xbf16>
    %78 = vector.shape_cast %77 : vector<1x1x144x1xbf16> to vector<144x1xbf16>
    %79 = arith.extf %78 : vector<144x1xbf16> to vector<144x1xf32>
    %80 = vector.extract_strided_slice %75 {offsets = [0, 0], sizes = [1, 64], strides = [1, 1]} : vector<9x64xf32> to vector<1x64xf32>
    %81 = vector.broadcast %79 : vector<144x1xf32> to vector<144x64xf32>
    %82 = vector.broadcast %80 : vector<1x64xf32> to vector<144x64xf32>
    %83 = arith.mulf %81, %82 : vector<144x64xf32>
    %84 = arith.addf %76, %83 : vector<144x64xf32>
    %c0_37 = arith.constant 0 : index
    %c0_38 = arith.constant 0 : index
    %c1_39 = arith.constant 1 : index
    %c0_40 = arith.constant 0 : index
    %85 = vector.load %arg2[%c0_37, %c0_38, %c1_39, %c0_40] : memref<1x4x162x1xbf16, #tpu.memory_space<vmem>>, vector<1x1x144x1xbf16>
    %86 = vector.shape_cast %85 : vector<1x1x144x1xbf16> to vector<144x1xbf16>
    %87 = arith.extf %86 : vector<144x1xbf16> to vector<144x1xf32>
    %88 = vector.extract_strided_slice %75 {offsets = [1, 0], sizes = [1, 64], strides = [1, 1]} : vector<9x64xf32> to vector<1x64xf32>
    %89 = vector.broadcast %87 : vector<144x1xf32> to vector<144x64xf32>
    %90 = vector.broadcast %88 : vector<1x64xf32> to vector<144x64xf32>
    %91 = arith.mulf %89, %90 : vector<144x64xf32>
    %92 = arith.addf %84, %91 : vector<144x64xf32>
    %c0_41 = arith.constant 0 : index
    %c1_42 = arith.constant 1 : index
    %c1_43 = arith.constant 1 : index
    %c0_44 = arith.constant 0 : index
    %93 = vector.load %arg2[%c0_41, %c1_42, %c1_43, %c0_44] : memref<1x4x162x1xbf16, #tpu.memory_space<vmem>>, vector<1x1x144x1xbf16>
    %94 = vector.shape_cast %93 : vector<1x1x144x1xbf16> to vector<144x1xbf16>
    %95 = arith.extf %94 : vector<144x1xbf16> to vector<144x1xf32>
    %96 = vector.extract_strided_slice %75 {offsets = [2, 0], sizes = [1, 64], strides = [1, 1]} : vector<9x64xf32> to vector<1x64xf32>
    %97 = vector.broadcast %95 : vector<144x1xf32> to vector<144x64xf32>
    %98 = vector.broadcast %96 : vector<1x64xf32> to vector<144x64xf32>
    %99 = arith.mulf %97, %98 : vector<144x64xf32>
    %100 = arith.addf %92, %99 : vector<144x64xf32>
    %c0_45 = arith.constant 0 : index
    %c3_46 = arith.constant 3 : index
    %c0_47 = arith.constant 0 : index
    %c0_48 = arith.constant 0 : index
    %101 = vector.load %arg2[%c0_45, %c3_46, %c0_47, %c0_48] : memref<1x4x162x1xbf16, #tpu.memory_space<vmem>>, vector<1x1x144x1xbf16>
    %102 = vector.shape_cast %101 : vector<1x1x144x1xbf16> to vector<144x1xbf16>
    %103 = arith.extf %102 : vector<144x1xbf16> to vector<144x1xf32>
    %104 = vector.extract_strided_slice %75 {offsets = [3, 0], sizes = [1, 64], strides = [1, 1]} : vector<9x64xf32> to vector<1x64xf32>
    %105 = vector.broadcast %103 : vector<144x1xf32> to vector<144x64xf32>
    %106 = vector.broadcast %104 : vector<1x64xf32> to vector<144x64xf32>
    %107 = arith.mulf %105, %106 : vector<144x64xf32>
    %108 = arith.addf %100, %107 : vector<144x64xf32>
    %c0_49 = arith.constant 0 : index
    %c2_50 = arith.constant 2 : index
    %c1_51 = arith.constant 1 : index
    %c0_52 = arith.constant 0 : index
    %109 = vector.load %arg2[%c0_49, %c2_50, %c1_51, %c0_52] : memref<1x4x162x1xbf16, #tpu.memory_space<vmem>>, vector<1x1x144x1xbf16>
    %110 = vector.shape_cast %109 : vector<1x1x144x1xbf16> to vector<144x1xbf16>
    %111 = arith.extf %110 : vector<144x1xbf16> to vector<144x1xf32>
    %112 = vector.extract_strided_slice %75 {offsets = [4, 0], sizes = [1, 64], strides = [1, 1]} : vector<9x64xf32> to vector<1x64xf32>
    %113 = vector.broadcast %111 : vector<144x1xf32> to vector<144x64xf32>
    %114 = vector.broadcast %112 : vector<1x64xf32> to vector<144x64xf32>
    %115 = arith.mulf %113, %114 : vector<144x64xf32>
    %116 = arith.addf %108, %115 : vector<144x64xf32>
    %c0_53 = arith.constant 0 : index
    %c3_54 = arith.constant 3 : index
    %c1_55 = arith.constant 1 : index
    %c0_56 = arith.constant 0 : index
    %117 = vector.load %arg2[%c0_53, %c3_54, %c1_55, %c0_56] : memref<1x4x162x1xbf16, #tpu.memory_space<vmem>>, vector<1x1x144x1xbf16>
    %118 = vector.shape_cast %117 : vector<1x1x144x1xbf16> to vector<144x1xbf16>
    %119 = arith.extf %118 : vector<144x1xbf16> to vector<144x1xf32>
    %120 = vector.extract_strided_slice %75 {offsets = [5, 0], sizes = [1, 64], strides = [1, 1]} : vector<9x64xf32> to vector<1x64xf32>
    %121 = vector.broadcast %119 : vector<144x1xf32> to vector<144x64xf32>
    %122 = vector.broadcast %120 : vector<1x64xf32> to vector<144x64xf32>
    %123 = arith.mulf %121, %122 : vector<144x64xf32>
    %124 = arith.addf %116, %123 : vector<144x64xf32>
    %c0_57 = arith.constant 0 : index
    %c1_58 = arith.constant 1 : index
    %c9_59 = arith.constant 9 : index
    %c0_60 = arith.constant 0 : index
    %125 = vector.load %arg2[%c0_57, %c1_58, %c9_59, %c0_60] : memref<1x4x162x1xbf16, #tpu.memory_space<vmem>>, vector<1x1x144x1xbf16>
    %126 = vector.shape_cast %125 : vector<1x1x144x1xbf16> to vector<144x1xbf16>
    %127 = arith.extf %126 : vector<144x1xbf16> to vector<144x1xf32>
    %128 = vector.extract_strided_slice %75 {offsets = [6, 0], sizes = [1, 64], strides = [1, 1]} : vector<9x64xf32> to vector<1x64xf32>
    %129 = vector.broadcast %127 : vector<144x1xf32> to vector<144x64xf32>
    %130 = vector.broadcast %128 : vector<1x64xf32> to vector<144x64xf32>
    %131 = arith.mulf %129, %130 : vector<144x64xf32>
    %132 = arith.addf %124, %131 : vector<144x64xf32>
    %c0_61 = arith.constant 0 : index
    %c0_62 = arith.constant 0 : index
    %c10_63 = arith.constant 10 : index
    %c0_64 = arith.constant 0 : index
    %133 = vector.load %arg2[%c0_61, %c0_62, %c10_63, %c0_64] : memref<1x4x162x1xbf16, #tpu.memory_space<vmem>>, vector<1x1x144x1xbf16>
    %134 = vector.shape_cast %133 : vector<1x1x144x1xbf16> to vector<144x1xbf16>
    %135 = arith.extf %134 : vector<144x1xbf16> to vector<144x1xf32>
    %136 = vector.extract_strided_slice %75 {offsets = [7, 0], sizes = [1, 64], strides = [1, 1]} : vector<9x64xf32> to vector<1x64xf32>
    %137 = vector.broadcast %135 : vector<144x1xf32> to vector<144x64xf32>
    %138 = vector.broadcast %136 : vector<1x64xf32> to vector<144x64xf32>
    %139 = arith.mulf %137, %138 : vector<144x64xf32>
    %140 = arith.addf %132, %139 : vector<144x64xf32>
    %c0_65 = arith.constant 0 : index
    %c1_66 = arith.constant 1 : index
    %c10_67 = arith.constant 10 : index
    %c0_68 = arith.constant 0 : index
    %141 = vector.load %arg2[%c0_65, %c1_66, %c10_67, %c0_68] : memref<1x4x162x1xbf16, #tpu.memory_space<vmem>>, vector<1x1x144x1xbf16>
    %142 = vector.shape_cast %141 : vector<1x1x144x1xbf16> to vector<144x1xbf16>
    %143 = arith.extf %142 : vector<144x1xbf16> to vector<144x1xf32>
    %144 = vector.extract_strided_slice %75 {offsets = [8, 0], sizes = [1, 64], strides = [1, 1]} : vector<9x64xf32> to vector<1x64xf32>
    %145 = vector.broadcast %143 : vector<144x1xf32> to vector<144x64xf32>
    %146 = vector.broadcast %144 : vector<1x64xf32> to vector<144x64xf32>
    %147 = arith.mulf %145, %146 : vector<144x64xf32>
    %148 = arith.addf %140, %147 : vector<144x64xf32>
    %149 = arith.maximumf %74, %148 : vector<144x64xf32>
    %150 = arith.extf %0 : vector<9x64xbf16> to vector<9x64xf32>
    %cst_69 = arith.constant 0.000000e+00 : f32
    %151 = vector.broadcast %cst_69 : f32 to vector<144x64xf32>
    %c0_70 = arith.constant 0 : index
    %c2_71 = arith.constant 2 : index
    %c0_72 = arith.constant 0 : index
    %c0_73 = arith.constant 0 : index
    %152 = vector.load %arg2[%c0_70, %c2_71, %c0_72, %c0_73] : memref<1x4x162x1xbf16, #tpu.memory_space<vmem>>, vector<1x1x144x1xbf16>
    %153 = vector.shape_cast %152 : vector<1x1x144x1xbf16> to vector<144x1xbf16>
    %154 = arith.extf %153 : vector<144x1xbf16> to vector<144x1xf32>
    %155 = vector.extract_strided_slice %150 {offsets = [0, 0], sizes = [1, 64], strides = [1, 1]} : vector<9x64xf32> to vector<1x64xf32>
    %156 = vector.broadcast %154 : vector<144x1xf32> to vector<144x64xf32>
    %157 = vector.broadcast %155 : vector<1x64xf32> to vector<144x64xf32>
    %158 = arith.mulf %156, %157 : vector<144x64xf32>
    %159 = arith.addf %151, %158 : vector<144x64xf32>
    %c0_74 = arith.constant 0 : index
    %c3_75 = arith.constant 3 : index
    %c0_76 = arith.constant 0 : index
    %c0_77 = arith.constant 0 : index
    %160 = vector.load %arg2[%c0_74, %c3_75, %c0_76, %c0_77] : memref<1x4x162x1xbf16, #tpu.memory_space<vmem>>, vector<1x1x144x1xbf16>
    %161 = vector.shape_cast %160 : vector<1x1x144x1xbf16> to vector<144x1xbf16>
    %162 = arith.extf %161 : vector<144x1xbf16> to vector<144x1xf32>
    %163 = vector.extract_strided_slice %150 {offsets = [1, 0], sizes = [1, 64], strides = [1, 1]} : vector<9x64xf32> to vector<1x64xf32>
    %164 = vector.broadcast %162 : vector<144x1xf32> to vector<144x64xf32>
    %165 = vector.broadcast %163 : vector<1x64xf32> to vector<144x64xf32>
    %166 = arith.mulf %164, %165 : vector<144x64xf32>
    %167 = arith.addf %159, %166 : vector<144x64xf32>
    %c0_78 = arith.constant 0 : index
    %c2_79 = arith.constant 2 : index
    %c1_80 = arith.constant 1 : index
    %c0_81 = arith.constant 0 : index
    %168 = vector.load %arg2[%c0_78, %c2_79, %c1_80, %c0_81] : memref<1x4x162x1xbf16, #tpu.memory_space<vmem>>, vector<1x1x144x1xbf16>
    %169 = vector.shape_cast %168 : vector<1x1x144x1xbf16> to vector<144x1xbf16>
    %170 = arith.extf %169 : vector<144x1xbf16> to vector<144x1xf32>
    %171 = vector.extract_strided_slice %150 {offsets = [2, 0], sizes = [1, 64], strides = [1, 1]} : vector<9x64xf32> to vector<1x64xf32>
    %172 = vector.broadcast %170 : vector<144x1xf32> to vector<144x64xf32>
    %173 = vector.broadcast %171 : vector<1x64xf32> to vector<144x64xf32>
    %174 = arith.mulf %172, %173 : vector<144x64xf32>
    %175 = arith.addf %167, %174 : vector<144x64xf32>
    %c0_82 = arith.constant 0 : index
    %c0_83 = arith.constant 0 : index
    %c9_84 = arith.constant 9 : index
    %c0_85 = arith.constant 0 : index
    %176 = vector.load %arg2[%c0_82, %c0_83, %c9_84, %c0_85] : memref<1x4x162x1xbf16, #tpu.memory_space<vmem>>, vector<1x1x144x1xbf16>
    %177 = vector.shape_cast %176 : vector<1x1x144x1xbf16> to vector<144x1xbf16>
    %178 = arith.extf %177 : vector<144x1xbf16> to vector<144x1xf32>
    %179 = vector.extract_strided_slice %150 {offsets = [3, 0], sizes = [1, 64], strides = [1, 1]} : vector<9x64xf32> to vector<1x64xf32>
    %180 = vector.broadcast %178 : vector<144x1xf32> to vector<144x64xf32>
    %181 = vector.broadcast %179 : vector<1x64xf32> to vector<144x64xf32>
    %182 = arith.mulf %180, %181 : vector<144x64xf32>
    %183 = arith.addf %175, %182 : vector<144x64xf32>
    %c0_86 = arith.constant 0 : index
    %c1_87 = arith.constant 1 : index
    %c9_88 = arith.constant 9 : index
    %c0_89 = arith.constant 0 : index
    %184 = vector.load %arg2[%c0_86, %c1_87, %c9_88, %c0_89] : memref<1x4x162x1xbf16, #tpu.memory_space<vmem>>, vector<1x1x144x1xbf16>
    %185 = vector.shape_cast %184 : vector<1x1x144x1xbf16> to vector<144x1xbf16>
    %186 = arith.extf %185 : vector<144x1xbf16> to vector<144x1xf32>
    %187 = vector.extract_strided_slice %150 {offsets = [4, 0], sizes = [1, 64], strides = [1, 1]} : vector<9x64xf32> to vector<1x64xf32>
    %188 = vector.broadcast %186 : vector<144x1xf32> to vector<144x64xf32>
    %189 = vector.broadcast %187 : vector<1x64xf32> to vector<144x64xf32>
    %190 = arith.mulf %188, %189 : vector<144x64xf32>
    %191 = arith.addf %183, %190 : vector<144x64xf32>
    %c0_90 = arith.constant 0 : index
    %c0_91 = arith.constant 0 : index
    %c10_92 = arith.constant 10 : index
    %c0_93 = arith.constant 0 : index
    %192 = vector.load %arg2[%c0_90, %c0_91, %c10_92, %c0_93] : memref<1x4x162x1xbf16, #tpu.memory_space<vmem>>, vector<1x1x144x1xbf16>
    %193 = vector.shape_cast %192 : vector<1x1x144x1xbf16> to vector<144x1xbf16>
    %194 = arith.extf %193 : vector<144x1xbf16> to vector<144x1xf32>
    %195 = vector.extract_strided_slice %150 {offsets = [5, 0], sizes = [1, 64], strides = [1, 1]} : vector<9x64xf32> to vector<1x64xf32>
    %196 = vector.broadcast %194 : vector<144x1xf32> to vector<144x64xf32>
    %197 = vector.broadcast %195 : vector<1x64xf32> to vector<144x64xf32>
    %198 = arith.mulf %196, %197 : vector<144x64xf32>
    %199 = arith.addf %191, %198 : vector<144x64xf32>
    %c0_94 = arith.constant 0 : index
    %c2_95 = arith.constant 2 : index
    %c9_96 = arith.constant 9 : index
    %c0_97 = arith.constant 0 : index
    %200 = vector.load %arg2[%c0_94, %c2_95, %c9_96, %c0_97] : memref<1x4x162x1xbf16, #tpu.memory_space<vmem>>, vector<1x1x144x1xbf16>
    %201 = vector.shape_cast %200 : vector<1x1x144x1xbf16> to vector<144x1xbf16>
    %202 = arith.extf %201 : vector<144x1xbf16> to vector<144x1xf32>
    %203 = vector.extract_strided_slice %150 {offsets = [6, 0], sizes = [1, 64], strides = [1, 1]} : vector<9x64xf32> to vector<1x64xf32>
    %204 = vector.broadcast %202 : vector<144x1xf32> to vector<144x64xf32>
    %205 = vector.broadcast %203 : vector<1x64xf32> to vector<144x64xf32>
    %206 = arith.mulf %204, %205 : vector<144x64xf32>
    %207 = arith.addf %199, %206 : vector<144x64xf32>
    %c0_98 = arith.constant 0 : index
    %c3_99 = arith.constant 3 : index
    %c9_100 = arith.constant 9 : index
    %c0_101 = arith.constant 0 : index
    %208 = vector.load %arg2[%c0_98, %c3_99, %c9_100, %c0_101] : memref<1x4x162x1xbf16, #tpu.memory_space<vmem>>, vector<1x1x144x1xbf16>
    %209 = vector.shape_cast %208 : vector<1x1x144x1xbf16> to vector<144x1xbf16>
    %210 = arith.extf %209 : vector<144x1xbf16> to vector<144x1xf32>
    %211 = vector.extract_strided_slice %150 {offsets = [7, 0], sizes = [1, 64], strides = [1, 1]} : vector<9x64xf32> to vector<1x64xf32>
    %212 = vector.broadcast %210 : vector<144x1xf32> to vector<144x64xf32>
    %213 = vector.broadcast %211 : vector<1x64xf32> to vector<144x64xf32>
    %214 = arith.mulf %212, %213 : vector<144x64xf32>
    %215 = arith.addf %207, %214 : vector<144x64xf32>
    %c0_102 = arith.constant 0 : index
    %c2_103 = arith.constant 2 : index
    %c10_104 = arith.constant 10 : index
    %c0_105 = arith.constant 0 : index
    %216 = vector.load %arg2[%c0_102, %c2_103, %c10_104, %c0_105] : memref<1x4x162x1xbf16, #tpu.memory_space<vmem>>, vector<1x1x144x1xbf16>
    %217 = vector.shape_cast %216 : vector<1x1x144x1xbf16> to vector<144x1xbf16>
    %218 = arith.extf %217 : vector<144x1xbf16> to vector<144x1xf32>
    %219 = vector.extract_strided_slice %150 {offsets = [8, 0], sizes = [1, 64], strides = [1, 1]} : vector<9x64xf32> to vector<1x64xf32>
    %220 = vector.broadcast %218 : vector<144x1xf32> to vector<144x64xf32>
    %221 = vector.broadcast %219 : vector<1x64xf32> to vector<144x64xf32>
    %222 = arith.mulf %220, %221 : vector<144x64xf32>
    %223 = arith.addf %215, %222 : vector<144x64xf32>
    %224 = arith.maximumf %149, %223 : vector<144x64xf32>
    %225 = arith.extf %0 : vector<9x64xbf16> to vector<9x64xf32>
    %cst_106 = arith.constant 0.000000e+00 : f32
    %226 = vector.broadcast %cst_106 : f32 to vector<144x64xf32>
    %c0_107 = arith.constant 0 : index
    %c3_108 = arith.constant 3 : index
    %c0_109 = arith.constant 0 : index
    %c0_110 = arith.constant 0 : index
    %227 = vector.load %arg2[%c0_107, %c3_108, %c0_109, %c0_110] : memref<1x4x162x1xbf16, #tpu.memory_space<vmem>>, vector<1x1x144x1xbf16>
    %228 = vector.shape_cast %227 : vector<1x1x144x1xbf16> to vector<144x1xbf16>
    %229 = arith.extf %228 : vector<144x1xbf16> to vector<144x1xf32>
    %230 = vector.extract_strided_slice %225 {offsets = [0, 0], sizes = [1, 64], strides = [1, 1]} : vector<9x64xf32> to vector<1x64xf32>
    %231 = vector.broadcast %229 : vector<144x1xf32> to vector<144x64xf32>
    %232 = vector.broadcast %230 : vector<1x64xf32> to vector<144x64xf32>
    %233 = arith.mulf %231, %232 : vector<144x64xf32>
    %234 = arith.addf %226, %233 : vector<144x64xf32>
    %c0_111 = arith.constant 0 : index
    %c2_112 = arith.constant 2 : index
    %c1_113 = arith.constant 1 : index
    %c0_114 = arith.constant 0 : index
    %235 = vector.load %arg2[%c0_111, %c2_112, %c1_113, %c0_114] : memref<1x4x162x1xbf16, #tpu.memory_space<vmem>>, vector<1x1x144x1xbf16>
    %236 = vector.shape_cast %235 : vector<1x1x144x1xbf16> to vector<144x1xbf16>
    %237 = arith.extf %236 : vector<144x1xbf16> to vector<144x1xf32>
    %238 = vector.extract_strided_slice %225 {offsets = [1, 0], sizes = [1, 64], strides = [1, 1]} : vector<9x64xf32> to vector<1x64xf32>
    %239 = vector.broadcast %237 : vector<144x1xf32> to vector<144x64xf32>
    %240 = vector.broadcast %238 : vector<1x64xf32> to vector<144x64xf32>
    %241 = arith.mulf %239, %240 : vector<144x64xf32>
    %242 = arith.addf %234, %241 : vector<144x64xf32>
    %c0_115 = arith.constant 0 : index
    %c3_116 = arith.constant 3 : index
    %c1_117 = arith.constant 1 : index
    %c0_118 = arith.constant 0 : index
    %243 = vector.load %arg2[%c0_115, %c3_116, %c1_117, %c0_118] : memref<1x4x162x1xbf16, #tpu.memory_space<vmem>>, vector<1x1x144x1xbf16>
    %244 = vector.shape_cast %243 : vector<1x1x144x1xbf16> to vector<144x1xbf16>
    %245 = arith.extf %244 : vector<144x1xbf16> to vector<144x1xf32>
    %246 = vector.extract_strided_slice %225 {offsets = [2, 0], sizes = [1, 64], strides = [1, 1]} : vector<9x64xf32> to vector<1x64xf32>
    %247 = vector.broadcast %245 : vector<144x1xf32> to vector<144x64xf32>
    %248 = vector.broadcast %246 : vector<1x64xf32> to vector<144x64xf32>
    %249 = arith.mulf %247, %248 : vector<144x64xf32>
    %250 = arith.addf %242, %249 : vector<144x64xf32>
    %c0_119 = arith.constant 0 : index
    %c1_120 = arith.constant 1 : index
    %c9_121 = arith.constant 9 : index
    %c0_122 = arith.constant 0 : index
    %251 = vector.load %arg2[%c0_119, %c1_120, %c9_121, %c0_122] : memref<1x4x162x1xbf16, #tpu.memory_space<vmem>>, vector<1x1x144x1xbf16>
    %252 = vector.shape_cast %251 : vector<1x1x144x1xbf16> to vector<144x1xbf16>
    %253 = arith.extf %252 : vector<144x1xbf16> to vector<144x1xf32>
    %254 = vector.extract_strided_slice %225 {offsets = [3, 0], sizes = [1, 64], strides = [1, 1]} : vector<9x64xf32> to vector<1x64xf32>
    %255 = vector.broadcast %253 : vector<144x1xf32> to vector<144x64xf32>
    %256 = vector.broadcast %254 : vector<1x64xf32> to vector<144x64xf32>
    %257 = arith.mulf %255, %256 : vector<144x64xf32>
    %258 = arith.addf %250, %257 : vector<144x64xf32>
    %c0_123 = arith.constant 0 : index
    %c0_124 = arith.constant 0 : index
    %c10_125 = arith.constant 10 : index
    %c0_126 = arith.constant 0 : index
    %259 = vector.load %arg2[%c0_123, %c0_124, %c10_125, %c0_126] : memref<1x4x162x1xbf16, #tpu.memory_space<vmem>>, vector<1x1x144x1xbf16>
    %260 = vector.shape_cast %259 : vector<1x1x144x1xbf16> to vector<144x1xbf16>
    %261 = arith.extf %260 : vector<144x1xbf16> to vector<144x1xf32>
    %262 = vector.extract_strided_slice %225 {offsets = [4, 0], sizes = [1, 64], strides = [1, 1]} : vector<9x64xf32> to vector<1x64xf32>
    %263 = vector.broadcast %261 : vector<144x1xf32> to vector<144x64xf32>
    %264 = vector.broadcast %262 : vector<1x64xf32> to vector<144x64xf32>
    %265 = arith.mulf %263, %264 : vector<144x64xf32>
    %266 = arith.addf %258, %265 : vector<144x64xf32>
    %c0_127 = arith.constant 0 : index
    %c1_128 = arith.constant 1 : index
    %c10_129 = arith.constant 10 : index
    %c0_130 = arith.constant 0 : index
    %267 = vector.load %arg2[%c0_127, %c1_128, %c10_129, %c0_130] : memref<1x4x162x1xbf16, #tpu.memory_space<vmem>>, vector<1x1x144x1xbf16>
    %268 = vector.shape_cast %267 : vector<1x1x144x1xbf16> to vector<144x1xbf16>
    %269 = arith.extf %268 : vector<144x1xbf16> to vector<144x1xf32>
    %270 = vector.extract_strided_slice %225 {offsets = [5, 0], sizes = [1, 64], strides = [1, 1]} : vector<9x64xf32> to vector<1x64xf32>
    %271 = vector.broadcast %269 : vector<144x1xf32> to vector<144x64xf32>
    %272 = vector.broadcast %270 : vector<1x64xf32> to vector<144x64xf32>
    %273 = arith.mulf %271, %272 : vector<144x64xf32>
    %274 = arith.addf %266, %273 : vector<144x64xf32>
    %c0_131 = arith.constant 0 : index
    %c3_132 = arith.constant 3 : index
    %c9_133 = arith.constant 9 : index
    %c0_134 = arith.constant 0 : index
    %275 = vector.load %arg2[%c0_131, %c3_132, %c9_133, %c0_134] : memref<1x4x162x1xbf16, #tpu.memory_space<vmem>>, vector<1x1x144x1xbf16>
    %276 = vector.shape_cast %275 : vector<1x1x144x1xbf16> to vector<144x1xbf16>
    %277 = arith.extf %276 : vector<144x1xbf16> to vector<144x1xf32>
    %278 = vector.extract_strided_slice %225 {offsets = [6, 0], sizes = [1, 64], strides = [1, 1]} : vector<9x64xf32> to vector<1x64xf32>
    %279 = vector.broadcast %277 : vector<144x1xf32> to vector<144x64xf32>
    %280 = vector.broadcast %278 : vector<1x64xf32> to vector<144x64xf32>
    %281 = arith.mulf %279, %280 : vector<144x64xf32>
    %282 = arith.addf %274, %281 : vector<144x64xf32>
    %c0_135 = arith.constant 0 : index
    %c2_136 = arith.constant 2 : index
    %c10_137 = arith.constant 10 : index
    %c0_138 = arith.constant 0 : index
    %283 = vector.load %arg2[%c0_135, %c2_136, %c10_137, %c0_138] : memref<1x4x162x1xbf16, #tpu.memory_space<vmem>>, vector<1x1x144x1xbf16>
    %284 = vector.shape_cast %283 : vector<1x1x144x1xbf16> to vector<144x1xbf16>
    %285 = arith.extf %284 : vector<144x1xbf16> to vector<144x1xf32>
    %286 = vector.extract_strided_slice %225 {offsets = [7, 0], sizes = [1, 64], strides = [1, 1]} : vector<9x64xf32> to vector<1x64xf32>
    %287 = vector.broadcast %285 : vector<144x1xf32> to vector<144x64xf32>
    %288 = vector.broadcast %286 : vector<1x64xf32> to vector<144x64xf32>
    %289 = arith.mulf %287, %288 : vector<144x64xf32>
    %290 = arith.addf %282, %289 : vector<144x64xf32>
    %c0_139 = arith.constant 0 : index
    %c3_140 = arith.constant 3 : index
    %c10_141 = arith.constant 10 : index
    %c0_142 = arith.constant 0 : index
    %291 = vector.load %arg2[%c0_139, %c3_140, %c10_141, %c0_142] : memref<1x4x162x1xbf16, #tpu.memory_space<vmem>>, vector<1x1x144x1xbf16>
    %292 = vector.shape_cast %291 : vector<1x1x144x1xbf16> to vector<144x1xbf16>
    %293 = arith.extf %292 : vector<144x1xbf16> to vector<144x1xf32>
    %294 = vector.extract_strided_slice %225 {offsets = [8, 0], sizes = [1, 64], strides = [1, 1]} : vector<9x64xf32> to vector<1x64xf32>
    %295 = vector.broadcast %293 : vector<144x1xf32> to vector<144x64xf32>
    %296 = vector.broadcast %294 : vector<1x64xf32> to vector<144x64xf32>
    %297 = arith.mulf %295, %296 : vector<144x64xf32>
    %298 = arith.addf %290, %297 : vector<144x64xf32>
    %299 = arith.maximumf %224, %298 : vector<144x64xf32>
    %c0_143 = arith.constant 0 : index
    %c0_144 = arith.constant 0 : index
    %300 = vector.load %arg4[%c0_143, %c0_144] : memref<1x64xf32, #tpu.memory_space<vmem>>, vector<1x64xf32>
    %301 = vector.broadcast %300 : vector<1x64xf32> to vector<144x64xf32>
    %302 = arith.addf %299, %301 : vector<144x64xf32>
    %cst_145 = arith.constant 0.000000e+00 : f32
    %303 = vector.broadcast %cst_145 : f32 to vector<144x64xf32>
    %304 = arith.maximumf %302, %303 : vector<144x64xf32>
    %305 = arith.truncf %304 : vector<144x64xf32> to vector<144x64xbf16>
    %c0_146 = arith.constant 0 : index
    %c0_147 = arith.constant 0 : index
    %c0_148 = arith.constant 0 : index
    %c0_149 = arith.constant 0 : index
    %306 = vector.load %arg5[%c0_146, %c0_147, %c0_148, %c0_149] : memref<1x1x144x64xbf16, #tpu.memory_space<vmem>>, vector<1x1x144x64xbf16>
    %307 = vector.shape_cast %306 : vector<1x1x144x64xbf16> to vector<144x64xbf16>
    %308 = vector.shape_cast %305 : vector<144x64xbf16> to vector<1x1x144x64xbf16>
    tpu.vector_store %arg5[%c0_146, %c0_147, %c0_148, %c0_149], %308 {strides = array<i32>} : memref<1x1x144x64xbf16, #tpu.memory_space<vmem>>, vector<1x1x144x64xbf16>,
    return
  }
  func.func @transform_0(%arg0: i32, %arg1: i32) -> (i32, i32, i32, i32) {
    %c0_i32 = arith.constant 0 : i32
    %c0_i32_0 = arith.constant 0 : i32
    %c0_i32_1 = arith.constant 0 : i32
    return %arg0, %arg1, %c0_i32, %c0_i32_0 : i32, i32, i32, i32
  }
  func.func @transform_1(%arg0: i32, %arg1: i32) -> (i32, i32) {
    %c0_i32 = arith.constant 0 : i32
    %c0_i32_0 = arith.constant 0 : i32
    %c0_i32_1 = arith.constant 0 : i32
    return %c0_i32, %c0_i32_0 : i32, i32
  }
  func.func @transform_2(%arg0: i32, %arg1: i32) -> (i32, i32) {
    %c0_i32 = arith.constant 0 : i32
    %c0_i32_0 = arith.constant 0 : i32
    %c0_i32_1 = arith.constant 0 : i32
    return %c0_i32, %c0_i32_0 : i32, i32
  }
  func.func @transform_3(%arg0: i32, %arg1: i32) -> (i32, i32, i32, i32) {
    %c0_i32 = arith.constant 0 : i32
    %c0_i32_0 = arith.constant 0 : i32
    %c0_i32_1 = arith.constant 0 : i32
    return %arg0, %arg1, %c0_i32, %c0_i32_0 : i32, i32, i32, i32
  }
}

</mosaic_0001>

<bundles_post_ra>
// kernel: tpu_custom_call.1
= control target key start
LH: loop header
LB: loop body
LE: loop exit
PB: predicated region body
PF: predicated region fallthrough
CT: control target
= control target key end

     0   :  { %s6818_s12 = smov 0   ;;  %s6820_s13 = smov 0   ;;  %s12282_s0 = inlined_call_operand.vmem [shape: bf16[2,4,162,1], index: 0, kind: input, shape index: {}]   ;;  %s12283_s1 = inlined_call_operand.vmem [shape: bf16[9,64], index: 1, kind: input, shape index: {}]   ;;  %s12284_s2 = inlined_call_operand.vmem [shape: f32[1,64], index: 2, kind: input, shape index: {}]   ;;  %s12285_s3 = inlined_call_operand.vmem [shape: bf16[2,1,144,64], index: 3, kind: output, shape index: {}]  }
   0x1   :  { %s6822_s14 = smov 0  }
   0x2 LB: > { %s25_s15 = sadd.s32 1, %s6791_s13  ;;  %p5458_p0 = scmp.ge.s32.totalorder %s6795_s14, 1  ;;  %s6795_s14 = sphi %s6822_s14, %s13_s14   ;;  %s6791_s13 = sphi %s6820_s13, %s14239_s13   ;;  %s6787_s12 = sphi %s6818_s12, %s14238_s12  }
   0x3   : > { %p27_p1 = scmp.ge.s32.totalorder %s25_s15, 2  ;;  %p159_p2 = scmp.lt.s32.totalorder %s6795_s14, 3 }
   0x5   : > { %s14241_s15 = smov (%p27_p1, %s25_s15), 0  ;;  %p160_p3 = pnand %p5458_p0, %p159_p2 }
   0x7   : > { %163 = sbr.rel (%p160_p3) target bundleno = 922 (0x39a), region = 32 }
   0xe   : > { %p193_p4 = scmp.lt.s32.totalorder %s6787_s12, 1  ;;  %v6797_v0 = vmov 0   ;;  %vm724_vm0 = vcmask 1046528   ;;  %vm1925_vm1 = vcmask 1045504   ;;  %vm5343_vm2 = vcmask 519168  }
   0xf   : > { %6217 = vset.pattern.permute.xlu1 %v6797_v0  ;;  %6206 = vset.pattern.permute.xlu0 %v6797_v0 }
  0x10   : > { %s14243_s12 = smov (!%p193_p4, %s6787_s12), 1 }
  0x11   : > { %s6179_s16 = smul.u32 336, %s14243_s12 }
  0x12   : > { %s6180_s26 = smul.u32 72, %s14243_s12 }
  0x13   : > { %s6842_s19 = scalar_lea.vmem %s12282_s0, %s6179_s16 }
  0x14   : > { %v6845_v1 = vld [vmem:[%s6842_s19 + $0x10] sm:$0xff]   ;;  %v5672_v2 = vld [vmem:[%s6842_s19] sm:$0xff]   ;;  %v6849_v3 = vld [vmem:[%s6842_s19 + $0x18] sm:$0xff]   ;;  %s11859_s29 = scalar_lea.vmem %s12285_s3, %s6180_s26 }
  0x15   : > { %v5681_v4 = vunpack.c.l.bf16 %v6845_v1  ;;  %v5682_v5 = vunpack.c.h.bf16 %v6845_v1  ;;  %v5673_v6 = vunpack.c.l.bf16 %v5672_v2  ;;  %v5674_v7 = vunpack.c.h.bf16 %v5672_v2  ;;  %v6854_v8 = vld [vmem:[%s6842_s19 + $0x8] sm:$0xff]   ;;  %v6864_v14 = vld [vmem:[%s6842_s19 + $0x20] sm:$0xff]   ;;  %v6893_v23 = vld [vmem:[%s6842_s19 + $0x38] sm:$0xff]  }
  0x16   : > { %v6857_v9 = vld [vmem:[%s6842_s19 + $0x28] sm:$0xff]   ;;  %v5685_v10 = vunpack.c.l.bf16 %v6849_v3  ;;  %v5686_v11 = vunpack.c.h.bf16 %v6849_v3  ;;  %v12287_v12 = vunpack.c.l.bf16 %v6854_v8  ;;  %v5678_v13 = vunpack.c.h.bf16 %v6854_v8  ;;  %v6896_v24 = vld [vmem:[%s6842_s19 + $0x30] sm:$0xff]   ;;  %v6087_v32 = vld [vmem:[%s6842_s19 + $0x58] sm:$0xff]  }
  0x17   : > { %v6870_v15 = vpack.i.bf16 %v5682_v5, %v5681_v4  ;;  %v6872_v16 = vpack.i.bf16 %v5674_v7, %v5673_v6  ;;  %v5693_v17 = vunpack.c.l.bf16 %v6857_v9  ;;  %v5694_v18 = vunpack.c.h.bf16 %v6857_v9  ;;  %v5461_v31 = vld [vmem:[%s6842_s19 + $0x54] ss:$68 sps:$4 sm:$0xff]   ;;  %v6919_v33 = vld [vmem:[%s6842_s19 + $0x40] sm:$0xff]   ;;  %v6089_v41 = vld [vmem:[%s6842_s19 + $0x68] sm:$0xff]  }
  0x18   : > { %v6882_v19 = vpack.i.bf16 %v5686_v11, %v5685_v10  ;;  %v6888_v20 = vpack.i.bf16 %v5678_v13, %v12287_v12  ;;  %v5689_v21 = vunpack.c.l.bf16 %v6864_v14  ;;  %v5690_v22 = vunpack.c.h.bf16 %v6864_v14  ;;  %v6088_v40 = vld [vmem:[%s6842_s19 + $0x60] sm:$0xff]   ;;  %v6090_v48 = vld [vmem:[%s6842_s19 + $0x70] sm:$0xff]   ;;  %v6091_v49 = vld [vmem:[%s6842_s19 + $0x78] sm:$0xff]  }
  0x19   : > { %6219 = vperm.xlu1 %6217, %v6870_v15   ;;  %6208 = vperm.xlu0 %6206, %v6872_v16   ;;  %v6902_v25 = vpack.i.bf16 %v5694_v18, %v5693_v17  ;;  %v5701_v26 = vunpack.c.l.bf16 %v6893_v23  ;;  %v5702_v28 = vunpack.c.h.bf16 %v6893_v23  ;;  %v5697_v29 = vunpack.c.l.bf16 %v6896_v24  ;;  %v6092_v56 = vld [vmem:[%s6842_s19 + $0x80] sm:$0xff]   ;;  %v6093_v57 = vld [vmem:[%s6842_s19 + $0x88] sm:$0xff]   ;;  %v6094_v0 = vld [vmem:[%s6842_s19 + $0x90] sm:$0xff]  }
  0x1a   : > { %v6911_v27 = vpack.i.bf16 %v5690_v22, %v5689_v21  ;;  %v5698_v30 = vunpack.c.h.bf16 %v6896_v24  ;;  %v6921_v34 = vunpack.c.l.bf16 %v6087_v32  ;;  %v401_v35 = vunpack.c.l.bf16 %v5461_v31 }
  0x1b   : > { %v6925_v36 = vpack.i.bf16 %v5702_v28, %v5701_v26  ;;  %v5705_v38 = vunpack.c.l.bf16 %v6919_v33  ;;  %v12286_v39 = vunpack.c.h.bf16 %v6919_v33  ;;  %v5714_v43 = vunpack.c.h.bf16 %v6088_v40 }
  0x1c   : > { %v6927_v37 = vpack.i.bf16 %v5698_v30, %v5697_v29  ;;  %v6253_v42 = vpack.i.bf16 %v6921_v34, %v401_v35  ;;  %v5717_v45 = vunpack.c.l.bf16 %v6089_v41  ;;  %v5710_v46 = vunpack.c.h.bf16 %v6087_v32 }
  0x1d   : > { %6224 = vperm.xlu1 %6217, %v6882_v19   ;;  %6213 = vperm.xlu0 %6206, %v6888_v20   ;;  %v6938_v44 = vpack.i.bf16 %v12286_v39, %v5705_v38  ;;  %v5713_v47 = vunpack.c.l.bf16 %v6088_v40  ;;  %v5722_v50 = vunpack.c.h.bf16 %v6090_v48  ;;  %v5725_v51 = vunpack.c.l.bf16 %v6091_v49 }
  0x1e   : > { %v6943_v52 = vpack.i.bf16 %v5717_v45, %v5714_v43  ;;  %v5718_v54 = vunpack.c.h.bf16 %v6089_v41  ;;  %v5721_v55 = vunpack.c.l.bf16 %v6090_v48  ;;  %v5730_v58 = vunpack.c.h.bf16 %v6092_v56 }
  0x1f   : > { %v6945_v53 = vpack.i.bf16 %v5713_v47, %v5710_v46  ;;  %v5733_v59 = vunpack.c.l.bf16 %v6093_v57  ;;  %v6951_v60 = vpack.i.bf16 %v5725_v51, %v5722_v50  ;;  %v5726_v62 = vunpack.c.h.bf16 %v6091_v49 }
  0x20   : > { %v6953_v61 = vpack.i.bf16 %v5721_v55, %v5718_v54  ;;  %v5729_v63 = vunpack.c.l.bf16 %v6092_v56  ;;  %v6958_v6 = vunpack.c.h.bf16 %v6094_v0  ;;  %v418_v7 = vunpack.c.h.bf16 %v5461_v31  ;;  %v6106_v56 = vld [vmem:[%s6842_s19 + $0xc0] sm:$0xff]  }
  0x21   : > { %6234 = vperm.xlu1 %6217, %v6902_v25   ;;  %6229 = vperm.xlu0 %6206, %v6911_v27   ;;  %v6956_v2 = vpack.i.bf16 %v5733_v59, %v5730_v58  ;;  %v6964_v23 = vpack.i.bf16 %v5685_v10, %v5682_v5  ;;  %v5734_v32 = vunpack.c.h.bf16 %v6093_v57  ;;  %v5737_v35 = vunpack.c.l.bf16 %v6094_v0  ;;  %v6107_v57 = vld [vmem:[%s6842_s19 + $0xc8] sm:$0xff]  }
  0x22   : > { %v6968_v24 = vpack.i.bf16 %v5729_v63, %v5726_v62  ;;  %v6974_v40 = vpack.i.bf16 %v5681_v4, %v5678_v13  ;;  %v6980_v5 = vpack.i.bf16 %v5693_v17, %v5690_v22  ;;  %v6986_v10 = vpack.i.bf16 %v5689_v21, %v5686_v11 }
  0x23   : > { %v6988_v31 = vpack.i.bf16 %v5701_v26, %v5698_v30  ;;  %v6992_v41 = vpack.i.bf16 %v5697_v29, %v5694_v18  ;;  %v6994_v1 = vpack.i.bf16 %v5705_v38, %v5702_v28  ;;  %v6293_v3 = vpack.i.bf16 %v418_v7, %v6958_v6  ;;  %v7023_v26 = vld [vmem:[%s6842_s19 + $0x100] sm:$0xff]   ;;  %v7026_v28 = vld [vmem:[%s6842_s19 + $0x108] sm:$0xff]  }
  0x24   : > { %v6999_v4 = vpack.i.bf16 %v5737_v35, %v5734_v32  ;;  %v7002_v11 = vpack.i.bf16 %v5710_v46, %v6921_v34  ;;  %v7004_v13 = vpack.i.bf16 %v5718_v54, %v5717_v45  ;;  %v7006_v9 = vpack.i.bf16 %v5714_v43, %v5713_v47  ;;  %v567_v38 = vld [vmem:[%s6842_s19 + $0x48] sm:$0x1]  ;;  %v7047_v43 = vld [vmem:[%s6842_s19 + $0x110] sm:$0xff]   ;;  %v7050_v45 = vld [vmem:[%s6842_s19 + $0x118] sm:$0xff]  }
  0x25   : > { %6244 = vperm.xlu1 %6217, %v6925_v36   ;;  %6239 = vperm.xlu0 %6206, %v6927_v37   ;;  %v7008_v14 = vpack.i.bf16 %v5726_v62, %v5725_v51  ;;  %v7011_v17 = vpack.i.bf16 %v5722_v50, %v5721_v55  ;;  %v7013_v18 = vpack.i.bf16 %v5734_v32, %v5733_v59  ;;  %v12294_v29 = vunpack.c.h.bf16 %v7023_v26  ;;  %v6105_v46 = vld [vmem:[%s6842_s19 + $0xb8] sm:$0xff]   ;;  %v6116_v62 = vld [vmem:[%s6842_s19 + $0x120] sm:$0xff]  }
  0x26   : > { %v7015_v21 = vpack.i.bf16 %v5730_v58, %v5729_v63  ;;  %v7018_v22 = vpack.i.bf16 %v6958_v6, %v5737_v35  ;;  %v12291_v30 = vunpack.c.l.bf16 %v7026_v28  ;;  %v12293_v48 = vunpack.c.l.bf16 %v7047_v43  ;;  %v7078_v63 = vld [vmem:[%s6842_s19 + $0x128] sm:$0xff]  }
  0x27   : > { %v12292_v49 = vunpack.c.h.bf16 %v7047_v43  ;;  %v5785_v51 = vunpack.c.l.bf16 %v6105_v46  ;;  %v5793_v59 = vunpack.c.l.bf16 %v6107_v57  ;;  %v5786_v32 = vunpack.c.h.bf16 %v6105_v46 }
  0x28   : > { %v5789_v35 = vunpack.c.l.bf16 %v6106_v56  ;;  %v5826_v39 = vunpack.c.h.bf16 %v7050_v45  ;;  %v5833_v12 = vunpack.c.l.bf16 %v7078_v63 }
  0x29   : > { %6254 = vperm.xlu1 %6217, %v6253_v42   ;;  %6249 = vperm.xlu0 %6206, %v6938_v44   ;;  %v7034_v42 = vld [vmem:[%s6842_s19 + $0xa8] sm:$0xff]  }
  0x2a   : > { %v5778_v54 = vunpack.c.h.bf16 %v7034_v42  ;;  %v6358_v46 = vpack.i.bf16 %v5789_v35, %v5786_v32  ;;  %v12295_v32 = vunpack.c.l.bf16 %v7023_v26 }
  0x2d   : > { %6264 = vperm.xlu1 %6217, %v6943_v52   ;;  %6259 = vperm.xlu0 %6206, %v6945_v53  }
  0x31   : > { %6274 = vperm.xlu1 %6217, %v6951_v60   ;;  %6269 = vperm.xlu0 %6206, %v6953_v61  }
  0x35   : > { %6284 = vperm.xlu1 %6217, %v6956_v2   ;;  %6279 = vperm.xlu0 %6206, %v6968_v24  }
  0x39   : > { %6294 = vperm.xlu1 %6217, %v6293_v3   ;;  %6289 = vperm.xlu0 %6206, %v6999_v4   ;;  %v6108_v3 = vld [vmem:[%s6842_s19 + $0xd0] sm:$0xff]  }
  0x3d   : > { %6304 = vperm.xlu1 %6217, %v6888_v20   ;;  %6299 = vperm.xlu0 %6206, %v6872_v16   ;;  %v7040_v16 = vpack.i.bf16 %v12291_v30, %v12294_v29  ;;  %v6104_v20 = vld [vmem:[%s6842_s19 + $0xb0] sm:$0xff]  }
  0x3e   : > { %v5782_v47 = vunpack.c.h.bf16 %v6104_v20  ;;  %v5781_v55 = vunpack.c.l.bf16 %v6104_v20  ;;  %v5829_v20 = vunpack.c.l.bf16 %v6116_v62 }
  0x40   : > { %v7081_v0 = vpack.i.bf16 %v5785_v51, %v5782_v47  ;;  %v7083_v7 = vpack.i.bf16 %v5781_v55, %v5778_v54  ;;  %v5797_v47 = vunpack.c.l.bf16 %v6108_v3  ;;  %v6110_v51 = vld [vmem:[%s6842_s19 + $0xe0] sm:$0xff]   ;;  %v7093_v54 = vld [vmem:[%s6842_s19 + $0xe8] sm:$0xff]  }
  0x41   : > { %6314 = vperm.xlu1 %6217, %v6882_v19   ;;  %6309 = vperm.xlu0 %6206, %v6870_v15   ;;  %v586_v19 = vunpack.c.l.bf16 %v567_v38  ;;  %v12288_v15 = vunpack.c.l.bf16 %v7034_v42  ;;  %v6109_v38 = vld [vmem:[%s6842_s19 + $0xd8] sm:$0xff]   ;;  %v5805_v30 = vunpack.c.l.bf16 %v6110_v51 }
  0x43   : > { %v6343_v50 = vpack.i.bf16 %v12288_v15, %v586_v19  ;;  %v5830_v19 = vunpack.c.h.bf16 %v6116_v62  ;;  %v5806_v62 = vunpack.c.h.bf16 %v6110_v51 }
  0x45   : > { %6324 = vperm.xlu1 %6217, %v6902_v25   ;;  %6319 = vperm.xlu0 %6206, %v6911_v27   ;;  %v12290_v25 = vunpack.c.h.bf16 %v7026_v28  ;;  %v12289_v27 = vunpack.c.l.bf16 %v7050_v45  ;;  %v7095_v55 = vpack.i.bf16 %v5833_v12, %v5830_v19 }
  0x47   : > { %v7068_v58 = vpack.i.bf16 %v12289_v27, %v12292_v49  ;;  %v5801_v27 = vunpack.c.l.bf16 %v6109_v38  ;;  %12761 = vst [vmem:[#allocation2_spill] sm:$0xff] %v7095_v55  ;;  %v5497_v49 = vld [vmem:[%s6842_s19 + $0xfc] ss:$68 sps:$4 sm:$0xff]  }
  0x48   : > { %v984_v29 = vunpack.c.l.bf16 %v5497_v49  ;;  %v1001_v55 = vunpack.c.h.bf16 %v5497_v49  ;;  %v1380_v49 = vld [vmem:[%s6842_s19 + $0x4] ss:$68 sps:$4 sm:$0xff]  }
  0x49   : > { %6334 = vperm.xlu1 %6217, %v6925_v36   ;;  %6329 = vperm.xlu0 %6206, %v6927_v37   ;;  %v7074_v36 = vpack.i.bf16 %v12293_v48, %v12290_v25  ;;  %v5790_v37 = vunpack.c.h.bf16 %v6106_v56  ;;  %v7097_v56 = vpack.i.bf16 %v5829_v20, %v5826_v39  ;;  %v5802_v25 = vunpack.c.h.bf16 %v6109_v38 }
  0x4a   : > { %v5810_v48 = vunpack.c.h.bf16 %v7093_v54 }
  0x4b   : > { %v6363_v15 = vpack.i.bf16 %v5793_v59, %v5790_v37  ;;  %12762 = vst [vmem:[#allocation3_spill] sm:$0xff] %v7097_v56  ;;  %v5809_v37 = vunpack.c.l.bf16 %v7093_v54  ;;  %v6413_v56 = vpack.i.bf16 %v5830_v19, %v5829_v20  ;;  %v5533_v19 = vld [vmem:[%s6842_s19 + $0xf0] sm:$0x1] }
  0x4d   : > { %6344 = vperm.xlu1 %6217, %v6343_v50   ;;  %6339 = vperm.xlu0 %6206, %v6938_v44   ;;  %v5798_v50 = vunpack.c.h.bf16 %v6108_v3  ;;  %v5794_v44 = vunpack.c.h.bf16 %v6107_v57  ;;  %v6383_v35 = vpack.i.bf16 %v5809_v37, %v5806_v62  ;;  %v6378_v3 = vpack.i.bf16 %v5805_v30, %v5802_v25  ;;  %v6118_v62 = vld [vmem:[%s6842_s19 + $0x130] sm:$0xff]  }
  0x4e   : > { %v12766_v30 = vunpack.c.l.bf16 %v7026_v28  ;;  %v12767_v25 = vunpack.c.h.bf16 %v7026_v28  ;;  %v5837_v37 = vunpack.c.l.bf16 %v6118_v62 }
  0x4f   : > { %v6373_v57 = vpack.i.bf16 %v5801_v27, %v5798_v50  ;;  %v6368_v59 = vpack.i.bf16 %v5797_v47, %v5794_v44  ;;  %v12763_v27 = vunpack.c.h.bf16 %v7023_v26  ;;  %v6388_v50 = vpack.i.bf16 %v984_v29, %v5810_v48 }
  0x50   : > { %v12764_v44 = vunpack.c.l.bf16 %v7047_v43  ;;  %v12765_v47 = vunpack.c.h.bf16 %v7047_v43  ;;  %v6398_v54 = vpack.i.bf16 %v12767_v25, %v12766_v30 }
  0x51   : > { %6354 = vperm.xlu1 %6217, %v7081_v0   ;;  %6349 = vperm.xlu0 %6206, %v7083_v7   ;;  %v6393_v38 = vpack.i.bf16 %v12763_v27, %v12295_v32  ;;  %v12768_v27 = vunpack.c.l.bf16 %v7050_v45  ;;  %v6119_v32 = vld [vmem:[%s6842_s19 + $0x138] sm:$0xff]   ;;  %v12769_v45 = vunpack.c.l.bf16 %v7034_v42  ;;  %v12770_v42 = vunpack.c.l.bf16 %v6854_v8  ;;  %v213_v8 = vld [vmem:[%s12283_s1 + $0x4] sm:$0x1] }
  0x52   : > { %v6403_v51 = vpack.i.bf16 %v12765_v47, %v12764_v44  ;;  %v5841_v44 = vunpack.c.l.bf16 %v6119_v32  ;;  %v5842_v47 = vunpack.c.h.bf16 %v6119_v32  ;;  %v5552_v32 = vld [vmem:[%s6842_s19 + $0xa0] sm:$0x1] }
  0x53   : > { %v6408_v29 = vpack.i.bf16 %v5826_v39, %v12768_v27  ;;  %v6433_v39 = vpack.i.bf16 %v12769_v45, %v1001_v55  ;;  %v215_v27 = vunpack.c.l.bf16 %v213_v8  ;;  %v7157_v45 = vld [vmem:[%s6842_s19 + $0x130] sm:$0xff]  }
  0x54   : > { %v6428_v20 = vpack.i.bf16 %v5842_v47, %v5841_v44  ;;  %v12773_v44 = vunpack.c.h.bf16 %v6919_v33  ;;  %v5572_v47 = vld [vmem:[%s6842_s19 + $0xfc] ss:$68 sps:$4 sm:$0xff]  }
  0x55   : > { %6364 = vperm.xlu1 %6217, %v6363_v15   ;;  %6359 = vperm.xlu0 %6206, %v6358_v46  }
  0x59   : > { %6374 = vperm.xlu1 %6217, %v6373_v57   ;;  %6369 = vperm.xlu0 %6206, %v6368_v59  }
  0x5d   : > { %6384 = vperm.xlu1 %6217, %v6383_v35   ;;  %6379 = vperm.xlu0 %6206, %v6378_v3  }
  0x61   : > { %6394 = vperm.xlu1 %6217, %v6393_v38   ;;  %6389 = vperm.xlu0 %6206, %v6388_v50   ;;  %v5838_v38 = vunpack.c.h.bf16 %v6118_v62  ;;  %v5834_v50 = vunpack.c.h.bf16 %v7078_v63 }
  0x63   : > { %v6423_v43 = vpack.i.bf16 %v5838_v38, %v5837_v37  ;;  %v6418_v28 = vpack.i.bf16 %v5834_v50, %v5833_v12  ;;  %v1399_v12 = vunpack.c.l.bf16 %v1380_v49 }
  0x65   : > { %6404 = vperm.xlu1 %6217, %v6403_v51   ;;  %6399 = vperm.xlu0 %6206, %v6398_v54   ;;  %v1665_v54 = vunpack.c.l.bf16 %v5552_v32 }
  0x69   : > { %6414 = vperm.xlu1 %6217, %v6413_v56   ;;  %6409 = vperm.xlu0 %6206, %v6408_v29   ;;  %v1169_v56 = vunpack.c.l.bf16 %v5533_v19 }
  0x6b   : > { %v6478_v55 = vpack.i.bf16 %v1169_v56, %v5810_v48  ;;  %v1876_v48 = vld [vmem:[%s6842_s19 + $0x4] sm:$0xe]  ;;  %v5591_v56 = vld [vmem:[%s6842_s19 + $0x58] sm:$0xe] }
  0x6c   : > { %v1877_v29 = vunpack.c.l.bf16 %v1876_v48  ;;  %v6164_v48 = vld [vmem:[%s6842_s19 + $0xc0] sm:$0xff]  }
  0x6d   : > { %6424 = vperm.xlu1 %6217, %v6423_v43   ;;  %6419 = vperm.xlu0 %6206, %v6418_v28  }
  0x71   : > { %6434 = vperm.xlu1 %6217, %v6433_v39   ;;  %6429 = vperm.xlu0 %6206, %v6428_v20  }
  0x75   : > { %6444 = vperm.xlu1 %6217, %v7081_v0   ;;  %6439 = vperm.xlu0 %6206, %v7083_v7   ;;  %v6483_v0 = vpack.i.bf16 %v12770_v42, %v1399_v12  ;;  %v212_v7 = vld [vmem:[%s12283_s1] sm:$0xf]  ;;  %v5590_v12 = vld [vmem:[%s6842_s19 + $0x144] sm:$0x1]  ;;  %v6162_v42 = vld [vmem:[%s6842_s19 + $0xb0] sm:$0xff]  }
  0x76   : > { %v7145_v51 = vunpack.c.l.bf16 %v212_v7  ;;  %v6163_v7 = vld [vmem:[%s6842_s19 + $0xb8] sm:$0xff]  }
  0x78   : > { %12772 = vst [vmem:[#allocation5_spill] sm:$0xff] %v7145_v51 }
  0x79   : > { %6454 = vperm.xlu1 %6217, %v6363_v15   ;;  %6449 = vperm.xlu0 %6206, %v6358_v46   ;;  %v342_v15 = vlaneseq }
  0x7b   : > { %v7135_v46 = vshrl.u32 %v342_v15, 7  ;;  %v6006_v15 = vunpack.c.h.bf16 %v7157_v45 }
  0x7d   : > { %6464 = vperm.xlu1 %6217, %v6373_v57   ;;  %6459 = vperm.xlu0 %6206, %v6368_v59   ;;  %12771 = vst [vmem:[#allocation4_spill] sm:$0xff] %v7135_v46  ;;  %v1398_v57 = vld [vmem:[%s6842_s19 + $0x4c] sm:$0x1]  ;;  %v6145_v59 = vld [vmem:[%s6842_s19 + $0x98] sm:$0xff]   ;;  %v344_v30 = vsub.s32 0, %v7135_v46  ;;  %v511_v37 = vsub.s32 1, %v7135_v46 }
  0x7e   : > { %v5946_v25 = vunpack.c.h.bf16 %v6145_v59  ;;  %v5945_v62 = vunpack.c.l.bf16 %v6145_v59  ;;  %v1094_v8 = vsub.s32 4, %v7135_v46 }
  0x7f   : > { %v7162_v39 = vrot.slane %v7145_v51, %v344_v30  ;;  %v7175_v19 = vrot.slane %v215_v27, %v344_v30  ;;  %v6014_v30 = vunpack.c.h.bf16 %v6162_v42 }
  0x80   : > { %v7164_v20 = vpack.i.bf16 %v1665_v54, %v5946_v25  ;;  %v7167_v33 = vpack.i.bf16 %v5945_v62, %v6958_v6  ;;  %v2556_v6 = vunpack.c.l.bf16 %v5572_v47  ;;  %v6166_v25 = vld [vmem:[%s6842_s19 + $0xd0] sm:$0xff]   ;;  %v7199_v54 = vld [vmem:[%s6842_s19 + $0xd8] sm:$0xff]   ;;  %v6017_v62 = vunpack.c.l.bf16 %v6163_v7 }
  0x81   : > { %6474 = vperm.xlu1 %6217, %v6383_v35   ;;  %6469 = vperm.xlu0 %6206, %v6378_v3   ;;  %v5553_v35 = vld [vmem:[%s6842_s19 + $0x54] ss:$68 sps:$4 sm:$0xff]   ;;  %v1416_v3 = vunpack.c.h.bf16 %v1380_v49  ;;  %12774 = vst [vmem:[#allocation6_spill] sm:$0xff] %v7175_v19 }
  0x82   : > { %v2165_v38 = vunpack.c.l.bf16 %v5553_v35  ;;  %v2182_v43 = vunpack.c.h.bf16 %v5553_v35  ;;  %v7170_v49 = vld [vmem:[%s6842_s19 + $0x138] sm:$0xff]   ;;  %v6165_v35 = vld [vmem:[%s6842_s19 + $0xc8] sm:$0xff]  }
  0x83   : > { %v6009_v59 = vunpack.c.l.bf16 %v7170_v49 }
  0x85   : > { %6484 = vperm.xlu1 %6217, %v6483_v0   ;;  %6479 = vperm.xlu0 %6206, %v6478_v55   ;;  %v927_v55 = vsub.s32 3, %v7135_v46  ;;  %v7219_v32 = vpack.i.bf16 %v6009_v59, %v6006_v15 }
  0x89   : > { %6494 = vperm.xlu1 %6217, %v6964_v23   ;;  %6489 = vperm.xlu0 %6206, %v6974_v40   ;;  %v1417_v23 = vunpack.c.l.bf16 %v1398_v57  ;;  %v5571_v40 = vld [vmem:[%s6842_s19 + $0x9c] sm:$0x1]  ;;  %v7189_v57 = vld [vmem:[%s6842_s19 + $0xac] ss:$68 sps:$4 sm:$0xff]  }
  0x8a   : > { %v2183_v28 = vunpack.c.l.bf16 %v5571_v40  ;;  %v2573_v40 = vunpack.c.h.bf16 %v5572_v47  ;;  %v3674_v27 = vunpack.c.l.bf16 %v7189_v57  ;;  %v6030_v47 = vunpack.c.h.bf16 %v6166_v25 }
  0x8c   : > { %v7183_v0 = vpack.i.bf16 %v2183_v28, %v2182_v43  ;;  %v6025_v43 = vunpack.c.l.bf16 %v6165_v35  ;;  %v6026_v28 = vunpack.c.h.bf16 %v6165_v35  ;;  %v7217_v35 = vrot.slane %v7145_v51, %v927_v55 }
  0x8d   : > { %6504 = vperm.xlu1 %6217, %v6980_v5   ;;  %6499 = vperm.xlu0 %6206, %v6986_v10   ;;  %v6523_v5 = vpack.i.bf16 %v1416_v3, %v12773_v44  ;;  %v6528_v10 = vpack.i.bf16 %v6921_v34, %v1417_v23  ;;  %v7173_v34 = vrot.slane %v7145_v51, %v511_v37  ;;  %v2574_v3 = vunpack.c.l.bf16 %v5590_v12 }
  0x8e   : > { %v3004_v23 = vunpack.c.l.bf16 %v5591_v56  ;;  %v6013_v37 = vunpack.c.l.bf16 %v6162_v42  ;;  %v6021_v44 = vunpack.c.l.bf16 %v6164_v48  ;;  %v6033_v12 = vunpack.c.l.bf16 %v7199_v54  ;;  %12776 = vst [vmem:[#allocation7_spill] sm:$0xff] %v7217_v35 }
  0x8f   : > { %v6029_v56 = vunpack.c.l.bf16 %v6166_v25  ;;  %v12777_v25 = vunpack.c.l.bf16 %v7157_v45  ;;  %v7235_v55 = vpack.i.bf16 %v6017_v62, %v6014_v30  ;;  %v7254_v30 = vrot.slane %v7145_v51, %v1094_v8 }
  0x90   : > { %v7237_v15 = vpack.i.bf16 %v6013_v37, %v3674_v27  ;;  %v6034_v62 = vunpack.c.h.bf16 %v7199_v54  ;;  %v6171_v37 = vld [vmem:[%s6842_s19 + $0x108] sm:$0xff]   ;;  %v6172_v27 = vld [vmem:[%s6842_s19 + $0x110] sm:$0xff]   ;;  %v3691_v8 = vunpack.c.h.bf16 %v7189_v57 }
  0x91   : > { %6514 = vperm.xlu1 %6217, %v6988_v31   ;;  %6509 = vperm.xlu0 %6206, %v6992_v41   ;;  %v7177_v31 = vpack.i.bf16 %v2165_v38, %v1877_v29  ;;  %v684_v41 = vsub.s32 2, %v7135_v46  ;;  %v6018_v29 = vunpack.c.h.bf16 %v6163_v7  ;;  %v6022_v38 = vunpack.c.h.bf16 %v6164_v48  ;;  %12780 = vst [vmem:[#allocation9_spill] sm:$0xff] %v7235_v55  ;;  %12786 = vst [vmem:[#allocation15_spill] sm:$0xff] %v7254_v30  ;;  %v6175_v30 = vld [vmem:[%s6842_s19 + $0x128] sm:$0xff]  }
  0x92   : > { %v12775_v7 = vunpack.c.l.bf16 %v7023_v26  ;;  %v7225_v19 = vpack.i.bf16 %v12777_v25, %v5834_v50  ;;  %v6168_v26 = vld [vmem:[%s6842_s19 + $0xe0] sm:$0xff]   ;;  %12781 = vst [vmem:[#allocation10_spill] sm:$0xff] %v7237_v15  ;;  %v5610_v50 = vld [vmem:[%s6842_s19 + $0xf4] sm:$0x1]  ;;  %v7251_v25 = vpack.i.bf16 %v6029_v56, %v6026_v28  ;;  %v6053_v54 = vunpack.c.l.bf16 %v6172_v27 }
  0x93   : > { %v7210_v42 = vrot.slane %v7145_v51, %v684_v41  ;;  %v7239_v63 = vpack.i.bf16 %v6025_v43, %v6022_v38  ;;  %v7241_v59 = vpack.i.bf16 %v6021_v44, %v6018_v29  ;;  %v6173_v29 = vld [vmem:[%s6842_s19 + $0x118] sm:$0xff]   ;;  %v6038_v38 = vunpack.c.h.bf16 %v6168_v26 }
  0x94   : > { %v7214_v48 = vpack.i.bf16 %v12775_v7, %v2556_v6  ;;  %v6169_v6 = vld [vmem:[%s6842_s19 + $0xe8] sm:$0xff]   ;;  %12785 = vst [vmem:[#allocation14_spill] sm:$0xff] %v7251_v25  ;;  %v6037_v44 = vunpack.c.l.bf16 %v6168_v26  ;;  %v3692_v28 = vunpack.c.l.bf16 %v5610_v50  ;;  %v6050_v25 = vunpack.c.h.bf16 %v6171_v37 }
  0x95   : > { %6524 = vperm.xlu1 %6217, %v6523_v5   ;;  %6519 = vperm.xlu0 %6206, %v6994_v1   ;;  %12782 = vst [vmem:[#allocation11_spill] sm:$0xff] %v7239_v63  ;;  %12783 = vst [vmem:[#allocation12_spill] sm:$0xff] %v7241_v59  ;;  %v6041_v43 = vunpack.c.l.bf16 %v6169_v6  ;;  %v6058_v59 = vunpack.c.h.bf16 %v6173_v29  ;;  %v6057_v15 = vunpack.c.l.bf16 %v6173_v29  ;;  %v1267_v26 = vsub.s32 5, %v7135_v46 }
  0x96   : > { %v6066_v57 = vunpack.c.h.bf16 %v6175_v30 }
  0x98   : > { %v7202_v5 = vpop.permute.xlu1 %6219  ;;  %v7204_v1 = vpop.permute.xlu0 %6208 }
  0x99   : > { %6534 = vperm.xlu1 %6217, %v6945_v53   ;;  %6529 = vperm.xlu0 %6206, %v6528_v10   ;;  %v7227_v53 = vpack.i.bf16 %v3004_v23, %v2574_v3  ;;  %v12778_v10 = vunpack.c.h.bf16 %v7170_v49  ;;  %v6170_v3 = vld [vmem:[%s6842_s19 + $0x100] sm:$0xff]   ;;  %v6221_v55 = vunpack.i.l.bf16 %v7202_v5  ;;  %v6211_v29 = vunpack.i.h.bf16 %v7204_v1 }
  0x9a   : > { %v6045_v56 = vunpack.c.l.bf16 %v6170_v3 }
  0x9b   : > { %v7231_v41 = vpack.i.bf16 %v2573_v40, %v12778_v10  ;;  %v7249_v40 = vpack.i.bf16 %v6033_v12, %v6030_v47  ;;  %v6042_v47 = vunpack.c.h.bf16 %v6169_v6  ;;  %v6174_v12 = vld [vmem:[%s6842_s19 + $0x120] sm:$0xff]   ;;  %v6046_v10 = vunpack.c.h.bf16 %v6170_v3 }
  0x9c   : > { %v7245_v23 = vpop.permute.xlu1 %6224  ;;  %v7247_v7 = vpop.permute.xlu0 %6213  ;;  %v7270_v6 = vpack.i.bf16 %v6041_v43, %v6038_v38  ;;  %v6062_v50 = vunpack.c.h.bf16 %v6174_v12  ;;  %v6065_v3 = vunpack.c.l.bf16 %v6175_v30  ;;  %v7279_v46 = vpack.i.bf16 %v6045_v56, %v3692_v28 }
  0x9d   : > { %12779 = vst [vmem:[#allocation8_spill] sm:$0xff] %v7231_v41  ;;  %12784 = vst [vmem:[#allocation13_spill] sm:$0xff] %v7249_v40  ;;  %6544 = vperm.xlu1 %6217, %v6953_v61   ;;  %6539 = vperm.xlu0 %6206, %v6943_v52   ;;  %v6049_v40 = vunpack.c.l.bf16 %v6171_v37  ;;  %v6061_v61 = vunpack.c.l.bf16 %v6174_v12  ;;  %v6054_v52 = vunpack.c.h.bf16 %v6172_v27  ;;  %v6222_v37 = vunpack.i.h.bf16 %v7202_v5 }
  0x9e   : > { %12787 = vst [vmem:[#allocation16_spill] sm:$0xff] %v7270_v6  ;;  %v7274_v41 = vpack.i.bf16 %v6037_v44, %v6034_v62  ;;  %v7276_v27 = vpack.i.bf16 %v3691_v8, %v6042_v47  ;;  %v6210_v38 = vunpack.i.l.bf16 %v7204_v1  ;;  %v7291_v5 = vrot.slane %v7145_v51, %v1267_v26  ;;  %v7294_v62 = vld [vmem:[%s6842_s19 + $0x140] sm:$0xff]  }
  0x9f   : > { %v7286_v12 = vpack.i.bf16 %v6061_v61, %v6058_v59  ;;  %v7288_v6 = vpack.i.bf16 %v6057_v15, %v6054_v52  ;;  %v6227_v44 = vunpack.i.h.bf16 %v7245_v23  ;;  %v12793_v1 = vunpack.c.l.bf16 %v7157_v45 }
  0xa0   : > { %v6235_v35 = vpop.permute.xlu1 %6234  ;;  %v7265_v63 = vpop.permute.xlu0 %6229  ;;  %12792 = vst [vmem:[#allocation21_spill] sm:$0xff] %v7291_v5  ;;  %v7304_v59 = vpack.i.bf16 %v6065_v3, %v6062_v50  ;;  %v7307_v15 = vmul.f32 %v6222_v37, %v7162_v39  ;;  %v7310_v47 = vmul.f32 %v6221_v55, %v7162_v39  ;;  %v6216_v28 = vunpack.i.h.bf16 %v7247_v7 }
  0xa1   : > { %6554 = vperm.xlu1 %6217, %v6968_v24   ;;  %6549 = vperm.xlu0 %6206, %v6951_v60   ;;  %v7281_v24 = vpack.i.bf16 %v6053_v54, %v6050_v25  ;;  %v7283_v60 = vpack.i.bf16 %v6049_v40, %v6046_v10  ;;  %12790 = vst [vmem:[#allocation19_spill] sm:$0xff] %v7286_v12  ;;  %12791 = vst [vmem:[#allocation20_spill] sm:$0xff] %v7288_v6  ;;  %v6226_v25 = vunpack.i.l.bf16 %v7245_v23 }
  0xa2   : > { %v7302_v40 = vpack.i.bf16 %v12793_v1, %v6066_v57  ;;  %12795 = vst [vmem:[#allocation23_spill] sm:$0xff] %v7304_v59  ;;  %v6215_v23 = vunpack.i.l.bf16 %v7247_v7  ;;  %v6237_v56 = vunpack.i.h.bf16 %v6235_v35  ;;  %v6077_v45 = vunpack.c.l.bf16 %v7294_v62 }
  0xa3   : > { %12788 = vst [vmem:[#allocation17_spill] sm:$0xff] %v7281_v24  ;;  %12789 = vst [vmem:[#allocation18_spill] sm:$0xff] %v7283_v60  ;;  %v346_v8 = vmul.f32 %v6210_v38, %v7162_v39  ;;  %v6232_v10 = vunpack.i.h.bf16 %v7265_v63  ;;  %v6231_v54 = vunpack.i.l.bf16 %v7265_v63  ;;  %v7320_v26 = vmul.f32 %v6227_v44, %v7162_v39 }
  0xa4   : > { %v6245_v43 = vpop.permute.xlu1 %6244  ;;  %v6240_v30 = vpop.permute.xlu0 %6239  ;;  %12794 = vst [vmem:[#allocation22_spill] sm:$0xff] %v7302_v40  ;;  %v7323_v7 = vmul.f32 %v6226_v25, %v7162_v39  ;;  %v7328_v50 = vmul.f32 %v6216_v28, %v7162_v39  ;;  %v7331_v63 = vmul.f32 %v6215_v23, %v7162_v39  ;;  %v12796_v44 = vunpack.c.h.bf16 %v7170_v49 }
  0xa5   : > { %6564 = vperm.xlu1 %6217, %v6999_v4   ;;  %6559 = vperm.xlu0 %6206, %v6956_v2   ;;  %v347_v4 = vmul.f32 %v6211_v29, %v7162_v39  ;;  %v6236_v2 = vunpack.i.l.bf16 %v6235_v35  ;;  %v6247_v61 = vunpack.i.h.bf16 %v6245_v43  ;;  %v6246_v57 = vunpack.i.l.bf16 %v6245_v43 }
  0xa6   : > { %v6242_v3 = vunpack.i.h.bf16 %v6240_v30  ;;  %v7334_v29 = vmul.f32 %v6237_v56, %v7162_v39  ;;  %v6241_v43 = vunpack.i.l.bf16 %v6240_v30  ;;  %v7345_v25 = vmul.f32 %v6232_v10, %v7162_v39 }
  0xa7   : > { %v7337_v38 = vmul.f32 %v6236_v2, %v7162_v39  ;;  %v7348_v1 = vmul.f32 %v6231_v54, %v7162_v39  ;;  %v7351_v28 = vmul.f32 %v6247_v61, %v7162_v39  ;;  %v7354_v2 = vmul.f32 %v6246_v57, %v7162_v39 }
  0xa8   : > { %v6255_v52 = vpop.permute.xlu1 %6254  ;;  %v6250_v55 = vpop.permute.xlu0 %6249  ;;  %v7360_v10 = vmul.f32 %v6242_v3, %v7162_v39  ;;  %v6078_v61 = vunpack.c.h.bf16 %v7294_v62  ;;  %v7365_v51 = vmul.f32 %v6241_v43, %v7162_v39 }
  0xa9   : > { %v6256_v35 = vunpack.i.l.bf16 %v6255_v52  ;;  %6574 = vperm.xlu1 %6217, %v7164_v20   ;;  %6569 = vperm.xlu0 %6206, %v7167_v33   ;;  %v6257_v37 = vunpack.i.h.bf16 %v6255_v52  ;;  %v7341_v20 = vpack.i.bf16 %v6077_v45, %v12796_v44  ;;  %v5629_v33 = vld [vmem:[%s6842_s19 + $0x148] sm:$0x1]  ;;  %v6252_v23 = vunpack.i.h.bf16 %v6250_v55 }
  0xaa   : > { %v6251_v30 = vunpack.i.l.bf16 %v6250_v55  ;;  %v3936_v44 = vunpack.c.l.bf16 %v5629_v33 }
  0xab   : > { %12797 = vst [vmem:[#allocation24_spill] sm:$0xff] %v7341_v20  ;;  %v513_v49 = vmul.f32 %v6256_v35, %v7173_v34  ;;  %v514_v54 = vmul.f32 %v6257_v37, %v7173_v34  ;;  %v7368_v55 = vmul.f32 %v6257_v37, %v7162_v39 }
  0xac   : > { %v6265_v56 = vpop.permute.xlu1 %6264  ;;  %v6260_v52 = vpop.permute.xlu0 %6259  ;;  %v7380_v43 = vmul.f32 %v6251_v30, %v7162_v39  ;;  %v7386_v40 = vpack.i.bf16 %v3936_v44, %v6078_v61 }
  0xad   : > { %v6266_v45 = vunpack.i.l.bf16 %v6265_v56  ;;  %6584 = vperm.xlu1 %6217, %v7002_v11   ;;  %6579 = vperm.xlu0 %6206, %v7177_v31   ;;  %v6267_v57 = vunpack.i.h.bf16 %v6265_v56  ;;  %v6262_v5 = vunpack.i.h.bf16 %v6260_v52  ;;  %v6261_v20 = vunpack.i.l.bf16 %v6260_v52 }
  0xae   : > { %v7371_v11 = vmul.f32 %v6256_v35, %v7162_v39  ;;  %v7374_v31 = vmul.f32 %v6252_v23, %v7162_v39  ;;  %v7377_v33 = vadd.f32 %v513_v49, %v346_v8  ;;  %v7384_v35 = vadd.f32 %v514_v54, %v347_v4  ;;  %12798 = vst [vmem:[#allocation25_spill] sm:$0xff] %v7386_v40 }
  0xaf   : > { %v517_v3 = vmul.f32 %v6266_v45, %v7173_v34  ;;  %v518_v6 = vmul.f32 %v6267_v57, %v7173_v34  ;;  %v7390_v8 = vmul.f32 %v6267_v57, %v7162_v39  ;;  %v516_v49 = vmul.f32 %v6262_v5, %v7173_v34 }
  0xb0   : > { %v6275_v59 = vpop.permute.xlu1 %6274  ;;  %v6270_v62 = vpop.permute.xlu0 %6269  ;;  %v515_v30 = vmul.f32 %v6261_v20, %v7173_v34  ;;  %v7404_v4 = vmul.f32 %v6261_v20, %v7162_v39  ;;  %v7413_v20 = vld [vmem:[%s6842_s19 + $0xac] sm:$0xe] }
  0xb1   : > { %v6277_v56 = vunpack.i.h.bf16 %v6275_v59  ;;  %v6276_v52 = vunpack.i.l.bf16 %v6275_v59  ;;  %6594 = vperm.xlu1 %6217, %v7004_v13   ;;  %6589 = vperm.xlu0 %6206, %v7006_v9   ;;  %v6272_v37 = vunpack.i.h.bf16 %v6270_v62  ;;  %v6271_v23 = vunpack.i.l.bf16 %v6270_v62  ;;  %12799 = vst [vmem:[#allocation26_spill] sm:$0xff] %v7413_v20 }
  0xb2   : > { %v7395_v59 = vadd.f32 %v517_v3, %v7310_v47  ;;  %v7398_v13 = vmul.f32 %v6266_v45, %v7162_v39  ;;  %v7401_v9 = vmul.f32 %v6262_v5, %v7162_v39  ;;  %v7416_v12 = vadd.f32 %v518_v6, %v7307_v15 }
  0xb3   : > { %v522_v44 = vmul.f32 %v6277_v56, %v7173_v34  ;;  %v521_v57 = vmul.f32 %v6276_v52, %v7173_v34  ;;  %v520_v47 = vmul.f32 %v6272_v37, %v7173_v34  ;;  %v519_v5 = vmul.f32 %v6271_v23, %v7173_v34 }
  0xb4   : > { %v6285_v54 = vpop.permute.xlu1 %6284  ;;  %v6280_v61 = vpop.permute.xlu0 %6279  ;;  %12800 = vst [vmem:[#allocation27_spill] sm:$0xff] %v7416_v12  ;;  %v7419_v60 = vadd.f32 %v515_v30, %v7331_v63  ;;  %v7431_v24 = vmul.f32 %v6272_v37, %v7162_v39 }
  0xb5   : > { %v6287_v62 = vunpack.i.h.bf16 %v6285_v54  ;;  %v6286_v40 = vunpack.i.l.bf16 %v6285_v54  ;;  %6604 = vperm.xlu1 %6217, %v7008_v14   ;;  %6599 = vperm.xlu0 %6206, %v7011_v17   ;;  %v6282_v45 = vunpack.i.h.bf16 %v6280_v61  ;;  %v6281_v3 = vunpack.i.l.bf16 %v6280_v61 }
  0xb6   : > { %v7422_v54 = vadd.f32 %v516_v49, %v7328_v50  ;;  %v7425_v14 = vmul.f32 %v6277_v56, %v7162_v39  ;;  %v7428_v17 = vmul.f32 %v6276_v52, %v7162_v39  ;;  %v7436_v63 = vadd.f32 %v521_v57, %v7348_v1 }
  0xb7   : > { %v526_v61 = vmul.f32 %v6287_v62, %v7173_v34  ;;  %v525_v6 = vmul.f32 %v6286_v40, %v7173_v34  ;;  %v7439_v50 = vadd.f32 %v522_v44, %v7345_v25  ;;  %v7442_v56 = vmul.f32 %v6271_v23, %v7162_v39 }
  0xb8   : > { %v6295_v15 = vpop.permute.xlu1 %6294  ;;  %v6290_v12 = vpop.permute.xlu0 %6289  ;;  %12801 = vst [vmem:[#allocation28_spill] sm:$0xff] %v7436_v63  ;;  %v7448_v37 = vadd.f32 %v520_v47, %v7320_v26  ;;  %v7451_v49 = vadd.f32 %v519_v5, %v7323_v7  ;;  %v524_v1 = vmul.f32 %v6282_v45, %v7173_v34  ;;  %v523_v25 = vmul.f32 %v6281_v3, %v7173_v34 }
  0xb9   : > { %12802 = vst [vmem:[#allocation29_spill] sm:$0xff] %v7439_v50  ;;  %6614 = vperm.xlu1 %6217, %v7013_v18   ;;  %6609 = vperm.xlu0 %6206, %v7015_v21   ;;  %v7456_v23 = vmul.f32 %v6287_v62, %v7162_v39  ;;  %v7459_v18 = vmul.f32 %v6286_v40, %v7162_v39  ;;  %v6297_v21 = vunpack.i.h.bf16 %v6295_v15  ;;  %v6296_v30 = vunpack.i.l.bf16 %v6295_v15 }
  0xba   : > { %12803 = vst [vmem:[#allocation30_spill] sm:$0xff] %v7451_v49  ;;  %v7462_v44 = vadd.f32 %v525_v6, %v7365_v51  ;;  %v7465_v26 = vadd.f32 %v526_v61, %v7360_v10  ;;  %v7468_v7 = vmul.f32 %v6282_v45, %v7162_v39  ;;  %v7471_v57 = vmul.f32 %v6281_v3, %v7162_v39 }
  0xbb   : > { %v6292_v5 = vunpack.i.h.bf16 %v6290_v12  ;;  %v6291_v52 = vunpack.i.l.bf16 %v6290_v12  ;;  %v7476_v51 = vadd.f32 %v524_v1, %v7334_v29  ;;  %v7479_v10 = vadd.f32 %v523_v25, %v7337_v38 }
  0xbc   : > { %12804 = vst [vmem:[#allocation31_spill] sm:$0xff] %v7462_v44  ;;  %12805 = vst [vmem:[#allocation32_spill] sm:$0xff] %v7465_v26  ;;  %v6305_v47 = vpop.permute.xlu1 %6304  ;;  %v6300_v62 = vpop.permute.xlu0 %6299  ;;  %v530_v3 = vmul.f32 %v6297_v21, %v7173_v34  ;;  %v7483_v6 = vmul.f32 %v6297_v21, %v7162_v39  ;;  %v529_v12 = vmul.f32 %v6296_v30, %v7173_v34 }
  0xbd   : > { %v6307_v40 = vunpack.i.h.bf16 %v6305_v47  ;;  %v6306_v20 = vunpack.i.l.bf16 %v6305_v47  ;;  %6624 = vperm.xlu1 %6217, %v7183_v0   ;;  %6619 = vperm.xlu0 %6206, %v7018_v22   ;;  %12806 = vst [vmem:[#allocation33_spill] sm:$0xff] %v7476_v51  ;;  %12807 = vst [vmem:[#allocation34_spill] sm:$0xff] %v7479_v10  ;;  %v6302_v45 = vunpack.i.h.bf16 %v6300_v62  ;;  %v6301_v61 = vunpack.i.l.bf16 %v6300_v62 }
  0xbe   : > { %v7488_v0 = vmul.f32 %v6296_v30, %v7162_v39  ;;  %v528_v47 = vmul.f32 %v6292_v5, %v7173_v34  ;;  %v7495_v21 = vmul.f32 %v6292_v5, %v7162_v39  ;;  %v527_v62 = vmul.f32 %v6291_v52, %v7173_v34 }
  0xbf   : > { %v2037_v15 = vmul.f32 %v6306_v20, %v7173_v34  ;;  %v2038_v22 = vmul.f32 %v6307_v40, %v7173_v34  ;;  %v2036_v29 = vmul.f32 %v6302_v45, %v7173_v34  ;;  %v2035_v38 = vmul.f32 %v6301_v61, %v7173_v34 }
  0xc0   : > { %v6315_v1 = vpop.permute.xlu1 %6314  ;;  %v6310_v25 = vpop.permute.xlu0 %6309  ;;  %12808 = vst [vmem:[#allocation35_spill] sm:$0xff] %v7495_v21  ;;  %v7501_v30 = vmul.f32 %v6291_v52, %v7162_v39  ;;  %v7504_v10 = vmul.f32 %v6307_v40, %v7210_v42  ;;  %v7507_v51 = vmul.f32 %v6306_v20, %v7210_v42  ;;  %v7512_v52 = vadd.f32 %v529_v12, %v7380_v43 }
  0xc1   : > { %v2076_v26 = vrot.slane %v2037_v15, 1  ;;  %6634 = vperm.xlu1 %6217, %v7040_v16   ;;  %6629 = vperm.xlu0 %6206, %v7214_v48   ;;  %v2074_v50 = vrot.slane %v2036_v29, 1  ;;  %v2073_v44 = vrot.slane %v2035_v38, 1  ;;  %v6317_v5 = vunpack.i.h.bf16 %v6315_v1 }
  0xc2   : > { %v6316_v21 = vunpack.i.l.bf16 %v6315_v1  ;;  %v6312_v49 = vunpack.i.h.bf16 %v6310_v25  ;;  %v2078_v63 = vrot.slane %v2038_v22, 1  ;;  %v6311_v48 = vunpack.i.l.bf16 %v6310_v25  ;;  %12809 = vst [vmem:[#allocation36_spill] sm:$0xff] %v7512_v52 }
  0xc3   : > { %v2077_v15 = vsel %vm724_vm0, %v2074_v50, %v2076_v26  ;;  %v2075_v16 = vsel %vm724_vm0, %v2073_v44, %v2074_v50  ;;  %v7515_v40 = vadd.f32 %v530_v3, %v7374_v31  ;;  %v7518_v29 = vadd.f32 %v528_v47, %v7351_v28  ;;  %v12813_v31 = vld [vmem:[#allocation2_spill] sm:$0xff] }
  0xc4   : > { %v7521_v20 = vadd.f32 %v527_v62, %v7354_v2  ;;  %v7525_v22 = vmul.f32 %v6302_v45, %v7210_v42  ;;  %v2042_v50 = vmul.f32 %v6317_v5, %v7173_v34  ;;  %v2041_v44 = vmul.f32 %v6316_v21, %v7173_v34  ;;  %v6325_v12 = vpop.permute.xlu1 %6324  ;;  %v6320_v45 = vpop.permute.xlu0 %6319 }
  0xc5   : > { %12810 = vst [vmem:[#allocation37_spill] sm:$0xff] %v7515_v40  ;;  %12811 = vst [vmem:[#allocation38_spill] sm:$0xff] %v7518_v29  ;;  %6644 = vperm.xlu1 %6217, %v7068_v58   ;;  %v2040_v43 = vmul.f32 %v6312_v49, %v7173_v34  ;;  %6639 = vperm.xlu0 %6206, %v7074_v36   ;;  %v7534_v2 = vmul.f32 %v6301_v61, %v7210_v42  ;;  %v6327_v62 = vunpack.i.h.bf16 %v6325_v12  ;;  %v12814_v29 = vld [vmem:[#allocation3_spill] sm:$0xff] }
  0xc6   : > { %12812 = vst [vmem:[#allocation39_spill] sm:$0xff] %v7521_v20  ;;  %v2039_v58 = vmul.f32 %v6311_v48, %v7173_v34  ;;  %v2079_v3 = vsel %vm724_vm0, %v2076_v26, %v2078_v63  ;;  %v7539_v38 = vmul.f32 %v6317_v5, %v7210_v42  ;;  %v2084_v1 = vrot.slane %v2041_v44, 1 }
  0xc7   : > { %v2082_v25 = vrot.slane %v2040_v43, 1  ;;  %v7542_v47 = vmul.f32 %v6316_v21, %v7210_v42  ;;  %v6326_v28 = vunpack.i.l.bf16 %v6325_v12  ;;  %v2086_v61 = vrot.slane %v2042_v50, 1 }
  0xc8   : > { %v2080_v36 = vrot.slane %v2039_v58, 1  ;;  %v6322_v20 = vunpack.i.h.bf16 %v6320_v45  ;;  %v6321_v52 = vunpack.i.l.bf16 %v6320_v45  ;;  %v7548_v26 = vadd.f32 %v2079_v3, %v7404_v4  ;;  %v6330_v45 = vpop.permute.xlu0 %6329 }
  0xc9   : > { %6654 = vperm.xlu1 %6217, %v12813_v31   ;;  %v2085_v40 = vsel %vm724_vm0, %v2082_v25, %v2084_v1  ;;  %6649 = vperm.xlu0 %6206, %v12814_v29   ;;  %v7554_v43 = vadd.f32 %v2077_v15, %v7368_v55  ;;  %v7557_v50 = vadd.f32 %v2075_v16, %v7371_v11  ;;  %v6335_v55 = vpop.permute.xlu1 %6334 }
  0xca   : > { %12815 = vst [vmem:[#allocation2_spill] sm:$0xff] %v7548_v26  ;;  %v2081_v44 = vsel %vm724_vm0, %v2078_v63, %v2080_v36  ;;  %v7560_v12 = vmul.f32 %v6312_v49, %v7210_v42  ;;  %v7563_v29 = vmul.f32 %v6327_v62, %v7173_v34  ;;  %v7567_v31 = vmul.f32 %v6311_v48, %v7210_v42 }
  0xcb   : > { %12816 = vst [vmem:[#allocation3_spill] sm:$0xff] %v7554_v43  ;;  %12817 = vst [vmem:[#allocation40_spill] sm:$0xff] %v7557_v50  ;;  %v2045_v58 = vmul.f32 %v6326_v28, %v7173_v34  ;;  %v2044_v63 = vmul.f32 %v6322_v20, %v7173_v34  ;;  %v2087_v49 = vsel %vm724_vm0, %v2084_v1, %v2086_v61  ;;  %v6337_v26 = vunpack.i.h.bf16 %v6335_v55 }
  0xcc   : > { %v2083_v15 = vsel %vm724_vm0, %v2080_v36, %v2082_v25  ;;  %v2043_v16 = vmul.f32 %v6321_v52, %v7173_v34  ;;  %v7578_v48 = vmul.f32 %v6327_v62, %v7210_v42  ;;  %v2094_v3 = vrot.slane %v7563_v29, 1  ;;  %v12825_v29 = vld [vmem:[#allocation10_spill] sm:$0xff] }
  0xcd   : > { %6664 = vperm.xlu1 %6217, %v7219_v32   ;;  %6659 = vperm.xlu0 %6206, %v7225_v19   ;;  %v2092_v4 = vrot.slane %v2045_v58, 1  ;;  %v2090_v21 = vrot.slane %v2044_v63, 1  ;;  %v7582_v5 = vmul.f32 %v6326_v28, %v7210_v42  ;;  %v7585_v11 = vmul.f32 %v6322_v20, %v7210_v42  ;;  %v12818_v20 = vld [vmem:[#allocation8_spill] sm:$0xff] }
  0xce   : > { %v2088_v1 = vrot.slane %v2043_v16, 1  ;;  %v6336_v25 = vunpack.i.l.bf16 %v6335_v55  ;;  %v6332_v50 = vunpack.i.h.bf16 %v6330_v45  ;;  %v6331_v19 = vunpack.i.l.bf16 %v6330_v45  ;;  %v7606_v45 = vpop.permute.xlu1 %6344 }
  0xcf   : > { %v2093_v36 = vsel %vm724_vm0, %v2090_v21, %v2092_v4  ;;  %v7592_v58 = vmul.f32 %v6321_v52, %v7210_v42  ;;  %v7597_v63 = vadd.f32 %v2087_v49, %v7442_v56  ;;  %v7600_v55 = vadd.f32 %v2085_v40, %v7390_v8 }
  0xd0   : > { %v2089_v28 = vsel %vm724_vm0, %v2086_v61, %v2088_v1  ;;  %v7603_v16 = vadd.f32 %v2081_v44, %v7401_v9  ;;  %v7609_v52 = vadd.f32 %v2083_v15, %v7398_v13  ;;  %v2048_v56 = vmul.f32 %v6332_v50, %v7173_v34  ;;  %v7620_v44 = vpop.permute.xlu0 %6339  ;;  %v12829_v15 = vld [vmem:[#allocation11_spill] sm:$0xff] }
  0xd1   : > { %6674 = vperm.xlu1 %6217, %v7227_v53   ;;  %6669 = vperm.xlu0 %6206, %v12818_v20   ;;  %12819 = vst [vmem:[#allocation8_spill] sm:$0xff] %v7597_v63  ;;  %12820 = vst [vmem:[#allocation41_spill] sm:$0xff] %v7600_v55  ;;  %v2095_v53 = vsel %vm724_vm0, %v2092_v4, %v2094_v3  ;;  %v2049_v20 = vmul.f32 %v6336_v25, %v7173_v34  ;;  %v12823_v4 = vld [vmem:[#allocation9_spill] sm:$0xff]  ;;  %v12306_v63 = vunpack.i.h.bf16 %v7606_v45 }
  0xd2   : > { %12821 = vst [vmem:[#allocation42_spill] sm:$0xff] %v7603_v16  ;;  %12822 = vst [vmem:[#allocation43_spill] sm:$0xff] %v7609_v52  ;;  %v7617_v9 = vmul.f32 %v6337_v26, %v7173_v34  ;;  %v2047_v40 = vmul.f32 %v6331_v19, %v7173_v34  ;;  %v7624_v13 = vadd.f32 %v2095_v53, %v7471_v57  ;;  %v2098_v62 = vrot.slane %v2048_v56, 1 }
  0xd3   : > { %v2100_v61 = vrot.slane %v2049_v20, 1  ;;  %v7629_v49 = vmul.f32 %v6337_v26, %v7210_v42  ;;  %v12305_v16 = vunpack.i.l.bf16 %v7606_v45  ;;  %v2091_v52 = vsel %vm724_vm0, %v2088_v1, %v2090_v21  ;;  %v7649_v1 = vpop.permute.xlu1 %6354 }
  0xd4   : > { %12824 = vst [vmem:[#allocation9_spill] sm:$0xff] %v7624_v13  ;;  %v2096_v8 = vrot.slane %v2047_v40, 1  ;;  %v12826_v57 = vrot.slane %v7525_v22, 1  ;;  %v12827_v53 = vrot.slane %v7534_v2, 1  ;;  %v7642_v26 = vadd.f32 %v2093_v36, %v7425_v14  ;;  %v12831_v36 = vld [vmem:[#allocation7_spill] sm:$0xff] }
  0xd5   : > { %6684 = vperm.xlu1 %6217, %v12823_v4   ;;  %6679 = vperm.xlu0 %6206, %v12825_v29   ;;  %v2101_v4 = vsel %vm724_vm0, %v2098_v62, %v2100_v61  ;;  %v12307_v29 = vunpack.i.h.bf16 %v7620_v44  ;;  %v2102_v56 = vrot.slane %v7617_v9, 1  ;;  %v7646_v40 = vmul.f32 %v6336_v25, %v7210_v42  ;;  %v12832_v9 = vld [vmem:[#allocation12_spill] sm:$0xff] }
  0xd6   : > { %v727_v20 = vsel %vm724_vm0, %v12827_v53, %v12826_v57  ;;  %12828 = vst [vmem:[#allocation10_spill] sm:$0xff] %v7642_v26  ;;  %v2097_v21 = vsel %vm724_vm0, %v2094_v3, %v2096_v8  ;;  %v7653_v2 = vadd.f32 %v2089_v28, %v7431_v24  ;;  %v7656_v57 = vmul.f32 %v6332_v50, %v7210_v42  ;;  %v12835_v53 = vld [vmem:[#allocation14_spill] sm:$0xff] }
  0xd7   : > { %v7659_v14 = vmul.f32 %v6331_v19, %v7210_v42  ;;  %v929_v25 = vmul.f32 %v12306_v63, %v12831_v36  ;;  %v7666_v3 = vadd.f32 %v2091_v52, %v7428_v17  ;;  %v780_v24 = vadd.f32 %v727_v20, %v7377_v33  ;;  %v12834_v20 = vld [vmem:[#allocation13_spill] sm:$0xff] }
  0xd8   : > { %12830 = vst [vmem:[#allocation11_spill] sm:$0xff] %v7653_v2  ;;  %v2053_v50 = vmul.f32 %v12305_v16, %v7173_v34  ;;  %v2052_v19 = vmul.f32 %v12307_v29, %v7173_v34  ;;  %v6341_v28 = vunpack.i.l.bf16 %v7620_v44  ;;  %v2103_v52 = vsel %vm724_vm0, %v2100_v61, %v2102_v56  ;;  %v7687_v2 = vpop.permute.xlu0 %6349 }
  0xd9   : > { %6694 = vperm.xlu1 %6217, %v12829_v15   ;;  %6689 = vperm.xlu0 %6206, %v12832_v9   ;;  %12833 = vst [vmem:[#allocation7_spill] sm:$0xff] %v7666_v3  ;;  %v12308_v9 = vunpack.i.l.bf16 %v7649_v1  ;;  %v7681_v15 = vadd.f32 %v929_v25, %v780_v24  ;;  %v12836_v17 = vunpack.i.h.bf16 %v7649_v1  ;;  %v12837_v25 = vrot.slane %v7567_v31, 1 }
  0xda   : > { %v2108_v33 = vrot.slane %v2053_v50, 1  ;;  %v2106_v29 = vrot.slane %v2052_v19, 1  ;;  %v2051_v13 = vmul.f32 %v6341_v28, %v7173_v34  ;;  %v12838_v24 = vrot.slane %v7504_v10, 1 }
  0xdb   : > { %v933_v61 = vmul.f32 %v12836_v17, %v12831_v36  ;;  %v12840_v19 = vmov %v12837_v25  ;;  %v7707_v63 = vadd.f32 %v2103_v52, %v7501_v30  ;;  %v7721_v30 = vpop.permute.xlu1 %6364  ;;  %v12845_v52 = vld [vmem:[#allocation16_spill] sm:$0xff] }
  0xdc   : > { %v733_v50 = vsel %vm724_vm0, %v12838_v24, %v12837_v25  ;;  %v2109_v17 = vsel %vm724_vm0, %v2106_v29, %v2108_v33  ;;  %v2104_v3 = vrot.slane %v2051_v13, 1  ;;  %v2099_v25 = vsel %vm724_vm0, %v2096_v8, %v2098_v62 }
  0xdd   : > { %6704 = vperm.xlu1 %6217, %v12834_v20   ;;  %6699 = vperm.xlu0 %6206, %v12835_v53   ;;  %v12839_v20 = vrot.slane %v7560_v12, 1  ;;  %v932_v53 = vmul.f32 %v12308_v9, %v12831_v36  ;;  %12841 = vst [vmem:[#allocation12_spill] sm:$0xff] %v7707_v63  ;;  %v783_v26 = vadd.f32 %v733_v50, %v7422_v54  ;;  %v6351_v8 = vunpack.i.l.bf16 %v7687_v2 }
  0xde   : > { %v7713_v24 = vadd.f32 %v2109_v17, %v7483_v6  ;;  %v7725_v13 = vsel %vm724_vm0, %v2102_v56, %v2104_v3  ;;  %v2107_v54 = vsel %vm724_vm0, %v2104_v3, %v2106_v29  ;;  %v6352_v6 = vunpack.i.h.bf16 %v7687_v2 }
  0xdf   : > { %v735_v16 = vsel %vm724_vm0, %v12840_v19, %v12839_v20  ;;  %v12843_v20 = vrot.slane %v7504_v10, 1  ;;  %v12844_v19 = vrot.slane %v7507_v51, 1  ;;  %v7728_v62 = vadd.f32 %v932_v53, %v783_v26 }
  0xe0   : > { %12842 = vst [vmem:[#allocation13_spill] sm:$0xff] %v7713_v24  ;;  %v784_v31 = vadd.f32 %v735_v16, %v7395_v59  ;;  %v7733_v59 = vadd.f32 %v2101_v4, %v7456_v23  ;;  %v7736_v10 = vadd.f32 %v2107_v54, %v7488_v0  ;;  %v7742_v56 = vadd.f32 %v2097_v21, %v7468_v7  ;;  %v7753_v4 = vpop.permute.xlu0 %6359 }
  0xe1   : > { %v731_v9 = vsel %vm724_vm0, %v12844_v19, %v12843_v20  ;;  %6714 = vperm.xlu1 %6217, %v12845_v52   ;;  %6709 = vperm.xlu0 %6206, %v7274_v41   ;;  %v931_v29 = vmul.f32 %v6352_v6, %v12831_v36  ;;  %v12849_v26 = vmov %v12844_v19  ;;  %v12850_v41 = vrot.slane %v7525_v22, 1  ;;  %v7793_v20 = vpop.permute.xlu1 %6374  ;;  %v12858_v19 = vld [vmem:[#allocation28_spill] sm:$0xff] }
  0xe2   : > { %12846 = vst [vmem:[#allocation14_spill] sm:$0xff] %v7733_v59  ;;  %12847 = vst [vmem:[#allocation16_spill] sm:$0xff] %v7736_v10  ;;  %v7738_v16 = vadd.f32 %v933_v61, %v784_v31  ;;  %v782_v0 = vadd.f32 %v731_v9, %v7419_v60  ;;  %v7756_v3 = vadd.f32 %v2099_v25, %v7459_v18  ;;  %v6367_v33 = vunpack.i.h.bf16 %v7721_v30 }
  0xe3   : > { %12848 = vst [vmem:[#allocation44_spill] sm:$0xff] %v7742_v56  ;;  %v729_v23 = vsel %vm724_vm0, %v12850_v41, %v12849_v26  ;;  %v930_v21 = vmul.f32 %v6351_v8, %v12831_v36  ;;  %v6366_v22 = vunpack.i.l.bf16 %v7721_v30  ;;  %v12852_v60 = vrot.slane %v7592_v58, 1 }
  0xe4   : > { %12851 = vst [vmem:[#allocation45_spill] sm:$0xff] %v7756_v3  ;;  %v781_v7 = vadd.f32 %v729_v23, %v7384_v35  ;;  %v7764_v51 = vadd.f32 %v931_v29, %v782_v0  ;;  %v12853_v9 = vrot.slane %v7539_v38, 1  ;;  %v12854_v35 = vrot.slane %v7585_v11, 1 }
  0xe5   : > { %6724 = vperm.xlu1 %6217, %v7279_v46   ;;  %v12855_v61 = vmov %v12852_v60  ;;  %6719 = vperm.xlu0 %6206, %v7276_v27   ;;  %v12856_v46 = vunpack.i.h.bf16 %v7606_v45  ;;  %v12857_v17 = vunpack.i.l.bf16 %v7606_v45  ;;  %v937_v58 = vmul.f32 %v6367_v33, %v12831_v36 }
  0xe6   : > { %v741_v18 = vsel %vm724_vm0, %v12853_v9, %v12852_v60  ;;  %v743_v50 = vsel %vm724_vm0, %v12855_v61, %v12854_v35  ;;  %v7788_v31 = vadd.f32 %v930_v21, %v781_v7  ;;  %v936_v54 = vmul.f32 %v6366_v22, %v12831_v36  ;;  %v12863_v60 = vld [vmem:[#allocation17_spill] sm:$0xff]  ;;  %v7824_v61 = vpop.permute.xlu0 %6369 }
  0xe7   : > { %v7781_v53 = vmul.f32 %v12856_v46, %v7162_v39  ;;  %v7786_v25 = vmul.f32 %v12857_v17, %v7210_v42  ;;  %v787_v27 = vadd.f32 %v741_v18, %v7448_v37  ;;  %v788_v52 = vadd.f32 %v743_v50, %v12858_v19  ;;  %v12866_v50 = vld [vmem:[#allocation27_spill] sm:$0xff]  ;;  %v12867_v17 = vld [vmem:[#allocation30_spill] sm:$0xff] }
  0xe8   : > { %v12859_v45 = vmov %v12853_v9  ;;  %v12860_v29 = vrot.slane %v7542_v47, 1  ;;  %v702_v41 = vmul.f32 %v6341_v28, %v7210_v42  ;;  %v12311_v23 = vunpack.i.h.bf16 %v7753_v4  ;;  %v12865_v47 = vld [vmem:[#allocation18_spill] sm:$0xff] }
  0xe9   : > { %v12310_v0 = vunpack.i.l.bf16 %v7753_v4  ;;  %v12862_v7 = vrot.slane %v7560_v12, 1  ;;  %6734 = vperm.xlu1 %6217, %v12863_v60   ;;  %v12864_v38 = vunpack.i.h.bf16 %v7620_v44  ;;  %v7819_v18 = vadd.f32 %v936_v54, %v787_v27  ;;  %6729 = vperm.xlu0 %6206, %v12865_v47   ;;  %v7854_v47 = vpop.permute.xlu1 %6384 }
  0xea   : > { %v739_v26 = vsel %vm724_vm0, %v12860_v29, %v12859_v45  ;;  %v12861_v37 = vmov %v12860_v29  ;;  %v7821_v28 = vadd.f32 %v937_v58, %v788_v52  ;;  %v12309_v35 = vunpack.i.h.bf16 %v7793_v20 }
  0xeb   : > { %v737_v21 = vsel %vm724_vm0, %v12862_v7, %v12861_v37  ;;  %v7817_v9 = vmul.f32 %v12864_v38, %v7210_v42  ;;  %v935_v12 = vmul.f32 %v12311_v23, %v12831_v36  ;;  %v786_v44 = vadd.f32 %v739_v26, %v12867_v17  ;;  %v12873_v17 = vld [vmem:[#allocation33_spill] sm:$0xff] }
  0xec   : > { %v785_v46 = vadd.f32 %v737_v21, %v12866_v50  ;;  %v934_v27 = vmul.f32 %v12310_v0, %v12831_v36  ;;  %v941_v19 = vmul.f32 %v12309_v35, %v12831_v36  ;;  %v12315_v52 = vunpack.i.l.bf16 %v7793_v20  ;;  %v12872_v50 = vld [vmem:[#allocation19_spill] sm:$0xff] }
  0xed   : > { %v12868_v54 = vrot.slane %v7659_v14, 1  ;;  %v12869_v45 = vrot.slane %v7578_v48, 1  ;;  %v756_v37 = vrot.slane %v702_v41, 1  ;;  %v7847_v7 = vadd.f32 %v935_v12, %v786_v44  ;;  %6744 = vperm.xlu1 %6217, %v12872_v50   ;;  %v12874_v0 = vld [vmem:[#allocation31_spill] sm:$0xff]  ;;  %v12877_v44 = vld [vmem:[#allocation20_spill] sm:$0xff] }
  0xee   : > { %v7845_v26 = vadd.f32 %v934_v27, %v785_v46  ;;  %v12870_v21 = vrot.slane %v7656_v57, 1  ;;  %v940_v41 = vmul.f32 %v12315_v52, %v12831_v36  ;;  %v12876_v46 = vrot.slane %v7582_v5, 1  ;;  %6739 = vperm.xlu0 %6206, %v12877_v44   ;;  %v12890_v52 = vld [vmem:[#allocation36_spill] sm:$0xff] }
  0xef   : > { %v749_v29 = vsel %vm724_vm0, %v12869_v45, %v12868_v54  ;;  %v12871_v60 = vmov %v12868_v54  ;;  %v12875_v12 = vmov %v12869_v45  ;;  %v758_v27 = vrot.slane %v7817_v9, 1 }
  0xf0   : > { %v751_v38 = vsel %vm724_vm0, %v12871_v60, %v12870_v21  ;;  %v791_v35 = vadd.f32 %v749_v29, %v12873_v17  ;;  %v747_v14 = vsel %vm724_vm0, %v12876_v46, %v12875_v12  ;;  %v12314_v54 = vunpack.i.h.bf16 %v7824_v61  ;;  %v7886_v17 = vpop.permute.xlu0 %6379 }
  0xf1   : > { %v792_v23 = vadd.f32 %v751_v38, %v12874_v0  ;;  %v12312_v45 = vunpack.i.l.bf16 %v7824_v61  ;;  %v12878_v0 = vmov %v12876_v46  ;;  %v12879_v29 = vrot.slane %v7585_v11, 1  ;;  %v12881_v11 = vld [vmem:[#allocation29_spill] sm:$0xff]  ;;  %v12882_v46 = vld [vmem:[#allocation34_spill] sm:$0xff] }
  0xf2   : > { %v12880_v48 = vunpack.i.h.bf16 %v7649_v1  ;;  %v7881_v38 = vadd.f32 %v940_v41, %v791_v35  ;;  %v12313_v9 = vunpack.i.h.bf16 %v7854_v47  ;;  %v939_v5 = vmul.f32 %v12314_v54, %v12831_v36  ;;  %v12883_v35 = vld [vmem:[#allocation22_spill] sm:$0xff] }
  0xf3   : > { %v745_v21 = vsel %vm724_vm0, %v12879_v29, %v12878_v0  ;;  %v7883_v50 = vadd.f32 %v941_v19, %v792_v23  ;;  %v790_v44 = vadd.f32 %v747_v14, %v12882_v46  ;;  %v938_v0 = vmul.f32 %v12312_v45, %v12831_v36  ;;  %6754 = vperm.xlu1 %6217, %v12883_v35   ;;  %v6395_v45 = vpop.permute.xlu1 %6394 }
  0xf4   : > { %v7879_v60 = vmul.f32 %v12880_v48, %v7162_v39  ;;  %v789_v12 = vadd.f32 %v745_v21, %v12881_v11  ;;  %v12884_v23 = vunpack.i.l.bf16 %v7649_v1  ;;  %v945_v41 = vmul.f32 %v12313_v9, %v12831_v36  ;;  %v12886_v48 = vld [vmem:[#allocation23_spill] sm:$0xff]  ;;  %v12889_v9 = vld [vmem:[#allocation38_spill] sm:$0xff] }
  0xf5   : > { %v12316_v29 = vunpack.i.l.bf16 %v7854_v47  ;;  %v12885_v21 = vrot.slane %v7629_v49, 1  ;;  %6749 = vperm.xlu0 %6206, %v12886_v48   ;;  %v12887_v11 = vld [vmem:[#allocation35_spill] sm:$0xff]  ;;  %v7916_v1 = vadd.f32 %v939_v5, %v790_v44  ;;  %v12891_v48 = vrot.slane %v7629_v49, 1 }
  0xf6   : > { %v7900_v19 = vmul.f32 %v12884_v23, %v7162_v39  ;;  %v7912_v46 = vadd.f32 %v7725_v13, %v12887_v11  ;;  %v7914_v35 = vadd.f32 %v938_v0, %v789_v12  ;;  %v759_v23 = vsel %vm724_vm0, %v756_v37, %v758_v27 }
  0xf7   : > { %v757_v14 = vsel %vm724_vm0, %v12885_v21, %v756_v37  ;;  %v796_v58 = vadd.f32 %v759_v23, %v12890_v52  ;;  %v944_v21 = vmul.f32 %v12316_v29, %v12831_v36  ;;  %v12892_v13 = vrot.slane %v7646_v40, 1 }
  0xf8   : > { %12888 = vst [vmem:[#allocation28_spill] sm:$0xff] %v7912_v46  ;;  %v795_v54 = vadd.f32 %v757_v14, %v12889_v9  ;;  %v3141_v5 = vmul.f32 %v6352_v6, %v7162_v39  ;;  %v6382_v37 = vunpack.i.h.bf16 %v7886_v17  ;;  %v6381_v9 = vunpack.i.l.bf16 %v7886_v17  ;;  %v12895_v14 = vld [vmem:[#allocation24_spill] sm:$0xff] }
  0xf9   : > { %v755_v12 = vsel %vm724_vm0, %v12892_v13, %v12891_v48  ;;  %v12893_v52 = vmov %v12892_v13  ;;  %v12894_v44 = vrot.slane %v7656_v57, 1  ;;  %6764 = vperm.xlu1 %6217, %v12895_v14   ;;  %v3140_v49 = vmul.f32 %v6351_v8, %v7162_v39  ;;  %v7947_v48 = vpop.permute.xlu0 %6389  ;;  %6759 = vperm.xlu0 %6206, %v7219_v32   ;;  %v12896_v57 = vld [vmem:[#allocation32_spill] sm:$0xff]  ;;  %v12897_v13 = vld [vmem:[#allocation39_spill] sm:$0xff]  ;;  %v12899_v14 = vld [vmem:[#allocation26_spill] sm:$0xff] }
  0xfa   : > { %v7943_v11 = vadd.f32 %v944_v21, %v795_v54  ;;  %v7945_v23 = vadd.f32 %v945_v41, %v796_v58  ;;  %v6397_v6 = vunpack.i.h.bf16 %v6395_v45  ;;  %v943_v40 = vmul.f32 %v6382_v37, %v12831_v36  ;;  %v12898_v58 = vld [vmem:[#allocation15_spill] sm:$0xff] }
  0xfb   : > { %v753_v0 = vsel %vm724_vm0, %v12894_v44, %v12893_v52  ;;  %v794_v52 = vadd.f32 %v755_v12, %v12897_v13  ;;  %v942_v44 = vmul.f32 %v6381_v9, %v12831_v36  ;;  %v7957_v2 = vmul.f32 %v6367_v33, %v7162_v39 }
  0xfc   : > { %v793_v17 = vadd.f32 %v753_v0, %v12896_v57  ;;  %v7962_v8 = vmul.f32 %v6366_v22, %v7162_v39  ;;  %v1098_v32 = vmul.f32 %v6397_v6, %v12898_v58  ;;  %v3177_v54 = vmul.f32 %v6397_v6, %v7173_v34 }
  0xfd   : > { %v7968_v21 = vadd.f32 %v943_v40, %v794_v52  ;;  %v6396_v12 = vunpack.i.l.bf16 %v6395_v45  ;;  %v7971_v0 = vunpack.i.h.bf16 %v7947_v48  ;;  %v12900_v33 = vunpack.c.l.bf16 %v12899_v14  ;;  %v12902_v40 = vld [vmem:[#allocation25_spill] sm:$0xff] }
  0xfe   : > { %v7966_v41 = vadd.f32 %v942_v44, %v793_v17  ;;  %v7976_v57 = vadd.f32 %v1098_v32, %v7764_v51  ;;  %v7978_v30 = vadd.f32 %v3177_v54, %v3141_v5  ;;  %v6391_v22 = vunpack.i.l.bf16 %v7947_v48  ;;  %6769 = vperm.xlu0 %6206, %v12902_v40   ;;  %v6405_v32 = vpop.permute.xlu1 %6404 }
  0xff   : > { %4147 = vperm.xlu1 %6217, %v12900_v33   ;;  %v12901_v13 = vrot.slane %v7786_v25, 1  ;;  %v12903_v45 = vunpack.i.h.bf16 %v7753_v4  ;;  %v12904_v44 = vunpack.i.l.bf16 %v7753_v4  ;;  %v1097_v51 = vmul.f32 %v6396_v12, %v12898_v58 }
 0x100   : > { %v3176_v5 = vmul.f32 %v6396_v12, %v7173_v34  ;;  %v12905_v25 = vunpack.i.h.bf16 %v7793_v20  ;;  %v1096_v33 = vmul.f32 %v7971_v0, %v12898_v58  ;;  %v3175_v4 = vmul.f32 %v7971_v0, %v7173_v34 }
 0x101   : > { %v761_v17 = vsel %vm724_vm0, %v758_v27, %v12901_v13  ;;  %v3145_v52 = vmul.f32 %v12903_v45, %v7162_v39  ;;  %v3144_v14 = vmul.f32 %v12904_v44, %v7162_v39  ;;  %v12906_v27 = vunpack.i.l.bf16 %v7793_v20  ;;  %v6400_v13 = vpop.permute.xlu0 %6399  ;;  %v12907_v44 = vld [vmem:[#allocation37_spill] sm:$0xff] }
 0x102   : > { %v7996_v48 = vmul.f32 %v12905_v25, %v7162_v39  ;;  %v8008_v40 = vadd.f32 %v1097_v51, %v7788_v31  ;;  %v8010_v45 = vadd.f32 %v3176_v5, %v3140_v49  ;;  %v797_v25 = vadd.f32 %v761_v17, %v12907_v44 }
 0x103   : > { %v8001_v54 = vmul.f32 %v12906_v27, %v7162_v39  ;;  %v946_v29 = vmul.f32 %v6391_v22, %v12831_v36  ;;  %v12908_v20 = vunpack.i.h.bf16 %v7824_v61  ;;  %v8018_v46 = vadd.f32 %v3175_v4, %v7781_v53 }
 0x104   : > { %v8021_v63 = vadd.f32 %v1096_v33, %v7681_v15  ;;  %v6407_v10 = vunpack.i.h.bf16 %v6405_v32  ;;  %v12909_v31 = vunpack.i.l.bf16 %v7824_v61  ;;  %v6406_v17 = vunpack.i.l.bf16 %v6405_v32 }
 0x105   : > { %v3149_v27 = vmul.f32 %v12908_v20, %v7162_v39  ;;  %v8026_v51 = vadd.f32 %v946_v29, %v797_v25  ;;  %v6402_v5 = vunpack.i.h.bf16 %v6400_v13  ;;  %v12910_v44 = vunpack.i.h.bf16 %v7854_v47 }
 0x106   : > { %v3148_v49 = vmul.f32 %v12909_v31, %v7162_v39  ;;  %v1102_v53 = vmul.f32 %v6407_v10, %v12898_v58  ;;  %v3181_v4 = vmul.f32 %v6407_v10, %v7173_v34  ;;  %v6401_v15 = vunpack.i.l.bf16 %v6400_v13 }
 0x107   : > { %v8031_v24 = vmul.f32 %v12910_v44, %v7162_v39  ;;  %v12911_v33 = vunpack.i.l.bf16 %v7854_v47  ;;  %v8041_v61 = vmul.f32 %v6382_v37, %v7162_v39  ;;  %v1101_v29 = vmul.f32 %v6406_v17, %v12898_v58  ;;  %v6415_v47 = vpop.permute.xlu1 %6414 }
 0x108   : > { %v3180_v32 = vmul.f32 %v6406_v17, %v7173_v34  ;;  %v8046_v25 = vmul.f32 %v6381_v9, %v7162_v39  ;;  %v8049_v31 = vadd.f32 %v1102_v53, %v7847_v7  ;;  %v8051_v44 = vadd.f32 %v3181_v4, %v3145_v52  ;;  %v6410_v9 = vpop.permute.xlu0 %6409 }
 0x109   : > { %v8038_v20 = vmul.f32 %v12911_v33, %v7162_v39  ;;  %v1100_v13 = vmul.f32 %v6402_v5, %v12898_v58  ;;  %v8055_v33 = vmul.f32 %v6397_v6, %v12831_v36  ;;  %v8058_v37 = vadd.f32 %v1101_v29, %v7845_v26 }
 0x10a   : > { %v8060_v56 = vadd.f32 %v3180_v32, %v3144_v14  ;;  %v3179_v3 = vmul.f32 %v6402_v5, %v7173_v34  ;;  %v8064_v59 = vmul.f32 %v6397_v6, %v7162_v39  ;;  %v1099_v7 = vmul.f32 %v6401_v15, %v12898_v58 }
 0x10b   : > { %12912 = vst [vmem:[#allocation17_spill] sm:$0xff] %v8055_v33  ;;  %v8068_v52 = vadd.f32 %v1100_v13, %v7738_v16  ;;  %v3178_v53 = vmul.f32 %v6401_v15, %v7173_v34  ;;  %v8072_v4 = vmul.f32 %v6396_v12, %v12831_v36  ;;  %v6417_v14 = vunpack.i.h.bf16 %v6415_v47  ;;  %v6425_v55 = vpop.permute.xlu1 %6424 }
 0x10c   : > { %12913 = vst [vmem:[#allocation18_spill] sm:$0xff] %v8064_v59  ;;  %v8075_v26 = vadd.f32 %v3179_v3, %v7879_v60  ;;  %v6416_v29 = vunpack.i.l.bf16 %v6415_v47  ;;  %v8078_v32 = vmul.f32 %v6396_v12, %v7162_v39  ;;  %v8081_v6 = vadd.f32 %v1099_v7, %v7728_v62 }
 0x10d   : > { %12914 = vst [vmem:[#allocation27_spill] sm:$0xff] %v8072_v4  ;;  %v8084_v59 = vadd.f32 %v3178_v53, %v7900_v19  ;;  %v6412_v16 = vunpack.i.h.bf16 %v6410_v9  ;;  %v8088_v13 = vmul.f32 %v7971_v0, %v12831_v36  ;;  %v1106_v33 = vmul.f32 %v6417_v14, %v12898_v58  ;;  %v6420_v4 = vpop.permute.xlu0 %6419 }
 0x10e   : > { %12915 = vst [vmem:[#allocation30_spill] sm:$0xff] %v8078_v32  ;;  %v3185_v3 = vmul.f32 %v6417_v14, %v7173_v34  ;;  %v6411_v60 = vunpack.i.l.bf16 %v6410_v9  ;;  %v8094_v12 = vmul.f32 %v7971_v0, %v7162_v39  ;;  %v8097_v62 = vmul.f32 %v6391_v22, %v7162_v39 }
 0x10f   : > { %12916 = vst [vmem:[#allocation19_spill] sm:$0xff] %v8088_v13  ;;  %v1105_v19 = vmul.f32 %v6416_v29, %v12898_v58  ;;  %v3184_v47 = vmul.f32 %v6416_v29, %v7173_v34  ;;  %v8102_v7 = vmul.f32 %v6407_v10, %v12831_v36  ;;  %v8105_v53 = vadd.f32 %v1106_v33, %v7916_v1 }
 0x110   : > { %12917 = vst [vmem:[#allocation33_spill] sm:$0xff] %v8094_v12  ;;  %v8107_v32 = vadd.f32 %v3185_v3, %v3149_v27  ;;  %v1104_v9 = vmul.f32 %v6412_v16, %v12898_v58  ;;  %v8111_v0 = vmul.f32 %v6407_v10, %v7162_v39  ;;  %v3183_v13 = vmul.f32 %v6412_v16, %v7173_v34 }
 0x111   : > { %12918 = vst [vmem:[#allocation31_spill] sm:$0xff] %v8102_v7  ;;  %v8114_v22 = vadd.f32 %v1105_v19, %v7914_v35  ;;  %v8116_v12 = vadd.f32 %v3184_v47, %v3148_v49  ;;  %v8120_v7 = vmul.f32 %v6406_v17, %v12831_v36  ;;  %v1103_v1 = vmul.f32 %v6411_v60, %v12898_v58 }
 0x112   : > { %12919 = vst [vmem:[#allocation20_spill] sm:$0xff] %v8111_v0  ;;  %v8124_v27 = vadd.f32 %v1104_v9, %v7821_v28  ;;  %v3182_v33 = vmul.f32 %v6411_v60, %v7173_v34  ;;  %v8128_v10 = vmul.f32 %v6406_v17, %v7162_v39  ;;  %v8131_v35 = vadd.f32 %v3183_v13, %v7957_v2 }
 0x113   : > { %12920 = vst [vmem:[#allocation29_spill] sm:$0xff] %v8120_v7  ;;  %v6427_v49 = vunpack.i.h.bf16 %v6425_v55  ;;  %v6426_v3 = vunpack.i.l.bf16 %v6425_v55  ;;  %v8134_v19 = vmul.f32 %v6402_v5, %v12831_v36  ;;  %v8137_v47 = vadd.f32 %v1103_v1, %v7819_v18 }
 0x114   : > { %12921 = vst [vmem:[#allocation34_spill] sm:$0xff] %v8128_v10  ;;  %v8140_v0 = vadd.f32 %v3182_v33, %v7962_v8  ;;  %v6422_v28 = vunpack.i.h.bf16 %v6420_v4  ;;  %v8143_v9 = vmul.f32 %v6402_v5, %v7162_v39  ;;  %v6421_v13 = vunpack.i.l.bf16 %v6420_v4 }
 0x115   : > { %12922 = vst [vmem:[#allocation22_spill] sm:$0xff] %v8134_v19  ;;  %v1110_v17 = vmul.f32 %v6427_v49, %v12898_v58  ;;  %v3189_v2 = vmul.f32 %v6427_v49, %v7173_v34  ;;  %v8148_v55 = vmul.f32 %v6401_v15, %v12831_v36  ;;  %v8151_v10 = vmul.f32 %v6401_v15, %v7162_v39  ;;  %v6430_v19 = vpop.permute.xlu0 %6429 }
 0x116   : > { %12923 = vst [vmem:[#allocation23_spill] sm:$0xff] %v8143_v9  ;;  %v1109_v18 = vmul.f32 %v6426_v3, %v12898_v58  ;;  %v3188_v8 = vmul.f32 %v6426_v3, %v7173_v34  ;;  %v8156_v1 = vmul.f32 %v6417_v14, %v12831_v36  ;;  %v1108_v4 = vmul.f32 %v6422_v28, %v12898_v58  ;;  %v6435_v9 = vpop.permute.xlu1 %6434 }
 0x117   : > { %12924 = vst [vmem:[#allocation35_spill] sm:$0xff] %v8148_v55  ;;  %12925 = vst [vmem:[#allocation38_spill] sm:$0xff] %v8151_v10  ;;  %v8159_v5 = vadd.f32 %v1110_v17, %v7968_v21  ;;  %v8162_v33 = vadd.f32 %v3189_v2, %v8041_v61  ;;  %v8166_v55 = vmul.f32 %v6417_v14, %v7162_v39 }
 0x118   : > { %12926 = vst [vmem:[#allocation36_spill] sm:$0xff] %v8156_v1  ;;  %v8169_v15 = vadd.f32 %v1109_v18, %v7966_v41  ;;  %v8172_v10 = vadd.f32 %v3188_v8, %v8046_v25  ;;  %v3187_v1 = vmul.f32 %v6422_v28, %v7173_v34  ;;  %v8176_v21 = vmul.f32 %v6416_v29, %v12831_v36 }
 0x119   : > { %12927 = vst [vmem:[#allocation24_spill] sm:$0xff] %v8166_v55  ;;  %v1107_v61 = vmul.f32 %v6421_v13, %v12898_v58  ;;  %v8180_v17 = vadd.f32 %v1108_v4, %v7883_v50  ;;  %v3186_v14 = vmul.f32 %v6421_v13, %v7173_v34  ;;  %v8184_v2 = vmul.f32 %v6416_v29, %v7162_v39 }
 0x11a   : > { %12928 = vst [vmem:[#allocation32_spill] sm:$0xff] %v8176_v21  ;;  %v8187_v41 = vmul.f32 %v6412_v16, %v12831_v36  ;;  %v8190_v25 = vadd.f32 %v3187_v1, %v7996_v48  ;;  %v6436_v18 = vunpack.i.l.bf16 %v6435_v9  ;;  %v8193_v8 = vmul.f32 %v6412_v16, %v7162_v39 }
 0x11b   : > { %12929 = vst [vmem:[#allocation39_spill] sm:$0xff] %v8184_v2  ;;  %v8196_v55 = vadd.f32 %v1107_v61, %v7881_v38  ;;  %v8199_v50 = vadd.f32 %v3186_v14, %v8001_v54  ;;  %v6432_v4 = vunpack.i.h.bf16 %v6430_v19  ;;  %v8202_v29 = vmul.f32 %v6411_v60, %v12831_v36 }
 0x11c   : > { %12930 = vst [vmem:[#allocation26_spill] sm:$0xff] %v8187_v41  ;;  %12931 = vst [vmem:[#allocation25_spill] sm:$0xff] %v8193_v8  ;;  %v8205_v2 = vmul.f32 %v6411_v60, %v7162_v39  ;;  %v6437_v41 = vunpack.i.h.bf16 %v6435_v9  ;;  %v6431_v48 = vunpack.i.l.bf16 %v6430_v19  ;;  %v8208_v1 = vmul.f32 %v6427_v49, %v12831_v36  ;;  %v6445_v9 = vpop.permute.xlu1 %6444 }
 0x11d   : > { %12932 = vst [vmem:[#allocation37_spill] sm:$0xff] %v8202_v29  ;;  %v8211_v16 = vmul.f32 %v6427_v49, %v7162_v39  ;;  %v1113_v38 = vmul.f32 %v6436_v18, %v12898_v58  ;;  %v3192_v54 = vmul.f32 %v6436_v18, %v7173_v34  ;;  %v8216_v61 = vmul.f32 %v6426_v3, %v12831_v36 }
 0x11e   : > { %12933 = vst [vmem:[#allocation46_spill] sm:$0xff] %v8205_v2  ;;  %12934 = vst [vmem:[#allocation47_spill] sm:$0xff] %v8208_v1  ;;  %v8219_v14 = vmul.f32 %v6426_v3, %v7162_v39  ;;  %v8222_v60 = vmul.f32 %v6422_v28, %v12831_v36  ;;  %v8225_v19 = vmul.f32 %v6422_v28, %v7162_v39  ;;  %v12943_v3 = vld [vmem:[#allocation21_spill] sm:$0xff]  ;;  %v6446_v21 = vunpack.i.l.bf16 %v6445_v9 }
 0x11f   : > { %12935 = vst [vmem:[#allocation48_spill] sm:$0xff] %v8211_v16  ;;  %12936 = vst [vmem:[#allocation49_spill] sm:$0xff] %v8216_v61  ;;  %v8228_v49 = vmul.f32 %v6421_v13, %v12831_v36  ;;  %v8231_v16 = vadd.f32 %v1113_v38, %v8026_v51  ;;  %v8234_v8 = vadd.f32 %v3192_v54, %v8097_v62  ;;  %v6447_v38 = vunpack.i.h.bf16 %v6445_v9 }
 0x120   : > { %12937 = vst [vmem:[#allocation50_spill] sm:$0xff] %v8219_v14  ;;  %12938 = vst [vmem:[#allocation51_spill] sm:$0xff] %v8222_v60  ;;  %v1112_v2 = vmul.f32 %v6432_v4, %v12898_v58  ;;  %v8238_v14 = vmul.f32 %v6437_v41, %v12943_v3  ;;  %v8241_v1 = vmul.f32 %v6437_v41, %v12898_v58  ;;  %v6440_v60 = vpop.permute.xlu0 %6439 }
 0x121   : > { %12939 = vst [vmem:[#allocation52_spill] sm:$0xff] %v8225_v19  ;;  %12940 = vst [vmem:[#allocation53_spill] sm:$0xff] %v8228_v49  ;;  %v3191_v28 = vmul.f32 %v6432_v4, %v7173_v34  ;;  %v1111_v19 = vmul.f32 %v6431_v48, %v12898_v58  ;;  %v8246_v49 = vmul.f32 %v6437_v41, %v7210_v42 }
 0x122   : > { %12941 = vst [vmem:[#allocation54_spill] sm:$0xff] %v8231_v16  ;;  %12942 = vst [vmem:[#allocation55_spill] sm:$0xff] %v8234_v8  ;;  %v8249_v51 = vadd.f32 %v1112_v2, %v7945_v23  ;;  %v3190_v62 = vmul.f32 %v6431_v48, %v7173_v34  ;;  %v8253_v54 = vmul.f32 %v6437_v41, %v7173_v34  ;;  %v6442_v2 = vunpack.i.h.bf16 %v6440_v60 }
 0x123   : > { %12944 = vst [vmem:[#allocation21_spill] sm:$0xff] %v8241_v1  ;;  %v8256_v61 = vadd.f32 %v3191_v28, %v8031_v24  ;;  %v8259_v29 = vadd.f32 %v1111_v19, %v7943_v11  ;;  %v8265_v43 = vmul.f32 %v6447_v38, %v12943_v3  ;;  %v8268_v23 = vmul.f32 %v6447_v38, %v7210_v42 }
 0x124   : > { %12945 = vst [vmem:[#allocation56_spill] sm:$0xff] %v8249_v51  ;;  %12946 = vst [vmem:[#allocation57_spill] sm:$0xff] %v8253_v54  ;;  %v8262_v7 = vadd.f32 %v3190_v62, %v8038_v20  ;;  %v8271_v41 = vmul.f32 %v6421_v13, %v7162_v39  ;;  %v8274_v24 = vmul.f32 %v6436_v18, %v12831_v36 }
 0x125   : > { %12947 = vst [vmem:[#allocation58_spill] sm:$0xff] %v8256_v61  ;;  %v1272_v11 = vmul.f32 %v6446_v21, %v12943_v3  ;;  %v3214_v19 = vmul.f32 %v6446_v21, %v7210_v42  ;;  %v8280_v9 = vmul.f32 %v6436_v18, %v7162_v39  ;;  %v12319_v28 = vrot.slane %v8265_v43, 1 }
 0x126   : > { %12948 = vst [vmem:[#allocation59_spill] sm:$0xff] %v8271_v41  ;;  %12949 = vst [vmem:[#allocation60_spill] sm:$0xff] %v8274_v24  ;;  %v12320_v62 = vrot.slane %v8268_v23, 1  ;;  %v8288_v61 = vmul.f32 %v6432_v4, %v12831_v36  ;;  %v1271_v20 = vmul.f32 %v6442_v2, %v12943_v3  ;;  %v3213_v18 = vmul.f32 %v6442_v2, %v7210_v42  ;;  %v6455_v24 = vpop.permute.xlu1 %6454 }
 0x127   : > { %12950 = vst [vmem:[#allocation61_spill] sm:$0xff] %v8280_v9  ;;  %v1312_v41 = vrot.slane %v1272_v11, 1  ;;  %v3254_v16 = vrot.slane %v3214_v19, 1  ;;  %v8293_v9 = vmul.f32 %v6432_v4, %v7162_v39  ;;  %v6441_v19 = vunpack.i.l.bf16 %v6440_v60 }
 0x128   : > { %12951 = vst [vmem:[#allocation62_spill] sm:$0xff] %v8288_v61  ;;  %v8302_v13 = vmul.f32 %v6447_v38, %v12898_v58  ;;  %v1310_v4 = vrot.slane %v1271_v20, 1  ;;  %v3252_v61 = vrot.slane %v3213_v18, 1  ;;  %v8327_v20 = vmul.f32 %v6446_v21, %v12898_v58 }
 0x129   : > { %12952 = vst [vmem:[#allocation63_spill] sm:$0xff] %v8293_v9  ;;  %v1315_v8 = vsel %vm724_vm0, %v1312_v41, %v12319_v28  ;;  %v3257_v11 = vsel %vm724_vm0, %v3254_v16, %v12320_v62  ;;  %v8311_v9 = vmul.f32 %v6431_v48, %v12831_v36  ;;  %v8314_v28 = vmul.f32 %v6447_v38, %v7173_v34 }
 0x12a   : > { %12953 = vst [vmem:[#allocation64_spill] sm:$0xff] %v8302_v13  ;;  %v8305_v54 = vadd.f32 %v1315_v8, %v8081_v6  ;;  %v8308_v1 = vadd.f32 %v3257_v11, %v8084_v59  ;;  %v8317_v60 = vmul.f32 %v6441_v19, %v12943_v3  ;;  %v8320_v62 = vmul.f32 %v6431_v48, %v7162_v39 }
 0x12b   : > { %12956 = vst [vmem:[#allocation67_spill] sm:$0xff] %v8311_v9  ;;  %12957 = vst [vmem:[#allocation68_spill] sm:$0xff] %v8314_v28  ;;  %v1313_v6 = vsel %vm724_vm0, %v1310_v4, %v1312_v41  ;;  %v8324_v8 = vmul.f32 %v6441_v19, %v7210_v42  ;;  %v6457_v59 = vunpack.i.h.bf16 %v6455_v24  ;;  %v3255_v11 = vsel %vm724_vm0, %v3252_v61, %v3254_v16 }
 0x12c   : > { %12954 = vst [vmem:[#allocation65_spill] sm:$0xff] %v8305_v54  ;;  %12955 = vst [vmem:[#allocation66_spill] sm:$0xff] %v8308_v1  ;;  %v12321_v38 = vrot.slane %v8317_v60, 1  ;;  %v8332_v18 = vadd.f32 %v1313_v6, %v7976_v57  ;;  %v8337_v48 = vadd.f32 %v3255_v11, %v7978_v30  ;;  %v8344_v54 = vmul.f32 %v6446_v21, %v7173_v34  ;;  %v6450_v21 = vpop.permute.xlu0 %6449 }
 0x12d   : > { %12958 = vst [vmem:[#allocation69_spill] sm:$0xff] %v8320_v62  ;;  %12959 = vst [vmem:[#allocation70_spill] sm:$0xff] %v8327_v20  ;;  %v12322_v39 = vrot.slane %v8324_v8, 1  ;;  %v8340_v41 = vmul.f32 %v6457_v59, %v12943_v3  ;;  %v8350_v16 = vmul.f32 %v6457_v59, %v7210_v42  ;;  %v8353_v6 = vmul.f32 %v6442_v2, %v12898_v58 }
 0x12e   : > { %12960 = vst [vmem:[#allocation71_spill] sm:$0xff] %v8332_v18  ;;  %12961 = vst [vmem:[#allocation72_spill] sm:$0xff] %v8337_v48  ;;  %v1311_v57 = vsel %vm724_vm0, %v12321_v38, %v1310_v4  ;;  %v6456_v62 = vunpack.i.l.bf16 %v6455_v24  ;;  %v8363_v48 = vmul.f32 %v6442_v2, %v7173_v34  ;;  %v8366_v4 = vmul.f32 %v6441_v19, %v12898_v58  ;;  %v6465_v24 = vpop.permute.xlu1 %6464 }
 0x12f   : > { %12962 = vst [vmem:[#allocation73_spill] sm:$0xff] %v8344_v54  ;;  %12963 = vst [vmem:[#allocation74_spill] sm:$0xff] %v8353_v6  ;;  %v8356_v30 = vadd.f32 %v1311_v57, %v8008_v40  ;;  %v3253_v11 = vsel %vm724_vm0, %v12322_v39, %v3252_v61  ;;  %v8377_v2 = vmul.f32 %v6441_v19, %v7173_v34  ;;  %v6452_v39 = vunpack.i.h.bf16 %v6450_v21 }
 0x130   : > { %12965 = vst [vmem:[#allocation76_spill] sm:$0xff] %v8363_v48  ;;  %12966 = vst [vmem:[#allocation77_spill] sm:$0xff] %v8366_v4  ;;  %v8369_v38 = vadd.f32 %v3253_v11, %v8010_v45  ;;  %v3218_v61 = vmul.f32 %v6456_v62, %v7210_v42  ;;  %v6451_v28 = vunpack.i.l.bf16 %v6450_v21  ;;  %v8381_v45 = vmul.f32 %v6457_v59, %v12898_v58 }
 0x131   : > { %12964 = vst [vmem:[#allocation75_spill] sm:$0xff] %v8356_v30  ;;  %v1276_v30 = vmul.f32 %v6456_v62, %v12943_v3  ;;  %v3217_v9 = vmul.f32 %v6452_v39, %v7210_v42  ;;  %v8386_v18 = vunpack.i.h.bf16 %v6465_v24  ;;  %v12969_v1 = vrot.slane %v8340_v41, 1 }
 0x132   : > { %12967 = vst [vmem:[#allocation78_spill] sm:$0xff] %v8369_v38  ;;  %12968 = vst [vmem:[#allocation79_spill] sm:$0xff] %v8381_v45  ;;  %v3262_v40 = vrot.slane %v3218_v61, 1  ;;  %v1275_v38 = vmul.f32 %v6452_v39, %v12943_v3  ;;  %v12970_v13 = vrot.slane %v8350_v16, 1  ;;  %v8405_v4 = vmul.f32 %v6457_v59, %v7173_v34 }
 0x133   : > { %v1320_v11 = vrot.slane %v1276_v30, 1  ;;  %v1274_v30 = vmul.f32 %v6451_v28, %v12943_v3  ;;  %v3216_v51 = vmul.f32 %v6451_v28, %v7210_v42  ;;  %v8411_v61 = vmul.f32 %v8386_v18, %v12943_v3 }
 0x134   : > { %v3265_v54 = vsel %vm724_vm0, %v3262_v40, %v12970_v13  ;;  %v1318_v6 = vrot.slane %v1275_v38, 1  ;;  %12973 = vst [vmem:[#allocation82_spill] sm:$0xff] %v8405_v4  ;;  %v8470_v19 = vmul.f32 %v6451_v28, %v7173_v34 }
 0x135   : > { %v1323_v21 = vsel %vm724_vm0, %v1320_v11, %v12969_v1  ;;  %v8401_v48 = vadd.f32 %v3265_v54, %v8140_v0  ;;  %v3260_v1 = vrot.slane %v3217_v9, 1  ;;  %v1316_v20 = vrot.slane %v1274_v30, 1 }
 0x136   : > { %v8398_v57 = vadd.f32 %v1323_v21, %v8137_v47  ;;  %v1321_v13 = vsel %vm724_vm0, %v1318_v6, %v1320_v11  ;;  %v8413_v47 = vunpack.i.l.bf16 %v6465_v24  ;;  %v12974_v54 = vrot.slane %v8265_v43, 1  ;;  %v6475_v43 = vpop.permute.xlu1 %6474  ;;  %12986 = vst [vmem:[#allocation93_spill] sm:$0xff] %v8470_v19 }
 0x137   : > { %12972 = vst [vmem:[#allocation81_spill] sm:$0xff] %v8401_v48  ;;  %v3263_v0 = vsel %vm724_vm0, %v3260_v1, %v3262_v40  ;;  %v1319_v9 = vsel %vm724_vm0, %v1316_v20, %v1318_v6  ;;  %v8421_v59 = vadd.f32 %v1321_v13, %v8049_v31  ;;  %v3258_v24 = vrot.slane %v3216_v51, 1  ;;  %v6460_v13 = vpop.permute.xlu0 %6459 }
 0x138   : > { %12971 = vst [vmem:[#allocation80_spill] sm:$0xff] %v8398_v57  ;;  %v1317_v38 = vsel %vm724_vm0, %v12974_v54, %v1316_v20  ;;  %v8427_v21 = vadd.f32 %v1319_v9, %v8058_v37  ;;  %v8430_v30 = vadd.f32 %v3263_v0, %v8051_v44  ;;  %v8434_v40 = vmul.f32 %v6456_v62, %v12898_v58  ;;  %v5631_v0 = vld [vmem:[%s6842_s19 + $0x100] sm:$0xe] }
 0x139   : > { %12975 = vst [vmem:[#allocation83_spill] sm:$0xff] %v8421_v59  ;;  %v8424_v11 = vadd.f32 %v1317_v38, %v8068_v52  ;;  %v8437_v20 = vmul.f32 %v6456_v62, %v7173_v34  ;;  %v8441_v31 = vmul.f32 %v8386_v18, %v7210_v42  ;;  %v12981_v52 = vrot.slane %v8268_v23, 1 }
 0x13a   : > { %12977 = vst [vmem:[#allocation85_spill] sm:$0xff] %v8427_v21  ;;  %12978 = vst [vmem:[#allocation86_spill] sm:$0xff] %v8430_v30  ;;  %v3261_v51 = vsel %vm724_vm0, %v3258_v24, %v3260_v1  ;;  %v1280_v6 = vmul.f32 %v8413_v47, %v12943_v3  ;;  %v8452_v62 = vmul.f32 %v6452_v39, %v12898_v58  ;;  %v6461_v44 = vunpack.i.l.bf16 %v6460_v13 }
 0x13b   : > { %12976 = vst [vmem:[#allocation84_spill] sm:$0xff] %v8424_v11  ;;  %12979 = vst [vmem:[#allocation87_spill] sm:$0xff] %v8434_v40  ;;  %v3259_v37 = vsel %vm724_vm0, %v12981_v52, %v3258_v24  ;;  %v8455_v54 = vmul.f32 %v6452_v39, %v7173_v34  ;;  %v8461_v23 = vadd.f32 %v3261_v51, %v8060_v56  ;;  %v6462_v39 = vunpack.i.h.bf16 %v6460_v13 }
 0x13c   : > { %12980 = vst [vmem:[#allocation88_spill] sm:$0xff] %v8437_v20  ;;  %v8458_v38 = vadd.f32 %v3259_v37, %v8075_v26  ;;  %v8464_v1 = vmul.f32 %v6451_v28, %v12898_v58  ;;  %v1328_v24 = vrot.slane %v1280_v6, 1  ;;  %v3222_v52 = vmul.f32 %v8413_v47, %v7210_v42 }
 0x13d   : > { %12982 = vst [vmem:[#allocation89_spill] sm:$0xff] %v8455_v54  ;;  %12984 = vst [vmem:[#allocation91_spill] sm:$0xff] %v8461_v23  ;;  %v5093_v26 = vunpack.c.l.bf16 %v5631_v0  ;;  %v12987_v51 = vrot.slane %v8411_v61, 1  ;;  %v1279_v28 = vmul.f32 %v6462_v39, %v12943_v3  ;;  %v6477_v23 = vunpack.i.h.bf16 %v6475_v43 }
 0x13e   : > { %12983 = vst [vmem:[#allocation90_spill] sm:$0xff] %v8458_v38  ;;  %12985 = vst [vmem:[#allocation92_spill] sm:$0xff] %v8464_v1  ;;  %v3270_v9 = vrot.slane %v3222_v52, 1  ;;  %v12989_v0 = vrot.slane %v8441_v31, 1  ;;  %v3221_v37 = vmul.f32 %v6462_v39, %v7210_v42  ;;  %v8504_v52 = vmul.f32 %v8413_v47, %v12898_v58 }
 0x13f   : > { %v1331_v48 = vsel %vm724_vm0, %v1328_v24, %v12987_v51  ;;  %5096 = vperm.xlu0 %6206, %v5093_v26   ;;  %v1278_v51 = vmul.f32 %v6461_v44, %v12943_v3  ;;  %v8495_v26 = vmul.f32 %v8386_v18, %v12898_v58 }
 0x140   : > { %v8479_v38 = vadd.f32 %v1331_v48, %v8196_v55  ;;  %v3273_v56 = vsel %vm724_vm0, %v3270_v9, %v12989_v0  ;;  %v1326_v48 = vrot.slane %v1279_v28, 1  ;;  %v3268_v13 = vrot.slane %v3221_v37, 1  ;;  %12993 = vst [vmem:[#allocation98_spill] sm:$0xff] %v8504_v52 }
 0x141   : > { %v8491_v55 = vadd.f32 %v3273_v56, %v8199_v50  ;;  %12991 = vst [vmem:[#allocation96_spill] sm:$0xff] %v8495_v26  ;;  %v1324_v30 = vrot.slane %v1278_v51, 1  ;;  %v3220_v0 = vmul.f32 %v6461_v44, %v7210_v42  ;;  %v8508_v56 = vmul.f32 %v6477_v23, %v12943_v3 }
 0x142   : > { %12988 = vst [vmem:[#allocation94_spill] sm:$0xff] %v8479_v38  ;;  %v8500_v38 = vmul.f32 %v8386_v18, %v7173_v34  ;;  %v1329_v50 = vsel %vm724_vm0, %v1326_v48, %v1328_v24  ;;  %v3271_v28 = vsel %vm724_vm0, %v3268_v13, %v3270_v9  ;;  %v12994_v37 = vrot.slane %v8340_v41, 1 }
 0x143   : > { %12990 = vst [vmem:[#allocation95_spill] sm:$0xff] %v8491_v55  ;;  %v1327_v6 = vsel %vm724_vm0, %v1324_v30, %v1326_v48  ;;  %v8516_v18 = vadd.f32 %v1329_v50, %v8105_v53  ;;  %v3266_v24 = vrot.slane %v3220_v0, 1  ;;  %v8525_v4 = vadd.f32 %v3271_v28, %v8107_v32  ;;  %v6470_v0 = vpop.permute.xlu0 %6469 }
 0x144   : > { %12992 = vst [vmem:[#allocation97_spill] sm:$0xff] %v8500_v38  ;;  %v1325_v51 = vsel %vm724_vm0, %v12994_v37, %v1324_v30  ;;  %v8522_v57 = vadd.f32 %v1327_v6, %v8114_v22  ;;  %v8530_v41 = vmul.f32 %v8413_v47, %v7173_v34  ;;  %v8533_v30 = vmul.f32 %v6462_v39, %v12898_v58 }
 0x145   : > { %12995 = vst [vmem:[#allocation99_spill] sm:$0xff] %v8516_v18  ;;  %v8519_v55 = vadd.f32 %v1325_v51, %v8124_v27  ;;  %12998 = vst [vmem:[#allocation102_spill] sm:$0xff] %v8525_v4  ;;  %v8536_v53 = vmul.f32 %v6477_v23, %v7210_v42  ;;  %v8539_v27 = vmul.f32 %v6462_v39, %v7173_v34  ;;  %v13002_v22 = vrot.slane %v8350_v16, 1  ;;  %v13007_v39 = vld [vmem:[#allocation4_spill] sm:$0xff] }
 0x146   : > { %12997 = vst [vmem:[#allocation101_spill] sm:$0xff] %v8522_v57  ;;  %12999 = vst [vmem:[#allocation103_spill] sm:$0xff] %v8530_v41  ;;  %v3269_v6 = vsel %vm724_vm0, %v3266_v24, %v3268_v13  ;;  %v6476_v48 = vunpack.i.l.bf16 %v6475_v43  ;;  %v6471_v47 = vunpack.i.l.bf16 %v6470_v0  ;;  %v8564_v9 = vmul.f32 %v6461_v44, %v7173_v34 }
 0x147   : > { %12996 = vst [vmem:[#allocation100_spill] sm:$0xff] %v8519_v55  ;;  %13000 = vst [vmem:[#allocation104_spill] sm:$0xff] %v8533_v30  ;;  %v3267_v32 = vsel %vm724_vm0, %v13002_v22, %v3266_v24  ;;  %v8551_v37 = vadd.f32 %v3269_v6, %v8116_v12  ;;  %v6472_v22 = vunpack.i.h.bf16 %v6470_v0  ;;  %v1515_v43 = vsub.s32 6, %v13007_v39 }
 0x148   : > { %13001 = vst [vmem:[#allocation105_spill] sm:$0xff] %v8539_v27  ;;  %v8548_v28 = vadd.f32 %v3267_v32, %v8131_v35  ;;  %v1284_v51 = vmul.f32 %v6476_v48, %v12943_v3  ;;  %v3226_v13 = vmul.f32 %v6476_v48, %v7210_v42  ;;  %v8561_v32 = vmul.f32 %v6461_v44, %v12898_v58 }
 0x149   : > { %13004 = vst [vmem:[#allocation107_spill] sm:$0xff] %v8551_v37  ;;  %13006 = vst [vmem:[#allocation109_spill] sm:$0xff] %v8564_v9  ;;  %v1283_v50 = vmul.f32 %v6472_v22, %v12943_v3  ;;  %v3225_v16 = vmul.f32 %v6472_v22, %v7210_v42  ;;  %v8570_v24 = vmul.f32 %v6477_v23, %v12898_v58  ;;  %v13009_v0 = vrot.slane %v8508_v56, 1 }
 0x14a   : > { %13003 = vst [vmem:[#allocation106_spill] sm:$0xff] %v8548_v28  ;;  %13005 = vst [vmem:[#allocation108_spill] sm:$0xff] %v8561_v32  ;;  %v1336_v12 = vrot.slane %v1284_v51, 1  ;;  %v3278_v6 = vrot.slane %v3226_v13, 1  ;;  %v6485_v28 = vpop.permute.xlu1 %6484  ;;  %v13010_v51 = vrot.slane %v8536_v53, 1  ;;  %v1282_v44 = vmul.f32 %v6471_v47, %v12943_v3 }
 0x14b   : > { %13008 = vst [vmem:[#allocation4_spill] sm:$0xff] %v8570_v24  ;;  %v8580_v37 = vmul.f32 %v6477_v23, %v7173_v34  ;;  %v1334_v26 = vrot.slane %v1283_v50, 1  ;;  %v8589_v57 = vmul.f32 %v6476_v48, %v12898_v58  ;;  %v8591_v45 = vunpack.i.h.bf16 %v6485_v28 }
 0x14c   : > { %v1339_v35 = vsel %vm724_vm0, %v1336_v12, %v13009_v0  ;;  %v3281_v13 = vsel %vm724_vm0, %v3278_v6, %v13010_v51  ;;  %v3276_v0 = vrot.slane %v3225_v16, 1  ;;  %v1332_v55 = vrot.slane %v1282_v44, 1 }
 0x14d   : > { %13011 = vst [vmem:[#allocation110_spill] sm:$0xff] %v8580_v37  ;;  %v8583_v4 = vadd.f32 %v1339_v35, %v8259_v29  ;;  %v8586_v38 = vadd.f32 %v3281_v13, %v8262_v7  ;;  %13014 = vst [vmem:[#allocation113_spill] sm:$0xff] %v8589_v57  ;;  %v8594_v51 = vmul.f32 %v6476_v48, %v7173_v34  ;;  %v13017_v29 = vld [vmem:[#allocation5_spill] sm:$0xff]  ;;  %v13018_v13 = vrot.slane %v8411_v61, 1 }
 0x14e   : > { %13015 = vst [vmem:[#allocation114_spill] sm:$0xff] %v8591_v45  ;;  %v1337_v23 = vsel %vm724_vm0, %v1334_v26, %v1336_v12  ;;  %v3224_v18 = vmul.f32 %v6471_v47, %v7210_v42  ;;  %v8599_v35 = vrot.slane %v13017_v29, %v1515_v43  ;;  %v3279_v50 = vsel %vm724_vm0, %v3276_v0, %v3278_v6 }
 0x14f   : > { %13012 = vst [vmem:[#allocation111_spill] sm:$0xff] %v8583_v4  ;;  %13013 = vst [vmem:[#allocation112_spill] sm:$0xff] %v8586_v38  ;;  %v1333_v16 = vsel %vm724_vm0, %v13018_v13, %v1332_v55  ;;  %v8607_v44 = vadd.f32 %v1337_v23, %v8159_v5  ;;  %v8617_v6 = vadd.f32 %v3279_v50, %v8162_v33  ;;  %v6486_v13 = vunpack.i.l.bf16 %v6485_v28 }
 0x150   : > { %13016 = vst [vmem:[#allocation115_spill] sm:$0xff] %v8594_v51  ;;  %v8612_v38 = vadd.f32 %v1333_v16, %v8180_v17  ;;  %v3274_v43 = vrot.slane %v3224_v18, 1  ;;  %v8621_v61 = vmul.f32 %v8591_v45, %v8599_v35  ;;  %v8625_v23 = vmul.f32 %v6472_v22, %v12898_v58  ;;  %v6480_v16 = vpop.permute.xlu0 %6479 }
 0x151   : > { %13019 = vst [vmem:[#allocation5_spill] sm:$0xff] %v8607_v44  ;;  %13021 = vst [vmem:[#allocation117_spill] sm:$0xff] %v8617_v6  ;;  %v13023_v17 = vrot.slane %v8441_v31, 1  ;;  %v8631_v4 = vmul.f32 %v6472_v22, %v7173_v34  ;;  %v1335_v33 = vsel %vm724_vm0, %v1332_v55, %v1334_v26  ;;  %v8639_v12 = vmul.f32 %v8591_v45, %v12831_v36 }
 0x152   : > { %13020 = vst [vmem:[#allocation116_spill] sm:$0xff] %v8612_v38  ;;  %13022 = vst [vmem:[#allocation118_spill] sm:$0xff] %v8625_v23  ;;  %v13027_v31 = vrot.slane %v8317_v60, 1  ;;  %v1517_v22 = vmul.f32 %v6486_v13, %v8599_v35  ;;  %v13029_v7 = vrot.slane %v8324_v8, 1  ;;  %v13030_v55 = vrot.slane %v8246_v49, 1 }
 0x153   : > { %v3275_v18 = vsel %vm724_vm0, %v13023_v17, %v3274_v43  ;;  %13024 = vst [vmem:[#allocation119_spill] sm:$0xff] %v8631_v4  ;;  %13026 = vst [vmem:[#allocation121_spill] sm:$0xff] %v8639_v12  ;;  %v13028_v17 = vrot.slane %v8238_v14, 1  ;;  %v3322_v48 = vmul.f32 %v6486_v13, %v12831_v36  ;;  %v6482_v5 = vunpack.i.h.bf16 %v6480_v16 }
 0x154   : > { %v8635_v50 = vadd.f32 %v3275_v18, %v8190_v25  ;;  %v3251_v25 = vsel %vm724_vm0, %v13030_v55, %v13029_v7  ;;  %v8658_v14 = vmul.f32 %v6471_v47, %v12898_v58  ;;  %v8662_v49 = vadd.f32 %v1335_v33, %v8169_v15 }
 0x155   : > { %v1309_v28 = vsel %vm724_vm0, %v13028_v17, %v13027_v31  ;;  %v3304_v18 = vadd.f32 %v3251_v25, %v8018_v46  ;;  %v1555_v31 = vrot.slane %v1517_v22, 1  ;;  %v6481_v17 = vunpack.i.l.bf16 %v6480_v16  ;;  %v6495_v46 = vpop.permute.xlu1 %6494 }
 0x156   : > { %13025 = vst [vmem:[#allocation120_spill] sm:$0xff] %v8635_v50  ;;  %v1362_v26 = vadd.f32 %v1309_v28, %v8021_v63  ;;  %13031 = vst [vmem:[#allocation122_spill] sm:$0xff] %v8658_v14  ;;  %v8665_v7 = vmul.f32 %v6471_v47, %v7173_v34  ;;  %v1287_v63 = vmul.f32 %v6482_v5, %v12943_v3  ;;  %v13034_v28 = vld [vmem:[#allocation6_spill] sm:$0xff]  ;;  %v13036_v22 = vrot.slane %v8621_v61, 1 }
 0x157   : > { %13032 = vst [vmem:[#allocation123_spill] sm:$0xff] %v8662_v49  ;;  %v3277_v13 = vsel %vm724_vm0, %v3274_v43, %v3276_v0  ;;  %v8671_v55 = vmul.f32 %v8591_v45, %v13034_v28  ;;  %v1286_v25 = vmul.f32 %v6481_v17, %v12943_v3  ;;  %v12348_v15 = vrot.slane %v8639_v12, 1 }
 0x158   : > { %13033 = vst [vmem:[#allocation124_spill] sm:$0xff] %v8665_v7  ;;  %v1557_v16 = vsel %vm724_vm0, %v1555_v31, %v13036_v22  ;;  %v3360_v47 = vrot.slane %v3322_v48, 1  ;;  %v3229_v8 = vmul.f32 %v6482_v5, %v7210_v42  ;;  %v1342_v0 = vrot.slane %v1287_v63, 1  ;;  %v13044_v31 = vld [vmem:[#allocation56_spill] sm:$0xff] }
 0x159   : > { %13035 = vst [vmem:[#allocation125_spill] sm:$0xff] %v8671_v55  ;;  %v8678_v33 = vadd.f32 %v1557_v16, %v1362_v26  ;;  %v1340_v43 = vrot.slane %v1286_v25, 1  ;;  %v8682_v50 = vunpack.i.h.bf16 %v6495_v46  ;;  %v8685_v6 = vadd.f32 %v3277_v13, %v8172_v10  ;;  %v6490_v55 = vpop.permute.xlu0 %6489 }
 0x15a   : > { %v8689_v22 = vmul.f32 %v6482_v5, %v12898_v58  ;;  %v3228_v26 = vmul.f32 %v6481_v17, %v7210_v42  ;;  %v8694_v16 = vmul.f32 %v6482_v5, %v7173_v34  ;;  %v13042_v63 = vrot.slane %v8508_v56, 1 }
 0x15b   : > { %13037 = vst [vmem:[#allocation126_spill] sm:$0xff] %v8678_v33  ;;  %13038 = vst [vmem:[#allocation127_spill] sm:$0xff] %v8682_v50  ;;  %v8700_v60 = vmul.f32 %v6481_v17, %v12898_v58  ;;  %v3362_v10 = vsel %vm724_vm0, %v3360_v47, %v12348_v15  ;;  %v3284_v13 = vrot.slane %v3229_v8, 1  ;;  %v1343_v48 = vsel %vm724_vm0, %v1340_v43, %v1342_v0 }
 0x15c   : > { %13039 = vst [vmem:[#allocation128_spill] sm:$0xff] %v8685_v6  ;;  %13040 = vst [vmem:[#allocation129_spill] sm:$0xff] %v8689_v22  ;;  %v1341_v25 = vsel %vm724_vm0, %v13042_v63, %v1340_v43  ;;  %v3282_v6 = vrot.slane %v3228_v26, 1  ;;  %v8710_v5 = vmul.f32 %v6481_v17, %v7173_v34  ;;  %v8714_v56 = vmul.f32 %v8682_v50, %v8599_v35  ;;  %v6505_v17 = vpop.permute.xlu1 %6504  ;;  %v13053_v26 = vld [vmem:[#allocation58_spill] sm:$0xff] }
 0x15d   : > { %13041 = vst [vmem:[#allocation130_spill] sm:$0xff] %v8694_v16  ;;  %13043 = vst [vmem:[#allocation131_spill] sm:$0xff] %v8700_v60  ;;  %v8706_v33 = vadd.f32 %v1341_v25, %v13044_v31  ;;  %v8716_v63 = vunpack.i.l.bf16 %v6495_v46  ;;  %v13049_v8 = vrot.slane %v8536_v53, 1  ;;  %v8724_v31 = vmul.f32 %v8682_v50, %v13034_v28  ;;  %v13055_v53 = vld [vmem:[#allocation54_spill] sm:$0xff]  ;;  %v6500_v43 = vpop.permute.xlu0 %6499 }
 0x15e   : > { %13046 = vst [vmem:[#allocation132_spill] sm:$0xff] %v8710_v5  ;;  %13047 = vst [vmem:[#allocation133_spill] sm:$0xff] %v8714_v56  ;;  %v8728_v34 = vmul.f32 %v8682_v50, %v12831_v36  ;;  %v8730_v0 = vadd.f32 %v3362_v10, %v3304_v18  ;;  %v3285_v15 = vsel %vm724_vm0, %v3282_v6, %v3284_v13  ;;  %v8741_v12 = vunpack.i.h.bf16 %v6490_v55  ;;  %v13061_v13 = vld [vmem:[#allocation55_spill] sm:$0xff] }
 0x15f   : > { %13045 = vst [vmem:[#allocation56_spill] sm:$0xff] %v8706_v33  ;;  %13048 = vst [vmem:[#allocation134_spill] sm:$0xff] %v8716_v63  ;;  %v3283_v47 = vsel %vm724_vm0, %v13049_v8, %v3282_v6  ;;  %v8738_v8 = vadd.f32 %v1343_v48, %v13055_v53  ;;  %v8743_v22 = vunpack.i.l.bf16 %v6490_v55  ;;  %v8749_v10 = vmul.f32 %v8716_v63, %v8599_v35 }
 0x160   : > { %13050 = vst [vmem:[#allocation135_spill] sm:$0xff] %v8724_v31  ;;  %13051 = vst [vmem:[#allocation136_spill] sm:$0xff] %v8728_v34  ;;  %v8735_v25 = vadd.f32 %v3283_v47, %v13053_v26  ;;  %v8751_v46 = vunpack.i.h.bf16 %v6505_v17  ;;  %v8757_v6 = vmul.f32 %v8716_v63, %v13034_v28  ;;  %v8761_v55 = vmul.f32 %v8716_v63, %v12831_v36  ;;  %v6515_v34 = vpop.permute.xlu1 %6514 }
 0x161   : > { %13052 = vst [vmem:[#allocation137_spill] sm:$0xff] %v8730_v0  ;;  %13056 = vst [vmem:[#allocation54_spill] sm:$0xff] %v8738_v8  ;;  %v8764_v26 = vadd.f32 %v3285_v15, %v13061_v13  ;;  %v8768_v53 = vmul.f32 %v8682_v50, %v12943_v3  ;;  %v8772_v33 = vmul.f32 %v8741_v12, %v8599_v35  ;;  %v8790_v18 = vunpack.i.l.bf16 %v6505_v17 }
 0x162   : > { %13054 = vst [vmem:[#allocation58_spill] sm:$0xff] %v8735_v25  ;;  %13057 = vst [vmem:[#allocation138_spill] sm:$0xff] %v8749_v10  ;;  %v8776_v48 = vmul.f32 %v8743_v22, %v8599_v35  ;;  %v8780_v47 = vmul.f32 %v8716_v63, %v12943_v3  ;;  %v8784_v15 = vmul.f32 %v8741_v12, %v13034_v28  ;;  %v8850_v7 = vunpack.i.h.bf16 %v6515_v34 }
 0x163   : > { %13058 = vst [vmem:[#allocation139_spill] sm:$0xff] %v8751_v46  ;;  %13059 = vst [vmem:[#allocation140_spill] sm:$0xff] %v8757_v6  ;;  %v8788_v13 = vmul.f32 %v8741_v12, %v12831_v36  ;;  %v8795_v25 = vmul.f32 %v8743_v22, %v13034_v28  ;;  %v8809_v17 = vmul.f32 %v8741_v12, %v12943_v3  ;;  %v13082_v37 = vrot.slane %v8621_v61, 1 }
 0x164   : > { %13060 = vst [vmem:[#allocation141_spill] sm:$0xff] %v8761_v55  ;;  %13062 = vst [vmem:[#allocation55_spill] sm:$0xff] %v8764_v26  ;;  %v8811_v26 = vunpack.i.h.bf16 %v6500_v43  ;;  %v8817_v60 = vmul.f32 %v8743_v22, %v12943_v3  ;;  %v8821_v8 = vmul.f32 %v8751_v46, %v13034_v28  ;;  %v8831_v16 = vmul.f32 %v8790_v18, %v8599_v35 }
 0x165   : > { %13063 = vst [vmem:[#allocation142_spill] sm:$0xff] %v8768_v53  ;;  %13064 = vst [vmem:[#allocation143_spill] sm:$0xff] %v8780_v47  ;;  %v8799_v53 = vmul.f32 %v8743_v22, %v12831_v36  ;;  %v8803_v47 = vmul.f32 %v8751_v46, %v8599_v35  ;;  %v8838_v24 = vmul.f32 %v8790_v18, %v13034_v28 }
 0x166   : > { %13065 = vst [vmem:[#allocation144_spill] sm:$0xff] %v8788_v13  ;;  %13066 = vst [vmem:[#allocation145_spill] sm:$0xff] %v8790_v18  ;;  %v8842_v55 = vmul.f32 %v8790_v18, %v12831_v36  ;;  %v8846_v0 = vmul.f32 %v8811_v26, %v8599_v35  ;;  %v8848_v13 = vunpack.i.l.bf16 %v6500_v43  ;;  %v8862_v14 = vmul.f32 %v8751_v46, %v12943_v3 }
 0x167   : > { %13067 = vst [vmem:[#allocation146_spill] sm:$0xff] %v8795_v25  ;;  %13068 = vst [vmem:[#allocation147_spill] sm:$0xff] %v8799_v53  ;;  %v8866_v38 = vmul.f32 %v8811_v26, %v13034_v28  ;;  %v8872_v61 = vmul.f32 %v8811_v26, %v12831_v36  ;;  %v8897_v53 = vmul.f32 %v8850_v7, %v8599_v35 }
 0x168   : > { %13069 = vst [vmem:[#allocation148_spill] sm:$0xff] %v8803_v47  ;;  %13070 = vst [vmem:[#allocation149_spill] sm:$0xff] %v8809_v17  ;;  %v8827_v17 = vmul.f32 %v8751_v46, %v12831_v36  ;;  %v8887_v43 = vmul.f32 %v8848_v13, %v13034_v28  ;;  %v8902_v44 = vmul.f32 %v8811_v26, %v12943_v3 }
 0x169   : > { %13071 = vst [vmem:[#allocation150_spill] sm:$0xff] %v8811_v26  ;;  %13072 = vst [vmem:[#allocation151_spill] sm:$0xff] %v8817_v60  ;;  %v13081_v60 = vrot.slane %v8776_v48, 1  ;;  %v8906_v4 = vmul.f32 %v8850_v7, %v13034_v28  ;;  %v8917_v51 = vmul.f32 %v8850_v7, %v12831_v36 }
 0x16a   : > { %13073 = vst [vmem:[#allocation152_spill] sm:$0xff] %v8821_v8  ;;  %13074 = vst [vmem:[#allocation153_spill] sm:$0xff] %v8827_v17  ;;  %v8893_v17 = vmul.f32 %v8848_v13, %v12831_v36 }
 0x16b   : > { %13075 = vst [vmem:[#allocation154_spill] sm:$0xff] %v8831_v16  ;;  %13076 = vst [vmem:[#allocation155_spill] sm:$0xff] %v8838_v24  ;;  %v8857_v5 = vsel %vm724_vm0, %v13082_v37, %v13081_v60  ;;  %v8874_v37 = vunpack.i.l.bf16 %v6515_v34  ;;  %v6510_v60 = vpop.permute.xlu0 %6509  ;;  %v8927_v34 = vmul.f32 %v8850_v7, %v12943_v3  ;;  %v1763_v16 = vsub.s32 7, %v13007_v39 }
 0x16c   : > { %13077 = vst [vmem:[#allocation156_spill] sm:$0xff] %v8842_v55  ;;  %13078 = vst [vmem:[#allocation157_spill] sm:$0xff] %v8846_v0  ;;  %v8908_v49 = vunpack.i.h.bf16 %v6510_v60  ;;  %v8913_v55 = vmul.f32 %v8848_v13, %v12943_v3  ;;  %v8939_v24 = vunpack.i.l.bf16 %v6510_v60 }
 0x16d   : > { %13079 = vst [vmem:[#allocation158_spill] sm:$0xff] %v8848_v13  ;;  %13080 = vst [vmem:[#allocation159_spill] sm:$0xff] %v8850_v7  ;;  %v8937_v32 = vmul.f32 %v8874_v37, %v12831_v36  ;;  %v8956_v60 = vmul.f32 %v8874_v37, %v12943_v3 }
 0x16e   : > { %13083 = vst [vmem:[#allocation160_spill] sm:$0xff] %v8857_v5  ;;  %13084 = vst [vmem:[#allocation161_spill] sm:$0xff] %v8862_v14  ;;  %v8879_v5 = vmul.f32 %v8790_v18, %v12943_v3  ;;  %v8883_v14 = vmul.f32 %v8848_v13, %v8599_v35  ;;  %v8944_v23 = vmul.f32 %v8908_v49, %v8599_v35  ;;  %v13230_v13 = vld [vmem:[#allocation22_spill] sm:$0xff] }
 0x16f   : > { %13085 = vst [vmem:[#allocation162_spill] sm:$0xff] %v8866_v38  ;;  %13086 = vst [vmem:[#allocation163_spill] sm:$0xff] %v8872_v61  ;;  %v6520_v61 = vpop.permute.xlu0 %6519  ;;  %v8960_v57 = vmul.f32 %v8908_v49, %v12831_v36  ;;  %v8969_v8 = vmul.f32 %v8939_v24, %v13034_v28 }
 0x170   : > { %13087 = vst [vmem:[#allocation164_spill] sm:$0xff] %v8874_v37  ;;  %13088 = vst [vmem:[#allocation165_spill] sm:$0xff] %v8879_v5  ;;  %v8921_v5 = vmul.f32 %v8874_v37, %v8599_v35 }
 0x171   : > { %13089 = vst [vmem:[#allocation166_spill] sm:$0xff] %v8887_v43  ;;  %13090 = vst [vmem:[#allocation167_spill] sm:$0xff] %v8893_v17 }
 0x172   : > { %13091 = vst [vmem:[#allocation168_spill] sm:$0xff] %v8897_v53  ;;  %13092 = vst [vmem:[#allocation169_spill] sm:$0xff] %v8902_v44  ;;  %v6525_v44 = vpop.permute.xlu1 %6524  ;;  %v8965_v53 = vmul.f32 %v8939_v24, %v8599_v35 }
 0x173   : > { %13093 = vst [vmem:[#allocation170_spill] sm:$0xff] %v8906_v4  ;;  %13094 = vst [vmem:[#allocation171_spill] sm:$0xff] %v8908_v49  ;;  %v8950_v7 = vunpack.i.h.bf16 %v6525_v44  ;;  %v8971_v9 = vunpack.i.l.bf16 %v6525_v44  ;;  %v8982_v4 = vunpack.i.h.bf16 %v6520_v61 }
 0x174   : > { %13095 = vst [vmem:[#allocation172_spill] sm:$0xff] %v8913_v55  ;;  %13096 = vst [vmem:[#allocation173_spill] sm:$0xff] %v8917_v51  ;;  %v8931_v55 = vmul.f32 %v8874_v37, %v13034_v28  ;;  %v8980_v51 = vmul.f32 %v8939_v24, %v12831_v36 }
 0x175   : > { %13097 = vst [vmem:[#allocation174_spill] sm:$0xff] %v8921_v5  ;;  %13098 = vst [vmem:[#allocation175_spill] sm:$0xff] %v8927_v34  ;;  %v8948_v34 = vmul.f32 %v8908_v49, %v13034_v28  ;;  %v8988_v44 = vmul.f32 %v8950_v7, %v8599_v35  ;;  %v8992_v17 = vmul.f32 %v8950_v7, %v13034_v28 }
 0x176   : > { %13099 = vst [vmem:[#allocation176_spill] sm:$0xff] %v8931_v55  ;;  %13100 = vst [vmem:[#allocation177_spill] sm:$0xff] %v8937_v32  ;;  %v9001_v37 = vmul.f32 %v8950_v7, %v12831_v36  ;;  %v9005_v5 = vmul.f32 %v8950_v7, %v12943_v3  ;;  %v9011_v47 = vmul.f32 %v8971_v9, %v8599_v35 }
 0x177   : > { %13101 = vst [vmem:[#allocation178_spill] sm:$0xff] %v8939_v24  ;;  %13102 = vst [vmem:[#allocation179_spill] sm:$0xff] %v8944_v23  ;;  %v9015_v32 = vmul.f32 %v8971_v9, %v13034_v28  ;;  %v9020_v46 = vmul.f32 %v8971_v9, %v12831_v36  ;;  %v9024_v55 = vmul.f32 %v8982_v4, %v8599_v35 }
 0x178   : > { %13103 = vst [vmem:[#allocation180_spill] sm:$0xff] %v8948_v34  ;;  %13104 = vst [vmem:[#allocation181_spill] sm:$0xff] %v8950_v7  ;;  %v9031_v18 = vmul.f32 %v8982_v4, %v13034_v28  ;;  %v9038_v34 = vmul.f32 %v8982_v4, %v12831_v36 }
 0x179   : > { %13105 = vst [vmem:[#allocation182_spill] sm:$0xff] %v8956_v60  ;;  %13106 = vst [vmem:[#allocation183_spill] sm:$0xff] %v8960_v57  ;;  %v8976_v60 = vmul.f32 %v8908_v49, %v12943_v3  ;;  %v6530_v57 = vpop.permute.xlu0 %6529 }
 0x17a   : > { %13107 = vst [vmem:[#allocation184_spill] sm:$0xff] %v8965_v53  ;;  %13108 = vst [vmem:[#allocation185_spill] sm:$0xff] %v8969_v8  ;;  %v9033_v8 = vunpack.i.l.bf16 %v6520_v61  ;;  %v9052_v61 = vmul.f32 %v8982_v4, %v12943_v3 }
 0x17b   : > { %13109 = vst [vmem:[#allocation186_spill] sm:$0xff] %v8971_v9  ;;  %13110 = vst [vmem:[#allocation187_spill] sm:$0xff] %v8976_v60  ;;  %v8997_v60 = vmul.f32 %v8939_v24, %v12943_v3 }
 0x17c   : > { %13111 = vst [vmem:[#allocation188_spill] sm:$0xff] %v8980_v51  ;;  %13112 = vst [vmem:[#allocation189_spill] sm:$0xff] %v8982_v4  ;;  %v9062_v7 = vmul.f32 %v9033_v8, %v8599_v35 }
 0x17d   : > { %13113 = vst [vmem:[#allocation190_spill] sm:$0xff] %v8988_v44  ;;  %13114 = vst [vmem:[#allocation191_spill] sm:$0xff] %v8992_v17  ;;  %v9048_v17 = vmul.f32 %v8971_v9, %v12943_v3  ;;  %v9057_v44 = vrot.slane %v13017_v29, %v1763_v16  ;;  %v6540_v30 = vpop.permute.xlu0 %6539 }
 0x17e   : > { %13115 = vst [vmem:[#allocation192_spill] sm:$0xff] %v8997_v60  ;;  %13116 = vst [vmem:[#allocation193_spill] sm:$0xff] %v9001_v37  ;;  %v6535_v60 = vpop.permute.xlu1 %6534 }
 0x17f   : > { %13117 = vst [vmem:[#allocation194_spill] sm:$0xff] %v9005_v5  ;;  %13118 = vst [vmem:[#allocation195_spill] sm:$0xff] %v9011_v47  ;;  %v9040_v27 = vunpack.i.h.bf16 %v6535_v60  ;;  %v9042_v39 = vunpack.i.l.bf16 %v6535_v60  ;;  %v6532_v60 = vunpack.i.h.bf16 %v6530_v57 }
 0x180   : > { %13119 = vst [vmem:[#allocation196_spill] sm:$0xff] %v9015_v32  ;;  %13120 = vst [vmem:[#allocation197_spill] sm:$0xff] %v9020_v46  ;;  %v9084_v46 = vmul.f32 %v9033_v8, %v12943_v3 }
 0x181   : > { %13121 = vst [vmem:[#allocation198_spill] sm:$0xff] %v9024_v55  ;;  %13122 = vst [vmem:[#allocation199_spill] sm:$0xff] %v9031_v18  ;;  %v9075_v29 = vmul.f32 %v9040_v27, %v13034_v28  ;;  %v9079_v16 = vmul.f32 %v9042_v39, %v9057_v44  ;;  %v1765_v5 = vmul.f32 %v6532_v60, %v9057_v44 }
 0x182   : > { %13123 = vst [vmem:[#allocation200_spill] sm:$0xff] %v9033_v8  ;;  %13124 = vst [vmem:[#allocation201_spill] sm:$0xff] %v9038_v34  ;;  %v6545_v37 = vpop.permute.xlu1 %6544  ;;  %v9088_v32 = vmul.f32 %v9040_v27, %v9057_v44  ;;  %v9092_v51 = vmul.f32 %v9040_v27, %v12898_v58  ;;  %v9094_v34 = vunpack.i.l.bf16 %v6530_v57  ;;  %v9098_v47 = vmul.f32 %v9040_v27, %v12943_v3 }
 0x183   : > { %13125 = vst [vmem:[#allocation202_spill] sm:$0xff] %v9042_v39  ;;  %13126 = vst [vmem:[#allocation203_spill] sm:$0xff] %v9048_v17  ;;  %v9066_v17 = vmul.f32 %v9033_v8, %v13034_v28  ;;  %v9101_v9 = vmul.f32 %v6532_v60, %v8599_v35  ;;  %v9104_v18 = vmul.f32 %v6532_v60, %v12898_v58  ;;  %v1803_v49 = vrot.slane %v1765_v5, 1 }
 0x184   : > { %13127 = vst [vmem:[#allocation204_spill] sm:$0xff] %v9052_v61  ;;  %13128 = vst [vmem:[#allocation205_spill] sm:$0xff] %v9062_v7  ;;  %v9070_v61 = vmul.f32 %v9033_v8, %v12831_v36  ;;  %v9112_v8 = vunpack.i.h.bf16 %v6545_v37  ;;  %v9118_v24 = vmul.f32 %v9094_v34, %v8599_v35  ;;  %v9124_v4 = vmul.f32 %v9094_v34, %v13034_v28 }
 0x185   : > { %13129 = vst [vmem:[#allocation206_spill] sm:$0xff] %v9066_v17  ;;  %13131 = vst [vmem:[#allocation208_spill] sm:$0xff] %v9075_v29  ;;  %v9128_v57 = vmul.f32 %v9094_v34, %v12831_v36  ;;  %v9147_v17 = vunpack.i.h.bf16 %v6540_v30  ;;  %v13147_v5 = vrot.slane %v9079_v16, 1 }
 0x186   : > { %13130 = vst [vmem:[#allocation207_spill] sm:$0xff] %v9070_v61  ;;  %13132 = vst [vmem:[#allocation209_spill] sm:$0xff] %v9079_v16  ;;  %v9133_v61 = vunpack.i.l.bf16 %v6545_v37  ;;  %v9141_v55 = vmul.f32 %v9112_v8, %v9057_v44  ;;  %v6555_v41 = vpop.permute.xlu1 %6554 }
 0x187   : > { %13133 = vst [vmem:[#allocation210_spill] sm:$0xff] %v9084_v46  ;;  %13134 = vst [vmem:[#allocation211_spill] sm:$0xff] %v9088_v32  ;;  %v9107_v46 = vmul.f32 %v6532_v60, %v12831_v36  ;;  %v9137_v60 = vmul.f32 %v9094_v34, %v12943_v3  ;;  %v9152_v37 = vsel %vm724_vm0, %v1803_v49, %v13147_v5  ;;  %v9183_v7 = vunpack.i.h.bf16 %v6555_v41 }
 0x188   : > { %13135 = vst [vmem:[#allocation212_spill] sm:$0xff] %v9092_v51  ;;  %13136 = vst [vmem:[#allocation213_spill] sm:$0xff] %v9094_v34  ;;  %v9145_v51 = vmul.f32 %v9112_v8, %v13034_v28  ;;  %v9165_v52 = vmul.f32 %v9133_v61, %v9057_v44  ;;  %v9169_v49 = vmul.f32 %v9133_v61, %v13034_v28 }
 0x189   : > { %13137 = vst [vmem:[#allocation214_spill] sm:$0xff] %v9098_v47  ;;  %13138 = vst [vmem:[#allocation215_spill] sm:$0xff] %v9104_v18  ;;  %v9159_v18 = vunpack.i.l.bf16 %v6540_v30  ;;  %v9173_v5 = vmul.f32 %v9112_v8, %v12943_v3  ;;  %v9177_v30 = vmul.f32 %v9133_v61, %v12898_v58  ;;  %v9181_v34 = vmul.f32 %v9147_v17, %v9057_v44 }
 0x18a   : > { %13139 = vst [vmem:[#allocation216_spill] sm:$0xff] %v9118_v24  ;;  %13140 = vst [vmem:[#allocation217_spill] sm:$0xff] %v9124_v4  ;;  %v9189_v16 = vmul.f32 %v9147_v17, %v13034_v28  ;;  %v9198_v4 = vmul.f32 %v9133_v61, %v12943_v3  ;;  %v9204_v47 = vunpack.i.l.bf16 %v6555_v41  ;;  %v9210_v19 = vmul.f32 %v9147_v17, %v12943_v3 }
 0x18b   : > { %13141 = vst [vmem:[#allocation218_spill] sm:$0xff] %v9128_v57  ;;  %13142 = vst [vmem:[#allocation219_spill] sm:$0xff] %v9133_v61  ;;  %v9202_v24 = vmul.f32 %v9159_v18, %v9057_v44  ;;  %v9214_v57 = vmul.f32 %v9159_v18, %v13034_v28  ;;  %v9220_v41 = vmul.f32 %v9159_v18, %v12898_v58  ;;  %v13221_v61 = vld [vmem:[#allocation40_spill] sm:$0xff] }
 0x18c   : > { %13143 = vst [vmem:[#allocation220_spill] sm:$0xff] %v9137_v60  ;;  %13144 = vst [vmem:[#allocation221_spill] sm:$0xff] %v9141_v55  ;;  %v9157_v60 = vmul.f32 %v9112_v8, %v12898_v58  ;;  %v9224_v53 = vmul.f32 %v9183_v7, %v9057_v44  ;;  %v9239_v1 = vmul.f32 %v9159_v18, %v12943_v3 }
 0x18d   : > { %13145 = vst [vmem:[#allocation222_spill] sm:$0xff] %v9145_v51  ;;  %13146 = vst [vmem:[#allocation223_spill] sm:$0xff] %v9147_v17  ;;  %v9278_v11 = vmul.f32 %v9204_v47, %v12943_v3 }
 0x18e   : > { %13148 = vst [vmem:[#allocation224_spill] sm:$0xff] %v9152_v37  ;;  %13149 = vst [vmem:[#allocation225_spill] sm:$0xff] %v9157_v60  ;;  %v6550_v37 = vpop.permute.xlu0 %6549  ;;  %v6565_v60 = vpop.permute.xlu1 %6564 }
 0x18f   : > { %13150 = vst [vmem:[#allocation226_spill] sm:$0xff] %v9165_v52  ;;  %13151 = vst [vmem:[#allocation227_spill] sm:$0xff] %v9169_v49  ;;  %v9241_v21 = vunpack.i.h.bf16 %v6550_v37  ;;  %v9243_v23 = vunpack.i.l.bf16 %v6550_v37  ;;  %v9262_v37 = vmul.f32 %v9204_v47, %v12898_v58 }
 0x190   : > { %13152 = vst [vmem:[#allocation228_spill] sm:$0xff] %v9173_v5  ;;  %13153 = vst [vmem:[#allocation229_spill] sm:$0xff] %v9177_v30  ;;  %v9193_v5 = vmul.f32 %v9147_v17, %v12898_v58  ;;  %v9230_v17 = vmul.f32 %v9183_v7, %v13034_v28  ;;  %v9256_v30 = vmul.f32 %v9204_v47, %v13034_v28 }
 0x191   : > { %13154 = vst [vmem:[#allocation230_spill] sm:$0xff] %v9181_v34  ;;  %13155 = vst [vmem:[#allocation231_spill] sm:$0xff] %v9183_v7  ;;  %v9270_v49 = vmul.f32 %v9241_v21, %v9057_v44  ;;  %v9288_v34 = vunpack.i.l.bf16 %v6565_v60  ;;  %v9303_v31 = vmul.f32 %v9241_v21, %v12943_v3 }
 0x192   : > { %13156 = vst [vmem:[#allocation232_spill] sm:$0xff] %v9189_v16  ;;  %13157 = vst [vmem:[#allocation233_spill] sm:$0xff] %v9193_v5  ;;  %v9248_v5 = vmul.f32 %v9183_v7, %v12943_v3  ;;  %v9252_v16 = vmul.f32 %v9204_v47, %v9057_v44 }
 0x193   : > { %13158 = vst [vmem:[#allocation234_spill] sm:$0xff] %v9198_v4  ;;  %13159 = vst [vmem:[#allocation235_spill] sm:$0xff] %v9204_v47  ;;  %v9234_v4 = vmul.f32 %v9183_v7, %v12898_v58  ;;  %v6560_v7 = vpop.permute.xlu0 %6559  ;;  %v6575_v47 = vpop.permute.xlu1 %6574 }
 0x194   : > { %13160 = vst [vmem:[#allocation236_spill] sm:$0xff] %v9210_v19  ;;  %13161 = vst [vmem:[#allocation237_spill] sm:$0xff] %v9220_v41  ;;  %v9264_v19 = vunpack.i.h.bf16 %v6565_v60  ;;  %v9282_v41 = vmul.f32 %v9241_v21, %v12898_v58  ;;  %v9346_v52 = vunpack.i.l.bf16 %v6560_v7  ;;  %v9348_v10 = vunpack.i.h.bf16 %v6575_v47 }
 0x195   : > { %13162 = vst [vmem:[#allocation238_spill] sm:$0xff] %v9224_v53  ;;  %13163 = vst [vmem:[#allocation239_spill] sm:$0xff] %v9230_v17  ;;  %v9294_v53 = vmul.f32 %v9243_v23, %v13034_v28  ;;  %v9309_v17 = vunpack.i.h.bf16 %v6560_v7  ;;  %v9359_v56 = vunpack.i.l.bf16 %v6575_v47 }
 0x196   : > { %13164 = vst [vmem:[#allocation240_spill] sm:$0xff] %v9234_v4  ;;  %13165 = vst [vmem:[#allocation241_spill] sm:$0xff] %v9239_v1  ;;  %v9274_v1 = vmul.f32 %v9241_v21, %v13034_v28  ;;  %v9307_v60 = vmul.f32 %v9264_v19, %v9057_v44  ;;  %v9319_v6 = vmul.f32 %v9264_v19, %v13034_v28 }
 0x197   : > { %13166 = vst [vmem:[#allocation242_spill] sm:$0xff] %v9241_v21  ;;  %13167 = vst [vmem:[#allocation243_spill] sm:$0xff] %v9248_v5  ;;  %v9286_v5 = vmul.f32 %v9243_v23, %v9057_v44  ;;  %v9325_v21 = vmul.f32 %v9264_v19, %v12898_v58  ;;  %v9329_v4 = vmul.f32 %v9288_v34, %v9057_v44 }
 0x198   : > { %13168 = vst [vmem:[#allocation244_spill] sm:$0xff] %v9252_v16  ;;  %13169 = vst [vmem:[#allocation245_spill] sm:$0xff] %v9256_v30  ;;  %v9315_v16 = vmul.f32 %v9243_v23, %v12943_v3  ;;  %v6570_v30 = vpop.permute.xlu0 %6569  ;;  %v9375_v47 = vmul.f32 %v9346_v52, %v9057_v44  ;;  %v9383_v7 = vmul.f32 %v9309_v17, %v12943_v3 }
 0x199   : > { %13170 = vst [vmem:[#allocation246_spill] sm:$0xff] %v9262_v37  ;;  %13171 = vst [vmem:[#allocation247_spill] sm:$0xff] %v9264_v19  ;;  %v6585_v37 = vpop.permute.xlu1 %6584  ;;  %v9414_v50 = vmul.f32 %v9359_v56, %v13034_v28  ;;  %v9416_v63 = vunpack.i.l.bf16 %v6570_v30  ;;  %v9422_v51 = vmul.f32 %v9346_v52, %v12943_v3 }
 0x19a   : > { %13172 = vst [vmem:[#allocation248_spill] sm:$0xff] %v9270_v49  ;;  %13173 = vst [vmem:[#allocation249_spill] sm:$0xff] %v9274_v1  ;;  %v9335_v49 = vmul.f32 %v9288_v34, %v13034_v28  ;;  %v9353_v1 = vmul.f32 %v9288_v34, %v12943_v3 }
 0x19b   : > { %13174 = vst [vmem:[#allocation250_spill] sm:$0xff] %v9278_v11  ;;  %13175 = vst [vmem:[#allocation251_spill] sm:$0xff] %v9282_v41  ;;  %v9298_v11 = vmul.f32 %v9243_v23, %v12898_v58  ;;  %v9344_v41 = vmul.f32 %v9264_v19, %v12943_v3 }
 0x19c   : > { %13176 = vst [vmem:[#allocation252_spill] sm:$0xff] %v9286_v5  ;;  %13177 = vst [vmem:[#allocation253_spill] sm:$0xff] %v9288_v34  ;;  %v13223_v5 = vld [vmem:[#allocation19_spill] sm:$0xff] }
 0x19d   : > { %13178 = vst [vmem:[#allocation254_spill] sm:$0xff] %v9294_v53  ;;  %13179 = vst [vmem:[#allocation255_spill] sm:$0xff] %v9298_v11  ;;  %v9357_v11 = vmul.f32 %v9309_v17, %v9057_v44  ;;  %v9426_v53 = vmul.f32 %v9348_v10, %v12943_v3 }
 0x19e   : > { %13180 = vst [vmem:[#allocation256_spill] sm:$0xff] %v9303_v31  ;;  %13181 = vst [vmem:[#allocation257_spill] sm:$0xff] %v9307_v60  ;;  %v9339_v31 = vmul.f32 %v9288_v34, %v12898_v58  ;;  %v9379_v60 = vmul.f32 %v9346_v52, %v13034_v28  ;;  %v9395_v34 = vmul.f32 %v9348_v10, %v13034_v28 }
 0x19f   : > { %13182 = vst [vmem:[#allocation258_spill] sm:$0xff] %v9309_v17  ;;  %13183 = vst [vmem:[#allocation259_spill] sm:$0xff] %v9315_v16  ;;  %v9369_v16 = vmul.f32 %v9309_v17, %v12898_v58 }
 0x1a0   : > { %13184 = vst [vmem:[#allocation260_spill] sm:$0xff] %v9319_v6  ;;  %13185 = vst [vmem:[#allocation261_spill] sm:$0xff] %v9325_v21  ;;  %v9387_v21 = vmul.f32 %v9346_v52, %v12898_v58  ;;  %v6595_v6 = vpop.permute.xlu1 %6594 }
 0x1a1   : > { %13186 = vst [vmem:[#allocation262_spill] sm:$0xff] %v9329_v4  ;;  %13187 = vst [vmem:[#allocation263_spill] sm:$0xff] %v9335_v49  ;;  %v9408_v4 = vunpack.i.h.bf16 %v6570_v30  ;;  %v9433_v49 = vmul.f32 %v9359_v56, %v12898_v58 }
 0x1a2   : > { %13188 = vst [vmem:[#allocation264_spill] sm:$0xff] %v9339_v31  ;;  %13189 = vst [vmem:[#allocation265_spill] sm:$0xff] %v9344_v41  ;;  %v9365_v41 = vmul.f32 %v9309_v17, %v13034_v28  ;;  %v9397_v31 = vpop.permute.xlu0 %6579  ;;  %v9402_v17 = vmul.f32 %v9348_v10, %v12898_v58 }
 0x1a3   : > { %13190 = vst [vmem:[#allocation266_spill] sm:$0xff] %v9346_v52  ;;  %13191 = vst [vmem:[#allocation267_spill] sm:$0xff] %v9348_v10  ;;  %v9448_v30 = vmul.f32 %v9408_v4, %v13034_v28  ;;  %v13220_v52 = vld [vmem:[#allocation3_spill] sm:$0xff] }
 0x1a4   : > { %13192 = vst [vmem:[#allocation268_spill] sm:$0xff] %v9353_v1  ;;  %13193 = vst [vmem:[#allocation269_spill] sm:$0xff] %v9357_v11  ;;  %v9391_v1 = vmul.f32 %v9348_v10, %v9057_v44  ;;  %v9452_v11 = vmul.f32 %v9408_v4, %v12898_v58  ;;  %v9465_v10 = vmul.f32 %v9416_v63, %v9057_v44 }
 0x1a5   : > { %13194 = vst [vmem:[#allocation270_spill] sm:$0xff] %v9359_v56  ;;  %13195 = vst [vmem:[#allocation271_spill] sm:$0xff] %v9365_v41  ;;  %v9456_v41 = vmul.f32 %v9408_v4, %v12943_v3 }
 0x1a6   : > { %13196 = vst [vmem:[#allocation272_spill] sm:$0xff] %v9369_v16  ;;  %13197 = vst [vmem:[#allocation273_spill] sm:$0xff] %v9375_v47  ;;  %v6587_v16 = vunpack.i.h.bf16 %v6585_v37 }
 0x1a7   : > { %13198 = vst [vmem:[#allocation274_spill] sm:$0xff] %v9379_v60  ;;  %13199 = vst [vmem:[#allocation275_spill] sm:$0xff] %v9383_v7  ;;  %v9406_v7 = vmul.f32 %v9359_v56, %v9057_v44  ;;  %v9470_v60 = vmul.f32 %v9416_v63, %v13034_v28 }
 0x1a8   : > { %13200 = vst [vmem:[#allocation276_spill] sm:$0xff] %v9387_v21  ;;  %13201 = vst [vmem:[#allocation277_spill] sm:$0xff] %v9391_v1  ;;  %v6586_v21 = vunpack.i.l.bf16 %v6585_v37  ;;  %v6596_v1 = vunpack.i.l.bf16 %v6595_v6  ;;  %v9479_v37 = vmul.f32 %v9416_v63, %v12898_v58 }
 0x1a9   : > { %13202 = vst [vmem:[#allocation278_spill] sm:$0xff] %v9395_v34  ;;  %13203 = vst [vmem:[#allocation279_spill] sm:$0xff] %v9402_v17  ;;  %v6590_v34 = vpop.permute.xlu0 %6589  ;;  %v6597_v17 = vunpack.i.h.bf16 %v6595_v6 }
 0x1aa   : > { %13204 = vst [vmem:[#allocation280_spill] sm:$0xff] %v9406_v7  ;;  %13205 = vst [vmem:[#allocation281_spill] sm:$0xff] %v9408_v4  ;;  %v2280_v7 = vmul.f32 %v6586_v21, %v7210_v42 }
 0x1ab   : > { %13206 = vst [vmem:[#allocation282_spill] sm:$0xff] %v9414_v50  ;;  %13207 = vst [vmem:[#allocation283_spill] sm:$0xff] %v9416_v63  ;;  %v2281_v50 = vmul.f32 %v6587_v16, %v7210_v42  ;;  %v9473_v16 = vmul.f32 %v6597_v17, %v7210_v42  ;;  %v2284_v17 = vmul.f32 %v6596_v1, %v7210_v42 }
 0x1ac   : > { %13208 = vst [vmem:[#allocation284_spill] sm:$0xff] %v9422_v51  ;;  %13209 = vst [vmem:[#allocation285_spill] sm:$0xff] %v9426_v53  ;;  %v9439_v51 = vmul.f32 %v9359_v56, %v12943_v3  ;;  %v9443_v53 = vmul.f32 %v9408_v4, %v9057_v44  ;;  %v6592_v4 = vunpack.i.h.bf16 %v6590_v34 }
 0x1ad   : > { %13210 = vst [vmem:[#allocation286_spill] sm:$0xff] %v9433_v49  ;;  %13213 = vst [vmem:[#allocation289_spill] sm:$0xff] %v9448_v30  ;;  %v2320_v19 = vrot.slane %v2281_v50, 1  ;;  %v2318_v49 = vrot.slane %v2280_v7, 1  ;;  %v2328_v50 = vrot.slane %v9473_v16, 1  ;;  %v6600_v7 = vpop.permute.xlu0 %6599  ;;  %v6591_v30 = vunpack.i.l.bf16 %v6590_v34 }
 0x1ae   : > { %13211 = vst [vmem:[#allocation287_spill] sm:$0xff] %v9439_v51  ;;  %13212 = vst [vmem:[#allocation288_spill] sm:$0xff] %v9443_v53  ;;  %v6582_v51 = vunpack.i.h.bf16 %v9397_v31  ;;  %v9483_v53 = vmul.f32 %v9416_v63, %v12943_v3  ;;  %v2326_v43 = vrot.slane %v2284_v17, 1  ;;  %v6602_v1 = vunpack.i.h.bf16 %v6600_v7 }
 0x1af   : > { %13214 = vst [vmem:[#allocation290_spill] sm:$0xff] %v9452_v11  ;;  %13215 = vst [vmem:[#allocation291_spill] sm:$0xff] %v9456_v41  ;;  %v6605_v41 = vpop.permute.xlu1 %6604  ;;  %v2321_v47 = vsel %vm724_vm0, %v2318_v49, %v2320_v19  ;;  %v2283_v11 = vmul.f32 %v6592_v4, %v7210_v42  ;;  %v2282_v16 = vmul.f32 %v6591_v30, %v7210_v42  ;;  %v6601_v17 = vunpack.i.l.bf16 %v6600_v7 }
 0x1b0   : > { %13216 = vst [vmem:[#allocation292_spill] sm:$0xff] %v9465_v10  ;;  %v2279_v56 = vmul.f32 %v6582_v51, %v7210_v42  ;;  %13217 = vst [vmem:[#allocation293_spill] sm:$0xff] %v9470_v60  ;;  %v2373_v21 = vadd.f32 %v2321_v47, %v13220_v52  ;;  %v6607_v38 = vunpack.i.h.bf16 %v6605_v41  ;;  %v6606_v63 = vunpack.i.l.bf16 %v6605_v41 }
 0x1b1   : > { %13218 = vst [vmem:[#allocation294_spill] sm:$0xff] %v9479_v37  ;;  %13219 = vst [vmem:[#allocation295_spill] sm:$0xff] %v9483_v53  ;;  %v13222_v53 = vld [vmem:[#allocation27_spill] sm:$0xff]  ;;  %v2324_v20 = vrot.slane %v2283_v11, 1  ;;  %v2287_v11 = vmul.f32 %v6602_v1, %v7210_v42 }
 0x1b2   : > { %v2317_v51 = vrot.slane %v2279_v56, 1  ;;  %v9493_v54 = vadd.f32 %v13222_v53, %v2373_v21  ;;  %v2289_v4 = vmul.f32 %v6607_v38, %v7210_v42  ;;  %v2288_v34 = vmul.f32 %v6606_v63, %v7210_v42  ;;  %v13225_v21 = vld [vmem:[#allocation43_spill] sm:$0xff] }
 0x1b3   : > { %v6615_v55 = vpop.permute.xlu1 %6614  ;;  %v2327_v41 = vsel %vm724_vm0, %v2324_v20, %v2326_v43  ;;  %v2322_v53 = vrot.slane %v2282_v16, 1  ;;  %v2332_v26 = vrot.slane %v2287_v11, 1 }
 0x1b4   : > { %v2319_v6 = vsel %vm724_vm0, %v2317_v51, %v2318_v49  ;;  %v2329_v49 = vsel %vm724_vm0, %v2326_v43, %v2328_v50  ;;  %v2376_v30 = vadd.f32 %v2327_v41, %v13225_v21  ;;  %v2334_v51 = vrot.slane %v2288_v34, 1  ;;  %v13229_v43 = vld [vmem:[#allocation42_spill] sm:$0xff] }
 0x1b5   : > { %v2372_v56 = vadd.f32 %v2319_v6, %v13221_v61  ;;  %v13224_v61 = vld [vmem:[#allocation41_spill] sm:$0xff]  ;;  %v2336_v6 = vrot.slane %v2289_v4, 1  ;;  %v2323_v38 = vsel %vm724_vm0, %v2320_v19, %v2322_v53  ;;  %v2325_v63 = vsel %vm724_vm0, %v2322_v53, %v2324_v20  ;;  %v13232_v34 = vld [vmem:[#allocation10_spill] sm:$0xff]  ;;  %v13234_v53 = vld [vmem:[#allocation35_spill] sm:$0xff] }
 0x1b6   : > { %v2377_v47 = vadd.f32 %v2329_v49, %v13224_v61  ;;  %v13228_v49 = vld [vmem:[#allocation2_spill] sm:$0xff]  ;;  %v2375_v16 = vadd.f32 %v2325_v63, %v13229_v43  ;;  %v9514_v1 = vadd.f32 %v13230_v13, %v2376_v30  ;;  %v2335_v41 = vsel %vm724_vm0, %v2332_v26, %v2334_v51  ;;  %v13237_v30 = vld [vmem:[#allocation32_spill] sm:$0xff] }
 0x1b7   : > { %v9497_v52 = vadd.f32 %v13223_v5, %v2372_v56  ;;  %v6610_v5 = vpop.permute.xlu0 %6609  ;;  %v13226_v56 = vld [vmem:[#allocation29_spill] sm:$0xff]  ;;  %v2374_v61 = vadd.f32 %v2323_v38, %v13228_v49  ;;  %v2337_v4 = vsel %vm724_vm0, %v2334_v51, %v2336_v6  ;;  %v6617_v21 = vunpack.i.h.bf16 %v6615_v55  ;;  %v6625_v19 = vpop.permute.xlu1 %6624  ;;  %v13236_v38 = vld [vmem:[#allocation7_spill] sm:$0xff] }
 0x1b8   : > { %v9507_v59 = vadd.f32 %v13226_v56, %v2377_v47  ;;  %13231 = vst [vmem:[#allocation40_spill] sm:$0xff] %v9514_v1  ;;  %v2381_v7 = vadd.f32 %v2337_v4, %v13232_v34  ;;  %v2286_v47 = vmul.f32 %v6601_v17, %v7210_v42  ;;  %v13233_v56 = vld [vmem:[#allocation17_spill] sm:$0xff]  ;;  %v9524_v11 = vadd.f32 %v13234_v53, %v2375_v16  ;;  %v13239_v34 = vld [vmem:[#allocation26_spill] sm:$0xff]  ;;  %v13241_v53 = vld [vmem:[#allocation8_spill] sm:$0xff] }
 0x1b9   : > { %v9521_v20 = vadd.f32 %v13233_v56, %v2374_v61  ;;  %v2380_v63 = vadd.f32 %v2335_v41, %v13236_v38  ;;  %v6616_v13 = vunpack.i.l.bf16 %v6615_v55  ;;  %v2293_v4 = vmul.f32 %v6617_v21, %v7210_v42  ;;  %v13242_v38 = vld [vmem:[#allocation11_spill] sm:$0xff] }
 0x1ba   : > { %13227 = vst [vmem:[#allocation3_spill] sm:$0xff] %v9507_v59  ;;  %13235 = vst [vmem:[#allocation27_spill] sm:$0xff] %v9524_v11  ;;  %v9528_v49 = vadd.f32 %v13237_v30, %v2381_v7  ;;  %v2330_v43 = vrot.slane %v2286_v47, 1  ;;  %v6612_v51 = vunpack.i.h.bf16 %v6610_v5  ;;  %v6611_v61 = vunpack.i.l.bf16 %v6610_v5 }
 0x1bb   : > { %v9532_v17 = vadd.f32 %v13239_v34, %v2380_v63  ;;  %v2292_v59 = vmul.f32 %v6616_v13, %v7210_v42  ;;  %v6627_v56 = vunpack.i.h.bf16 %v6625_v19  ;;  %v6620_v1 = vpop.permute.xlu0 %6619  ;;  %v2344_v55 = vrot.slane %v2293_v4, 1 }
 0x1bc   : > { %13238 = vst [vmem:[#allocation19_spill] sm:$0xff] %v9528_v49  ;;  %v2331_v16 = vsel %vm724_vm0, %v2328_v50, %v2330_v43  ;;  %v2333_v41 = vsel %vm724_vm0, %v2330_v43, %v2332_v26  ;;  %v2291_v7 = vmul.f32 %v6612_v51, %v7210_v42  ;;  %v2290_v63 = vmul.f32 %v6611_v61, %v7210_v42  ;;  %v13244_v50 = vld [vmem:[#allocation37_spill] sm:$0xff]  ;;  %v13246_v51 = vld [vmem:[#allocation14_spill] sm:$0xff] }
 0x1bd   : > { %13240 = vst [vmem:[#allocation41_spill] sm:$0xff] %v9532_v17  ;;  %v2378_v47 = vadd.f32 %v2331_v16, %v13241_v53  ;;  %v2379_v21 = vadd.f32 %v2333_v41, %v13242_v38  ;;  %v2342_v30 = vrot.slane %v2292_v59, 1  ;;  %v2297_v13 = vmul.f32 %v6627_v56, %v7210_v42  ;;  %v13243_v17 = vld [vmem:[#allocation31_spill] sm:$0xff]  ;;  %v13248_v38 = vld [vmem:[#allocation49_spill] sm:$0xff] }
 0x1be   : > { %v2340_v34 = vrot.slane %v2291_v7, 1  ;;  %v6626_v5 = vunpack.i.l.bf16 %v6625_v19  ;;  %v6622_v49 = vunpack.i.h.bf16 %v6620_v1  ;;  %v2338_v4 = vrot.slane %v2290_v63, 1  ;;  %v13247_v7 = vld [vmem:[#allocation45_spill] sm:$0xff] }
 0x1bf   : > { %v9543_v11 = vadd.f32 %v13243_v17, %v2378_v47  ;;  %v9546_v26 = vadd.f32 %v13244_v50, %v2379_v21  ;;  %v2345_v43 = vsel %vm724_vm0, %v2342_v30, %v2344_v55  ;;  %v2352_v41 = vrot.slane %v2297_v13, 1  ;;  %v6635_v47 = vpop.permute.xlu1 %6634  ;;  %v13250_v63 = vld [vmem:[#allocation9_spill] sm:$0xff] }
 0x1c0   : > { %v2385_v16 = vadd.f32 %v2345_v43, %v13246_v51  ;;  %v2343_v59 = vsel %vm724_vm0, %v2340_v34, %v2342_v30  ;;  %v2296_v61 = vmul.f32 %v6626_v5, %v7210_v42  ;;  %v2339_v56 = vsel %vm724_vm0, %v2336_v6, %v2338_v4  ;;  %v13251_v43 = vld [vmem:[#allocation44_spill] sm:$0xff]  ;;  %v13252_v5 = vld [vmem:[#allocation51_spill] sm:$0xff] }
 0x1c1   : > { %13245 = vst [vmem:[#allocation43_spill] sm:$0xff] %v9546_v26  ;;  %v2341_v19 = vsel %vm724_vm0, %v2338_v4, %v2340_v34  ;;  %v2384_v17 = vadd.f32 %v2343_v59, %v13247_v7  ;;  %v2295_v53 = vmul.f32 %v6622_v49, %v7210_v42  ;;  %v2382_v50 = vadd.f32 %v2339_v56, %v13250_v63  ;;  %v13254_v4 = vld [vmem:[#allocation36_spill] sm:$0xff]  ;;  %v13256_v49 = vld [vmem:[#allocation53_spill] sm:$0xff]  ;;  %v13270_v56 = vld [vmem:[#allocation74_spill] sm:$0xff] }
 0x1c2   : > { %v9557_v21 = vadd.f32 %v13248_v38, %v2385_v16  ;;  %v2383_v51 = vadd.f32 %v2341_v19, %v13251_v43  ;;  %v2350_v30 = vrot.slane %v2296_v61, 1  ;;  %v6581_v13 = vunpack.i.l.bf16 %v9397_v31  ;;  %v13258_v19 = vld [vmem:[#allocation13_spill] sm:$0xff] }
 0x1c3   : > { %v9563_v26 = vadd.f32 %v13252_v5, %v2384_v17  ;;  %v2348_v6 = vrot.slane %v2295_v53, 1  ;;  %v6621_v34 = vunpack.i.l.bf16 %v6620_v1  ;;  %v9566_v59 = vadd.f32 %v13254_v4, %v2382_v50  ;;  %v13259_v1 = vld [vmem:[#allocation16_spill] sm:$0xff] }
 0x1c4   : > { %13249 = vst [vmem:[#allocation29_spill] sm:$0xff] %v9557_v21  ;;  %v9569_v7 = vadd.f32 %v13256_v49, %v2383_v51  ;;  %v2353_v16 = vsel %vm724_vm0, %v2350_v30, %v2352_v41  ;;  %v6637_v38 = vunpack.i.h.bf16 %v6635_v47  ;;  %v6636_v43 = vunpack.i.l.bf16 %v6635_v47  ;;  %v13261_v5 = vld [vmem:[#allocation60_spill] sm:$0xff] }
 0x1c5   : > { %13253 = vst [vmem:[#allocation2_spill] sm:$0xff] %v9563_v26  ;;  %13255 = vst [vmem:[#allocation42_spill] sm:$0xff] %v9566_v59  ;;  %v2389_v61 = vadd.f32 %v2353_v16, %v13258_v19  ;;  %v2351_v31 = vsel %vm724_vm0, %v2348_v6, %v2350_v30  ;;  %v2294_v17 = vmul.f32 %v6621_v34, %v7210_v42  ;;  %v13264_v34 = vld [vmem:[#allocation62_spill] sm:$0xff]  ;;  %v13266_v47 = vrot.slane %v8772_v33, 1  ;;  %v13284_v26 = vld [vmem:[#allocation76_spill] sm:$0xff] }
 0x1c6   : > { %13257 = vst [vmem:[#allocation22_spill] sm:$0xff] %v9569_v7  ;;  %v2388_v63 = vadd.f32 %v2351_v31, %v13259_v1  ;;  %v9579_v50 = vmul.f32 %v6637_v38, %v12943_v3  ;;  %v9583_v41 = vmul.f32 %v6581_v13, %v13034_v28  ;;  %v9589_v30 = vmul.f32 %v6581_v13, %v9057_v44  ;;  %v13282_v28 = vld [vmem:[#allocation73_spill] sm:$0xff] }
 0x1c7   : > { %v9586_v4 = vadd.f32 %v13261_v5, %v2389_v61  ;;  %v2346_v49 = vrot.slane %v2294_v17, 1  ;;  %v9595_v19 = vmul.f32 %v6637_v38, %v7210_v42  ;;  %v13267_v31 = vrot.slane %v8776_v48, 1  ;;  %v13268_v5 = vld [vmem:[#allocation70_spill] sm:$0xff]  ;;  %v13272_v38 = vld [vmem:[#allocation12_spill] sm:$0xff] }
 0x1c8   : > { %13260 = vst [vmem:[#allocation10_spill] sm:$0xff] %v9583_v41  ;;  %13263 = vst [vmem:[#allocation35_spill] sm:$0xff] %v9589_v30  ;;  %v9592_v16 = vadd.f32 %v13264_v34, %v2388_v63  ;;  %v13269_v53 = vrot.slane %v13268_v5, 1  ;;  %v13271_v63 = vrot.slane %v13270_v56, 1  ;;  %v13283_v21 = vrot.slane %v13282_v28, 1 }
 0x1c9   : > { %13262 = vst [vmem:[#allocation17_spill] sm:$0xff] %v9586_v4  ;;  %v1561_v1 = vsel %vm724_vm0, %v13267_v31, %v13266_v47  ;;  %v2347_v51 = vsel %vm724_vm0, %v2344_v55, %v2346_v49  ;;  %v2349_v61 = vsel %vm724_vm0, %v2346_v49, %v2348_v6  ;;  %v13273_v4 = vld [vmem:[#allocation28_spill] sm:$0xff]  ;;  %v9614_v47 = vmul.f32 %v6636_v43, %v12943_v3  ;;  %v13274_v55 = vld [vmem:[#allocation71_spill] sm:$0xff] }
 0x1ca   : > { %13265 = vst [vmem:[#allocation7_spill] sm:$0xff] %v9592_v16  ;;  %v2470_v34 = vsel %vm724_vm0, %v13271_v63, %v13269_v53  ;;  %v2386_v37 = vadd.f32 %v2347_v51, %v13272_v38  ;;  %v2387_v16 = vadd.f32 %v2349_v61, %v13273_v4  ;;  %v1612_v31 = vadd.f32 %v1561_v1, %v13274_v55  ;;  %v13275_v51 = vld [vmem:[#allocation47_spill] sm:$0xff] }
 0x1cb   : > { %v2521_v48 = vadd.f32 %v2470_v34, %v9521_v20  ;;  %v9619_v6 = vmul.f32 %v9040_v27, %v8599_v35  ;;  %v9623_v49 = vmul.f32 %v9159_v18, %v8599_v35  ;;  %v9627_v53 = vmul.f32 %v8743_v22, %v9057_v44  ;;  %v13277_v20 = vld [vmem:[#allocation67_spill] sm:$0xff] }
 0x1cc   : > { %v9630_v4 = vadd.f32 %v13275_v51, %v2386_v37  ;;  %v9633_v61 = vadd.f32 %v13277_v20, %v2387_v16  ;;  %v12637_v1 = vrot.slane %v9614_v47, 1  ;;  %v9638_v63 = vmul.f32 %v8741_v12, %v9057_v44  ;;  %v13286_v37 = vld [vmem:[#allocation18_spill] sm:$0xff] }
 0x1cd   : > { %v13279_v34 = vrot.slane %v9202_v24, 1  ;;  %v13280_v38 = vrot.slane %v9088_v32, 1  ;;  %v13281_v16 = vrot.slane %v9579_v50, 1  ;;  %v13285_v32 = vrot.slane %v13284_v26, 1 }
 0x1ce   : > { %13276 = vst [vmem:[#allocation32_spill] sm:$0xff] %v9630_v4  ;;  %13278 = vst [vmem:[#allocation26_spill] sm:$0xff] %v9633_v61  ;;  %v12641_v51 = vrot.slane %v9595_v19, 1  ;;  %v13321_v59 = vrot.slane %v9101_v9, 1 }
 0x1cf   : > { %v1809_v55 = vsel %vm724_vm0, %v13280_v38, %v13279_v34  ;;  %v2714_v20 = vsel %vm724_vm0, %v12637_v1, %v13281_v16  ;;  %v4359_v34 = vsel %vm724_vm0, %v13285_v32, %v13283_v21  ;;  %v9660_v38 = vmul.f32 %v6636_v43, %v7210_v42 }
 0x1d0   : > { %v2765_v17 = vadd.f32 %v2714_v20, %v2521_v48  ;;  %v4410_v7 = vadd.f32 %v4359_v34, %v13286_v37  ;;  %v1860_v60 = vadd.f32 %v1809_v55, %v1612_v31  ;;  %v13287_v16 = vrot.slane %v9623_v49, 1 }
 0x1d1   : > { %v13288_v1 = vrot.slane %v9619_v6, 1  ;;  %v12642_v10 = vrot.slane %v9660_v38, 1  ;;  %v9672_v32 = vmul.f32 %v9159_v18, %v12831_v36  ;;  %v9675_v21 = vmul.f32 %v6581_v13, %v12943_v3 }
 0x1d2   : > { %v9679_v48 = vmul.f32 %v9040_v27, %v12831_v36  ;;  %v9683_v31 = vmul.f32 %v8743_v22, %v12898_v58  ;;  %v13292_v55 = vrot.slane %v8784_v15, 2  ;;  %v13293_v18 = vrot.slane %v8795_v25, 2 }
 0x1d3   : > { %v2825_v61 = vsel %vm724_vm0, %v13288_v1, %v13287_v16  ;;  %13289 = vst [vmem:[#allocation8_spill] sm:$0xff] %v9672_v32  ;;  %13290 = vst [vmem:[#allocation11_spill] sm:$0xff] %v9675_v21  ;;  %v9686_v1 = vmul.f32 %v6581_v13, %v12898_v58  ;;  %v13294_v20 = vrot.slane %v9638_v63, 2  ;;  %v4470_v13 = vsel %vm724_vm0, %v12642_v10, %v12641_v51  ;;  %v13305_v10 = vld [vmem:[#allocation21_spill] sm:$0xff] }
 0x1d4   : > { %v2876_v43 = vadd.f32 %v2825_v61, %v2765_v17  ;;  %v1932_v37 = vsel %vm1925_vm1, %v13293_v18, %v13292_v55  ;;  %v13295_v17 = vrot.slane %v9627_v53, 2  ;;  %v9700_v61 = vmul.f32 %v8741_v12, %v12898_v58  ;;  %v6630_v55 = vpop.permute.xlu0 %6629 }
 0x1d5   : > { %13291 = vst [vmem:[#allocation31_spill] sm:$0xff] %v9686_v1  ;;  %v2782_v16 = vmul.f32 %v9042_v39, %v8599_v35  ;;  %v13298_v12 = vrot.slane %v9214_v57, 2  ;;  %v4578_v51 = vrot.slane %v9679_v48, 1  ;;  %v9725_v34 = vmul.f32 %v8591_v45, %v9057_v44  ;;  %v13303_v48 = vld [vmem:[#allocation77_spill] sm:$0xff] }
 0x1d6   : > { %v2936_v27 = vsel %vm1925_vm1, %v13295_v17, %v13294_v20  ;;  %13296 = vst [vmem:[#allocation37_spill] sm:$0xff] %v9700_v61  ;;  %v9712_v17 = vadd.f32 %v1932_v37, %v1860_v60  ;;  %v4521_v18 = vadd.f32 %v4470_v13, %v4410_v7  ;;  %v6632_v37 = vunpack.i.h.bf16 %v6630_v55 }
 0x1d7   : > { %v2987_v22 = vadd.f32 %v2936_v27, %v2876_v43  ;;  %v13299_v43 = vrot.slane %v9075_v29, 2  ;;  %13301 = vst [vmem:[#allocation49_spill] sm:$0xff] %v9725_v34  ;;  %v6631_v20 = vunpack.i.l.bf16 %v6630_v55  ;;  %v13306_v29 = vrot.slane %v13305_v10, 1 }
 0x1d8   : > { %13297 = vst [vmem:[#allocation14_spill] sm:$0xff] %v9712_v17  ;;  %v2671_v7 = vmul.f32 %v6632_v37, %v12943_v3  ;;  %v4427_v13 = vmul.f32 %v6632_v37, %v7210_v42  ;;  %v13307_v55 = vrot.slane %v13270_v56, 1  ;;  %v9750_v10 = vmul.f32 %v8591_v45, %v12898_v58 }
 0x1d9   : > { %v3054_v27 = vsel %vm1925_vm1, %v13299_v43, %v13298_v12  ;;  %v13302_v12 = vrot.slane %v9672_v32, 1  ;;  %v2820_v43 = vrot.slane %v2782_v16, 1  ;;  %v4538_v16 = vmul.f32 %v9042_v39, %v12831_v36  ;;  %v13315_v39 = vld [vmem:[#allocation33_spill] sm:$0xff] }
 0x1da   : > { %v9719_v25 = vadd.f32 %v3054_v27, %v2987_v22  ;;  %v13304_v27 = vrot.slane %v13303_v48, 1  ;;  %13309 = vst [vmem:[#allocation9_spill] sm:$0xff] %v9750_v10  ;;  %v2709_v37 = vrot.slane %v2671_v7, 1  ;;  %v13310_v56 = vrot.slane %v8377_v2, 1  ;;  %v13311_v48 = vld [vmem:[#allocation57_spill] sm:$0xff] }
 0x1db   : > { %v4581_v22 = vsel %vm724_vm0, %v4578_v51, %v13302_v12  ;;  %v2670_v12 = vmul.f32 %v6631_v20, %v12943_v3  ;;  %v13312_v17 = vrot.slane %v13311_v48, 1  ;;  %v4426_v7 = vmul.f32 %v6631_v20, %v7210_v42 }
 0x1dc   : > { %13300 = vst [vmem:[#allocation45_spill] sm:$0xff] %v9719_v25  ;;  %v2466_v30 = vsel %vm724_vm0, %v13306_v29, %v13304_v27  ;;  %v13308_v60 = vmov %v13304_v27  ;;  %v4465_v27 = vrot.slane %v4427_v13, 1  ;;  %v6645_v13 = vpop.permute.xlu1 %6644  ;;  %v4632_v32 = vadd.f32 %v4581_v22, %v4521_v18 }
 0x1dd   : > { %v2468_v41 = vsel %vm724_vm0, %v13308_v60, %v13307_v55  ;;  %v2519_v25 = vadd.f32 %v2466_v30, %v9497_v52  ;;  %v4355_v60 = vsel %vm724_vm0, %v13312_v17, %v13310_v56  ;;  %v13313_v52 = vrot.slane %v13284_v26, 1 }
 0x1de   : > { %v2520_v29 = vadd.f32 %v2468_v41, %v9493_v54  ;;  %v13314_v30 = vmov %v13310_v56  ;;  %v2708_v45 = vrot.slane %v2670_v12, 1  ;;  %v4408_v4 = vadd.f32 %v4355_v60, %v13315_v39  ;;  %v13316_v54 = vld [vmem:[#allocation30_spill] sm:$0xff] }
 0x1df   : > { %v4357_v55 = vsel %vm724_vm0, %v13314_v30, %v13313_v52  ;;  %v13317_v26 = vrot.slane %v9700_v61, 2  ;;  %v13318_v2 = vrot.slane %v9683_v31, 2  ;;  %v4576_v56 = vrot.slane %v4538_v16, 1  ;;  %v13407_v61 = vld [vmem:[#allocation92_spill] sm:$0xff] }
 0x1e0   : > { %v4409_v41 = vadd.f32 %v4357_v55, %v13316_v54  ;;  %v2710_v39 = vsel %vm724_vm0, %v2708_v45, %v2709_v37  ;;  %v4464_v60 = vrot.slane %v4426_v7, 1  ;;  %v13319_v20 = vrot.slane %v9619_v6, 1  ;;  %v13344_v54 = vld [vmem:[#allocation89_spill] sm:$0xff] }
 0x1e1   : > { %v4692_v12 = vsel %vm1925_vm1, %v13318_v2, %v13317_v26  ;;  %v13320_v30 = vrot.slane %v9614_v47, 1  ;;  %v2763_v22 = vadd.f32 %v2710_v39, %v2519_v25  ;;  %v6647_v55 = vunpack.i.h.bf16 %v6645_v13 }
 0x1e2   : > { %v2823_v52 = vsel %vm724_vm0, %v2820_v43, %v13319_v20  ;;  %v2821_v26 = vsel %vm724_vm0, %v13321_v59, %v2820_v43  ;;  %v4466_v16 = vsel %vm724_vm0, %v4464_v60, %v4465_v27  ;;  %v6646_v45 = vunpack.i.l.bf16 %v6645_v13 }
 0x1e3   : > { %v2712_v18 = vsel %vm724_vm0, %v2709_v37, %v13320_v30  ;;  %v9787_v7 = vadd.f32 %v4692_v12, %v4632_v32  ;;  %v9789_v6 = vadd.f32 %v2821_v26, %v2763_v22  ;;  %v4519_v2 = vadd.f32 %v4466_v16, %v4408_v4  ;;  %v13334_v22 = vld [vmem:[#allocation158_spill] sm:$0xff] }
 0x1e4   : > { %v9792_v47 = vmul.f32 %v6647_v55, %v12943_v3  ;;  %v4579_v25 = vsel %vm724_vm0, %v4576_v56, %v4578_v51  ;;  %v13325_v37 = vrot.slane %v9660_v38, 1  ;;  %v2764_v9 = vadd.f32 %v2712_v18, %v2520_v29  ;;  %v13335_v26 = vld [vmem:[#allocation150_spill] sm:$0xff] }
 0x1e5   : > { %13322 = vst [vmem:[#allocation44_spill] sm:$0xff] %v9787_v7  ;;  %13323 = vst [vmem:[#allocation51_spill] sm:$0xff] %v9789_v6  ;;  %v13326_v59 = vrot.slane %v9107_v46, 1  ;;  %v9805_v4 = vmul.f32 %v6647_v55, %v7210_v42  ;;  %v13329_v12 = vrot.slane %v8846_v0, 1  ;;  %v13330_v51 = vrot.slane %v8883_v14, 1  ;;  %v13399_v0 = vld [vmem:[#allocation230_spill] sm:$0xff] }
 0x1e6   : > { %13324 = vst [vmem:[#allocation36_spill] sm:$0xff] %v9792_v47  ;;  %v4468_v39 = vsel %vm724_vm0, %v4465_v27, %v13325_v37  ;;  %v12654_v32 = vrot.slane %v9792_v47, 1  ;;  %v13331_v27 = vrot.slane %v8434_v40, 1  ;;  %v13332_v29 = vrot.slane %v8452_v62, 1 }
 0x1e7   : > { %v4577_v43 = vsel %vm724_vm0, %v13326_v59, %v4576_v56  ;;  %13328 = vst [vmem:[#allocation13_spill] sm:$0xff] %v9805_v4  ;;  %v1569_v38 = vsel %vm724_vm0, %v13330_v51, %v13329_v12  ;;  %v9818_v56 = vmul.f32 %v6646_v45, %v12943_v3  ;;  %v9822_v60 = vmul.f32 %v9112_v8, %v8599_v35  ;;  %v13338_v59 = vld [vmem:[#allocation252_spill] sm:$0xff]  ;;  %v13340_v12 = vld [vmem:[#allocation221_spill] sm:$0xff] }
 0x1e8   : > { %v9801_v13 = vadd.f32 %v4577_v43, %v4519_v2  ;;  %v2478_v46 = vsel %vm724_vm0, %v13332_v29, %v13331_v27  ;;  %v9826_v20 = vmul.f32 %v9243_v23, %v8599_v35  ;;  %v4520_v30 = vadd.f32 %v4468_v39, %v4409_v41  ;;  %v13337_v2 = vld [vmem:[#allocation83_spill] sm:$0xff] }
 0x1e9   : > { %v2525_v18 = vadd.f32 %v2478_v46, %v9543_v11  ;;  %v9831_v55 = vmul.f32 %v13334_v22, %v9057_v44  ;;  %v9835_v16 = vmul.f32 %v13335_v26, %v9057_v44  ;;  %v1616_v37 = vadd.f32 %v1569_v38, %v13337_v2  ;;  %v13342_v46 = vld [vmem:[#allocation88_spill] sm:$0xff] }
 0x1ea   : > { %13327 = vst [vmem:[#allocation53_spill] sm:$0xff] %v9801_v13  ;;  %13333 = vst [vmem:[#allocation16_spill] sm:$0xff] %v9826_v20  ;;  %v13339_v43 = vrot.slane %v13338_v59, 1  ;;  %v13341_v51 = vrot.slane %v13340_v12, 1  ;;  %v12655_v41 = vrot.slane %v9818_v56, 1  ;;  %v2830_v29 = vrot.slane %v9822_v60, 1 }
 0x1eb   : > { %13336 = vst [vmem:[#allocation60_spill] sm:$0xff] %v9835_v16  ;;  %v13343_v48 = vrot.slane %v13342_v46, 1  ;;  %v13345_v17 = vrot.slane %v13344_v54, 1  ;;  %v9853_v2 = vmul.f32 %v6646_v45, %v7210_v42  ;;  %v12656_v39 = vrot.slane %v9835_v16, 2  ;;  %v13346_v60 = vld [vmem:[#allocation20_spill] sm:$0xff]  ;;  %v13375_v16 = vld [vmem:[#allocation226_spill] sm:$0xff] }
 0x1ec   : > { %v1817_v27 = vsel %vm724_vm0, %v13341_v51, %v13339_v43  ;;  %v2722_v43 = vsel %vm724_vm0, %v12655_v41, %v12654_v32  ;;  %v12657_v51 = vrot.slane %v9831_v55, 2  ;;  %v2875_v7 = vadd.f32 %v2823_v52, %v2764_v9 }
 0x1ed   : > { %v4367_v38 = vsel %vm724_vm0, %v13345_v17, %v13343_v48  ;;  %v1864_v21 = vadd.f32 %v1817_v27, %v1616_v37  ;;  %v2769_v13 = vadd.f32 %v2722_v43, %v2525_v18  ;;  %v12658_v48 = vrot.slane %v9853_v2, 1  ;;  %v13357_v27 = vld [vmem:[#allocation166_spill] sm:$0xff] }
 0x1ee   : > { %v4414_v11 = vadd.f32 %v4367_v38, %v13346_v60  ;;  %v13347_v17 = vrot.slane %v9627_v53, 2  ;;  %v13348_v45 = vrot.slane %v9725_v34, 2  ;;  %v13349_v6 = vrot.slane %v9683_v31, 2 }
 0x1ef   : > { %v13350_v32 = vrot.slane %v9750_v10, 2  ;;  %v13351_v38 = vrot.slane %v9826_v20, 1  ;;  %v9881_v9 = vmul.f32 %v9243_v23, %v12831_v36  ;;  %v9883_v53 = vadd.f32 %v4579_v25, %v4520_v30  ;;  %v13372_v10 = vld [vmem:[#allocation138_spill] sm:$0xff] }
 0x1f0   : > { %v2934_v1 = vsel %vm1925_vm1, %v13348_v45, %v13347_v17  ;;  %v9887_v37 = vmul.f32 %v13334_v22, %v12898_v58  ;;  %v9891_v31 = vmul.f32 %v13335_v26, %v12898_v58  ;;  %v13358_v43 = vrot.slane %v13357_v27, 2  ;;  %v13362_v45 = vld [vmem:[#allocation219_spill] sm:$0xff] }
 0x1f1   : > { %v9874_v41 = vsel %vm1925_vm1, %v13350_v32, %v13349_v6  ;;  %v2833_v52 = vsel %vm724_vm0, %v2830_v29, %v13351_v38  ;;  %13352 = vst [vmem:[#allocation62_spill] sm:$0xff] %v9881_v9  ;;  %v13355_v6 = vld [vmem:[#allocation162_spill] sm:$0xff]  ;;  %v2944_v23 = vsel %vm1925_vm1, %v12657_v51, %v12656_v39  ;;  %v13359_v25 = vrot.slane %v9805_v4, 1 }
 0x1f2   : > { %v2880_v18 = vadd.f32 %v2833_v52, %v2769_v13  ;;  %13353 = vst [vmem:[#allocation70_spill] sm:$0xff] %v9887_v37  ;;  %13354 = vst [vmem:[#allocation74_spill] sm:$0xff] %v9891_v31  ;;  %v13356_v32 = vrot.slane %v13355_v6, 2  ;;  %v9910_v30 = vmul.f32 %v9112_v8, %v12831_v36  ;;  %v9912_v22 = vadd.f32 %v2934_v1, %v2875_v7  ;;  %v13363_v52 = vld [vmem:[#allocation254_spill] sm:$0xff]  ;;  %v13383_v6 = vld [vmem:[#allocation64_spill] sm:$0xff] }
 0x1f3   : > { %v4478_v13 = vsel %vm724_vm0, %v12658_v48, %v13359_v25  ;;  %v9918_v38 = vmul.f32 %v13362_v45, %v8599_v35  ;;  %v13367_v8 = vld [vmem:[#allocation134_spill] sm:$0xff]  ;;  %v13373_v34 = vrot.slane %v13372_v10, 1  ;;  %v13376_v20 = vrot.slane %v13375_v16, 1 }
 0x1f4   : > { %v1940_v60 = vsel %vm1925_vm1, %v13358_v43, %v13356_v32  ;;  %13360 = vst [vmem:[#allocation12_spill] sm:$0xff] %v9912_v22  ;;  %v2991_v17 = vadd.f32 %v2944_v23, %v2880_v18  ;;  %v13364_v32 = vrot.slane %v13363_v52, 2  ;;  %v13365_v43 = vld [vmem:[#allocation222_spill] sm:$0xff]  ;;  %v9928_v48 = vmul.f32 %v13367_v8, %v9057_v44  ;;  %v6640_v22 = vpop.permute.xlu0 %6639 }
 0x1f5   : > { %v9914_v26 = vadd.f32 %v1940_v60, %v1864_v21  ;;  %v13366_v39 = vrot.slane %v13365_v43, 2  ;;  %v13368_v21 = vld [vmem:[#allocation127_spill] sm:$0xff]  ;;  %v4525_v18 = vadd.f32 %v4478_v13, %v4414_v11  ;;  %v13374_v52 = vrot.slane %v13340_v12, 1 }
 0x1f6   : > { %v9932_v1 = vmul.f32 %v13368_v21, %v9057_v44  ;;  %v13377_v11 = vld [vmem:[#allocation135_spill] sm:$0xff]  ;;  %v2828_v47 = vrot.slane %v9918_v38, 1  ;;  %v13384_v59 = vrot.slane %v13383_v6, 1  ;;  %v6642_v38 = vunpack.i.h.bf16 %v6640_v22 }
 0x1f7   : > { %13361 = vst [vmem:[#allocation28_spill] sm:$0xff] %v9914_v26  ;;  %v3062_v51 = vsel %vm1925_vm1, %v13366_v39, %v13364_v32  ;;  %v13370_v32 = vld [vmem:[#allocation133_spill] sm:$0xff]  ;;  %v13378_v13 = vrot.slane %v13377_v11, 2  ;;  %v9973_v39 = vmul.f32 %v13362_v45, %v12831_v36  ;;  %v13389_v45 = vld [vmem:[#allocation227_spill] sm:$0xff]  ;;  %v13400_v40 = vrot.slane %v13399_v0, 1 }
 0x1f8   : > { %v9934_v7 = vadd.f32 %v3062_v51, %v2991_v17  ;;  %v13371_v25 = vrot.slane %v13370_v32, 1  ;;  %v1815_v51 = vsel %vm724_vm0, %v13376_v20, %v13374_v52  ;;  %v13379_v17 = vld [vmem:[#allocation140_spill] sm:$0xff]  ;;  %v2939_v12 = vrot.slane %v9932_v1, 2  ;;  %v13413_v0 = vld [vmem:[#allocation27_spill] sm:$0xff] }
 0x1f9   : > { %v13380_v60 = vrot.slane %v13379_v17, 2  ;;  %v13382_v20 = vrot.slane %v9910_v30, 1  ;;  %v13386_v1 = vrot.slane %v9891_v31, 2  ;;  %v13394_v31 = vld [vmem:[#allocation68_spill] sm:$0xff] }
 0x1fa   : > { %13369 = vst [vmem:[#allocation71_spill] sm:$0xff] %v9934_v7  ;;  %v1565_v4 = vsel %vm724_vm0, %v13373_v34, %v13371_v25  ;;  %v13381_v25 = vrot.slane %v9881_v9, 1  ;;  %v13387_v7 = vrot.slane %v9887_v37, 2  ;;  %v13403_v37 = vld [vmem:[#allocation84_spill] sm:$0xff] }
 0x1fb   : > { %v9954_v23 = vsel %vm1925_vm1, %v13380_v60, %v13378_v13  ;;  %v13385_v60 = vrot.slane %v13268_v5, 1  ;;  %v9990_v5 = vmul.f32 %v13368_v21, %v12898_v58  ;;  %v2831_v21 = vsel %vm724_vm0, %v2828_v47, %v2830_v29 }
 0x1fc   : > { %v4589_v52 = vsel %vm724_vm0, %v13382_v20, %v13381_v25  ;;  %v9982_v26 = vsel %vm1925_vm1, %v13387_v7, %v13386_v1  ;;  %v9986_v25 = vmul.f32 %v13367_v8, %v12898_v58  ;;  %v10001_v7 = vmul.f32 %v6642_v38, %v7210_v42 }
 0x1fd   : > { %v2472_v13 = vsel %vm724_vm0, %v13385_v60, %v13384_v59  ;;  %v9975_v34 = vadd.f32 %v4589_v52, %v4525_v18  ;;  %v13388_v59 = vrot.slane %v13365_v43, 2  ;;  %v13390_v18 = vrot.slane %v13389_v45, 2 }
 0x1fe   : > { %v2675_v52 = vmul.f32 %v6642_v38, %v12943_v3  ;;  %v13391_v60 = vrot.slane %v13372_v10, 1  ;;  %v13392_v8 = vrot.slane %v8772_v33, 1  ;;  %v13393_v43 = vrot.slane %v9928_v48, 2 }
 0x1ff   : > { %v9997_v20 = vsel %vm1925_vm1, %v13390_v18, %v13388_v59  ;;  %v13395_v59 = vrot.slane %v13394_v31, 1  ;;  %v13396_v18 = vrot.slane %v13282_v28, 1  ;;  %v13397_v38 = vrot.slane %v8883_v14, 1 }
 0x200   : > { %v1563_v1 = vsel %vm724_vm0, %v13392_v8, %v13391_v60  ;;  %v2940_v9 = vsel %vm1925_vm1, %v13393_v43, %v2939_v12  ;;  %v13398_v10 = vrot.slane %v13370_v32, 1  ;;  %v2717_v8 = vrot.slane %v2675_v52, 1 }
 0x201   : > { %v4361_v46 = vsel %vm724_vm0, %v13396_v18, %v13395_v59  ;;  %v6641_v29 = vunpack.i.l.bf16 %v6640_v22  ;;  %v13401_v43 = vrot.slane %v9202_v24, 1  ;;  %v13402_v18 = vld [vmem:[#allocation65_spill] sm:$0xff]  ;;  %v1614_v32 = vadd.f32 %v1565_v4, %v13403_v37 }
 0x202   : > { %v1567_v33 = vsel %vm724_vm0, %v13398_v10, %v13397_v38  ;;  %v1613_v14 = vadd.f32 %v1563_v1, %v13402_v18  ;;  %v4473_v38 = vrot.slane %v10001_v7, 1  ;;  %v13404_v10 = vld [vmem:[#allocation85_spill] sm:$0xff]  ;;  %v13405_v22 = vrot.slane %v13375_v16, 1 }
 0x203   : > { %v1811_v58 = vsel %vm724_vm0, %v13401_v43, %v13400_v40  ;;  %v1615_v60 = vadd.f32 %v1567_v33, %v13404_v10  ;;  %v13406_v52 = vmov %v13400_v40  ;;  %v13408_v40 = vrot.slane %v13407_v61, 1  ;;  %v13414_v10 = vld [vmem:[#allocation40_spill] sm:$0xff] }
 0x204   : > { %v1813_v24 = vsel %vm724_vm0, %v13406_v52, %v13405_v22  ;;  %v13409_v43 = vrot.slane %v13383_v6, 1  ;;  %v13410_v1 = vrot.slane %v9818_v56, 1  ;;  %v1861_v37 = vadd.f32 %v1811_v58, %v1613_v14  ;;  %v13415_v52 = vld [vmem:[#allocation3_spill] sm:$0xff] }
 0x205   : > { %v13411_v7 = vrot.slane %v8452_v62, 1  ;;  %v13412_v33 = vmov %v13408_v40  ;;  %v2522_v18 = vadd.f32 %v2472_v13, %v13413_v0  ;;  %v2674_v6 = vmul.f32 %v6641_v29, %v12943_v3  ;;  %v13421_v0 = vld [vmem:[#allocation93_spill] sm:$0xff] }
 0x206   : > { %v2474_v28 = vsel %vm724_vm0, %v13409_v43, %v13408_v40  ;;  %v2720_v4 = vsel %vm724_vm0, %v2717_v8, %v13410_v1  ;;  %v13416_v40 = vld [vmem:[#allocation223_spill] sm:$0xff]  ;;  %v1862_v43 = vadd.f32 %v1813_v24, %v1614_v32  ;;  %v1863_v1 = vadd.f32 %v1815_v51, %v1615_v60 }
 0x207   : > { %v2476_v16 = vsel %vm724_vm0, %v13412_v33, %v13411_v7  ;;  %v2523_v22 = vadd.f32 %v2474_v28, %v13414_v10  ;;  %v2785_v56 = vmul.f32 %v13416_v40, %v8599_v35  ;;  %v13417_v58 = vrot.slane %v13379_v17, 2 }
 0x208   : > { %v2524_v59 = vadd.f32 %v2476_v16, %v13415_v52  ;;  %v13418_v62 = vrot.slane %v8784_v15, 2  ;;  %v13419_v14 = vrot.slane %v13357_v27, 2  ;;  %v13420_v13 = vrot.slane %v13377_v11, 2  ;;  %v13426_v27 = vld [vmem:[#allocation38_spill] sm:$0xff]  ;;  %v13427_v11 = vld [vmem:[#allocation23_spill] sm:$0xff] }
 0x209   : > { %v2715_v7 = vrot.slane %v2674_v6, 1  ;;  %v2826_v16 = vrot.slane %v2785_v56, 1  ;;  %v13422_v10 = vrot.slane %v13421_v0, 1  ;;  %v13423_v32 = vrot.slane %v13394_v31, 1  ;;  %v13431_v0 = vld [vmem:[#allocation34_spill] sm:$0xff] }
 0x20a   : > { %v1934_v61 = vsel %vm1925_vm1, %v13418_v62, %v13417_v58  ;;  %v1938_v28 = vsel %vm1925_vm1, %v13420_v13, %v13419_v14  ;;  %v2768_v33 = vadd.f32 %v2720_v4, %v2524_v59  ;;  %v13424_v17 = vrot.slane %v13344_v54, 1 }
 0x20b   : > { %v4363_v51 = vsel %vm724_vm0, %v13423_v32, %v13422_v10  ;;  %v13425_v15 = vmov %v13422_v10  ;;  %v4411_v24 = vadd.f32 %v4361_v46, %v13426_v27  ;;  %v4430_v6 = vmul.f32 %v6641_v29, %v7210_v42  ;;  %v6655_v29 = vpop.permute.xlu1 %6654 }
 0x20c   : > { %v4365_v60 = vsel %vm724_vm0, %v13425_v15, %v13424_v17  ;;  %v4412_v52 = vadd.f32 %v4363_v51, %v13427_v11  ;;  %v13428_v59 = vrot.slane %v9853_v2, 1  ;;  %v13429_v31 = vrot.slane %v9579_v50, 1 }
 0x20d   : > { %v2718_v54 = vsel %vm724_vm0, %v2715_v7, %v2717_v8  ;;  %v13430_v58 = vrot.slane %v9831_v55, 2  ;;  %v2879_v13 = vadd.f32 %v2831_v21, %v2768_v33  ;;  %v4413_v10 = vadd.f32 %v4365_v60, %v13431_v0 }
 0x20e   : > { %v4476_v4 = vsel %vm724_vm0, %v4473_v38, %v13428_v59  ;;  %v2716_v56 = vsel %vm724_vm0, %v13429_v31, %v2715_v7  ;;  %v2767_v46 = vadd.f32 %v2718_v54, %v2523_v22  ;;  %v13432_v2 = vrot.slane %v9623_v49, 1 }
 0x20f   : > { %v2942_v62 = vsel %vm1925_vm1, %v2939_v12, %v13430_v58  ;;  %v2766_v14 = vadd.f32 %v2716_v56, %v2522_v18  ;;  %v2829_v50 = vsel %vm724_vm0, %v2826_v16, %v2828_v47  ;;  %v4471_v51 = vrot.slane %v4430_v6, 1 }
 0x210   : > { %v2827_v32 = vsel %vm724_vm0, %v13432_v2, %v2826_v16  ;;  %v4541_v8 = vmul.f32 %v13416_v40, %v12831_v36  ;;  %v10098_v7 = vadd.f32 %v1934_v61, %v1861_v37  ;;  %v2878_v12 = vadd.f32 %v2829_v50, %v2767_v46  ;;  %v13438_v40 = vld [vmem:[#allocation232_spill] sm:$0xff] }
 0x211   : > { %v2877_v55 = vadd.f32 %v2827_v32, %v2766_v14  ;;  %v2990_v18 = vadd.f32 %v2942_v62, %v2879_v13  ;;  %v10101_v21 = vadd.f32 %v9954_v23, %v1862_v43  ;;  %v10103_v22 = vadd.f32 %v1938_v28, %v1863_v1  ;;  %v13454_v62 = vld [vmem:[#allocation8_spill] sm:$0xff] }
 0x212   : > { %13433 = vst [vmem:[#allocation47_spill] sm:$0xff] %v10098_v7  ;;  %v13436_v49 = vrot.slane %v9928_v48, 2  ;;  %v13437_v33 = vrot.slane %v9638_v63, 2  ;;  %v6657_v16 = vunpack.i.h.bf16 %v6655_v29  ;;  %v2989_v15 = vadd.f32 %v2940_v9, %v2878_v12  ;;  %v13459_v32 = vld [vmem:[#allocation184_spill] sm:$0xff] }
 0x213   : > { %13434 = vst [vmem:[#allocation67_spill] sm:$0xff] %v10101_v21  ;;  %13435 = vst [vmem:[#allocation73_spill] sm:$0xff] %v10103_v22  ;;  %v13439_v37 = vrot.slane %v13438_v40, 2  ;;  %v13440_v61 = vrot.slane %v9214_v57, 2  ;;  %v10116_v23 = vadd.f32 %v9997_v20, %v2990_v18  ;;  %v13442_v43 = vrot.slane %v13389_v45, 2 }
 0x214   : > { %v2938_v47 = vsel %vm1925_vm1, %v13437_v33, %v13436_v49  ;;  %v13444_v1 = vrot.slane %v9595_v19, 1  ;;  %v4524_v9 = vadd.f32 %v4476_v4, %v4413_v10  ;;  %v4582_v27 = vrot.slane %v4541_v8, 1  ;;  %v13461_v8 = vld [vmem:[#allocation98_spill] sm:$0xff] }
 0x215   : > { %v2988_v17 = vadd.f32 %v2938_v47, %v2877_v55  ;;  %v3056_v60 = vsel %vm1925_vm1, %v13440_v61, %v13439_v37  ;;  %13441 = vst [vmem:[#allocation76_spill] sm:$0xff] %v10116_v23  ;;  %v13443_v48 = vmov %v13439_v37  ;;  %v4474_v6 = vsel %vm724_vm0, %v4471_v51, %v4473_v38  ;;  %v13465_v49 = vld [vmem:[#allocation42_spill] sm:$0xff]  ;;  %v13466_v47 = vld [vmem:[#allocation231_spill] sm:$0xff] }
 0x216   : > { %v3058_v63 = vsel %vm1925_vm1, %v13443_v48, %v13442_v43  ;;  %v4472_v28 = vsel %vm724_vm0, %v13444_v1, %v4471_v51  ;;  %v10135_v45 = vadd.f32 %v9874_v41, %v9883_v53  ;;  %v10139_v19 = vadd.f32 %v9982_v26, %v9975_v34  ;;  %v13471_v48 = vld [vmem:[#allocation171_spill] sm:$0xff] }
 0x217   : > { %v10126_v11 = vadd.f32 %v3056_v60, %v2988_v17  ;;  %v10128_v57 = vadd.f32 %v3058_v63, %v2989_v15  ;;  %v13449_v59 = vrot.slane %v9910_v30, 1  ;;  %v13450_v4 = vrot.slane %v9973_v39, 1  ;;  %v13467_v15 = vld [vmem:[#allocation266_spill] sm:$0xff] }
 0x218   : > { %13447 = vst [vmem:[#allocation21_spill] sm:$0xff] %v10135_v45  ;;  %13448 = vst [vmem:[#allocation57_spill] sm:$0xff] %v10139_v19  ;;  %v10147_v56 = vmul.f32 %v6657_v16, %v12943_v3  ;;  %v4522_v53 = vadd.f32 %v4472_v28, %v4411_v24  ;;  %v6656_v54 = vunpack.i.l.bf16 %v6655_v29  ;;  %v13452_v26 = vrot.slane %v9990_v5, 2  ;;  %v13457_v24 = vld [vmem:[#allocation179_spill] sm:$0xff]  ;;  %v13470_v60 = vld [vmem:[#allocation178_spill] sm:$0xff] }
 0x219   : > { %13445 = vst [vmem:[#allocation18_spill] sm:$0xff] %v10126_v11  ;;  %13446 = vst [vmem:[#allocation77_spill] sm:$0xff] %v10128_v57  ;;  %v4587_v31 = vsel %vm724_vm0, %v13450_v4, %v13449_v59  ;;  %v13453_v34 = vrot.slane %v9986_v25, 2  ;;  %v4523_v58 = vadd.f32 %v4474_v6, %v4412_v52  ;;  %v13455_v14 = vrot.slane %v13454_v62, 1  ;;  %v13463_v52 = vld [vmem:[#allocation104_spill] sm:$0xff]  ;;  %v13475_v59 = vld [vmem:[#allocation105_spill] sm:$0xff] }
 0x21a   : > { %13451 = vst [vmem:[#allocation33_spill] sm:$0xff] %v10147_v56  ;;  %v13456_v13 = vmov %v13450_v4  ;;  %v4635_v10 = vadd.f32 %v4587_v31, %v4524_v9  ;;  %v12677_v2 = vrot.slane %v10147_v56, 1  ;;  %v13458_v29 = vrot.slane %v13457_v24, 1  ;;  %v13477_v31 = vld [vmem:[#allocation99_spill] sm:$0xff]  ;;  %v13480_v62 = vld [vmem:[#allocation238_spill] sm:$0xff] }
 0x21b   : > { %v4696_v30 = vsel %vm1925_vm1, %v13453_v34, %v13452_v26  ;;  %v4583_v46 = vsel %vm724_vm0, %v13455_v14, %v4582_v27  ;;  %v4585_v0 = vsel %vm724_vm0, %v4582_v27, %v13456_v13  ;;  %v13460_v50 = vrot.slane %v13459_v32, 1  ;;  %v13473_v27 = vld [vmem:[#allocation103_spill] sm:$0xff]  ;;  %v13478_v26 = vld [vmem:[#allocation273_spill] sm:$0xff]  ;;  %v13482_v13 = vld [vmem:[#allocation24_spill] sm:$0xff] }
 0x21c   : > { %v13462_v55 = vrot.slane %v13461_v8, 1  ;;  %v13464_v12 = vrot.slane %v13463_v52, 1  ;;  %v10177_v39 = vmul.f32 %v6656_v54, %v12943_v3  ;;  %v10181_v17 = vmul.f32 %v13466_v47, %v8599_v35  ;;  %v13519_v57 = vld [vmem:[#allocation79_spill] sm:$0xff]  ;;  %v13533_v11 = vld [vmem:[#allocation82_spill] sm:$0xff] }
 0x21d   : > { %v1577_v51 = vsel %vm724_vm0, %v13460_v50, %v13458_v29  ;;  %v10185_v40 = vmul.f32 %v13467_v15, %v8599_v35  ;;  %v4633_v37 = vadd.f32 %v4583_v46, %v4522_v53  ;;  %v10188_v61 = vmul.f32 %v6657_v16, %v7210_v42  ;;  %v13521_v19 = vld [vmem:[#allocation87_spill] sm:$0xff]  ;;  %v13560_v56 = vld [vmem:[#allocation162_spill] sm:$0xff] }
 0x21e   : > { %v2486_v18 = vsel %vm724_vm0, %v13464_v12, %v13462_v55  ;;  %v10192_v43 = vmul.f32 %v13470_v60, %v9057_v44  ;;  %v10196_v63 = vmul.f32 %v13471_v48, %v9057_v44  ;;  %v4634_v1 = vadd.f32 %v4585_v0, %v4523_v58 }
 0x21f   : > { %v2529_v33 = vadd.f32 %v2486_v18, %v13465_v49  ;;  %13468 = vst [vmem:[#allocation30_spill] sm:$0xff] %v10185_v40  ;;  %13469 = vst [vmem:[#allocation158_spill] sm:$0xff] %v10188_v61  ;;  %v12680_v28 = vrot.slane %v10177_v39, 1  ;;  %v12676_v9 = vrot.slane %v10185_v40, 1  ;;  %v13474_v6 = vrot.slane %v13473_v27, 1  ;;  %v13484_v18 = vld [vmem:[#allocation37_spill] sm:$0xff] }
 0x220   : > { %13472 = vst [vmem:[#allocation150_spill] sm:$0xff] %v10196_v63  ;;  %v13476_v4 = vrot.slane %v13475_v59, 1  ;;  %v1620_v53 = vadd.f32 %v1577_v51, %v13477_v31  ;;  %v13479_v34 = vrot.slane %v13478_v26, 1  ;;  %v13481_v14 = vrot.slane %v13480_v62, 1 }
 0x221   : > { %v2838_v58 = vrot.slane %v10181_v17, 1  ;;  %v2730_v29 = vsel %vm724_vm0, %v12680_v28, %v12677_v2  ;;  %v12678_v50 = vrot.slane %v10192_v43, 2  ;;  %v12675_v51 = vrot.slane %v10196_v63, 2 }
 0x222   : > { %v4375_v16 = vsel %vm724_vm0, %v13476_v4, %v13474_v6  ;;  %v1825_v46 = vsel %vm724_vm0, %v13481_v14, %v13479_v34  ;;  %v10221_v55 = vmul.f32 %v6656_v54, %v7210_v42  ;;  %v13483_v12 = vrot.slane %v9986_v25, 2  ;;  %v13486_v6 = vld [vmem:[#allocation70_spill] sm:$0xff] }
 0x223   : > { %v4418_v0 = vadd.f32 %v4375_v16, %v13482_v13  ;;  %v13485_v49 = vrot.slane %v13484_v18, 2  ;;  %v13487_v4 = vrot.slane %v13486_v6, 2  ;;  %v13488_v16 = vrot.slane %v9990_v5, 2  ;;  %v13491_v5 = vld [vmem:[#allocation15_spill] sm:$0xff]  ;;  %v13497_v6 = vld [vmem:[#allocation185_spill] sm:$0xff] }
 0x224   : > { %v12674_v34 = vrot.slane %v10188_v61, 1  ;;  %v2773_v14 = vadd.f32 %v2730_v29, %v2529_v33  ;;  %v1868_v20 = vadd.f32 %v1825_v46, %v1620_v53  ;;  %v2841_v25 = vsel %vm724_vm0, %v2838_v58, %v12676_v9  ;;  %v13543_v61 = vld [vmem:[#allocation248_spill] sm:$0xff] }
 0x225   : > { %v4694_v17 = vsel %vm1925_vm1, %v13485_v49, %v13483_v12  ;;  %v4698_v31 = vsel %vm1925_vm1, %v13488_v16, %v13487_v4  ;;  %v12679_v54 = vrot.slane %v10221_v55, 1  ;;  %v10242_v12 = vmul.f32 %v13467_v15, %v12831_v36 }
 0x226   : > { %v10234_v13 = vadd.f32 %v4698_v31, %v4635_v10  ;;  %v2884_v18 = vadd.f32 %v2841_v25, %v2773_v14  ;;  %v10246_v49 = vmul.f32 %v13470_v60, %v13491_v5  ;;  %v10250_v10 = vmul.f32 %v13471_v48, %v13491_v5  ;;  %v13495_v60 = vld [vmem:[#allocation180_spill] sm:$0xff]  ;;  %v13503_v14 = vld [vmem:[#allocation239_spill] sm:$0xff] }
 0x227   : > { %13490 = vst [vmem:[#allocation221_spill] sm:$0xff] %v10242_v12  ;;  %v10252_v33 = vadd.f32 %v4694_v17, %v4633_v37  ;;  %v10254_v53 = vadd.f32 %v4696_v30, %v4634_v1  ;;  %v2952_v46 = vsel %vm1925_vm1, %v12678_v50, %v12675_v51  ;;  %v10263_v15 = vmul.f32 %v13466_v47, %v12831_v36  ;;  %v13499_v1 = vld [vmem:[#allocation235_spill] sm:$0xff]  ;;  %v13501_v47 = vld [vmem:[#allocation274_spill] sm:$0xff]  ;;  %v6650_v51 = vpop.permute.xlu0 %6649 }
 0x228   : > { %13489 = vst [vmem:[#allocation83_spill] sm:$0xff] %v10234_v13  ;;  %13492 = vst [vmem:[#allocation89_spill] sm:$0xff] %v10250_v10  ;;  %v13496_v29 = vrot.slane %v13495_v60, 2  ;;  %v13498_v4 = vrot.slane %v13497_v6, 2  ;;  %v2995_v37 = vadd.f32 %v2952_v46, %v2884_v18  ;;  %v4486_v30 = vsel %vm724_vm0, %v12679_v54, %v12674_v34  ;;  %v13505_v18 = vld [vmem:[#allocation145_spill] sm:$0xff]  ;;  %v13510_v50 = vld [vmem:[#allocation154_spill] sm:$0xff] }
 0x229   : > { %13493 = vst [vmem:[#allocation20_spill] sm:$0xff] %v10252_v33  ;;  %13494 = vst [vmem:[#allocation166_spill] sm:$0xff] %v10254_v53  ;;  %v10277_v17 = vmul.f32 %v13499_v1, %v8599_v35  ;;  %v13502_v31 = vrot.slane %v13501_v47, 2  ;;  %v13504_v25 = vrot.slane %v13503_v14, 2  ;;  %v10288_v46 = vmul.f32 %v13505_v18, %v9057_v44  ;;  %v13531_v53 = vld [vmem:[#allocation157_spill] sm:$0xff] }
 0x22a   : > { %v1948_v48 = vsel %vm1925_vm1, %v13498_v4, %v13496_v29  ;;  %v13506_v29 = vld [vmem:[#allocation139_spill] sm:$0xff]  ;;  %v4529_v9 = vadd.f32 %v4486_v30, %v4418_v0  ;;  %v13511_v54 = vrot.slane %v13510_v50, 1  ;;  %v13512_v23 = vrot.slane %v13480_v62, 1  ;;  %v13542_v47 = vld [vmem:[#allocation101_spill] sm:$0xff] }
 0x22b   : > { %v10279_v16 = vadd.f32 %v1948_v48, %v1868_v20  ;;  %v3070_v41 = vsel %vm1925_vm1, %v13504_v25, %v13502_v31  ;;  %v10292_v4 = vmul.f32 %v13506_v29, %v9057_v44  ;;  %v13508_v25 = vld [vmem:[#allocation148_spill] sm:$0xff]  ;;  %v13517_v0 = vld [vmem:[#allocation155_spill] sm:$0xff]  ;;  %v13520_v21 = vrot.slane %v13519_v57, 1 }
 0x22c   : > { %v10294_v38 = vadd.f32 %v3070_v41, %v2995_v37  ;;  %v13509_v2 = vrot.slane %v13508_v25, 1  ;;  %v13513_v41 = vld [vmem:[#allocation244_spill] sm:$0xff]  ;;  %v13518_v30 = vrot.slane %v13517_v0, 2  ;;  %v10329_v20 = vmul.f32 %v13499_v1, %v12831_v36 }
 0x22d   : > { %13500 = vst [vmem:[#allocation219_spill] sm:$0xff] %v10279_v16  ;;  %v13514_v37 = vrot.slane %v13513_v41, 1  ;;  %v13515_v48 = vld [vmem:[#allocation152_spill] sm:$0xff]  ;;  %v10349_v1 = vmul.f32 %v13506_v29, %v13491_v5  ;;  %v13565_v60 = vrot.slane %v13475_v59, 1 }
 0x22e   : > { %13507 = vst [vmem:[#allocation222_spill] sm:$0xff] %v10294_v38  ;;  %v1573_v28 = vsel %vm724_vm0, %v13511_v54, %v13509_v2  ;;  %v13516_v22 = vrot.slane %v13515_v48, 2  ;;  %v13522_v2 = vrot.slane %v13521_v19, 1  ;;  %v2836_v54 = vrot.slane %v10277_v17, 1 }
 0x22f   : > { %v1823_v34 = vsel %vm724_vm0, %v13514_v37, %v13512_v23  ;;  %v2947_v37 = vrot.slane %v10292_v4, 2  ;;  %v6652_v38 = vunpack.i.h.bf16 %v6650_v51  ;;  %v13525_v19 = vrot.slane %v10250_v10, 2 }
 0x230   : > { %v10317_v31 = vsel %vm1925_vm1, %v13518_v30, %v13516_v22  ;;  %v2480_v62 = vsel %vm724_vm0, %v13522_v2, %v13520_v21  ;;  %v13523_v22 = vrot.slane %v10242_v12, 1  ;;  %v13524_v30 = vrot.slane %v10263_v15, 1  ;;  %v13541_v12 = vld [vmem:[#allocation100_spill] sm:$0xff] }
 0x231   : > { %v13526_v21 = vrot.slane %v10246_v49, 2  ;;  %v10345_v4 = vmul.f32 %v13505_v18, %v13491_v5  ;;  %v13527_v23 = vrot.slane %v13503_v14, 2  ;;  %v13532_v18 = vrot.slane %v13531_v53, 1 }
 0x232   : > { %v4597_v16 = vsel %vm724_vm0, %v13524_v30, %v13523_v22  ;;  %v13528_v22 = vld [vmem:[#allocation245_spill] sm:$0xff]  ;;  %v2839_v29 = vsel %vm724_vm0, %v2836_v54, %v2838_v58  ;;  %v10373_v33 = vmul.f32 %v6652_v38, %v7210_v42  ;;  %v13539_v53 = vrot.slane %v10288_v46, 2 }
 0x233   : > { %v10341_v17 = vsel %vm1925_vm1, %v13526_v21, %v13525_v19  ;;  %v10351_v2 = vadd.f32 %v4597_v16, %v4529_v9  ;;  %v13529_v30 = vrot.slane %v13528_v22, 2  ;;  %v2679_v19 = vmul.f32 %v6652_v38, %v12943_v3  ;;  %v13535_v16 = vld [vmem:[#allocation88_spill] sm:$0xff] }
 0x234   : > { %v13530_v21 = vrot.slane %v13510_v50, 1  ;;  %v13534_v9 = vrot.slane %v13533_v11, 1  ;;  %v13536_v7 = vrot.slane %v13535_v16, 1  ;;  %v6651_v10 = vunpack.i.l.bf16 %v6650_v51  ;;  %v13540_v38 = vld [vmem:[#allocation80_spill] sm:$0xff] }
 0x235   : > { %v10358_v13 = vsel %vm1925_vm1, %v13529_v30, %v13527_v23  ;;  %v13537_v23 = vrot.slane %v13459_v32, 1  ;;  %v13538_v30 = vrot.slane %v13508_v25, 1  ;;  %v1618_v32 = vadd.f32 %v1573_v28, %v13541_v12  ;;  %v13549_v16 = vld [vmem:[#allocation108_spill] sm:$0xff] }
 0x236   : > { %v1571_v45 = vsel %vm724_vm0, %v13532_v18, %v13530_v21  ;;  %v4369_v14 = vsel %vm724_vm0, %v13536_v7, %v13534_v9  ;;  %v2948_v21 = vsel %vm1925_vm1, %v13539_v53, %v2947_v37  ;;  %v2725_v18 = vrot.slane %v2679_v19, 1 }
 0x237   : > { %v1575_v50 = vsel %vm724_vm0, %v13538_v30, %v13537_v23  ;;  %v1617_v9 = vadd.f32 %v1571_v45, %v13540_v38  ;;  %v13544_v23 = vrot.slane %v13543_v61, 1  ;;  %v13545_v30 = vld [vmem:[#allocation252_spill] sm:$0xff]  ;;  %v13547_v58 = vrot.slane %v13513_v41, 1  ;;  %v13555_v38 = vld [vmem:[#allocation43_spill] sm:$0xff] }
 0x238   : > { %v1619_v25 = vadd.f32 %v1575_v50, %v13542_v47  ;;  %v13546_v63 = vrot.slane %v13545_v30, 1  ;;  %v13550_v7 = vrot.slane %v13549_v16, 1  ;;  %v13551_v45 = vrot.slane %v13519_v57, 1 }
 0x239   : > { %v13548_v51 = vmov %v13544_v23  ;;  %v13552_v12 = vrot.slane %v10177_v39, 1  ;;  %v4481_v50 = vrot.slane %v10373_v33, 1  ;;  %v13558_v39 = vld [vmem:[#allocation242_spill] sm:$0xff]  ;;  %v13561_v16 = vrot.slane %v13560_v56, 2  ;;  %v13568_v56 = vld [vmem:[#allocation25_spill] sm:$0xff] }
 0x23a   : > { %v1819_v53 = vsel %vm724_vm0, %v13546_v63, %v13544_v23  ;;  %v1821_v19 = vsel %vm724_vm0, %v13548_v51, %v13547_v58  ;;  %v2482_v28 = vsel %vm724_vm0, %v13551_v45, %v13550_v7  ;;  %v13553_v63 = vrot.slane %v13463_v52, 1  ;;  %v13556_v23 = vld [vmem:[#allocation41_spill] sm:$0xff]  ;;  %v13557_v51 = vld [vmem:[#allocation19_spill] sm:$0xff] }
 0x23b   : > { %v2728_v47 = vsel %vm724_vm0, %v2725_v18, %v13552_v12  ;;  %v13554_v41 = vmov %v13550_v7  ;;  %v2526_v58 = vadd.f32 %v2480_v62, %v13555_v38  ;;  %v2527_v30 = vadd.f32 %v2482_v28, %v13556_v23  ;;  %v13562_v28 = vld [vmem:[#allocation109_spill] sm:$0xff] }
 0x23c   : > { %v2484_v61 = vsel %vm724_vm0, %v13554_v41, %v13553_v63  ;;  %v2678_v7 = vmul.f32 %v6651_v10, %v12943_v3  ;;  %v2789_v45 = vmul.f32 %v13558_v39, %v8599_v35  ;;  %v1865_v12 = vadd.f32 %v1819_v53, %v1617_v9 }
 0x23d   : > { %v2528_v57 = vadd.f32 %v2484_v61, %v13557_v51  ;;  %v1866_v40 = vadd.f32 %v1821_v19, %v1618_v32  ;;  %v1867_v33 = vadd.f32 %v1823_v34, %v1619_v25  ;;  %v13559_v52 = vrot.slane %v13517_v0, 2  ;;  %v13567_v0 = vld [vmem:[#allocation46_spill] sm:$0xff] }
 0x23e   : > { %v2723_v41 = vrot.slane %v2678_v7, 1  ;;  %v2834_v38 = vrot.slane %v2789_v45, 1  ;;  %v13563_v23 = vrot.slane %v13562_v28, 1  ;;  %v13564_v61 = vrot.slane %v13533_v11, 1  ;;  %v13572_v7 = vld [vmem:[#allocation36_spill] sm:$0xff] }
 0x23f   : > { %v1942_v63 = vsel %vm1925_vm1, %v13561_v16, %v13559_v52  ;;  %v2772_v62 = vadd.f32 %v2728_v47, %v2528_v57  ;;  %v4415_v32 = vadd.f32 %v4369_v14, %v13567_v0  ;;  %v4434_v53 = vmul.f32 %v6651_v10, %v7210_v42  ;;  %v13574_v10 = vld [vmem:[#allocation39_spill] sm:$0xff] }
 0x240   : > { %v4371_v51 = vsel %vm724_vm0, %v13564_v61, %v13563_v23  ;;  %v13566_v9 = vmov %v13563_v23  ;;  %v13569_v19 = vrot.slane %v10221_v55, 1  ;;  %v13570_v11 = vrot.slane %v13497_v6, 2  ;;  %v6665_v55 = vpop.permute.xlu1 %6664  ;;  %v13575_v61 = vld [vmem:[#allocation16_spill] sm:$0xff] }
 0x241   : > { %v4373_v34 = vsel %vm724_vm0, %v13566_v9, %v13565_v60  ;;  %v4416_v25 = vadd.f32 %v4371_v51, %v13568_v56  ;;  %v13571_v57 = vrot.slane %v13515_v48, 2  ;;  %v13573_v45 = vrot.slane %v13572_v7, 1 }
 0x242   : > { %v4484_v47 = vsel %vm724_vm0, %v4481_v50, %v13569_v19  ;;  %v2726_v14 = vsel %vm724_vm0, %v2723_v41, %v2725_v18  ;;  %v2883_v28 = vadd.f32 %v2839_v29, %v2772_v62  ;;  %v4417_v23 = vadd.f32 %v4373_v34, %v13574_v10  ;;  %v13581_v62 = vld [vmem:[#allocation60_spill] sm:$0xff] }
 0x243   : > { %v1946_v59 = vsel %vm1925_vm1, %v13571_v57, %v13570_v11  ;;  %v2724_v60 = vsel %vm724_vm0, %v13573_v45, %v2723_v41  ;;  %v2771_v16 = vadd.f32 %v2726_v14, %v2527_v30  ;;  %v13576_v51 = vrot.slane %v13575_v61, 1 }
 0x244   : > { %v2770_v52 = vadd.f32 %v2724_v60, %v2526_v58  ;;  %v2837_v48 = vsel %vm724_vm0, %v2834_v38, %v2836_v54  ;;  %v13577_v9 = vrot.slane %v10192_v43, 2  ;;  %v4479_v56 = vrot.slane %v4434_v53, 1  ;;  %v13591_v60 = vld [vmem:[#allocation13_spill] sm:$0xff] }
 0x245   : > { %v2835_v6 = vsel %vm724_vm0, %v13576_v51, %v2834_v38  ;;  %v2882_v11 = vadd.f32 %v2837_v48, %v2771_v16  ;;  %v4545_v29 = vmul.f32 %v13558_v39, %v12831_v36  ;;  %v10459_v58 = vadd.f32 %v1942_v63, %v1865_v12  ;;  %v13585_v39 = vld [vmem:[#allocation249_spill] sm:$0xff]  ;;  %v13587_v63 = vld [vmem:[#allocation254_spill] sm:$0xff] }
 0x246   : > { %v2950_v0 = vsel %vm1925_vm1, %v2947_v37, %v13577_v9  ;;  %v2881_v19 = vadd.f32 %v2835_v6, %v2770_v52  ;;  %v10462_v30 = vadd.f32 %v10317_v31, %v1866_v40  ;;  %v13580_v41 = vrot.slane %v10288_v46, 2 }
 0x247   : > { %v2994_v18 = vadd.f32 %v2950_v0, %v2883_v28  ;;  %13578 = vst [vmem:[#allocation134_spill] sm:$0xff] %v10459_v58  ;;  %v13582_v54 = vrot.slane %v13581_v62, 2  ;;  %v6667_v38 = vunpack.i.h.bf16 %v6665_v55  ;;  %v10469_v37 = vadd.f32 %v1946_v59, %v1867_v33 }
 0x248   : > { %13579 = vst [vmem:[#allocation127_spill] sm:$0xff] %v10462_v30  ;;  %v2993_v53 = vadd.f32 %v2948_v21, %v2882_v11  ;;  %v13586_v12 = vrot.slane %v13585_v39, 2  ;;  %v13588_v7 = vrot.slane %v13587_v63, 2  ;;  %v13589_v46 = vrot.slane %v13528_v22, 2  ;;  %v13602_v11 = vld [vmem:[#allocation74_spill] sm:$0xff] }
 0x249   : > { %v2946_v43 = vsel %vm1925_vm1, %v13582_v54, %v13580_v41  ;;  %13583 = vst [vmem:[#allocation133_spill] sm:$0xff] %v10469_v37  ;;  %v10472_v57 = vadd.f32 %v10358_v13, %v2994_v18  ;;  %v13592_v33 = vrot.slane %v13591_v60, 1  ;;  %v4482_v21 = vsel %vm724_vm0, %v4479_v56, %v4481_v50  ;;  %v13618_v60 = vld [vmem:[#allocation200_spill] sm:$0xff] }
 0x24a   : > { %v2992_v34 = vadd.f32 %v2946_v43, %v2881_v19  ;;  %v3064_v40 = vsel %vm1925_vm1, %v13588_v7, %v13586_v12  ;;  %v13590_v31 = vmov %v13586_v12  ;;  %v4590_v16 = vrot.slane %v4545_v29, 1  ;;  %v13606_v43 = vld [vmem:[#allocation62_spill] sm:$0xff]  ;;  %v13613_v12 = vld [vmem:[#allocation32_spill] sm:$0xff]  ;;  %v13614_v7 = vld [vmem:[#allocation247_spill] sm:$0xff] }
 0x24b   : > { %13584 = vst [vmem:[#allocation138_spill] sm:$0xff] %v10472_v57  ;;  %v3066_v45 = vsel %vm1925_vm1, %v13590_v31, %v13589_v46  ;;  %v4480_v59 = vsel %vm724_vm0, %v13592_v33, %v4479_v56  ;;  %v10496_v22 = vadd.f32 %v10341_v17, %v10351_v2  ;;  %v13596_v28 = vrot.slane %v10263_v15, 1  ;;  %v13638_v17 = vld [vmem:[#allocation199_spill] sm:$0xff]  ;;  %v6660_v57 = vpop.permute.xlu0 %6659  ;;  %v13652_v37 = vld [vmem:[#allocation168_spill] sm:$0xff] }
 0x24c   : > { %v10488_v13 = vadd.f32 %v3064_v40, %v2992_v34  ;;  %v10490_v14 = vadd.f32 %v3066_v45, %v2993_v53  ;;  %v13597_v10 = vrot.slane %v10329_v20, 1  ;;  %v13598_v50 = vrot.slane %v10349_v1, 2  ;;  %v13615_v20 = vld [vmem:[#allocation283_spill] sm:$0xff] }
 0x24d   : > { %13595 = vst [vmem:[#allocation140_spill] sm:$0xff] %v10496_v22  ;;  %v13599_v51 = vrot.slane %v10345_v4, 2  ;;  %v10511_v48 = vmul.f32 %v6667_v38, %v12943_v3  ;;  %v4528_v2 = vadd.f32 %v4484_v47, %v4417_v23  ;;  %v6666_v9 = vunpack.i.l.bf16 %v6665_v55  ;;  %v13611_v55 = vld [vmem:[#allocation118_spill] sm:$0xff] }
 0x24e   : > { %13593 = vst [vmem:[#allocation226_spill] sm:$0xff] %v10488_v13  ;;  %13594 = vst [vmem:[#allocation135_spill] sm:$0xff] %v10490_v14  ;;  %v4595_v61 = vsel %vm724_vm0, %v13597_v10, %v13596_v28  ;;  %v4526_v0 = vadd.f32 %v4480_v59, %v4415_v32  ;;  %v4527_v56 = vadd.f32 %v4482_v21, %v4416_v25  ;;  %v13603_v18 = vrot.slane %v13602_v11, 2  ;;  %v13609_v25 = vld [vmem:[#allocation113_spill] sm:$0xff]  ;;  %v13627_v11 = vld [vmem:[#allocation119_spill] sm:$0xff] }
 0x24f   : > { %v10508_v6 = vsel %vm1925_vm1, %v13599_v51, %v13598_v50  ;;  %13600 = vst [vmem:[#allocation64_spill] sm:$0xff] %v10511_v48  ;;  %v13601_v19 = vmov %v13599_v51  ;;  %v13604_v41 = vrot.slane %v10246_v49, 2  ;;  %v13605_v62 = vmov %v13598_v50  ;;  %v13619_v59 = vld [vmem:[#allocation189_spill] sm:$0xff]  ;;  %v13654_v14 = vld [vmem:[#allocation174_spill] sm:$0xff] }
 0x250   : > { %v4702_v29 = vsel %vm1925_vm1, %v13603_v18, %v13601_v19  ;;  %v13607_v34 = vrot.slane %v13606_v43, 1  ;;  %v13608_v47 = vmov %v13597_v10  ;;  %v12696_v4 = vrot.slane %v10511_v48, 1  ;;  %v13623_v10 = vld [vmem:[#allocation205_spill] sm:$0xff]  ;;  %v13629_v43 = vld [vmem:[#allocation292_spill] sm:$0xff]  ;;  %v13657_v13 = vld [vmem:[#allocation262_spill] sm:$0xff] }
 0x251   : > { %v4706_v54 = vsel %vm1925_vm1, %v13605_v62, %v13604_v41  ;;  %v4593_v32 = vsel %vm724_vm0, %v4590_v16, %v13608_v47  ;;  %v13610_v23 = vrot.slane %v13609_v25, 1  ;;  %v13612_v39 = vrot.slane %v13611_v55, 1  ;;  %v13631_v47 = vld [vmem:[#allocation257_spill] sm:$0xff]  ;;  %v13685_v48 = vld [vmem:[#allocation116_spill] sm:$0xff] }
 0x252   : > { %v4591_v53 = vsel %vm724_vm0, %v13607_v34, %v4590_v16  ;;  %v10541_v63 = vmul.f32 %v6666_v9, %v12943_v3  ;;  %v10545_v40 = vmul.f32 %v13614_v7, %v8599_v35  ;;  %v10549_v46 = vmul.f32 %v13615_v20, %v8599_v35  ;;  %v13621_v16 = vld [vmem:[#allocation198_spill] sm:$0xff] }
 0x253   : > { %v2494_v49 = vsel %vm724_vm0, %v13612_v39, %v13610_v23  ;;  %v4639_v31 = vadd.f32 %v4595_v61, %v4528_v2  ;;  %v10552_v45 = vmul.f32 %v6667_v38, %v7210_v42  ;;  %v10556_v33 = vmul.f32 %v13618_v60, %v9057_v44  ;;  %v13625_v38 = vld [vmem:[#allocation115_spill] sm:$0xff] }
 0x254   : > { %v2533_v1 = vadd.f32 %v2494_v49, %v13613_v12  ;;  %13616 = vst [vmem:[#allocation227_spill] sm:$0xff] %v10549_v46  ;;  %v10560_v21 = vmul.f32 %v13619_v59, %v9057_v44  ;;  %v13622_v28 = vrot.slane %v13621_v16, 1  ;;  %v13624_v50 = vrot.slane %v13623_v10, 1  ;;  %v13633_v12 = vld [vmem:[#allocation48_spill] sm:$0xff] }
 0x255   : > { %13617 = vst [vmem:[#allocation68_spill] sm:$0xff] %v10552_v45  ;;  %v12697_v19 = vrot.slane %v10541_v63, 1  ;;  %v12695_v61 = vrot.slane %v10549_v46, 1  ;;  %v13626_v2 = vrot.slane %v13625_v38, 1  ;;  %v13628_v18 = vrot.slane %v13627_v11, 1 }
 0x256   : > { %13620 = vst [vmem:[#allocation230_spill] sm:$0xff] %v10560_v21  ;;  %v1585_v51 = vsel %vm724_vm0, %v13624_v50, %v13622_v28  ;;  %v4637_v62 = vadd.f32 %v4591_v53, %v4526_v0  ;;  %v13630_v34 = vrot.slane %v13629_v43, 1  ;;  %v13632_v23 = vrot.slane %v13631_v47, 1 }
 0x257   : > { %v4383_v41 = vsel %vm724_vm0, %v13628_v18, %v13626_v2  ;;  %v2846_v49 = vrot.slane %v10545_v40, 1  ;;  %v2738_v50 = vsel %vm724_vm0, %v12697_v19, %v12696_v4  ;;  %v12699_v52 = vrot.slane %v10556_v33, 2  ;;  %v13634_v18 = vld [vmem:[#allocation5_spill] sm:$0xff]  ;;  %v13640_v4 = vld [vmem:[#allocation206_spill] sm:$0xff] }
 0x258   : > { %v1833_v39 = vsel %vm724_vm0, %v13632_v23, %v13630_v34  ;;  %v4422_v28 = vadd.f32 %v4383_v41, %v13633_v12  ;;  %v12698_v0 = vrot.slane %v10560_v21, 2  ;;  %v10589_v53 = vmul.f32 %v6666_v9, %v7210_v42 }
 0x259   : > { %v12700_v2 = vrot.slane %v10552_v45, 1  ;;  %v1624_v34 = vadd.f32 %v1585_v51, %v13634_v18  ;;  %v2777_v40 = vadd.f32 %v2738_v50, %v2533_v1  ;;  %v10595_v41 = vmul.f32 %v13615_v20, %v12831_v36  ;;  %v13682_v45 = vld [vmem:[#allocation94_spill] sm:$0xff] }
 0x25a   : > { %v2849_v23 = vsel %vm724_vm0, %v2846_v49, %v12695_v61  ;;  %v12701_v12 = vrot.slane %v10589_v53, 1  ;;  %v10603_v15 = vmul.f32 %v13618_v60, %v13491_v5  ;;  %v10607_v9 = vmul.f32 %v13619_v59, %v13491_v5 }
 0x25b   : > { %13635 = vst [vmem:[#allocation65_spill] sm:$0xff] %v10595_v41  ;;  %v10609_v51 = vadd.f32 %v4593_v32, %v4527_v56  ;;  %v1872_v1 = vadd.f32 %v1833_v39, %v1624_v34  ;;  %v2888_v50 = vadd.f32 %v2849_v23, %v2777_v40  ;;  %v10613_v20 = vmul.f32 %v13614_v7, %v12831_v36  ;;  %v13642_v32 = vld [vmem:[#allocation293_spill] sm:$0xff]  ;;  %v13644_v39 = vld [vmem:[#allocation260_spill] sm:$0xff] }
 0x25c   : > { %13636 = vst [vmem:[#allocation84_spill] sm:$0xff] %v10607_v9  ;;  %v10615_v18 = vadd.f32 %v4706_v54, %v4639_v31  ;;  %v13639_v61 = vrot.slane %v13638_v17, 2  ;;  %v13641_v19 = vrot.slane %v13640_v4, 2  ;;  %v2960_v56 = vsel %vm1925_vm1, %v12699_v52, %v12698_v0  ;;  %v13647_v52 = vld [vmem:[#allocation164_spill] sm:$0xff] }
 0x25d   : > { %v13643_v59 = vrot.slane %v13642_v32, 2  ;;  %v13645_v34 = vrot.slane %v13644_v39, 2  ;;  %v2999_v54 = vadd.f32 %v2960_v56, %v2888_v50  ;;  %v4494_v31 = vsel %vm724_vm0, %v12701_v12, %v12700_v2  ;;  %v13648_v50 = vld [vmem:[#allocation159_spill] sm:$0xff] }
 0x25e   : > { %13637 = vst [vmem:[#allocation85_spill] sm:$0xff] %v10615_v18  ;;  %v1956_v60 = vsel %vm1925_vm1, %v13641_v19, %v13639_v61  ;;  %v13646_v61 = vld [vmem:[#allocation253_spill] sm:$0xff]  ;;  %v10650_v56 = vmul.f32 %v13648_v50, %v9057_v44  ;;  %v12710_v19 = vrot.slane %v10613_v20, 1  ;;  %v4533_v23 = vadd.f32 %v4494_v31, %v4422_v28  ;;  %v13683_v32 = vld [vmem:[#allocation123_spill] sm:$0xff] }
 0x25f   : > { %v3078_v7 = vsel %vm1925_vm1, %v13645_v34, %v13643_v59  ;;  %v10640_v40 = vmul.f32 %v13646_v61, %v8599_v35  ;;  %v10646_v59 = vmul.f32 %v13647_v52, %v9057_v44  ;;  %v10652_v34 = vadd.f32 %v4702_v29, %v4637_v62  ;;  %v13659_v62 = vld [vmem:[#allocation170_spill] sm:$0xff] }
 0x260   : > { %v10654_v2 = vadd.f32 %v1956_v60, %v1872_v1  ;;  %v10656_v12 = vadd.f32 %v3078_v7, %v2999_v54  ;;  %v13653_v0 = vrot.slane %v13652_v37, 1  ;;  %v13655_v30 = vrot.slane %v13654_v14, 1  ;;  %v13661_v60 = vld [vmem:[#allocation176_spill] sm:$0xff] }
 0x261   : > { %13649 = vst [vmem:[#allocation92_spill] sm:$0xff] %v10652_v34  ;;  %v13656_v18 = vrot.slane %v13631_v47, 1  ;;  %v13658_v58 = vrot.slane %v13657_v13, 1  ;;  %v13660_v1 = vrot.slane %v13659_v62, 2  ;;  %v13662_v7 = vrot.slane %v13661_v60, 2  ;;  %v13664_v47 = vld [vmem:[#allocation96_spill] sm:$0xff] }
 0x262   : > { %13650 = vst [vmem:[#allocation27_spill] sm:$0xff] %v10654_v2  ;;  %13651 = vst [vmem:[#allocation40_spill] sm:$0xff] %v10656_v12  ;;  %v1581_v22 = vsel %vm724_vm0, %v13655_v30, %v13653_v0  ;;  %v13663_v31 = vrot.slane %v10595_v41, 1  ;;  %v13665_v0 = vrot.slane %v13664_v47, 1  ;;  %v2844_v34 = vrot.slane %v10640_v40, 1 }
 0x263   : > { %v1831_v29 = vsel %vm724_vm0, %v13658_v58, %v13656_v18  ;;  %v10674_v54 = vsel %vm1925_vm1, %v13662_v7, %v13660_v1  ;;  %v13666_v58 = vrot.slane %v13461_v8, 1  ;;  %v13667_v1 = vrot.slane %v10607_v9, 2  ;;  %v13674_v9 = vld [vmem:[#allocation263_spill] sm:$0xff] }
 0x264   : > { %v4605_v30 = vsel %vm724_vm0, %v12710_v19, %v13663_v31  ;;  %v13668_v7 = vrot.slane %v10603_v15, 2  ;;  %v2955_v2 = vrot.slane %v10650_v56, 2  ;;  %v6662_v31 = vunpack.i.h.bf16 %v6660_v57 }
 0x265   : > { %v2488_v18 = vsel %vm724_vm0, %v13666_v58, %v13665_v0  ;;  %v10700_v19 = vmul.f32 %v13646_v61, %v12831_v36  ;;  %v10704_v8 = vmul.f32 %v13647_v52, %v13491_v5  ;;  %v13669_v40 = vrot.slane %v13654_v14, 1 }
 0x266   : > { %v10694_v28 = vsel %vm1925_vm1, %v13668_v7, %v13667_v1  ;;  %v13670_v0 = vrot.slane %v13457_v24, 1  ;;  %v13671_v1 = vrot.slane %v13623_v10, 1  ;;  %v13672_v7 = vrot.slane %v13652_v37, 1 }
 0x267   : > { %v10716_v12 = vadd.f32 %v4605_v30, %v4533_v23  ;;  %v13673_v61 = vrot.slane %v13644_v39, 2  ;;  %v13675_v41 = vrot.slane %v13674_v9, 2  ;;  %v2683_v14 = vmul.f32 %v6662_v31, %v12943_v3  ;;  %v13679_v39 = vld [vmem:[#allocation269_spill] sm:$0xff] }
 0x268   : > { %v1579_v58 = vsel %vm724_vm0, %v13670_v0, %v13669_v40  ;;  %v1583_v56 = vsel %vm724_vm0, %v13672_v7, %v13671_v1  ;;  %v4439_v24 = vmul.f32 %v6662_v31, %v7210_v42  ;;  %v2847_v40 = vsel %vm724_vm0, %v2844_v34, %v2846_v49  ;;  %v13676_v0 = vld [vmem:[#allocation97_spill] sm:$0xff] }
 0x269   : > { %v3076_v52 = vsel %vm1925_vm1, %v13675_v41, %v13673_v61  ;;  %v13677_v10 = vrot.slane %v13676_v0, 1  ;;  %v13678_v37 = vrot.slane %v13473_v27, 1  ;;  %v10733_v23 = vmul.f32 %v13648_v50, %v13491_v5  ;;  %v13704_v50 = vld [vmem:[#allocation124_spill] sm:$0xff] }
 0x26a   : > { %v13680_v30 = vrot.slane %v13679_v39, 1  ;;  %v13681_v41 = vrot.slane %v13478_v26, 1  ;;  %v2733_v61 = vrot.slane %v2683_v14, 1  ;;  %v6661_v31 = vunpack.i.l.bf16 %v6660_v57  ;;  %v13694_v39 = vld [vmem:[#allocation22_spill] sm:$0xff] }
 0x26b   : > { %v4377_v1 = vsel %vm724_vm0, %v13678_v37, %v13677_v10  ;;  %v1621_v49 = vadd.f32 %v1579_v58, %v13682_v45  ;;  %v1623_v21 = vadd.f32 %v1583_v56, %v13683_v32  ;;  %v13684_v27 = vrot.slane %v10646_v59, 2 }
 0x26c   : > { %v1827_v7 = vsel %vm724_vm0, %v13681_v41, %v13680_v30  ;;  %v4600_v37 = vrot.slane %v10700_v19, 1  ;;  %v4489_v46 = vrot.slane %v4439_v24, 1  ;;  %v1622_v17 = vadd.f32 %v1581_v22, %v13685_v48 }
 0x26d   : > { %v2956_v10 = vsel %vm1925_vm1, %v13684_v27, %v2955_v2  ;;  %v13686_v26 = vrot.slane %v13657_v13, 1  ;;  %v13687_v14 = vmov %v13680_v30  ;;  %v1869_v45 = vadd.f32 %v1827_v7, %v1621_v49  ;;  %v13689_v30 = vld [vmem:[#allocation122_spill] sm:$0xff] }
 0x26e   : > { %v1871_v58 = vadd.f32 %v1831_v29, %v1623_v21  ;;  %v13688_v32 = vrot.slane %v10541_v63, 1  ;;  %v13690_v41 = vrot.slane %v13689_v30, 1  ;;  %v13691_v27 = vrot.slane %v13664_v47, 1  ;;  %v13695_v7 = vld [vmem:[#allocation2_spill] sm:$0xff]  ;;  %v13696_v29 = vld [vmem:[#allocation29_spill] sm:$0xff] }
 0x26f   : > { %v1829_v57 = vsel %vm724_vm0, %v13687_v14, %v13686_v26  ;;  %v13692_v22 = vrot.slane %v13611_v55, 1  ;;  %v2530_v26 = vadd.f32 %v2488_v18, %v13694_v39  ;;  %v2682_v49 = vmul.f32 %v6661_v31, %v12943_v3  ;;  %v13697_v14 = vld [vmem:[#allocation258_spill] sm:$0xff] }
 0x270   : > { %v2736_v56 = vsel %vm724_vm0, %v2733_v61, %v13688_v32  ;;  %v2490_v24 = vsel %vm724_vm0, %v13691_v27, %v13690_v41  ;;  %v13693_v13 = vmov %v13690_v41  ;;  %v2793_v32 = vmul.f32 %v13697_v14, %v8599_v35  ;;  %v13700_v27 = vld [vmem:[#allocation180_spill] sm:$0xff] }
 0x271   : > { %v2492_v48 = vsel %vm724_vm0, %v13693_v13, %v13692_v22  ;;  %v2531_v21 = vadd.f32 %v2490_v24, %v13695_v7  ;;  %v13698_v47 = vrot.slane %v10589_v53, 1  ;;  %v1870_v55 = vadd.f32 %v1829_v57, %v1622_v17 }
 0x272   : > { %v2532_v63 = vadd.f32 %v2492_v48, %v13696_v29  ;;  %v13699_v30 = vrot.slane %v13661_v60, 2  ;;  %v13701_v22 = vrot.slane %v13700_v27, 2  ;;  %v13702_v24 = vrot.slane %v13640_v4, 2  ;;  %v13709_v4 = vld [vmem:[#allocation59_spill] sm:$0xff] }
 0x273   : > { %v4492_v41 = vsel %vm724_vm0, %v4489_v46, %v13698_v47  ;;  %v13703_v13 = vrot.slane %v13659_v62, 2  ;;  %v2731_v39 = vrot.slane %v2682_v49, 1  ;;  %v2842_v29 = vrot.slane %v2793_v32, 1  ;;  %v13710_v62 = vld [vmem:[#allocation52_spill] sm:$0xff] }
 0x274   : > { %v1950_v18 = vsel %vm1925_vm1, %v13701_v22, %v13699_v30  ;;  %v2776_v7 = vadd.f32 %v2736_v56, %v2532_v63  ;;  %v13705_v53 = vrot.slane %v13704_v50, 1  ;;  %v13706_v47 = vrot.slane %v13676_v0, 1  ;;  %v13712_v63 = vld [vmem:[#allocation33_spill] sm:$0xff] }
 0x275   : > { %v1954_v48 = vsel %vm1925_vm1, %v13703_v13, %v13702_v24  ;;  %v13707_v60 = vrot.slane %v13627_v11, 1  ;;  %v4419_v27 = vadd.f32 %v4377_v1, %v13709_v4  ;;  %v4438_v49 = vmul.f32 %v6661_v31, %v7210_v42  ;;  %v6675_v31 = vpop.permute.xlu1 %6674 }
 0x276   : > { %v4379_v17 = vsel %vm724_vm0, %v13706_v47, %v13705_v53  ;;  %v13708_v57 = vmov %v13705_v53  ;;  %v10798_v56 = vadd.f32 %v1954_v48, %v1871_v58  ;;  %v13713_v32 = vrot.slane %v13712_v63, 1  ;;  %v13715_v47 = vld [vmem:[#allocation30_spill] sm:$0xff] }
 0x277   : > { %v4381_v30 = vsel %vm724_vm0, %v13708_v57, %v13707_v60  ;;  %v4420_v22 = vadd.f32 %v4379_v17, %v13710_v62  ;;  %v2734_v24 = vsel %vm724_vm0, %v2731_v39, %v2733_v61  ;;  %v13714_v11 = vrot.slane %v10556_v33, 2  ;;  %v13717_v48 = vld [vmem:[#allocation50_spill] sm:$0xff] }
 0x278   : > { %13711 = vst [vmem:[#allocation3_spill] sm:$0xff] %v10798_v56  ;;  %v2732_v0 = vsel %vm724_vm0, %v13713_v32, %v2731_v39  ;;  %v2775_v53 = vadd.f32 %v2734_v24, %v2531_v21  ;;  %v13716_v1 = vrot.slane %v13715_v47, 1  ;;  %v2887_v60 = vadd.f32 %v2847_v40, %v2776_v7  ;;  %v13721_v32 = vld [vmem:[#allocation158_spill] sm:$0xff] }
 0x279   : > { %v2958_v50 = vsel %vm1925_vm1, %v2955_v2, %v13714_v11  ;;  %v2774_v13 = vadd.f32 %v2732_v0, %v2530_v26  ;;  %v2845_v58 = vsel %vm724_vm0, %v2842_v29, %v2844_v34  ;;  %v4421_v57 = vadd.f32 %v4381_v30, %v13717_v48  ;;  %v13719_v26 = vld [vmem:[#allocation150_spill] sm:$0xff] }
 0x27a   : > { %v2843_v17 = vsel %vm724_vm0, %v13716_v1, %v2842_v29  ;;  %v4487_v4 = vrot.slane %v4438_v49, 1  ;;  %v4549_v61 = vmul.f32 %v13697_v14, %v12831_v36  ;;  %v2886_v33 = vadd.f32 %v2845_v58, %v2775_v53  ;;  %v13727_v53 = vld [vmem:[#allocation274_spill] sm:$0xff] }
 0x27b   : > { %v2885_v39 = vadd.f32 %v2843_v17, %v2774_v13  ;;  %v13718_v2 = vrot.slane %v10646_v59, 2  ;;  %v13720_v21 = vrot.slane %v13719_v26, 2  ;;  %v2998_v63 = vadd.f32 %v2958_v50, %v2887_v60  ;;  %v13725_v59 = vld [vmem:[#allocation271_spill] sm:$0xff] }
 0x27c   : > { %v13722_v40 = vrot.slane %v13721_v32, 1  ;;  %v4490_v34 = vsel %vm724_vm0, %v4487_v4, %v4489_v46  ;;  %v4532_v29 = vadd.f32 %v4492_v41, %v4421_v57  ;;  %v6677_v30 = vunpack.i.h.bf16 %v6675_v31 }
 0x27d   : > { %v2954_v62 = vsel %vm1925_vm1, %v13720_v21, %v13718_v2  ;;  %v2997_v0 = vadd.f32 %v2956_v10, %v2886_v33  ;;  %v10823_v14 = vadd.f32 %v3076_v52, %v2998_v63  ;;  %v4598_v24 = vrot.slane %v4549_v61, 1  ;;  %v13740_v63 = vld [vmem:[#allocation202_spill] sm:$0xff] }
 0x27e   : > { %v4488_v7 = vsel %vm724_vm0, %v13722_v40, %v4487_v4  ;;  %v2996_v49 = vadd.f32 %v2954_v62, %v2885_v39  ;;  %v10825_v11 = vadd.f32 %v1950_v18, %v1869_v45  ;;  %v13726_v13 = vrot.slane %v13725_v59, 2  ;;  %v13736_v4 = vld [vmem:[#allocation221_spill] sm:$0xff] }
 0x27f   : > { %13723 = vst [vmem:[#allocation223_spill] sm:$0xff] %v10823_v14  ;;  %v13728_v47 = vrot.slane %v13727_v53, 2  ;;  %v13729_v1 = vrot.slane %v13674_v9, 2  ;;  %v4530_v41 = vadd.f32 %v4488_v7, %v4419_v27  ;;  %v10838_v10 = vadd.f32 %v10674_v54, %v1870_v55  ;;  %v13735_v27 = vld [vmem:[#allocation6_spill] sm:$0xff]  ;;  %v13752_v53 = vld [vmem:[#allocation51_spill] sm:$0xff]  ;;  %v13792_v14 = vld [vmem:[#allocation288_spill] sm:$0xff] }
 0x280   : > { %13724 = vst [vmem:[#allocation93_spill] sm:$0xff] %v10825_v11  ;;  %v13730_v17 = vmov %v13726_v13  ;;  %v13734_v60 = vrot.slane %v10613_v20, 1  ;;  %v4711_v58 = vrot.slane %v10733_v23, 2  ;;  %v4531_v48 = vadd.f32 %v4490_v34, %v4420_v22 }
 0x281   : > { %v3072_v50 = vsel %vm1925_vm1, %v13728_v47, %v13726_v13  ;;  %v3074_v46 = vsel %vm1925_vm1, %v13730_v17, %v13729_v1  ;;  %13731 = vst [vmem:[#allocation38_spill] sm:$0xff] %v10838_v10  ;;  %v3010_v57 = vmul.f32 %v6677_v30, %v13735_v27  ;;  %v13737_v61 = vrot.slane %v13736_v4, 1 }
 0x282   : > { %v10840_v52 = vadd.f32 %v3072_v50, %v2996_v49  ;;  %v10842_v45 = vadd.f32 %v3074_v46, %v2997_v0  ;;  %v4603_v9 = vsel %vm724_vm0, %v4600_v37, %v13734_v60  ;;  %v10862_v33 = vadd.f32 %v10508_v6, %v10609_v51  ;;  %v13749_v49 = vld [vmem:[#allocation35_spill] sm:$0xff]  ;;  %v13753_v46 = vld [vmem:[#allocation270_spill] sm:$0xff] }
 0x283   : > { %v4599_v39 = vsel %vm724_vm0, %v13737_v61, %v4598_v24  ;;  %v4643_v20 = vadd.f32 %v4603_v9, %v4532_v29  ;;  %v10866_v23 = vadd.f32 %v10694_v28, %v10716_v12  ;;  %v6676_v2 = vunpack.i.l.bf16 %v6675_v31  ;;  %v13743_v28 = vld [vmem:[#allocation89_spill] sm:$0xff]  ;;  %v13754_v60 = vld [vmem:[#allocation267_spill] sm:$0xff] }
 0x284   : > { %13732 = vst [vmem:[#allocation23_spill] sm:$0xff] %v10840_v52  ;;  %13733 = vst [vmem:[#allocation34_spill] sm:$0xff] %v10842_v45  ;;  %v4641_v22 = vadd.f32 %v4599_v39, %v4530_v41  ;;  %v4601_v26 = vsel %vm724_vm0, %v4598_v24, %v4600_v37  ;;  %v3048_v21 = vrot.slane %v3010_v57, 2  ;;  %v4759_v62 = vmul.f32 %v6677_v30, %v12943_v3  ;;  %v13747_v29 = vld [vmem:[#allocation49_spill] sm:$0xff]  ;;  %v13759_v61 = vld [vmem:[#allocation31_spill] sm:$0xff] }
 0x285   : > { %13738 = vst [vmem:[#allocation232_spill] sm:$0xff] %v10862_v33  ;;  %13739 = vst [vmem:[#allocation8_spill] sm:$0xff] %v10866_v23  ;;  %v10874_v32 = vmul.f32 %v13740_v63, %v13735_v27  ;;  %v13741_v6 = vrot.slane %v10704_v8, 2  ;;  %v4642_v40 = vadd.f32 %v4601_v26, %v4531_v48  ;;  %v13744_v31 = vrot.slane %v13743_v28, 2  ;;  %v13757_v57 = vld [vmem:[#allocation9_spill] sm:$0xff] }
 0x286   : > { %v13745_v37 = vrot.slane %v10603_v15, 2  ;;  %v13748_v30 = vrot.slane %v13747_v29, 2  ;;  %v13750_v0 = vrot.slane %v13749_v49, 2  ;;  %v10897_v8 = vmul.f32 %v13740_v63, %v12943_v3  ;;  %v13820_v23 = vld [vmem:[#allocation69_spill] sm:$0xff] }
 0x287   : > { %v4712_v51 = vsel %vm1925_vm1, %v13741_v6, %v4711_v58  ;;  %v13742_v12 = vmov %v13741_v6  ;;  %v12718_v59 = vrot.slane %v10874_v32, 2  ;;  %v2688_v15 = vmul.f32 %v6676_v2, %v12943_v3  ;;  %v13764_v6 = vld [vmem:[#allocation195_spill] sm:$0xff] }
 0x288   : > { %v4710_v19 = vsel %vm1925_vm1, %v13744_v31, %v13742_v12  ;;  %v4714_v7 = vsel %vm1925_vm1, %v4711_v58, %v13745_v37  ;;  %v2932_v24 = vsel %vm1925_vm1, %v13750_v0, %v13748_v30  ;;  %v4444_v50 = vmul.f32 %v6676_v2, %v7210_v42  ;;  %v13766_v12 = vld [vmem:[#allocation277_spill] sm:$0xff]  ;;  %v13768_v31 = vld [vmem:[#allocation280_spill] sm:$0xff]  ;;  %v10943_v30 = vpop.permute.xlu0 %6669 }
 0x289   : > { %v10887_v34 = vadd.f32 %v4714_v7, %v4643_v20  ;;  %v10899_v13 = vadd.f32 %v4710_v19, %v4641_v22  ;;  %v2985_v47 = vadd.f32 %v2932_v24, %v13752_v53  ;;  %v4797_v1 = vrot.slane %v4759_v62, 2  ;;  %v13761_v22 = vld [vmem:[#allocation186_spill] sm:$0xff]  ;;  %v13770_v7 = vld [vmem:[#allocation181_spill] sm:$0xff]  ;;  %v13771_v24 = vld [vmem:[#allocation191_spill] sm:$0xff] }
 0x28a   : > { %v3050_v17 = vsel %vm1925_vm1, %v3048_v21, %v12718_v59  ;;  %v10909_v41 = vmul.f32 %v13753_v46, %v8599_v35  ;;  %v2799_v9 = vmul.f32 %v13754_v60, %v8599_v35  ;;  %v10913_v58 = vadd.f32 %v4712_v51, %v4642_v40  ;;  %v13762_v21 = vld [vmem:[#allocation190_spill] sm:$0xff] }
 0x28b   : > { %13746 = vst [vmem:[#allocation179_spill] sm:$0xff] %v10887_v34  ;;  %13751 = vst [vmem:[#allocation184_spill] sm:$0xff] %v10899_v13  ;;  %v10915_v48 = vadd.f32 %v3050_v17, %v2985_v47  ;;  %v13758_v4 = vrot.slane %v13757_v57, 2  ;;  %v13760_v39 = vrot.slane %v13759_v61, 2  ;;  %v10926_v2 = vmul.f32 %v13761_v22, %v9057_v44  ;;  %v13773_v47 = vld [vmem:[#allocation196_spill] sm:$0xff] }
 0x28c   : > { %13755 = vst [vmem:[#allocation98_spill] sm:$0xff] %v10913_v58  ;;  %v12717_v26 = vrot.slane %v10897_v8, 2  ;;  %v13763_v62 = vrot.slane %v13762_v21, 1  ;;  %v13765_v51 = vrot.slane %v13764_v6, 1  ;;  %v13767_v28 = vrot.slane %v13766_v12, 1  ;;  %v13821_v58 = vld [vmem:[#allocation64_spill] sm:$0xff] }
 0x28d   : > { %13756 = vst [vmem:[#allocation104_spill] sm:$0xff] %v10915_v48  ;;  %v10922_v20 = vsel %vm1925_vm1, %v13760_v39, %v13758_v4  ;;  %v13769_v19 = vrot.slane %v13768_v31, 1  ;;  %v10941_v29 = vmul.f32 %v13770_v7, %v9057_v44  ;;  %v2743_v49 = vrot.slane %v2688_v15, 1  ;;  %v13775_v4 = vld [vmem:[#allocation4_spill] sm:$0xff] }
 0x28e   : > { %v1589_v40 = vsel %vm724_vm0, %v13765_v51, %v13763_v62  ;;  %v4499_v0 = vrot.slane %v4444_v50, 1  ;;  %v13772_v53 = vrot.slane %v13771_v24, 2  ;;  %v13774_v17 = vrot.slane %v13773_v47, 2 }
 0x28f   : > { %v1839_v37 = vsel %vm724_vm0, %v13769_v19, %v13767_v28  ;;  %v13776_v61 = vrot.slane %v13775_v4, 1  ;;  %v13777_v39 = vrot.slane %v13609_v25, 1  ;;  %v10958_v51 = vsel %vm1925_vm1, %v4797_v1, %v12717_v26  ;;  %v13778_v19 = vld [vmem:[#allocation278_spill] sm:$0xff]  ;;  %v13791_v28 = vld [vmem:[#allocation56_spill] sm:$0xff] }
 0x290   : > { %v1960_v57 = vsel %vm1925_vm1, %v13774_v17, %v13772_v53  ;;  %v2852_v15 = vrot.slane %v10909_v41, 1  ;;  %v2854_v50 = vrot.slane %v2799_v9, 1  ;;  %v10963_v12 = vmul.f32 %v13753_v46, %v12831_v36  ;;  %v13780_v17 = vld [vmem:[#allocation282_spill] sm:$0xff] }
 0x291   : > { %v2496_v62 = vsel %vm724_vm0, %v13777_v39, %v13776_v61  ;;  %v13779_v53 = vrot.slane %v13778_v19, 2  ;;  %v13781_v25 = vrot.slane %v13780_v17, 2  ;;  %v13782_v39 = vld [vmem:[#allocation110_spill] sm:$0xff]  ;;  %v13784_v1 = vrot.slane %v13625_v38, 1 }
 0x292   : > { %v13783_v18 = vrot.slane %v13782_v39, 1  ;;  %v6672_v9 = vunpack.i.h.bf16 %v10943_v30  ;;  %v2963_v46 = vrot.slane %v10941_v29, 2  ;;  %v10982_v55 = vmul.f32 %v13754_v60, %v12831_v36  ;;  %v13787_v60 = vld [vmem:[#allocation216_spill] sm:$0xff] }
 0x293   : > { %v10971_v61 = vsel %vm1925_vm1, %v13781_v25, %v13779_v53  ;;  %v10986_v19 = vmul.f32 %v13761_v22, %v13491_v5  ;;  %v13785_v53 = vrot.slane %v13764_v6, 1  ;;  %v13786_v25 = vrot.slane %v13621_v16, 1 }
 0x294   : > { %v4385_v41 = vsel %vm724_vm0, %v13784_v1, %v13783_v18  ;;  %v10995_v18 = vmul.f32 %v13770_v7, %v13491_v5  ;;  %v2687_v29 = vmul.f32 %v6672_v9, %v12943_v3  ;;  %v10999_v1 = vmul.f32 %v6672_v9, %v7210_v42 }
 0x295   : > { %v1587_v38 = vsel %vm724_vm0, %v13786_v25, %v13785_v53  ;;  %v13788_v54 = vrot.slane %v13787_v60, 1  ;;  %v13789_v22 = vrot.slane %v13762_v21, 1  ;;  %v2855_v6 = vsel %vm724_vm0, %v2852_v15, %v2854_v50  ;;  %v13790_v25 = vld [vmem:[#allocation111_spill] sm:$0xff] }
 0x296   : > { %v6671_v53 = vunpack.i.l.bf16 %v10943_v30  ;;  %v1625_v7 = vadd.f32 %v1587_v38, %v13790_v25  ;;  %v2741_v59 = vrot.slane %v2687_v29, 1  ;;  %v1626_v48 = vadd.f32 %v1589_v40, %v13791_v28  ;;  %v13798_v28 = vld [vmem:[#allocation54_spill] sm:$0xff]  ;;  %v13802_v38 = vld [vmem:[#allocation129_spill] sm:$0xff] }
 0x297   : > { %v1591_v26 = vsel %vm724_vm0, %v13789_v22, %v13788_v54  ;;  %v13793_v9 = vrot.slane %v13792_v14, 1  ;;  %v13794_v56 = vrot.slane %v13629_v43, 1  ;;  %v13795_v21 = vrot.slane %v13768_v31, 1 }
 0x298   : > { %v13797_v22 = vrot.slane %v10926_v2, 2  ;;  %v4497_v40 = vrot.slane %v10999_v1, 1  ;;  %v1627_v29 = vadd.f32 %v1591_v26, %v13798_v28  ;;  %v2744_v14 = vsel %vm724_vm0, %v2741_v59, %v2743_v49  ;;  %v13805_v28 = vld [vmem:[#allocation26_spill] sm:$0xff] }
 0x299   : > { %v1835_v60 = vsel %vm724_vm0, %v13794_v56, %v13793_v9  ;;  %v13796_v54 = vmov %v13793_v9  ;;  %v13801_v16 = vrot.slane %v13775_v4, 1  ;;  %v13803_v45 = vrot.slane %v13802_v38, 1  ;;  %v13806_v56 = vld [vmem:[#allocation7_spill] sm:$0xff] }
 0x29a   : > { %v1837_v50 = vsel %vm724_vm0, %v13796_v54, %v13795_v21  ;;  %v2964_v30 = vsel %vm1925_vm1, %v13797_v22, %v2963_v46  ;;  %v1873_v25 = vadd.f32 %v1835_v60, %v1625_v7  ;;  %v1875_v9 = vadd.f32 %v1839_v37, %v1627_v29  ;;  %v13799_v21 = vld [vmem:[#allocation131_spill] sm:$0xff]  ;;  %v13811_v29 = vld [vmem:[#allocation281_spill] sm:$0xff] }
 0x29b   : > { %v1874_v31 = vadd.f32 %v1837_v50, %v1626_v48  ;;  %v13800_v54 = vrot.slane %v13799_v21, 1  ;;  %v2534_v43 = vadd.f32 %v2496_v62, %v13805_v28  ;;  %v13807_v48 = vld [vmem:[#allocation17_spill] sm:$0xff]  ;;  %v2686_v37 = vmul.f32 %v6671_v53, %v12943_v3  ;;  %v13809_v50 = vld [vmem:[#allocation199_spill] sm:$0xff]  ;;  %v13816_v28 = vld [vmem:[#allocation132_spill] sm:$0xff] }
 0x29c   : > { %v4500_v49 = vsel %vm724_vm0, %v4497_v40, %v4499_v0  ;;  %v13808_v4 = vrot.slane %v13773_v47, 2  ;;  %v2797_v21 = vmul.f32 %v13811_v29, %v8599_v35  ;;  %v13817_v47 = vrot.slane %v13816_v28, 1 }
 0x29d   : > { %v2498_v22 = vsel %vm724_vm0, %v13801_v16, %v13800_v54  ;;  %v13804_v1 = vmov %v13800_v54  ;;  %v13810_v16 = vrot.slane %v13809_v50, 2  ;;  %v13813_v54 = vld [vmem:[#allocation217_spill] sm:$0xff]  ;;  %v4423_v34 = vadd.f32 %v4385_v41, %v13820_v23  ;;  %v13828_v23 = vld [vmem:[#allocation227_spill] sm:$0xff] }
 0x29e   : > { %v2500_v26 = vsel %vm724_vm0, %v13804_v1, %v13803_v45  ;;  %v2535_v7 = vadd.f32 %v2498_v22, %v13806_v56  ;;  %v13812_v45 = vld [vmem:[#allocation213_spill] sm:$0xff]  ;;  %v13814_v56 = vrot.slane %v13813_v54, 2  ;;  %v13815_v22 = vrot.slane %v13771_v24, 2 }
 0x29f   : > { %v2536_v60 = vadd.f32 %v2500_v26, %v13807_v48  ;;  %v1958_v38 = vsel %vm1925_vm1, %v13810_v16, %v13808_v4  ;;  %v2910_v62 = vmul.f32 %v13812_v45, %v9057_v44  ;;  %v2739_v26 = vrot.slane %v2686_v37, 1 }
 0x2a0   : > { %v1962_v1 = vsel %vm1925_vm1, %v13815_v22, %v13814_v56  ;;  %v13818_v48 = vrot.slane %v13782_v39, 1  ;;  %v11064_v50 = vadd.f32 %v1958_v38, %v1873_v25  ;;  %v2850_v16 = vrot.slane %v2797_v21, 1 }
 0x2a1   : > { %v2780_v0 = vadd.f32 %v2744_v14, %v2536_v60  ;;  %v2965_v10 = vrot.slane %v2910_v62, 2  ;;  %v13822_v54 = vrot.slane %v13821_v58, 1  ;;  %v2742_v56 = vsel %vm724_vm0, %v2739_v26, %v2741_v59  ;;  %v13823_v14 = vld [vmem:[#allocation63_spill] sm:$0xff] }
 0x2a2   : > { %v4387_v4 = vsel %vm724_vm0, %v13818_v48, %v13817_v47  ;;  %13819 = vst [vmem:[#allocation42_spill] sm:$0xff] %v11064_v50  ;;  %v11072_v22 = vadd.f32 %v1960_v57, %v1874_v31  ;;  %v2779_v33 = vadd.f32 %v2742_v56, %v2535_v7  ;;  %v13825_v47 = vld [vmem:[#allocation130_spill] sm:$0xff]  ;;  %v13827_v38 = vrot.slane %v13816_v28, 1  ;;  %v13842_v56 = vld [vmem:[#allocation68_spill] sm:$0xff] }
 0x2a3   : > { %v2740_v24 = vsel %vm724_vm0, %v13822_v54, %v2739_v26  ;;  %v2891_v37 = vadd.f32 %v2855_v6, %v2780_v0  ;;  %v4424_v60 = vadd.f32 %v4387_v4, %v13823_v14  ;;  %v13826_v25 = vrot.slane %v13825_v47, 1  ;;  %v13832_v28 = vld [vmem:[#allocation230_spill] sm:$0xff]  ;;  %v13834_v54 = vld [vmem:[#allocation289_spill] sm:$0xff]  ;;  %v6685_v47 = vpop.permute.xlu1 %6684 }
 0x2a4   : > { %13824 = vst [vmem:[#allocation231_spill] sm:$0xff] %v11072_v22  ;;  %v2778_v39 = vadd.f32 %v2740_v24, %v2534_v43  ;;  %v13829_v41 = vrot.slane %v13828_v23, 1  ;;  %v2853_v62 = vsel %vm724_vm0, %v2850_v16, %v2852_v15  ;;  %v2966_v59 = vsel %vm1925_vm1, %v2963_v46, %v2965_v10  ;;  %v13846_v23 = vld [vmem:[#allocation208_spill] sm:$0xff]  ;;  %v13922_v22 = vld [vmem:[#allocation66_spill] sm:$0xff] }
 0x2a5   : > { %v4389_v21 = vsel %vm724_vm0, %v13827_v38, %v13826_v25  ;;  %v4442_v6 = vmul.f32 %v6671_v53, %v7210_v42  ;;  %v2890_v31 = vadd.f32 %v2853_v62, %v2779_v33  ;;  %v3002_v43 = vadd.f32 %v2966_v59, %v2891_v37  ;;  %v13849_v62 = vld [vmem:[#allocation53_spill] sm:$0xff]  ;;  %v13956_v50 = vld [vmem:[#allocation246_spill] sm:$0xff] }
 0x2a6   : > { %v2851_v58 = vsel %vm724_vm0, %v13829_v41, %v2850_v16  ;;  %v4553_v7 = vmul.f32 %v13811_v29, %v12831_v36  ;;  %v11087_v26 = vadd.f32 %v1962_v1, %v1875_v9  ;;  %v13831_v0 = vrot.slane %v10926_v2, 2  ;;  %v13836_v16 = vld [vmem:[#allocation293_spill] sm:$0xff] }
 0x2a7   : > { %v2889_v57 = vadd.f32 %v2851_v58, %v2778_v39  ;;  %v13833_v48 = vrot.slane %v13832_v28, 2  ;;  %v13835_v15 = vrot.slane %v13834_v54, 2  ;;  %v13837_v10 = vrot.slane %v13836_v16, 2  ;;  %v13841_v29 = vld [vmem:[#allocation61_spill] sm:$0xff] }
 0x2a8   : > { %13830 = vst [vmem:[#allocation266_spill] sm:$0xff] %v11087_v26  ;;  %v4495_v46 = vrot.slane %v4442_v6, 1  ;;  %v3001_v53 = vadd.f32 %v2964_v30, %v2890_v31  ;;  %v13838_v24 = vrot.slane %v13780_v17, 2  ;;  %v11105_v2 = vadd.f32 %v10971_v61, %v3002_v43  ;;  %v13919_v26 = vld [vmem:[#allocation233_spill] sm:$0xff] }
 0x2a9   : > { %v2962_v4 = vsel %vm1925_vm1, %v13833_v48, %v13831_v0  ;;  %v3080_v42 = vsel %vm1925_vm1, %v13837_v10, %v13835_v15  ;;  %v13839_v36 = vmov %v13835_v15  ;;  %v4425_v1 = vadd.f32 %v4389_v21, %v13841_v29 }
 0x2aa   : > { %v3000_v33 = vadd.f32 %v2962_v4, %v2889_v57  ;;  %v3082_v9 = vsel %vm1925_vm1, %v13839_v36, %v13838_v24  ;;  %13840 = vst [vmem:[#allocation178_spill] sm:$0xff] %v11105_v2  ;;  %v13843_v37 = vrot.slane %v13842_v56, 1  ;;  %v4498_v39 = vsel %vm724_vm0, %v4495_v46, %v4497_v40  ;;  %v13914_v2 = vld [vmem:[#allocation142_spill] sm:$0xff] }
 0x2ab   : > { %v4666_v30 = vmul.f32 %v13812_v45, %v13491_v5  ;;  %v11116_v25 = vadd.f32 %v3082_v9, %v3001_v53  ;;  %v4606_v38 = vrot.slane %v4553_v7, 1  ;;  %v13847_v21 = vrot.slane %v13846_v23, 2  ;;  %v13850_v7 = vld [vmem:[#allocation12_spill] sm:$0xff]  ;;  %v13866_v23 = vld [vmem:[#allocation237_spill] sm:$0xff] }
 0x2ac   : > { %v4496_v14 = vsel %vm724_vm0, %v13843_v37, %v4495_v46  ;;  %v11114_v17 = vadd.f32 %v3080_v42, %v3000_v33  ;;  %v13848_v41 = vrot.slane %v10874_v32, 2  ;;  %v4741_v40 = vadd.f32 %v10922_v20, %v13849_v62  ;;  %v13860_v46 = vld [vmem:[#allocation147_spill] sm:$0xff] }
 0x2ad   : > { %13845 = vst [vmem:[#allocation103_spill] sm:$0xff] %v11116_v25  ;;  %v4534_v59 = vadd.f32 %v4496_v14, %v4423_v34  ;;  %v4536_v45 = vadd.f32 %v4500_v49, %v4425_v1  ;;  %v4535_v31 = vadd.f32 %v4498_v39, %v4424_v60  ;;  %v6687_v43 = vunpack.i.h.bf16 %v6685_v47  ;;  %v13856_v60 = vld [vmem:[#allocation65_spill] sm:$0xff]  ;;  %v13864_v1 = vld [vmem:[#allocation84_spill] sm:$0xff]  ;;  %v6680_v14 = vpop.permute.xlu0 %6679  ;;  %v13871_v62 = vld [vmem:[#allocation151_spill] sm:$0xff] }
 0x2ae   : > { %13844 = vst [vmem:[#allocation171_spill] sm:$0xff] %v11114_v17  ;;  %v3052_v58 = vsel %vm1925_vm1, %v13848_v41, %v13847_v21  ;;  %v11135_v32 = vadd.f32 %v10958_v51, %v4741_v40  ;;  %v13852_v28 = vrot.slane %v10982_v55, 1  ;;  %v13853_v20 = vrot.slane %v10963_v12, 1  ;;  %v13858_v51 = vld [vmem:[#allocation144_spill] sm:$0xff] }
 0x2af   : > { %v11132_v0 = vadd.f32 %v3052_v58, %v13850_v7  ;;  %v13854_v49 = vrot.slane %v10995_v18, 2  ;;  %v13855_v48 = vrot.slane %v10986_v19, 2  ;;  %v13857_v54 = vrot.slane %v13856_v60, 1  ;;  %v13868_v21 = vld [vmem:[#allocation212_spill] sm:$0xff] }
 0x2b0   : > { %13851 = vst [vmem:[#allocation105_spill] sm:$0xff] %v11135_v32  ;;  %v4611_v34 = vsel %vm724_vm0, %v13853_v20, %v13852_v28  ;;  %v4721_v16 = vrot.slane %v4666_v30, 2  ;;  %v6686_v10 = vunpack.i.l.bf16 %v6685_v47  ;;  %v13859_v42 = vrot.slane %v13858_v51, 1  ;;  %v13870_v58 = vld [vmem:[#allocation72_spill] sm:$0xff] }
 0x2b1   : > { %v4720_v4 = vsel %vm1925_vm1, %v13855_v48, %v13854_v49  ;;  %v4607_v15 = vsel %vm724_vm0, %v13857_v54, %v4606_v38  ;;  %v13861_v55 = vrot.slane %v13860_v46, 1  ;;  %v13862_v53 = vmov %v13853_v20 }
 0x2b2   : > { %v4609_v24 = vsel %vm724_vm0, %v4606_v38, %v13862_v53  ;;  %v4645_v36 = vadd.f32 %v4607_v15, %v4534_v59  ;;  %v4647_v9 = vadd.f32 %v4611_v34, %v4536_v45  ;;  %v13863_v29 = vmov %v13855_v48  ;;  %v13872_v59 = vld [vmem:[#allocation149_spill] sm:$0xff]  ;;  %v13874_v34 = vld [vmem:[#allocation114_spill] sm:$0xff] }
 0x2b3   : > { %v3366_v33 = vsel %vm724_vm0, %v13861_v55, %v13859_v42  ;;  %v13865_v56 = vrot.slane %v13864_v1, 2  ;;  %v4646_v39 = vadd.f32 %v4609_v24, %v4535_v31  ;;  %v11164_v30 = vmul.f32 %v6687_v43, %v8599_v35 }
 0x2b4   : > { %v11167_v47 = vmul.f32 %v6687_v43, %v13735_v27  ;;  %v13867_v12 = vrot.slane %v13866_v23, 1  ;;  %v13869_v38 = vrot.slane %v13868_v21, 1  ;;  %v3417_v19 = vadd.f32 %v3366_v33, %v13870_v58 }
 0x2b5   : > { %v4718_v37 = vsel %vm1925_vm1, %v13865_v56, %v13863_v29  ;;  %v3585_v40 = vrot.slane %v13871_v62, 2  ;;  %v12724_v45 = vrot.slane %v13872_v59, 2  ;;  %v3434_v31 = vmul.f32 %v13740_v63, %v13491_v5 }
 0x2b6   : > { %v3477_v41 = vsel %vm724_vm0, %v13869_v38, %v13867_v12  ;;  %v13873_v7 = vmov %v13854_v49  ;;  %v3790_v20 = vmul.f32 %v6686_v10, %v8599_v35  ;;  %v3545_v49 = vmul.f32 %v13874_v34, %v12943_v3  ;;  %v13882_v38 = vld [vmem:[#allocation215_spill] sm:$0xff] }
 0x2b7   : > { %v4722_v28 = vsel %vm1925_vm1, %v13873_v7, %v4721_v16  ;;  %v6682_v48 = vunpack.i.h.bf16 %v6680_v14  ;;  %v11188_v54 = vmul.f32 %v6687_v43, %v9057_v44  ;;  %v3528_v15 = vadd.f32 %v3477_v41, %v3417_v19 }
 0x2b8   : > { %v11185_v60 = vadd.f32 %v4722_v28, %v4647_v9  ;;  %v3472_v42 = vrot.slane %v3434_v31, 1  ;;  %v11190_v55 = vadd.f32 %v4718_v37, %v4645_v36  ;;  %v11192_v5 = vadd.f32 %v4720_v4, %v4646_v39  ;;  %v6695_v9 = vpop.permute.xlu1 %6694  ;;  %v13880_v37 = vld [vmem:[#allocation121_spill] sm:$0xff] }
 0x2b9   : > { %v4152_v63 = vmul.f32 %v6686_v10, %v13735_v27  ;;  %v3789_v18 = vmul.f32 %v6682_v48, %v8599_v35  ;;  %v12723_v16 = vrot.slane %v11164_v30, 1  ;;  %v12728_v3 = vrot.slane %v11167_v47, 2 }
 0x2ba   : > { %13875 = vst [vmem:[#allocation99_spill] sm:$0xff] %v11185_v60  ;;  %13876 = vst [vmem:[#allocation273_spill] sm:$0xff] %v11190_v55  ;;  %v3588_v33 = vsel %vm1925_vm1, %v3585_v40, %v12724_v45  ;;  %v4983_v43 = vmul.f32 %v6686_v10, %v9057_v44  ;;  %v3829_v53 = vrot.slane %v3790_v20, 1  ;;  %v3583_v24 = vrot.slane %v3545_v49, 2  ;;  %v13888_v20 = vld [vmem:[#allocation137_spill] sm:$0xff] }
 0x2bb   : > { %13877 = vst [vmem:[#allocation238_spill] sm:$0xff] %v11192_v5  ;;  %v11203_v36 = vmul.f32 %v6682_v48, %v13735_v27  ;;  %v6681_v4 = vunpack.i.l.bf16 %v6680_v14  ;;  %v12727_v29 = vrot.slane %v11188_v54, 2  ;;  %v3639_v1 = vadd.f32 %v3588_v33, %v3528_v15  ;;  %v13885_v14 = vld [vmem:[#allocation11_spill] sm:$0xff]  ;;  %v13889_v33 = vld [vmem:[#allocation78_spill] sm:$0xff] }
 0x2bc   : > { %v13879_v56 = vrot.slane %v13860_v46, 1  ;;  %v13881_v39 = vrot.slane %v13880_v37, 1  ;;  %v13883_v41 = vrot.slane %v13882_v38, 1  ;;  %v4191_v58 = vrot.slane %v4152_v63, 2 }
 0x2bd   : > { %13878 = vst [vmem:[#allocation24_spill] sm:$0xff] %v11203_v36  ;;  %v3827_v19 = vrot.slane %v3789_v18, 1  ;;  %v11215_v62 = vmul.f32 %v6682_v48, %v9057_v44  ;;  %v13886_v31 = vrot.slane %v13885_v14, 2  ;;  %v13887_v28 = vrot.slane %v13868_v21, 1  ;;  %v13890_v21 = vld [vmem:[#allocation163_spill] sm:$0xff] }
 0x2be   : > { %v3364_v12 = vsel %vm724_vm0, %v13881_v39, %v13879_v56  ;;  %v3473_v10 = vsel %vm724_vm0, %v13883_v41, %v3472_v42  ;;  %v3788_v49 = vmul.f32 %v6681_v4, %v8599_v35  ;;  %v6697_v15 = vunpack.i.h.bf16 %v6695_v9 }
 0x2bf   : > { %13884 = vst [vmem:[#allocation37_spill] sm:$0xff] %v11215_v62  ;;  %v3584_v7 = vsel %vm1925_vm1, %v13886_v31, %v3583_v24  ;;  %v3475_v46 = vsel %vm724_vm0, %v3472_v42, %v13887_v28  ;;  %v3526_v34 = vadd.f32 %v3473_v10, %v13888_v20  ;;  %v3832_v63 = vsel %vm724_vm0, %v3829_v53, %v12723_v16  ;;  %v13892_v42 = vld [vmem:[#allocation167_spill] sm:$0xff]  ;;  %v6690_v16 = vpop.permute.xlu0 %6689 }
 0x2c0   : > { %v5022_v18 = vrot.slane %v4983_v43, 2  ;;  %v12726_v48 = vrot.slane %v11203_v36, 2  ;;  %v3416_v56 = vadd.f32 %v3364_v12, %v13889_v33  ;;  %v3826_v39 = vrot.slane %v3788_v49, 1  ;;  %v13896_v49 = vld [vmem:[#allocation225_spill] sm:$0xff] }
 0x2c1   : > { %v3637_v37 = vadd.f32 %v3584_v7, %v3526_v34  ;;  %v6696_v38 = vunpack.i.l.bf16 %v6695_v9  ;;  %v13891_v41 = vrot.slane %v13890_v21, 1  ;;  %v13893_v14 = vrot.slane %v13892_v42, 1  ;;  %v13894_v7 = vld [vmem:[#allocation255_spill] sm:$0xff] }
 0x2c2   : > { %v3830_v4 = vsel %vm724_vm0, %v3827_v19, %v3829_v53  ;;  %v12725_v31 = vrot.slane %v11215_v62, 2  ;;  %v3527_v28 = vadd.f32 %v3475_v46, %v3416_v56  ;;  %v3586_v43 = vsel %vm1925_vm1, %v3583_v24, %v3585_v40  ;;  %v13899_v40 = vld [vmem:[#allocation86_spill] sm:$0xff] }
 0x2c3   : > { %v3374_v10 = vsel %vm724_vm0, %v13893_v14, %v13891_v41  ;;  %v3828_v20 = vsel %vm724_vm0, %v3826_v39, %v3827_v19  ;;  %v11240_v12 = vmul.f32 %v6697_v15, %v8599_v35  ;;  %v11243_v9 = vmul.f32 %v6697_v15, %v13735_v27  ;;  %v13900_v19 = vld [vmem:[#allocation172_spill] sm:$0xff]  ;;  %v13901_v39 = vld [vmem:[#allocation169_spill] sm:$0xff] }
 0x2c4   : > { %v13895_v34 = vrot.slane %v13894_v7, 1  ;;  %v13897_v33 = vrot.slane %v13896_v49, 1  ;;  %v11250_v53 = vadd.f32 %v3828_v20, %v3637_v37  ;;  %v11253_v46 = vmul.f32 %v6697_v15, %v9057_v44 }
 0x2c5   : > { %v3421_v24 = vadd.f32 %v3374_v10, %v13899_v40  ;;  %v3593_v56 = vrot.slane %v13900_v19, 2  ;;  %v12729_v14 = vrot.slane %v13901_v39, 2  ;;  %v3794_v61 = vmul.f32 %v6696_v38, %v8599_v35 }
 0x2c6   : > { %v3485_v41 = vsel %vm724_vm0, %v13897_v33, %v13895_v34  ;;  %13898 = vst [vmem:[#allocation70_spill] sm:$0xff] %v11250_v53  ;;  %v4156_v57 = vmul.f32 %v6696_v38, %v13735_v27  ;;  %v4987_v6 = vmul.f32 %v6696_v38, %v9057_v44  ;;  %v11261_v45 = vadd.f32 %v3832_v63, %v3639_v1 }
 0x2c7   : > { %v11266_v15 = vsel %vm1925_vm1, %v4191_v58, %v12728_v3  ;;  %v3638_v37 = vadd.f32 %v3586_v43, %v3527_v28  ;;  %v3532_v10 = vadd.f32 %v3485_v41, %v3421_v24  ;;  %v11271_v20 = vsel %vm1925_vm1, %v5022_v18, %v12727_v29  ;;  %v13906_v3 = vld [vmem:[#allocation141_spill] sm:$0xff] }
 0x2c8   : > { %v11276_v34 = vsel %vm1925_vm1, %v12726_v48, %v4191_v58  ;;  %v11281_v1 = vsel %vm1925_vm1, %v12725_v31, %v5022_v18  ;;  %v12731_v63 = vrot.slane %v11240_v12, 1  ;;  %v3837_v43 = vrot.slane %v3794_v61, 1 }
 0x2c9   : > { %v11284_v38 = vadd.f32 %v3830_v4, %v3638_v37  ;;  %v6692_v33 = vunpack.i.h.bf16 %v6690_v16  ;;  %v3596_v58 = vsel %vm1925_vm1, %v3593_v56, %v12729_v14  ;;  %v4199_v40 = vrot.slane %v4156_v57, 2  ;;  %v13903_v37 = vld [vmem:[#allocation136_spill] sm:$0xff] }
 0x2ca   : > { %v5030_v24 = vrot.slane %v4987_v6, 2  ;;  %v3643_v19 = vadd.f32 %v3596_v58, %v3532_v10  ;;  %v13902_v4 = vrot.slane %v13892_v42, 1  ;;  %v13904_v48 = vrot.slane %v13903_v37, 1  ;;  %v13911_v37 = vld [vmem:[#allocation229_spill] sm:$0xff] }
 0x2cb   : > { %v3793_v18 = vmul.f32 %v6692_v33, %v8599_v35  ;;  %v4155_v31 = vmul.f32 %v6692_v33, %v13735_v27  ;;  %v13907_v41 = vrot.slane %v13906_v3, 1  ;;  %v11304_v57 = vmul.f32 %v6692_v33, %v9057_v44 }
 0x2cc   : > { %v3372_v61 = vsel %vm724_vm0, %v13904_v48, %v13902_v4  ;;  %v13905_v29 = vmov %v13904_v48  ;;  %v6691_v6 = vunpack.i.l.bf16 %v6690_v16  ;;  %v13909_v58 = vrot.slane %v13858_v51, 1 }
 0x2cd   : > { %v3370_v28 = vsel %vm724_vm0, %v13907_v41, %v13905_v29  ;;  %v13908_v10 = vmov %v13907_v41  ;;  %v3840_v48 = vsel %vm724_vm0, %v3837_v43, %v12731_v63  ;;  %v13910_v4 = vrot.slane %v13896_v49, 1  ;;  %v13913_v41 = vld [vmem:[#allocation143_spill] sm:$0xff] }
 0x2ce   : > { %v3368_v42 = vsel %vm724_vm0, %v13909_v58, %v13908_v10  ;;  %v13912_v14 = vrot.slane %v13911_v37, 1  ;;  %v3589_v33 = vrot.slane %v13913_v41, 2  ;;  %v3591_v16 = vrot.slane %v13914_v2, 2  ;;  %v13918_v63 = vld [vmem:[#allocation91_spill] sm:$0xff] }
 0x2cf   : > { %v13915_v3 = vrot.slane %v11243_v9, 2  ;;  %v13916_v10 = vrot.slane %v11253_v46, 2  ;;  %v3420_v49 = vadd.f32 %v3372_v61, %v13918_v63  ;;  %v13920_v25 = vrot.slane %v13919_v26, 1  ;;  %v13925_v63 = vld [vmem:[#allocation90_spill] sm:$0xff] }
 0x2d0   : > { %v3483_v29 = vsel %vm724_vm0, %v13912_v14, %v13910_v4  ;;  %v13921_v14 = vrot.slane %v13866_v23, 1  ;;  %v3835_v41 = vrot.slane %v3793_v18, 1  ;;  %v4197_v2 = vrot.slane %v4155_v31, 2 }
 0x2d1   : > { %v11324_v51 = vsel %vm1925_vm1, %v4199_v40, %v13915_v3  ;;  %v11329_v58 = vsel %vm1925_vm1, %v5030_v24, %v13916_v10  ;;  %v3418_v60 = vadd.f32 %v3368_v42, %v13922_v22  ;;  %v13923_v3 = vrot.slane %v13911_v37, 1  ;;  %v6705_v10 = vpop.permute.xlu1 %6704 }
 0x2d2   : > { %13917 = vst [vmem:[#allocation15_spill] sm:$0xff] %v11329_v58  ;;  %v3479_v4 = vsel %vm724_vm0, %v13921_v14, %v13920_v25  ;;  %v13924_v5 = vmov %v13920_v25  ;;  %v5028_v62 = vrot.slane %v11304_v57, 2  ;;  %v3419_v61 = vadd.f32 %v3370_v28, %v13925_v63 }
 0x2d3   : > { %v3481_v32 = vsel %vm724_vm0, %v13924_v5, %v13923_v3  ;;  %v3531_v36 = vadd.f32 %v3483_v29, %v3420_v49  ;;  %v3792_v23 = vmul.f32 %v6691_v6, %v8599_v35  ;;  %v3592_v25 = vsel %vm1925_vm1, %v3589_v33, %v3591_v16 }
 0x2d4   : > { %v3529_v18 = vadd.f32 %v3479_v4, %v3418_v60  ;;  %v4154_v31 = vmul.f32 %v6691_v6, %v13735_v27  ;;  %v4985_v22 = vmul.f32 %v6691_v6, %v9057_v44  ;;  %v11349_v42 = vadd.f32 %v3840_v48, %v3643_v19  ;;  %v13929_v48 = vld [vmem:[#allocation183_spill] sm:$0xff]  ;;  %v13931_v4 = vld [vmem:[#allocation188_spill] sm:$0xff] }
 0x2d5   : > { %v3530_v26 = vadd.f32 %v3481_v32, %v3419_v61  ;;  %v3833_v37 = vrot.slane %v3792_v23, 1  ;;  %v6707_v5 = vunpack.i.h.bf16 %v6705_v10  ;;  %v3838_v14 = vsel %vm724_vm0, %v3835_v41, %v3837_v43 }
 0x2d6   : > { %v11353_v57 = vsel %vm1925_vm1, %v4197_v2, %v4199_v40  ;;  %v13927_v28 = vrot.slane %v13872_v59, 2  ;;  %v3594_v60 = vsel %vm1925_vm1, %v3591_v16, %v3593_v56  ;;  %v11360_v49 = vsel %vm1925_vm1, %v5028_v62, %v5030_v24 }
 0x2d7   : > { %13926 = vst [vmem:[#allocation185_spill] sm:$0xff] %v11353_v57  ;;  %13928 = vst [vmem:[#allocation235_spill] sm:$0xff] %v11360_v49  ;;  %v3642_v6 = vadd.f32 %v3594_v60, %v3531_v36  ;;  %v6706_v19 = vunpack.i.l.bf16 %v6705_v10  ;;  %v13930_v32 = vrot.slane %v13929_v48, 1  ;;  %v13932_v3 = vrot.slane %v13931_v4, 1  ;;  %v6700_v60 = vpop.permute.xlu0 %6699 }
 0x2d8   : > { %v3590_v29 = vsel %vm1925_vm1, %v13927_v28, %v3589_v33  ;;  %v13933_v40 = vrot.slane %v11164_v30, 1  ;;  %v4195_v61 = vrot.slane %v4154_v31, 2  ;;  %v5026_v33 = vrot.slane %v4985_v22, 2  ;;  %v13936_v28 = vld [vmem:[#allocation276_spill] sm:$0xff] }
 0x2d9   : > { %v3382_v43 = vsel %vm724_vm0, %v13932_v3, %v13930_v32  ;;  %v3640_v63 = vadd.f32 %v3590_v29, %v3529_v18  ;;  %v3641_v23 = vadd.f32 %v3592_v25, %v3530_v26  ;;  %v3836_v56 = vsel %vm724_vm0, %v3833_v37, %v3835_v41  ;;  %v13935_v18 = vld [vmem:[#allocation102_spill] sm:$0xff]  ;;  %v13938_v31 = vld [vmem:[#allocation240_spill] sm:$0xff] }
 0x2da   : > { %v3834_v59 = vsel %vm724_vm0, %v13933_v40, %v3833_v37  ;;  %v11371_v24 = vadd.f32 %v3838_v14, %v3642_v6  ;;  %v11374_v36 = vmul.f32 %v6707_v5, %v8599_v35  ;;  %v11377_v16 = vmul.f32 %v6707_v5, %v13735_v27 }
 0x2db   : > { %v11380_v10 = vmul.f32 %v6707_v5, %v9057_v44  ;;  %v3425_v30 = vadd.f32 %v3382_v43, %v13935_v18  ;;  %v13937_v29 = vrot.slane %v13936_v28, 1  ;;  %v13939_v22 = vrot.slane %v13938_v31, 1 }
 0x2dc   : > { %13934 = vst [vmem:[#allocation239_spill] sm:$0xff] %v11371_v24  ;;  %v11388_v41 = vadd.f32 %v3834_v59, %v3640_v63  ;;  %v3798_v26 = vmul.f32 %v6706_v19, %v8599_v35  ;;  %v4160_v37 = vmul.f32 %v6706_v19, %v13735_v27  ;;  %v11393_v14 = vmul.f32 %v6706_v19, %v9057_v44  ;;  %v13944_v59 = vld [vmem:[#allocation192_spill] sm:$0xff] }
 0x2dd   : > { %v3493_v25 = vsel %vm724_vm0, %v13939_v22, %v13937_v29  ;;  %v11395_v5 = vadd.f32 %v3836_v56, %v3641_v23  ;;  %v13941_v6 = vrot.slane %v11167_v47, 2  ;;  %v11403_v3 = vsel %vm1925_vm1, %v4195_v61, %v4197_v2  ;;  %v13945_v23 = vld [vmem:[#allocation187_spill] sm:$0xff]  ;;  %v13946_v47 = vld [vmem:[#allocation165_spill] sm:$0xff] }
 0x2de   : > { %13942 = vst [vmem:[#allocation139_spill] sm:$0xff] %v11403_v3  ;;  %v13943_v43 = vrot.slane %v11188_v54, 2  ;;  %v3536_v19 = vadd.f32 %v3493_v25, %v3425_v30  ;;  %v3601_v18 = vrot.slane %v13944_v59, 2  ;;  %v12741_v56 = vrot.slane %v13945_v23, 2  ;;  %v13950_v59 = vld [vmem:[#allocation153_spill] sm:$0xff] }
 0x2df   : > { %13940 = vst [vmem:[#allocation145_spill] sm:$0xff] %v11395_v5  ;;  %v11400_v32 = vsel %vm1925_vm1, %v13941_v6, %v4195_v61  ;;  %v3845_v29 = vrot.slane %v3798_v26, 1  ;;  %v3597_v22 = vrot.slane %v13946_v47, 2  ;;  %v13947_v6 = vld [vmem:[#allocation161_spill] sm:$0xff]  ;;  %v6702_v17 = vunpack.i.h.bf16 %v6700_v60 }
 0x2e0   : > { %v11408_v63 = vsel %vm1925_vm1, %v13943_v43, %v5026_v33  ;;  %v3599_v53 = vrot.slane %v13947_v6, 2  ;;  %v4207_v61 = vrot.slane %v4160_v37, 2  ;;  %v5038_v43 = vrot.slane %v11393_v14, 2  ;;  %v13953_v14 = vld [vmem:[#allocation156_spill] sm:$0xff] }
 0x2e1   : > { %v11419_v40 = vsel %vm1925_vm1, %v5026_v33, %v5028_v62  ;;  %v3797_v30 = vmul.f32 %v6702_v17, %v8599_v35  ;;  %v4159_v25 = vmul.f32 %v6702_v17, %v13735_v27  ;;  %v13949_v26 = vrot.slane %v13931_v4, 1 }
 0x2e2   : > { %13948 = vst [vmem:[#allocation148_spill] sm:$0xff] %v11419_v40  ;;  %v13951_v47 = vrot.slane %v13950_v59, 1  ;;  %v3604_v54 = vsel %vm1925_vm1, %v3601_v18, %v12741_v56  ;;  %v13954_v2 = vrot.slane %v13953_v14, 1  ;;  %v13955_v33 = vrot.slane %v13938_v31, 1 }
 0x2e3   : > { %v13957_v55 = vrot.slane %v13956_v50, 1  ;;  %v6701_v52 = vunpack.i.l.bf16 %v6700_v60  ;;  %v3647_v11 = vadd.f32 %v3604_v54, %v3536_v19  ;;  %v3600_v56 = vsel %vm1925_vm1, %v3597_v22, %v3599_v53  ;;  %v13965_v54 = vld [vmem:[#allocation107_spill] sm:$0xff] }
 0x2e4   : > { %v3380_v6 = vsel %vm724_vm0, %v13951_v47, %v13949_v26  ;;  %v13952_v37 = vmov %v13951_v47  ;;  %v13958_v26 = vrot.slane %v11374_v36, 1  ;;  %v13959_v59 = vmov %v13954_v2 }
 0x2e5   : > { %v3378_v62 = vsel %vm724_vm0, %v13954_v2, %v13952_v37  ;;  %v3491_v4 = vsel %vm724_vm0, %v13957_v55, %v13955_v33  ;;  %v13960_v13 = vrot.slane %v13890_v21, 1  ;;  %v13961_v31 = vrot.slane %v11377_v16, 2  ;;  %v13966_v21 = vld [vmem:[#allocation251_spill] sm:$0xff] }
 0x2e6   : > { %v3848_v47 = vsel %vm724_vm0, %v3845_v29, %v13958_v26  ;;  %v13963_v55 = vrot.slane %v11380_v10, 2  ;;  %v4990_v19 = vmul.f32 %v6702_v17, %v9057_v44  ;;  %v3424_v33 = vadd.f32 %v3380_v6, %v13965_v54  ;;  %v6715_v26 = vpop.permute.xlu1 %6714  ;;  %v13972_v17 = vld [vmem:[#allocation106_spill] sm:$0xff] }
 0x2e7   : > { %v3376_v2 = vsel %vm724_vm0, %v13960_v13, %v13959_v59  ;;  %v11453_v37 = vsel %vm1925_vm1, %v4207_v61, %v13961_v31  ;;  %v3843_v14 = vrot.slane %v3797_v30, 1  ;;  %v4205_v49 = vrot.slane %v4159_v25, 2 }
 0x2e8   : > { %13962 = vst [vmem:[#allocation154_spill] sm:$0xff] %v11453_v37  ;;  %v11458_v60 = vsel %vm1925_vm1, %v5038_v43, %v13963_v55  ;;  %v13967_v40 = vrot.slane %v13966_v21, 1  ;;  %v13968_v13 = vrot.slane %v13894_v7, 1  ;;  %v13969_v31 = vrot.slane %v13956_v50, 1 }
 0x2e9   : > { %13964 = vst [vmem:[#allocation244_spill] sm:$0xff] %v11458_v60  ;;  %v13971_v60 = vld [vmem:[#allocation81_spill] sm:$0xff]  ;;  %v3423_v57 = vadd.f32 %v3378_v62, %v13972_v17  ;;  %v3535_v6 = vadd.f32 %v3491_v4, %v3424_v33  ;;  %v3796_v30 = vmul.f32 %v6701_v52, %v8599_v35  ;;  %v11475_v25 = vadd.f32 %v3848_v47, %v3647_v11 }
 0x2ea   : > { %v3487_v59 = vsel %vm724_vm0, %v13968_v13, %v13967_v40  ;;  %v13970_v37 = vmov %v13967_v40  ;;  %v3422_v58 = vadd.f32 %v3376_v2, %v13971_v60  ;;  %v4158_v54 = vmul.f32 %v6701_v52, %v13735_v27 }
 0x2eb   : > { %v3489_v55 = vsel %vm724_vm0, %v13970_v37, %v13969_v31  ;;  %13973 = vst [vmem:[#allocation152_spill] sm:$0xff] %v11475_v25  ;;  %v4989_v7 = vmul.f32 %v6701_v52, %v9057_v44  ;;  %v6717_v40 = vunpack.i.h.bf16 %v6715_v26  ;;  %v5036_v13 = vrot.slane %v4990_v19, 2  ;;  %v13976_v52 = vld [vmem:[#allocation201_spill] sm:$0xff]  ;;  %v13978_v19 = vld [vmem:[#allocation207_spill] sm:$0xff]  ;;  %v14013_v25 = vld [vmem:[#allocation128_spill] sm:$0xff] }
 0x2ec   : > { %v3533_v50 = vadd.f32 %v3487_v59, %v3422_v58  ;;  %v3534_v3 = vadd.f32 %v3489_v55, %v3423_v57  ;;  %v3841_v21 = vrot.slane %v3796_v30, 1  ;;  %v3846_v37 = vsel %vm724_vm0, %v3843_v14, %v3845_v29 }
 0x2ed   : > { %v11481_v2 = vsel %vm1925_vm1, %v4205_v49, %v4207_v61  ;;  %v13975_v62 = vrot.slane %v13901_v39, 2  ;;  %v3602_v11 = vsel %vm1925_vm1, %v3599_v53, %v3601_v18  ;;  %v4203_v60 = vrot.slane %v4158_v54, 2 }
 0x2ee   : > { %13974 = vst [vmem:[#allocation155_spill] sm:$0xff] %v11481_v2  ;;  %v3646_v47 = vadd.f32 %v3602_v11, %v3535_v6  ;;  %v6716_v33 = vunpack.i.l.bf16 %v6715_v26  ;;  %v13977_v31 = vrot.slane %v13976_v52, 1  ;;  %v13979_v58 = vrot.slane %v13978_v19, 1  ;;  %v13983_v6 = vld [vmem:[#allocation117_spill] sm:$0xff] }
 0x2ef   : > { %v3598_v4 = vsel %vm1925_vm1, %v13975_v62, %v3597_v22  ;;  %v13980_v29 = vrot.slane %v11240_v12, 1  ;;  %v3844_v59 = vsel %vm724_vm0, %v3841_v21, %v3843_v14  ;;  %v5034_v39 = vrot.slane %v4989_v7, 2  ;;  %v13984_v14 = vld [vmem:[#allocation294_spill] sm:$0xff]  ;;  %v13986_v7 = vld [vmem:[#allocation261_spill] sm:$0xff] }
 0x2f0   : > { %v3390_v57 = vsel %vm724_vm0, %v13979_v58, %v13977_v31  ;;  %v11497_v22 = vmul.f32 %v6717_v40, %v8599_v35  ;;  %v3644_v53 = vadd.f32 %v3598_v4, %v3533_v50  ;;  %v3645_v18 = vadd.f32 %v3600_v56, %v3534_v3 }
 0x2f1   : > { %v3842_v61 = vsel %vm724_vm0, %v13980_v29, %v3841_v21  ;;  %v11500_v26 = vmul.f32 %v6717_v40, %v13735_v27  ;;  %v11503_v55 = vmul.f32 %v6717_v40, %v9057_v44  ;;  %v11506_v17 = vsel %vm1925_vm1, %v5036_v13, %v5038_v43  ;;  %v13993_v29 = vld [vmem:[#allocation210_spill] sm:$0xff] }
 0x2f2   : > { %13981 = vst [vmem:[#allocation79_spill] sm:$0xff] %v11506_v17  ;;  %v11508_v12 = vadd.f32 %v3846_v37, %v3646_v47  ;;  %v3429_v30 = vadd.f32 %v3390_v57, %v13983_v6  ;;  %v13985_v54 = vrot.slane %v13984_v14, 1  ;;  %v13987_v21 = vrot.slane %v13986_v7, 1  ;;  %v6710_v37 = vpop.permute.xlu0 %6709  ;;  %v14000_v57 = vld [vmem:[#allocation175_spill] sm:$0xff] }
 0x2f3   : > { %v11516_v3 = vadd.f32 %v3842_v61, %v3644_v53  ;;  %v11518_v56 = vadd.f32 %v3844_v59, %v3645_v18  ;;  %v13989_v40 = vrot.slane %v11243_v9, 2  ;;  %v3802_v43 = vmul.f32 %v6716_v33, %v8599_v35  ;;  %v13994_v59 = vld [vmem:[#allocation204_spill] sm:$0xff] }
 0x2f4   : > { %13982 = vst [vmem:[#allocation87_spill] sm:$0xff] %v11508_v12  ;;  %v3501_v50 = vsel %vm724_vm0, %v13987_v21, %v13985_v54  ;;  %v11527_v4 = vsel %vm1925_vm1, %v4203_v60, %v4205_v49  ;;  %v13991_v11 = vrot.slane %v11253_v46, 2  ;;  %v11535_v31 = vsel %vm1925_vm1, %v5034_v39, %v5036_v13  ;;  %v13995_v54 = vld [vmem:[#allocation173_spill] sm:$0xff]  ;;  %v14009_v12 = vld [vmem:[#allocation272_spill] sm:$0xff] }
 0x2f5   : > { %13988 = vst [vmem:[#allocation245_spill] sm:$0xff] %v11518_v56  ;;  %v11523_v62 = vsel %vm1925_vm1, %v13989_v40, %v4203_v60  ;;  %13990 = vst [vmem:[#allocation157_spill] sm:$0xff] %v11527_v4  ;;  %v3609_v61 = vrot.slane %v13993_v29, 2  ;;  %v3540_v49 = vadd.f32 %v3501_v50, %v3429_v30  ;;  %v4164_v60 = vmul.f32 %v6716_v33, %v13735_v27  ;;  %v14012_v56 = vld [vmem:[#allocation95_spill] sm:$0xff] }
 0x2f6   : > { %v11532_v47 = vsel %vm1925_vm1, %v13991_v11, %v5034_v39  ;;  %13992 = vst [vmem:[#allocation82_spill] sm:$0xff] %v11535_v31  ;;  %v4995_v46 = vmul.f32 %v6716_v33, %v9057_v44  ;;  %v6712_v18 = vunpack.i.h.bf16 %v6710_v37  ;;  %v3853_v6 = vrot.slane %v3802_v43, 1  ;;  %v13997_v39 = vld [vmem:[#allocation177_spill] sm:$0xff]  ;;  %v13999_v11 = vld [vmem:[#allocation182_spill] sm:$0xff]  ;;  %v14007_v31 = vld [vmem:[#allocation264_spill] sm:$0xff] }
 0x2f7   : > { %v13996_v13 = vrot.slane %v13995_v54, 1  ;;  %v13998_v21 = vrot.slane %v13997_v39, 1  ;;  %v3605_v9 = vrot.slane %v13999_v11, 2  ;;  %v3607_v58 = vrot.slane %v14000_v57, 2 }
 0x2f8   : > { %v3801_v29 = vmul.f32 %v6712_v18, %v8599_v35  ;;  %v4163_v30 = vmul.f32 %v6712_v18, %v13735_v27  ;;  %v14002_v33 = vrot.slane %v13929_v48, 1  ;;  %v14003_v53 = vrot.slane %v13978_v19, 1 }
 0x2f9   : > { %v3386_v40 = vsel %vm724_vm0, %v13998_v21, %v13996_v13  ;;  %v14001_v50 = vmov %v13998_v21  ;;  %v14004_v17 = vmov %v13996_v13  ;;  %v14005_v21 = vrot.slane %v13994_v59, 2 }
 0x2fa   : > { %v3384_v43 = vsel %vm724_vm0, %v14002_v33, %v14001_v50  ;;  %v3388_v13 = vsel %vm724_vm0, %v14004_v17, %v14003_v53  ;;  %v14006_v11 = vrot.slane %v13986_v7, 1  ;;  %v14008_v2 = vrot.slane %v14007_v31, 1 }
 0x2fb   : > { %v3612_v57 = vsel %vm1925_vm1, %v3609_v61, %v14005_v21  ;;  %v4994_v48 = vmul.f32 %v6712_v18, %v9057_v44  ;;  %v6711_v4 = vunpack.i.l.bf16 %v6710_v37  ;;  %v4215_v33 = vrot.slane %v4164_v60, 2 }
 0x2fc   : > { %v3499_v39 = vsel %vm724_vm0, %v14008_v2, %v14006_v11  ;;  %v3651_v50 = vadd.f32 %v3612_v57, %v3540_v49  ;;  %v5046_v19 = vrot.slane %v4995_v46, 2  ;;  %v14010_v54 = vrot.slane %v14009_v12, 1  ;;  %v14016_v57 = vld [vmem:[#allocation120_spill] sm:$0xff] }
 0x2fd   : > { %v14011_v17 = vrot.slane %v13936_v28, 1  ;;  %v3608_v21 = vsel %vm1925_vm1, %v3605_v9, %v3607_v58  ;;  %v3426_v7 = vadd.f32 %v3384_v43, %v14012_v56  ;;  %v3428_v24 = vadd.f32 %v3388_v13, %v14013_v25  ;;  %v6725_v25 = vpop.permute.xlu1 %6724 }
 0x2fe   : > { %v14014_v18 = vmov %v14010_v54  ;;  %v14015_v49 = vrot.slane %v11497_v22, 1  ;;  %v3851_v46 = vrot.slane %v3801_v29, 1  ;;  %v4213_v28 = vrot.slane %v4163_v30, 2 }
 0x2ff   : > { %v3495_v53 = vsel %vm724_vm0, %v14011_v17, %v14010_v54  ;;  %v3497_v37 = vsel %vm724_vm0, %v14014_v18, %v14008_v2  ;;  %v3427_v11 = vadd.f32 %v3386_v40, %v14016_v57  ;;  %v5044_v54 = vrot.slane %v4994_v48, 2 }
 0x300   : > { %v3856_v60 = vsel %vm724_vm0, %v3853_v6, %v14015_v49  ;;  %v3537_v17 = vadd.f32 %v3495_v53, %v3426_v7  ;;  %v3539_v5 = vadd.f32 %v3499_v39, %v3428_v24  ;;  %v3800_v56 = vmul.f32 %v6711_v4, %v8599_v35 }
 0x301   : > { %v14017_v31 = vrot.slane %v11500_v26, 2  ;;  %v14018_v43 = vrot.slane %v11503_v55, 2  ;;  %v3538_v29 = vadd.f32 %v3497_v37, %v3427_v11  ;;  %v4162_v30 = vmul.f32 %v6711_v4, %v13735_v27 }
 0x302   : > { %v11601_v40 = vadd.f32 %v3856_v60, %v3651_v50  ;;  %v14020_v24 = vrot.slane %v13945_v23, 2  ;;  %v3849_v48 = vrot.slane %v3800_v56, 1  ;;  %v4993_v53 = vmul.f32 %v6711_v4, %v9057_v44  ;;  %v6720_v56 = vpop.permute.xlu0 %6719 }
 0x303   : > { %v11593_v12 = vsel %vm1925_vm1, %v4215_v33, %v14017_v31  ;;  %v11598_v13 = vsel %vm1925_vm1, %v5046_v19, %v14018_v43  ;;  %v3854_v7 = vsel %vm724_vm0, %v3851_v46, %v3853_v6  ;;  %v3610_v2 = vsel %vm1925_vm1, %v3607_v58, %v3609_v61  ;;  %v14026_v31 = vld [vmem:[#allocation197_spill] sm:$0xff] }
 0x304   : > { %14019 = vst [vmem:[#allocation88_spill] sm:$0xff] %v11598_v13  ;;  %v3606_v39 = vsel %vm1925_vm1, %v14020_v24, %v3605_v9  ;;  %v6727_v18 = vunpack.i.h.bf16 %v6725_v25  ;;  %v6726_v49 = vunpack.i.l.bf16 %v6725_v25  ;;  %v11610_v57 = vsel %vm1925_vm1, %v4213_v28, %v4215_v33  ;;  %v14024_v25 = vld [vmem:[#allocation193_spill] sm:$0xff] }
 0x305   : > { %14021 = vst [vmem:[#allocation80_spill] sm:$0xff] %v11610_v57  ;;  %v11613_v37 = vsel %vm1925_vm1, %v5044_v54, %v5046_v19  ;;  %v3648_v50 = vadd.f32 %v3606_v39, %v3537_v17  ;;  %v3650_v60 = vadd.f32 %v3610_v2, %v3539_v5  ;;  %v3649_v23 = vadd.f32 %v3608_v21, %v3538_v29  ;;  %v14028_v17 = vld [vmem:[#allocation279_spill] sm:$0xff]  ;;  %v14030_v21 = vld [vmem:[#allocation286_spill] sm:$0xff]  ;;  %v14086_v13 = vld [vmem:[#allocation125_spill] sm:$0xff] }
 0x306   : > { %14022 = vst [vmem:[#allocation100_spill] sm:$0xff] %v11613_v37  ;;  %v14023_v9 = vrot.slane %v11374_v36, 1  ;;  %v3852_v4 = vsel %vm724_vm0, %v3849_v48, %v3851_v46  ;;  %v4211_v6 = vrot.slane %v4162_v30, 2  ;;  %v5042_v61 = vrot.slane %v4993_v53, 2 }
 0x307   : > { %v11619_v58 = vadd.f32 %v3854_v7, %v3650_v60  ;;  %v14025_v33 = vrot.slane %v14024_v25, 1  ;;  %v14027_v43 = vrot.slane %v14026_v31, 1  ;;  %v14029_v5 = vrot.slane %v14028_v17, 1  ;;  %v14042_v31 = vld [vmem:[#allocation203_spill] sm:$0xff]  ;;  %v14043_v17 = vld [vmem:[#allocation194_spill] sm:$0xff] }
 0x308   : > { %v3850_v11 = vsel %vm724_vm0, %v14023_v9, %v3849_v48  ;;  %v14031_v29 = vrot.slane %v14030_v21, 1  ;;  %v11632_v24 = vmul.f32 %v6727_v18, %v9057_v44  ;;  %v11635_v46 = vmul.f32 %v6727_v18, %v8599_v35 }
 0x309   : > { %v3394_v19 = vsel %vm724_vm0, %v14027_v43, %v14025_v33  ;;  %v3806_v30 = vmul.f32 %v6726_v49, %v8599_v35  ;;  %v11639_v39 = vmul.f32 %v6726_v49, %v13735_v27  ;;  %v11641_v48 = vadd.f32 %v3850_v11, %v3648_v50 }
 0x30a   : > { %v3507_v36 = vsel %vm724_vm0, %v14031_v29, %v14029_v5  ;;  %14032 = vst [vmem:[#allocation101_spill] sm:$0xff] %v11632_v24  ;;  %14033 = vst [vmem:[#allocation248_spill] sm:$0xff] %v11635_v46  ;;  %v11643_v53 = vadd.f32 %v3852_v4, %v3649_v23  ;;  %v6722_v7 = vunpack.i.h.bf16 %v6720_v56  ;;  %v14035_v2 = vmov %v14027_v43  ;;  %v14084_v24 = vld [vmem:[#allocation146_spill] sm:$0xff] }
 0x30b   : > { %14034 = vst [vmem:[#allocation252_spill] sm:$0xff] %v11639_v39  ;;  %v14036_v60 = vrot.slane %v13976_v52, 1  ;;  %v14037_v33 = vrot.slane %v11377_v16, 2  ;;  %v11656_v43 = vsel %vm1925_vm1, %v4211_v6, %v4213_v28  ;;  %v11659_v50 = vmul.f32 %v6726_v49, %v9057_v44  ;;  %v14045_v28 = vld [vmem:[#allocation218_spill] sm:$0xff] }
 0x30c   : > { %14038 = vst [vmem:[#allocation108_spill] sm:$0xff] %v11656_v43  ;;  %v6721_v23 = vunpack.i.l.bf16 %v6720_v56  ;;  %v14040_v11 = vrot.slane %v11380_v10, 2  ;;  %v11667_v52 = vsel %vm1925_vm1, %v5042_v61, %v5044_v54  ;;  %v3613_v16 = vrot.slane %v14042_v31, 2  ;;  %v14048_v10 = vld [vmem:[#allocation112_spill] sm:$0xff]  ;;  %v14058_v31 = vld [vmem:[#allocation55_spill] sm:$0xff] }
 0x30d   : > { %v3392_v9 = vsel %vm724_vm0, %v14036_v60, %v14035_v2  ;;  %v11653_v18 = vsel %vm1925_vm1, %v14037_v33, %v4211_v6  ;;  %14039 = vst [vmem:[#allocation43_spill] sm:$0xff] %v11659_v50  ;;  %14041 = vst [vmem:[#allocation41_spill] sm:$0xff] %v11667_v52  ;;  %v11672_v29 = vmul.f32 %v6722_v7, %v8599_v35  ;;  %v14046_v6 = vrot.slane %v14045_v28, 1  ;;  %v14049_v60 = vld [vmem:[#allocation290_spill] sm:$0xff] }
 0x30e   : > { %v11664_v4 = vsel %vm1925_vm1, %v14040_v11, %v5042_v61  ;;  %v14047_v49 = vrot.slane %v14024_v25, 1  ;;  %v3430_v2 = vadd.f32 %v3392_v9, %v14048_v10  ;;  %v14050_v33 = vrot.slane %v14049_v60, 1 }
 0x30f   : > { %14044 = vst [vmem:[#allocation19_spill] sm:$0xff] %v11672_v29  ;;  %v14051_v54 = vrot.slane %v13984_v14, 1  ;;  %v3861_v5 = vrot.slane %v3806_v30, 1  ;;  %v11688_v37 = vmul.f32 %v6722_v7, %v13735_v27  ;;  %v11693_v9 = vmul.f32 %v6721_v23, %v8599_v35  ;;  %v14057_v30 = vld [vmem:[#allocation58_spill] sm:$0xff] }
 0x310   : > { %v3396_v56 = vsel %vm724_vm0, %v14047_v49, %v14046_v6  ;;  %v6735_v49 = vpop.permute.xlu1 %6734  ;;  %v14054_v14 = vrot.slane %v14043_v17, 2  ;;  %v14062_v46 = vrot.slane %v13994_v59, 2  ;;  %v14085_v52 = vrot.slane %v14084_v24, 2 }
 0x311   : > { %v3503_v61 = vsel %vm724_vm0, %v14051_v54, %v14050_v33  ;;  %14052 = vst [vmem:[#allocation242_spill] sm:$0xff] %v11688_v37  ;;  %14053 = vst [vmem:[#allocation162_spill] sm:$0xff] %v11693_v9  ;;  %v11701_v33 = vmul.f32 %v6722_v7, %v9057_v44  ;;  %v3431_v54 = vadd.f32 %v3394_v19, %v14057_v30  ;;  %v12744_v50 = vrot.slane %v11693_v9, 1  ;;  %v14083_v37 = vld [vmem:[#allocation160_spill] sm:$0xff] }
 0x312   : > { %v3541_v6 = vadd.f32 %v3503_v61, %v3430_v2  ;;  %v11698_v10 = vsel %vm1925_vm1, %v3613_v16, %v14054_v14  ;;  %v3432_v11 = vadd.f32 %v3396_v56, %v14058_v31  ;;  %v14059_v2 = vrot.slane %v14030_v21, 1 }
 0x313   : > { %14055 = vst [vmem:[#allocation109_spill] sm:$0xff] %v11698_v10  ;;  %14056 = vst [vmem:[#allocation46_spill] sm:$0xff] %v11701_v33  ;;  %v14060_v61 = vrot.slane %v14049_v60, 1  ;;  %v11713_v14 = vmul.f32 %v6721_v23, %v13735_v27  ;;  %v3614_v19 = vsel %vm1925_vm1, %v14062_v46, %v3613_v16  ;;  %v11720_v56 = vmul.f32 %v6721_v23, %v9057_v44  ;;  %v14082_v46 = vld [vmem:[#allocation75_spill] sm:$0xff] }
 0x314   : > { %v6737_v31 = vunpack.i.h.bf16 %v6735_v49  ;;  %v3652_v21 = vadd.f32 %v3614_v19, %v3541_v6  ;;  %v14063_v60 = vrot.slane %v11497_v22, 1  ;;  %v11731_v59 = vadd.f32 %v3507_v36, %v3432_v11 }
 0x315   : > { %v3505_v28 = vsel %vm724_vm0, %v14060_v61, %v14059_v2  ;;  %14061 = vst [vmem:[#allocation25_spill] sm:$0xff] %v11713_v14  ;;  %v12745_v2 = vrot.slane %v11713_v14, 2  ;;  %v6736_v61 = vunpack.i.l.bf16 %v6735_v49  ;;  %v14067_v16 = vrot.slane %v11672_v29, 1  ;;  %v14072_v14 = vld [vmem:[#allocation211_spill] sm:$0xff] }
 0x316   : > { %v3858_v30 = vsel %vm724_vm0, %v14063_v60, %v12744_v50  ;;  %v11729_v25 = vadd.f32 %v3505_v28, %v3431_v54  ;;  %14065 = vst [vmem:[#allocation39_spill] sm:$0xff] %v11731_v59  ;;  %v11742_v22 = vmul.f32 %v6737_v31, %v9057_v44  ;;  %v11745_v49 = vmul.f32 %v6737_v31, %v8599_v35  ;;  %v14071_v50 = vld [vmem:[#allocation236_spill] sm:$0xff]  ;;  %v14074_v60 = vld [vmem:[#allocation209_spill] sm:$0xff] }
 0x317   : > { %v11737_v6 = vsel %vm724_vm0, %v14067_v16, %v3861_v5  ;;  %v11739_v19 = vadd.f32 %v3858_v30, %v3652_v21  ;;  %v14069_v36 = vrot.slane %v11500_v26, 2  ;;  %v11756_v5 = vmul.f32 %v6737_v31, %v13735_v27  ;;  %v6730_v21 = vpop.permute.xlu0 %6729  ;;  %v14070_v16 = vld [vmem:[#allocation241_spill] sm:$0xff]  ;;  %v14078_v59 = vld [vmem:[#allocation20_spill] sm:$0xff] }
 0x318   : > { %14064 = vst [vmem:[#allocation36_spill] sm:$0xff] %v11729_v25  ;;  %14068 = vst [vmem:[#allocation16_spill] sm:$0xff] %v11737_v6  ;;  %v4035_v54 = vmul.f32 %v6736_v61, %v9057_v44  ;;  %v4802_v7 = vrot.slane %v14070_v16, 2  ;;  %v12752_v23 = vrot.slane %v14071_v50, 2  ;;  %v5102_v28 = vmul.f32 %v6736_v61, %v13735_v27  ;;  %v14076_v16 = vld [vmem:[#allocation214_spill] sm:$0xff] }
 0x319   : > { %v11752_v11 = vsel %vm1925_vm1, %v14069_v36, %v12745_v2  ;;  %v4873_v2 = vmul.f32 %v6736_v61, %v8599_v35  ;;  %v14073_v33 = vrot.slane %v14072_v14, 1  ;;  %v14075_v6 = vrot.slane %v14074_v60, 1 }
 0x31a   : > { %v4075_v36 = vrot.slane %v4035_v54, 1  ;;  %v4805_v31 = vsel %vm1925_vm1, %v4802_v7, %v12752_v23  ;;  %v4800_v9 = vrot.slane %v14076_v16, 2  ;;  %v6732_v29 = vunpack.i.h.bf16 %v6730_v21 }
 0x31b   : > { %v1807_v30 = vsel %vm724_vm0, %v14075_v6, %v14073_v33  ;;  %v14077_v26 = vrot.slane %v11742_v22, 1  ;;  %v4855_v10 = vadd.f32 %v4805_v31, %v14078_v59  ;;  %v4913_v61 = vrot.slane %v4873_v2, 1 }
 0x31c   : > { %v5142_v25 = vrot.slane %v5102_v28, 2  ;;  %v14079_v23 = vrot.slane %v10897_v8, 2  ;;  %v4034_v60 = vmul.f32 %v6732_v29, %v9057_v44  ;;  %v4872_v33 = vmul.f32 %v6732_v29, %v8599_v35 }
 0x31d   : > { %v4078_v54 = vsel %vm724_vm0, %v4075_v36, %v14077_v26  ;;  %v14080_v6 = vrot.slane %v11745_v49, 1  ;;  %v14081_v26 = vrot.slane %v11756_v5, 2  ;;  %v5101_v2 = vmul.f32 %v6732_v29, %v13735_v27  ;;  %v14088_v29 = vld [vmem:[#allocation47_spill] sm:$0xff] }
 0x31e   : > { %v4128_v17 = vadd.f32 %v4078_v54, %v11388_v41  ;;  %v4801_v14 = vsel %vm1925_vm1, %v14079_v23, %v4800_v9  ;;  %v6731_v28 = vunpack.i.l.bf16 %v6730_v21  ;;  %v4073_v31 = vrot.slane %v4034_v60, 1  ;;  %v14089_v21 = vld [vmem:[#allocation18_spill] sm:$0xff] }
 0x31f   : > { %v4916_v16 = vsel %vm724_vm0, %v4913_v61, %v14080_v6  ;;  %v5145_v59 = vsel %vm1925_vm1, %v5142_v25, %v14081_v26  ;;  %v4911_v23 = vrot.slane %v4872_v33, 1  ;;  %v5140_v54 = vrot.slane %v5101_v2, 2  ;;  %v14091_v2 = vld [vmem:[#allocation21_spill] sm:$0xff] }
 0x320   : > { %v4246_v41 = vadd.f32 %v11400_v32, %v4128_v17  ;;  %v4966_v8 = vadd.f32 %v4916_v16, %v4855_v10  ;;  %v1611_v39 = vadd.f32 %v14083_v37, %v14082_v46  ;;  %v14087_v6 = vrot.slane %v14086_v13, 2 }
 0x321   : > { %v11801_v26 = vmul.f32 %v6731_v28, %v9057_v44  ;;  %v14090_v43 = vmax.f32 %v14088_v29, %v14089_v21  ;;  %v4076_v10 = vsel %vm724_vm0, %v4073_v31, %v4075_v36  ;;  %v4914_v60 = vsel %vm724_vm0, %v4911_v23, %v4913_v61  ;;  %v6745_v36 = vpop.permute.xlu1 %6744  ;;  %v11820_v61 = vld [vmem:[%s12284_s2] ss:$0 sm:$0xff] }
 0x322   : > { %v1930_v57 = vsel %vm1925_vm1, %v14087_v6, %v14085_v52  ;;  %v5077_v17 = vadd.f32 %v11408_v63, %v4966_v8  ;;  %v5143_v37 = vsel %vm1925_vm1, %v5140_v54, %v5142_v25  ;;  %v1859_v24 = vadd.f32 %v1807_v30, %v1611_v39  ;;  %v14092_v30 = vld [vmem:[#allocation44_spill] sm:$0xff]  ;;  %v14094_v6 = vld [vmem:[#allocation45_spill] sm:$0xff] }
 0x323   : > { %v4264_v32 = vmax.f32 %v14090_v43, %v4246_v41  ;;  %v12759_v46 = vrot.slane %v11801_v26, 1  ;;  %v4127_v52 = vadd.f32 %v4076_v10, %v11261_v45  ;;  %v4803_v16 = vsel %vm1925_vm1, %v4800_v9, %v4802_v7 }
 0x324   : > { %v5195_v33 = vadd.f32 %v5145_v59, %v5077_v17  ;;  %v4853_v43 = vadd.f32 %v4801_v14, %v14091_v2  ;;  %v11815_v63 = vmul.f32 %v6731_v28, %v8599_v35  ;;  %v1982_v39 = vadd.f32 %v1930_v57, %v1859_v24  ;;  %v14093_v57 = vld [vmem:[#allocation14_spill] sm:$0xff] }
 0x325   : > { %v4074_v25 = vsel %vm724_vm0, %v12759_v46, %v4073_v31  ;;  %v4245_v45 = vadd.f32 %v11266_v15, %v4127_v52  ;;  %v4854_v9 = vadd.f32 %v4803_v16, %v14092_v30  ;;  %v11830_v41 = vmul.f32 %v6731_v28, %v13735_v27 }
 0x326   : > { %v5213_v7 = vmax.f32 %v4264_v32, %v5195_v33  ;;  %v4126_v14 = vadd.f32 %v4074_v25, %v11284_v38  ;;  %v12758_v59 = vrot.slane %v11815_v63, 1  ;;  %v3122_v8 = vmax.f32 %v1982_v39, %v11132_v0 }
 0x327   : > { %v14095_v29 = vmax.f32 %v14093_v57, %v14094_v6  ;;  %v4965_v31 = vadd.f32 %v4914_v60, %v4854_v9  ;;  %v6747_v17 = vunpack.i.h.bf16 %v6745_v36  ;;  %v12757_v28 = vrot.slane %v11830_v41, 2  ;;  %v6740_v9 = vpop.permute.xlu0 %6739  ;;  %v14098_v6 = vld [vmem:[#allocation234_spill] sm:$0xff] }
 0x328   : > { %v5238_v15 = vadd.f32 %v11820_v61, %v5213_v7  ;;  %v4244_v32 = vadd.f32 %v11276_v34, %v4126_v14  ;;  %v4912_v38 = vsel %vm724_vm0, %v12758_v59, %v4911_v23 }
 0x329   : > { %v4263_v21 = vmax.f32 %v14095_v29, %v4245_v45  ;;  %v4964_v10 = vadd.f32 %v4912_v38, %v4853_v43  ;;  %v5076_v24 = vadd.f32 %v11271_v20, %v4965_v31  ;;  %v11845_v0 = vmul.f32 %v6747_v17, %v9057_v44  ;;  %v14096_v45 = vld [vmem:[#allocation259_spill] sm:$0xff] }
 0x32a   : > { %v11848_v52 = vmul.f32 %v6747_v17, %v8599_v35  ;;  %v5256_v60 = vmax.f32 %v5238_v15, 0.0  ;;  %v4262_v33 = vmax.f32 %v3122_v8, %v4244_v32  ;;  %v5141_v34 = vsel %vm1925_vm1, %v12757_v28, %v5140_v54  ;;  %v14097_v8 = vld [vmem:[#allocation256_spill] sm:$0xff] }
 0x32b   : > { %v11854_v16 = vmul.f32 %v6747_v17, %v13735_v27  ;;  %v5075_v20 = vadd.f32 %v11281_v1, %v4964_v10  ;;  %v5194_v23 = vadd.f32 %v5143_v37, %v5076_v24  ;;  %v4085_v2 = vrot.slane %v11845_v0, 1  ;;  %v14099_v17 = vld [vmem:[#allocation228_spill] sm:$0xff] }
 0x32c   : > { %v4923_v43 = vrot.slane %v11848_v52, 1  ;;  %v5656_v39 = vpack.c.bf16 %v5256_v60, %v5256_v60  ;;  %v6746_v54 = vunpack.i.l.bf16 %v6745_v36  ;;  %v4810_v30 = vrot.slane %v14096_v45, 2  ;;  %v14100_v24 = vld [vmem:[#allocation92_spill] sm:$0xff] }
 0x32d   : > { %v12760_v25 = vrot.slane %v11854_v16, 2  ;;  %v5193_v7 = vadd.f32 %v5141_v34, %v5075_v20  ;;  %v5212_v14 = vmax.f32 %v4263_v21, %v5194_v23  ;;  %v4812_v57 = vrot.slane %v14097_v8, 2 }
 0x32e   : > { %v4806_v29 = vrot.slane %v14098_v6, 2  ;;  %5347 = vst.msk [vmem:[%s11859_s29 + $0xc] sm:$0xf] %vm5343_vm2, %v5656_v39  ;;  %v4039_v1 = vmul.f32 %v6746_v54, %v9057_v44  ;;  %v4877_v37 = vmul.f32 %v6746_v54, %v8599_v35  ;;  %v5106_v31 = vmul.f32 %v6746_v54, %v13735_v27 }
 0x32f   : > { %v4808_v15 = vrot.slane %v14099_v17, 2  ;;  %v5211_v36 = vmax.f32 %v4262_v33, %v5193_v7  ;;  %v5237_v32 = vadd.f32 %v11820_v61, %v5212_v14  ;;  %v4813_v21 = vsel %vm1925_vm1, %v4810_v30, %v4812_v57 }
 0x330   : > { %v6742_v38 = vunpack.i.h.bf16 %v6740_v9  ;;  %v4083_v10 = vrot.slane %v4039_v1, 1  ;;  %v4859_v60 = vadd.f32 %v4813_v21, %v14100_v24  ;;  %v4921_v34 = vrot.slane %v4877_v37, 1 }
 0x331   : > { %v5150_v20 = vrot.slane %v5106_v31, 2  ;;  %v5236_v23 = vadd.f32 %v11820_v61, %v5211_v36  ;;  %v5255_v39 = vmax.f32 %v5237_v32, 0.0  ;;  %v4809_v54 = vsel %vm1925_vm1, %v4806_v29, %v4808_v15 }
 0x332   : > { %v4038_v33 = vmul.f32 %v6742_v38, %v9057_v44  ;;  %v4086_v45 = vsel %vm724_vm0, %v4083_v10, %v4085_v2  ;;  %v4924_v7 = vsel %vm724_vm0, %v4921_v34, %v4923_v43  ;;  %v4876_v6 = vmul.f32 %v6742_v38, %v8599_v35 }
 0x333   : > { %v5153_v14 = vsel %vm1925_vm1, %v5150_v20, %v12760_v25  ;;  %v5254_v1 = vmax.f32 %v5236_v23, 0.0  ;;  %v5655_v37 = vpack.c.bf16 %v5255_v39, %v5255_v39  ;;  %v4132_v31 = vadd.f32 %v4086_v45, %v11516_v3 }
 0x334   : > { %v4970_v17 = vadd.f32 %v4924_v7, %v4859_v60  ;;  %v4081_v36 = vrot.slane %v4038_v33, 1  ;;  %v4919_v32 = vrot.slane %v4876_v6, 1  ;;  %v5105_v21 = vmul.f32 %v6742_v38, %v13735_v27  ;;  %v14103_v38 = vld [vmem:[#allocation226_spill] sm:$0xff]  ;;  %v6755_v6 = vpop.permute.xlu1 %6754 }
 0x335   : > { %v6741_v24 = vunpack.i.l.bf16 %v6740_v9  ;;  %v5654_v28 = vpack.c.bf16 %v5254_v1, %v5254_v1  ;;  %5346 = vst.msk [vmem:[%s11859_s29 + $0x8] sm:$0xf] %vm5343_vm2, %v5655_v37  ;;  %v4250_v59 = vadd.f32 %v11523_v62, %v4132_v31  ;;  %v14101_v25 = vrot.slane %v14071_v50, 2  ;;  %v14102_v9 = vld [vmem:[#allocation134_spill] sm:$0xff]  ;;  %v14106_v1 = vld [vmem:[#allocation83_spill] sm:$0xff] }
 0x336   : > { %v5081_v46 = vadd.f32 %v11532_v47, %v4970_v17  ;;  %v4084_v39 = vsel %vm724_vm0, %v4081_v36, %v4083_v10  ;;  %v4922_v3 = vsel %vm724_vm0, %v4919_v32, %v4921_v34  ;;  %v5148_v60 = vrot.slane %v5105_v21, 2  ;;  %v14105_v10 = vld [vmem:[#allocation166_spill] sm:$0xff]  ;;  %v14107_v17 = vld [vmem:[#allocation57_spill] sm:$0xff] }
 0x337   : > { %v4807_v23 = vsel %vm1925_vm1, %v14101_v25, %v4806_v29  ;;  %v4037_v33 = vmul.f32 %v6741_v24, %v9057_v44  ;;  %5345 = vst.msk [vmem:[%s11859_s29 + $0x4] sm:$0xf] %vm5343_vm2, %v5654_v28  ;;  %v14104_v45 = vmax.f32 %v14102_v9, %v14103_v38  ;;  %v4131_v47 = vadd.f32 %v4084_v39, %v11349_v42  ;;  %v14110_v39 = vld [vmem:[#allocation239_spill] sm:$0xff] }
 0x338   : > { %v5199_v62 = vadd.f32 %v5153_v14, %v5081_v46  ;;  %v4811_v50 = vsel %vm1925_vm1, %v4808_v15, %v4810_v30  ;;  %v5151_v25 = vsel %vm1925_vm1, %v5148_v60, %v5150_v20  ;;  %v4856_v34 = vadd.f32 %v4807_v23, %v14105_v10  ;;  %v14109_v23 = vld [vmem:[#allocation145_spill] sm:$0xff]  ;;  %v14112_v9 = vld [vmem:[#allocation71_spill] sm:$0xff] }
 0x339   : > { %v4268_v7 = vmax.f32 %v14104_v45, %v4250_v59  ;;  %v4079_v29 = vrot.slane %v4037_v33, 1  ;;  %v4857_v37 = vadd.f32 %v4809_v54, %v14106_v1  ;;  %v4249_v28 = vadd.f32 %v11324_v51, %v4131_v47  ;;  %v14111_v51 = vld [vmem:[#allocation28_spill] sm:$0xff] }
 0x33a   : > { %v4858_v21 = vadd.f32 %v4811_v50, %v14107_v17  ;;  %v4875_v59 = vmul.f32 %v6741_v24, %v8599_v35  ;;  %v14108_v46 = vrot.slane %v11742_v22, 1  ;;  %v5104_v15 = vmul.f32 %v6741_v24, %v13735_v27  ;;  %v14114_v50 = vld [vmem:[#allocation139_spill] sm:$0xff] }
 0x33b   : > { %v5217_v31 = vmax.f32 %v4268_v7, %v5199_v62  ;;  %v4082_v30 = vsel %vm724_vm0, %v4079_v29, %v4081_v36  ;;  %v6757_v20 = vunpack.i.h.bf16 %v6755_v6  ;;  %v14113_v38 = vmax.f32 %v14111_v51, %v14112_v9 }
 0x33c   : > { %v4080_v42 = vsel %vm724_vm0, %v14108_v46, %v4079_v29  ;;  %v4130_v33 = vadd.f32 %v4082_v30, %v14110_v39  ;;  %v4917_v7 = vrot.slane %v4875_v59, 1  ;;  %v4969_v62 = vadd.f32 %v4922_v3, %v4858_v21  ;;  %v14115_v29 = vld [vmem:[#allocation185_spill] sm:$0xff]  ;;  %v14117_v3 = vld [vmem:[#allocation15_spill] sm:$0xff]  ;;  %v14123_v39 = vld [vmem:[#allocation76_spill] sm:$0xff] }
 0x33d   : > { %v5242_v14 = vadd.f32 %v11820_v61, %v5217_v31  ;;  %v4129_v54 = vadd.f32 %v4080_v42, %v14109_v23  ;;  %v4267_v45 = vmax.f32 %v14113_v38, %v4249_v28  ;;  %v5146_v22 = vrot.slane %v5104_v15, 2  ;;  %v14119_v30 = vld [vmem:[#allocation67_spill] sm:$0xff]  ;;  %v14120_v15 = vld [vmem:[#allocation77_spill] sm:$0xff] }
 0x33e   : > { %v11929_v47 = vmul.f32 %v6757_v20, %v9057_v44  ;;  %v4248_v10 = vadd.f32 %v14115_v29, %v4130_v33  ;;  %v11934_v1 = vmul.f32 %v6757_v20, %v8599_v35  ;;  %v14116_v31 = vrot.slane %v11745_v49, 1  ;;  %v14126_v29 = vld [vmem:[#allocation235_spill] sm:$0xff] }
 0x33f   : > { %v5260_v36 = vmax.f32 %v5242_v14, 0.0  ;;  %v4247_v24 = vadd.f32 %v14114_v50, %v4129_v54  ;;  %v4920_v28 = vsel %vm724_vm0, %v4917_v7, %v4919_v32  ;;  %v5080_v21 = vadd.f32 %v14117_v3, %v4969_v62  ;;  %v14122_v54 = vld [vmem:[#allocation73_spill] sm:$0xff] }
 0x340   : > { %v4918_v17 = vsel %vm724_vm0, %v14116_v31, %v4917_v7  ;;  %v14118_v59 = vrot.slane %v11756_v5, 2  ;;  %v14121_v14 = vmax.f32 %v14119_v30, %v14120_v15  ;;  %v14124_v33 = vmax.f32 %v14122_v54, %v14123_v39  ;;  %v14125_v5 = vld [vmem:[#allocation148_spill] sm:$0xff] }
 0x341   : > { %v5660_v42 = vpack.c.bf16 %v5260_v36, %v5260_v36  ;;  %v4967_v49 = vadd.f32 %v4918_v17, %v4856_v34  ;;  %v4968_v9 = vadd.f32 %v4920_v28, %v4857_v37  ;;  %v5149_v38 = vsel %vm1925_vm1, %v5146_v22, %v5148_v60  ;;  %v14127_v34 = vld [vmem:[#allocation284_spill] sm:$0xff]  ;;  %v14128_v17 = vld [vmem:[#allocation275_spill] sm:$0xff] }
 0x342   : > { %v5147_v46 = vsel %vm1925_vm1, %v14118_v59, %v5146_v22  ;;  %v4265_v23 = vmax.f32 %v14121_v14, %v4247_v24  ;;  %v4266_v51 = vmax.f32 %v14124_v33, %v4248_v10  ;;  %v5198_v32 = vadd.f32 %v5151_v25, %v5080_v21  ;;  %v14129_v30 = vld [vmem:[#allocation184_spill] sm:$0xff]  ;;  %v14130_v33 = vld [vmem:[#allocation250_spill] sm:$0xff] }
 0x343   : > { %v4093_v7 = vrot.slane %v11929_v47, 1  ;;  %5351 = vst.msk [vmem:[%s11859_s29 + $0x1c] sm:$0xf] %vm5343_vm2, %v5660_v42  ;;  %v5078_v62 = vadd.f32 %v14125_v5, %v4967_v49  ;;  %v4931_v36 = vrot.slane %v11934_v1, 1  ;;  %v11957_v50 = vmul.f32 %v6757_v20, %v13735_v27  ;;  %v14131_v5 = vld [vmem:[#allocation243_spill] sm:$0xff]  ;;  %v14173_v47 = vld [vmem:[#allocation10_spill] sm:$0xff] }
 0x344   : > { %v6756_v24 = vunpack.i.l.bf16 %v6755_v6  ;;  %v5079_v31 = vadd.f32 %v14126_v29, %v4968_v9  ;;  %v5216_v10 = vmax.f32 %v4267_v45, %v5198_v32  ;;  %v4818_v37 = vrot.slane %v14127_v34, 2  ;;  %v6750_v9 = vpop.permute.xlu0 %6749 }
 0x345   : > { %v4820_v60 = vrot.slane %v14128_v17, 2  ;;  %v5196_v25 = vadd.f32 %v5147_v46, %v5078_v62  ;;  %v5160_v22 = vrot.slane %v11957_v50, 2  ;;  %v4814_v49 = vrot.slane %v14130_v33, 2 }
 0x346   : > { %v4043_v28 = vmul.f32 %v6756_v24, %v9057_v44  ;;  %v4881_v3 = vmul.f32 %v6756_v24, %v8599_v35  ;;  %v5197_v21 = vadd.f32 %v5149_v38, %v5079_v31  ;;  %v5241_v59 = vadd.f32 %v11820_v61, %v5216_v10 }
 0x347   : > { %v4821_v6 = vsel %vm1925_vm1, %v4818_v37, %v4820_v60  ;;  %v5110_v20 = vmul.f32 %v6756_v24, %v13735_v27  ;;  %v5214_v45 = vmax.f32 %v4265_v23, %v5196_v25  ;;  %v4816_v62 = vrot.slane %v14131_v5, 2 }
 0x348   : > { %v4091_v42 = vrot.slane %v4043_v28, 1  ;;  %v4863_v15 = vadd.f32 %v4821_v6, %v14129_v30  ;;  %v4929_v46 = vrot.slane %v4881_v3, 1  ;;  %v5215_v14 = vmax.f32 %v4266_v51, %v5197_v21 }
 0x349   : > { %v5259_v54 = vmax.f32 %v5241_v59, 0.0  ;;  %v5158_v39 = vrot.slane %v5110_v20, 2  ;;  %v5239_v38 = vadd.f32 %v11820_v61, %v5214_v45  ;;  %v4817_v25 = vsel %vm1925_vm1, %v4814_v49, %v4816_v62 }
 0x34a   : > { %v4094_v32 = vsel %vm724_vm0, %v4091_v42, %v4093_v7  ;;  %v4932_v23 = vsel %vm724_vm0, %v4929_v46, %v4931_v36  ;;  %v5240_v51 = vadd.f32 %v11820_v61, %v5215_v14  ;;  %v6752_v28 = vunpack.i.h.bf16 %v6750_v9  ;;  %v14132_v14 = vld [vmem:[#allocation93_spill] sm:$0xff] }
 0x34b   : > { %v5659_v24 = vpack.c.bf16 %v5259_v54, %v5259_v54  ;;  %v4136_v29 = vadd.f32 %v4094_v32, %v11641_v48  ;;  %v4974_v31 = vadd.f32 %v4932_v23, %v4863_v15  ;;  %v5257_v10 = vmax.f32 %v5239_v38, 0.0  ;;  %v14133_v54 = vld [vmem:[#allocation23_spill] sm:$0xff] }
 0x34c   : > { %v5161_v34 = vsel %vm1925_vm1, %v5158_v39, %v5160_v22  ;;  %v5258_v3 = vmax.f32 %v5240_v51, 0.0  ;;  %v6751_v6 = vunpack.i.l.bf16 %v6750_v9  ;;  %v4042_v20 = vmul.f32 %v6752_v28, %v9057_v44 }
 0x34d   : > { %5350 = vst.msk [vmem:[%s11859_s29 + $0x18] sm:$0xf] %vm5343_vm2, %v5659_v24  ;;  %v4254_v21 = vadd.f32 %v11653_v18, %v4136_v29  ;;  %v5085_v59 = vadd.f32 %v11664_v4, %v4974_v31  ;;  %v5657_v48 = vpack.c.bf16 %v5257_v10, %v5257_v10  ;;  %v4880_v45 = vmul.f32 %v6752_v28, %v8599_v35  ;;  %v14135_v31 = vld [vmem:[#allocation232_spill] sm:$0xff] }
 0x34e   : > { %v5109_v30 = vmul.f32 %v6752_v28, %v13735_v27  ;;  %v5658_v15 = vpack.c.bf16 %v5258_v3, %v5258_v3  ;;  %v14134_v33 = vmax.f32 %v14132_v14, %v14133_v54  ;;  %v4041_v23 = vmul.f32 %v6751_v6, %v9057_v44  ;;  %v14141_v14 = vld [vmem:[#allocation154_spill] sm:$0xff] }
 0x34f   : > { %v5203_v32 = vadd.f32 %v5161_v34, %v5085_v59  ;;  %5348 = vst.msk [vmem:[%s11859_s29 + $0x10] sm:$0xf] %vm5343_vm2, %v5657_v48  ;;  %v4089_v18 = vrot.slane %v4042_v20, 1  ;;  %v4927_v4 = vrot.slane %v4880_v45, 1  ;;  %v4815_v5 = vsel %vm1925_vm1, %v4812_v57, %v4814_v49  ;;  %v6765_v48 = vpop.permute.xlu1 %6764  ;;  %v14138_v20 = vld [vmem:[#allocation245_spill] sm:$0xff] }
 0x350   : > { %v4272_v38 = vmax.f32 %v14134_v33, %v4254_v21  ;;  %v5156_v9 = vrot.slane %v5109_v30, 2  ;;  %5349 = vst.msk [vmem:[%s11859_s29 + $0x14] sm:$0xf] %vm5343_vm2, %v5658_v15  ;;  %v4087_v24 = vrot.slane %v4041_v23, 1  ;;  %v4819_v29 = vsel %vm1925_vm1, %v4816_v62, %v4818_v37  ;;  %v14136_v21 = vld [vmem:[#allocation85_spill] sm:$0xff]  ;;  %v14137_v37 = vld [vmem:[#allocation152_spill] sm:$0xff] }
 0x351   : > { %v4860_v10 = vadd.f32 %v4815_v5, %v14135_v31  ;;  %v4092_v34 = vsel %vm724_vm0, %v4089_v18, %v4091_v42  ;;  %v4930_v28 = vsel %vm724_vm0, %v4927_v4, %v4929_v46  ;;  %v4861_v59 = vadd.f32 %v4817_v25, %v14136_v21  ;;  %v14139_v42 = vld [vmem:[#allocation87_spill] sm:$0xff]  ;;  %v14140_v46 = vld [vmem:[#allocation140_spill] sm:$0xff]  ;;  %v14145_v31 = vld [vmem:[#allocation222_spill] sm:$0xff] }
 0x352   : > { %v5221_v51 = vmax.f32 %v4272_v38, %v5203_v32  ;;  %v5159_v3 = vsel %vm1925_vm1, %v5156_v9, %v5158_v39  ;;  %v4088_v57 = vsel %vm724_vm0, %v4085_v2, %v4087_v24  ;;  %v4090_v49 = vsel %vm724_vm0, %v4087_v24, %v4089_v18  ;;  %v14142_v2 = vld [vmem:[#allocation157_spill] sm:$0xff]  ;;  %v14143_v32 = vld [vmem:[#allocation155_spill] sm:$0xff] }
 0x353   : > { %v4135_v62 = vadd.f32 %v4092_v34, %v14137_v37  ;;  %v4133_v45 = vadd.f32 %v4088_v57, %v14138_v20  ;;  %v4134_v30 = vadd.f32 %v4090_v49, %v14139_v42  ;;  %v4862_v15 = vadd.f32 %v4819_v29, %v14140_v46  ;;  %v14144_v24 = vld [vmem:[#allocation219_spill] sm:$0xff]  ;;  %v14151_v20 = vld [vmem:[#allocation138_spill] sm:$0xff] }
 0x354   : > { %v5246_v8 = vadd.f32 %v11820_v61, %v5221_v51  ;;  %v4879_v39 = vmul.f32 %v6751_v6, %v8599_v35  ;;  %v5108_v0 = vmul.f32 %v6751_v6, %v13735_v27  ;;  %v6767_v33 = vunpack.i.h.bf16 %v6765_v48  ;;  %v14147_v57 = vld [vmem:[#allocation127_spill] sm:$0xff] }
 0x355   : > { %v4253_v54 = vadd.f32 %v14141_v14, %v4135_v62  ;;  %v4251_v38 = vadd.f32 %v14142_v2, %v4133_v45  ;;  %v4252_v23 = vadd.f32 %v14143_v32, %v4134_v30  ;;  %v4973_v5 = vadd.f32 %v4930_v28, %v4862_v15  ;;  %v14148_v49 = vld [vmem:[#allocation135_spill] sm:$0xff]  ;;  %v14150_v62 = vld [vmem:[#allocation133_spill] sm:$0xff] }
 0x356   : > { %v5264_v25 = vmax.f32 %v5246_v8, 0.0  ;;  %v4925_v18 = vrot.slane %v4879_v39, 1  ;;  %v14146_v34 = vmax.f32 %v14144_v24, %v14145_v31  ;;  %v5154_v21 = vrot.slane %v5108_v0, 2  ;;  %v14153_v39 = vld [vmem:[#allocation244_spill] sm:$0xff] }
 0x357   : > { %v12028_v8 = vmul.f32 %v6767_v33, %v9057_v44  ;;  %v14149_v37 = vmax.f32 %v14147_v57, %v14148_v49  ;;  %v14152_v45 = vmax.f32 %v14150_v62, %v14151_v20  ;;  %v14154_v14 = vrot.slane %v11854_v16, 2  ;;  %v14159_v49 = vld [vmem:[#allocation268_spill] sm:$0xff] }
 0x358   : > { %v5664_v51 = vpack.c.bf16 %v5264_v25, %v5264_v25  ;;  %v4271_v29 = vmax.f32 %v14146_v34, %v4253_v54  ;;  %v4926_v28 = vsel %vm724_vm0, %v4923_v43, %v4925_v18  ;;  %v4928_v30 = vsel %vm724_vm0, %v4925_v18, %v4927_v4  ;;  %v14155_v4 = vld [vmem:[#allocation82_spill] sm:$0xff] }
 0x359   : > { %v4269_v6 = vmax.f32 %v14149_v37, %v4251_v38  ;;  %v4270_v42 = vmax.f32 %v14152_v45, %v4252_v23  ;;  %v4971_v46 = vadd.f32 %v4926_v28, %v4860_v10  ;;  %v4972_v15 = vadd.f32 %v4928_v30, %v4861_v59  ;;  %v14156_v10 = vld [vmem:[#allocation79_spill] sm:$0xff]  ;;  %v14160_v30 = vld [vmem:[#allocation273_spill] sm:$0xff] }
 0x35a   : > { %5355 = vst.msk [vmem:[%s11859_s29 + $0x2c] sm:$0xf] %vm5343_vm2, %v5664_v51  ;;  %v5084_v25 = vadd.f32 %v14153_v39, %v4973_v5  ;;  %v5155_v54 = vsel %vm1925_vm1, %v14154_v14, %v5154_v21  ;;  %v5157_v0 = vsel %vm1925_vm1, %v5154_v21, %v5156_v9  ;;  %v4101_v2 = vrot.slane %v12028_v8, 1  ;;  %v14157_v5 = vld [vmem:[#allocation295_spill] sm:$0xff]  ;;  %v14161_v39 = vld [vmem:[#allocation265_spill] sm:$0xff] }
 0x35b   : > { %v12049_v52 = vmul.f32 %v6767_v33, %v8599_v35  ;;  %v12052_v43 = vmul.f32 %v6767_v33, %v13735_v27  ;;  %v5082_v38 = vadd.f32 %v14155_v4, %v4971_v46  ;;  %v5083_v59 = vadd.f32 %v14156_v10, %v4972_v15  ;;  %v14158_v51 = vld [vmem:[#allocation291_spill] sm:$0xff] }
 0x35c   : > { %v5202_v32 = vadd.f32 %v5159_v3, %v5084_v25  ;;  %v6766_v23 = vunpack.i.l.bf16 %v6765_v48  ;;  %v4826_v9 = vrot.slane %v14157_v5, 2  ;;  %v4828_v24 = vrot.slane %v14158_v51, 2 }
 0x35d   : > { %v4939_v16 = vrot.slane %v12049_v52, 1  ;;  %v5168_v18 = vrot.slane %v12052_v43, 2  ;;  %v5200_v31 = vadd.f32 %v5155_v54, %v5082_v38  ;;  %v5201_v34 = vadd.f32 %v5157_v0, %v5083_v59 }
 0x35e   : > { %v5220_v21 = vmax.f32 %v4271_v29, %v5202_v32  ;;  %v4047_v33 = vmul.f32 %v6766_v23, %v9057_v44  ;;  %v4829_v57 = vsel %vm1925_vm1, %v4826_v9, %v4828_v24  ;;  %v4885_v3 = vmul.f32 %v6766_v23, %v8599_v35 }
 0x35f   : > { %v12066_v48 = vmul.f32 %v6766_v23, %v13735_v27  ;;  %v4822_v37 = vrot.slane %v14159_v49, 2  ;;  %v5218_v62 = vmax.f32 %v4269_v6, %v5200_v31  ;;  %v5219_v20 = vmax.f32 %v4270_v42, %v5201_v34  ;;  %v6760_v42 = vpop.permute.xlu0 %6759 }
 0x360   : > { %v5245_v45 = vadd.f32 %v11820_v61, %v5220_v21  ;;  %v4099_v28 = vrot.slane %v4047_v33, 1  ;;  %v4867_v29 = vadd.f32 %v4829_v57, %v14160_v30  ;;  %v4937_v46 = vrot.slane %v4885_v3, 1  ;;  %v14165_v30 = vld [vmem:[#allocation171_spill] sm:$0xff] }
 0x361   : > { %v5166_v15 = vrot.slane %v12066_v48, 2  ;;  %v4824_v25 = vrot.slane %v14161_v39, 2  ;;  %v5243_v14 = vadd.f32 %v11820_v61, %v5218_v62  ;;  %v5244_v54 = vadd.f32 %v11820_v61, %v5219_v20 }
 0x362   : > { %v5263_v0 = vmax.f32 %v5245_v45, 0.0  ;;  %v4102_v6 = vsel %vm724_vm0, %v4099_v28, %v4101_v2  ;;  %v14162_v4 = vrot.slane %v11720_v56, 2  ;;  %v14163_v38 = vrot.slane %v11503_v55, 2  ;;  %v14164_v45 = vld [vmem:[#allocation42_spill] sm:$0xff] }
 0x363   : > { %v4140_v59 = vadd.f32 %v4102_v6, %v11739_v19  ;;  %v4940_v32 = vsel %vm724_vm0, %v4937_v46, %v4939_v16  ;;  %v5169_v23 = vsel %vm1925_vm1, %v5166_v15, %v5168_v18  ;;  %v5261_v5 = vmax.f32 %v5243_v14, 0.0 }
 0x364   : > { %v5051_v10 = vsel %vm1925_vm1, %v14163_v38, %v14162_v4  ;;  %v5262_v31 = vmax.f32 %v5244_v54, 0.0  ;;  %v5663_v34 = vpack.c.bf16 %v5263_v0, %v5263_v0  ;;  %v4978_v55 = vadd.f32 %v4940_v32, %v4867_v29 }
 0x365   : > { %v4258_v21 = vadd.f32 %v11752_v11, %v4140_v59  ;;  %v4825_v19 = vsel %vm1925_vm1, %v4822_v37, %v4824_v25  ;;  %v6762_v33 = vunpack.i.h.bf16 %v6760_v42  ;;  %v6761_v57 = vunpack.i.l.bf16 %v6760_v42 }
 0x366   : > { %v5661_v3 = vpack.c.bf16 %v5261_v5, %v5261_v5  ;;  %v5662_v49 = vpack.c.bf16 %v5262_v31, %v5262_v31  ;;  %5354 = vst.msk [vmem:[%s11859_s29 + $0x28] sm:$0xf] %vm5343_vm2, %v5663_v34  ;;  %v5089_v62 = vadd.f32 %v5051_v10, %v4978_v55  ;;  %v4823_v20 = vsel %vm1925_vm1, %v4820_v60, %v4822_v37  ;;  %v14167_v60 = vld [vmem:[#allocation98_spill] sm:$0xff]  ;;  %v14168_v10 = vld [vmem:[#allocation179_spill] sm:$0xff] }
 0x367   : > { %v14166_v39 = vmax.f32 %v14164_v45, %v14165_v30  ;;  %v4046_v29 = vmul.f32 %v6762_v33, %v9057_v44  ;;  %v4884_v11 = vmul.f32 %v6762_v33, %v8599_v35  ;;  %v5113_v54 = vmul.f32 %v6762_v33, %v13735_v27 }
 0x368   : > { %5352 = vst.msk [vmem:[%s11859_s29 + $0x20] sm:$0xf] %vm5343_vm2, %v5661_v3  ;;  %5353 = vst.msk [vmem:[%s11859_s29 + $0x24] sm:$0xf] %vm5343_vm2, %v5662_v49  ;;  %v5207_v0 = vadd.f32 %v5169_v23, %v5089_v62  ;;  %v4045_v6 = vmul.f32 %v6761_v57, %v9057_v44  ;;  %v4827_v17 = vsel %vm1925_vm1, %v4824_v25, %v4826_v9  ;;  %v14170_v9 = vld [vmem:[#allocation126_spill] sm:$0xff]  ;;  %v14171_v25 = vld [vmem:[#allocation224_spill] sm:$0xff] }
 0x369   : > { %v4276_v14 = vmax.f32 %v14166_v39, %v4258_v21  ;;  %v4864_v37 = vadd.f32 %v4823_v20, %v14167_v60  ;;  %v4097_v42 = vrot.slane %v4046_v29, 1  ;;  %v4935_v4 = vrot.slane %v4884_v11, 1  ;;  %v14169_v21 = vld [vmem:[#allocation8_spill] sm:$0xff] }
 0x36a   : > { %v5164_v38 = vrot.slane %v5113_v54, 2  ;;  %v4865_v59 = vadd.f32 %v4825_v19, %v14168_v10  ;;  %v4095_v5 = vrot.slane %v4045_v6, 1  ;;  %v4883_v31 = vmul.f32 %v6761_v57, %v8599_v35  ;;  %v14175_v54 = vld [vmem:[#allocation108_spill] sm:$0xff] }
 0x36b   : > { %v5225_v32 = vmax.f32 %v4276_v14, %v5207_v0  ;;  %v5112_v34 = vmul.f32 %v6761_v57, %v13735_v27  ;;  %v4100_v55 = vsel %vm724_vm0, %v4097_v42, %v4099_v28  ;;  %v4938_v23 = vsel %vm724_vm0, %v4935_v4, %v4937_v46  ;;  %v14178_v60 = vld [vmem:[#allocation40_spill] sm:$0xff] }
 0x36c   : > { %v4866_v33 = vadd.f32 %v4827_v17, %v14169_v21  ;;  %v1858_v3 = vadd.f32 %v14171_v25, %v14170_v9  ;;  %v4096_v19 = vsel %vm724_vm0, %v4093_v7, %v4095_v5  ;;  %v4098_v62 = vsel %vm724_vm0, %v4095_v5, %v4097_v42  ;;  %v4148_v5 = vpop.permute.xlu1 %4147  ;;  %v14183_v21 = vld [vmem:[#allocation3_spill] sm:$0xff]  ;;  %v14186_v9 = vld [vmem:[#allocation88_spill] sm:$0xff] }
 0x36d   : > { %v5250_v49 = vadd.f32 %v11820_v61, %v5225_v32  ;;  %v4139_v20 = vadd.f32 %v4100_v55, %v11601_v40  ;;  %v4137_v57 = vadd.f32 %v4096_v19, %v11643_v53  ;;  %v4138_v28 = vadd.f32 %v4098_v62, %v11619_v58  ;;  %v14176_v40 = vld [vmem:[#allocation80_spill] sm:$0xff]  ;;  %v14181_v55 = vld [vmem:[#allocation34_spill] sm:$0xff] }
 0x36e   : > { %v4933_v46 = vrot.slane %v4883_v31, 1  ;;  %v4977_v45 = vadd.f32 %v4938_v23, %v4866_v33  ;;  %v5162_v14 = vrot.slane %v5112_v34, 2  ;;  %v14172_v29 = vrot.slane %v14086_v13, 2  ;;  %v14180_v34 = vld [vmem:[#allocation38_spill] sm:$0xff] }
 0x36f   : > { %v5268_v30 = vmax.f32 %v5250_v49, 0.0  ;;  %v4257_v39 = vadd.f32 %v11593_v12, %v4139_v20  ;;  %v14174_v11 = vrot.slane %v14173_v47, 2  ;;  %v4255_v0 = vadd.f32 %v14175_v54, %v4137_v57  ;;  %v14177_v12 = vld [vmem:[#allocation27_spill] sm:$0xff]  ;;  %v14187_v49 = vld [vmem:[#allocation41_spill] sm:$0xff]  ;;  %v14194_v47 = vld [vmem:[#allocation242_spill] sm:$0xff] }
 0x370   : > { %v4256_v6 = vadd.f32 %v14176_v40, %v4138_v28  ;;  %v4934_v58 = vsel %vm724_vm0, %v4931_v36, %v4933_v46  ;;  %v4936_v53 = vsel %vm724_vm0, %v4933_v46, %v4935_v4  ;;  %v14179_v42 = vmax.f32 %v14177_v12, %v14178_v60  ;;  %v14184_v36 = vld [vmem:[#allocation223_spill] sm:$0xff]  ;;  %v14190_v28 = vld [vmem:[#allocation101_spill] sm:$0xff]  ;;  %v14197_v54 = vld [vmem:[#allocation220_spill] sm:$0xff] }
 0x371   : > { %v1928_v7 = vsel %vm1925_vm1, %v14174_v11, %v14172_v29  ;;  %v5668_v17 = vpack.c.bf16 %v5268_v30, %v5268_v30  ;;  %v4975_v13 = vadd.f32 %v4934_v58, %v4864_v37  ;;  %v4976_v32 = vadd.f32 %v4936_v53, %v4865_v59  ;;  %v14188_v59 = vld [vmem:[#allocation100_spill] sm:$0xff]  ;;  %v14202_v60 = vld [vmem:[#allocation109_spill] sm:$0xff] }
 0x372   : > { %v4275_v10 = vmax.f32 %v14179_v42, %v4257_v39  ;;  %v5167_v31 = vsel %vm1925_vm1, %v5164_v38, %v5166_v15  ;;  %v14182_v23 = vmax.f32 %v14180_v34, %v14181_v55  ;;  %v14185_v33 = vmax.f32 %v14183_v21, %v14184_v36  ;;  %v14192_v39 = vld [vmem:[#allocation252_spill] sm:$0xff] }
 0x373   : > { %v5088_v25 = vadd.f32 %v14186_v9, %v4977_v45  ;;  %5359 = vst.msk [vmem:[%s11859_s29 + $0x3c] sm:$0xf] %vm5343_vm2, %v5668_v17  ;;  %v5086_v37 = vadd.f32 %v14187_v49, %v4975_v13  ;;  %v5087_v19 = vadd.f32 %v14188_v59, %v4976_v32  ;;  %v5163_v48 = vsel %vm1925_vm1, %v5160_v22, %v5162_v14  ;;  %v14201_v12 = vld [vmem:[#allocation36_spill] sm:$0xff]  ;;  %v14207_v59 = vld [vmem:[#allocation19_spill] sm:$0xff] }
 0x374   : > { %v4273_v1 = vmax.f32 %v14182_v23, %v4255_v0  ;;  %v4274_v4 = vmax.f32 %v14185_v33, %v4256_v6  ;;  %v1981_v15 = vadd.f32 %v1928_v7, %v1858_v3  ;;  %v5165_v62 = vsel %vm1925_vm1, %v5162_v14, %v5164_v38  ;;  %v14196_v7 = vld [vmem:[#allocation104_spill] sm:$0xff]  ;;  %v6770_v14 = vpop.permute.xlu0 %6769  ;;  %v14199_v0 = vld [vmem:[#allocation194_spill] sm:$0xff] }
 0x375   : > { %v5206_v20 = vadd.f32 %v5167_v31, %v5088_v25  ;;  %v14189_v57 = vrot.slane %v11801_v26, 1  ;;  %v14191_v46 = vrot.slane %v14190_v28, 1  ;;  %v4150_v30 = vmul.f32 %v4148_v5, %v13735_v27  ;;  %v14203_v31 = vld [vmem:[#allocation70_spill] sm:$0xff]  ;;  %v14204_v23 = vld [vmem:[#allocation24_spill] sm:$0xff]  ;;  %v14206_v25 = vld [vmem:[#allocation39_spill] sm:$0xff] }
 0x376   : > { %v14193_v29 = vrot.slane %v14192_v39, 2  ;;  %v14195_v11 = vrot.slane %v14194_v47, 2  ;;  %v5204_v22 = vadd.f32 %v5163_v48, %v5086_v37  ;;  %v5205_v3 = vadd.f32 %v5165_v62, %v5087_v19 }
 0x377   : > { %v4072_v45 = vsel %vm724_vm0, %v14191_v46, %v14189_v57  ;;  %v3121_v38 = vmax.f32 %v1981_v15, %v14196_v7  ;;  %v14198_v26 = vrot.slane %v14197_v54, 2  ;;  %v14200_v40 = vrot.slane %v14199_v0, 2  ;;  %v14216_v54 = vld [vmem:[#allocation287_spill] sm:$0xff]  ;;  %v14217_v0 = vld [vmem:[#allocation285_spill] sm:$0xff] }
 0x378   : > { %v12172_v50 = vsel %vm1925_vm1, %v14195_v11, %v14193_v29  ;;  %v5224_v58 = vmax.f32 %v4275_v10, %v5206_v20  ;;  %v4188_v53 = vrot.slane %v4150_v30, 2  ;;  %v4981_v17 = vmul.f32 %v4148_v5, %v9057_v44  ;;  %v14212_v20 = vld [vmem:[#allocation248_spill] sm:$0xff]  ;;  %v5097_v11 = vpop.permute.xlu0 %5096 }
 0x379   : > { %v3618_v6 = vsel %vm1925_vm1, %v14200_v40, %v14198_v26  ;;  %v3653_v42 = vadd.f32 %v14202_v60, %v14201_v12  ;;  %v5222_v13 = vmax.f32 %v4273_v1, %v5204_v22  ;;  %v5223_v32 = vmax.f32 %v4274_v4, %v5205_v3  ;;  %v14209_v4 = vld [vmem:[#allocation162_spill] sm:$0xff]  ;;  %v14214_v3 = vld [vmem:[#allocation37_spill] sm:$0xff] }
 0x37a   : > { %v4125_v34 = vadd.f32 %v4072_v45, %v14203_v31  ;;  %v5249_v55 = vadd.f32 %v11820_v61, %v5224_v58  ;;  %v14205_v21 = vrot.slane %v14204_v23, 2  ;;  %v5019_v33 = vrot.slane %v4981_v17, 2  ;;  %v14218_v12 = vld [vmem:[#allocation105_spill] sm:$0xff] }
 0x37b   : > { %v6772_v9 = vunpack.i.h.bf16 %v6770_v14  ;;  %v3654_v10 = vadd.f32 %v3618_v6, %v14206_v25  ;;  %v5247_v49 = vadd.f32 %v11820_v61, %v5222_v13  ;;  %v5248_v5 = vadd.f32 %v11820_v61, %v5223_v32 }
 0x37c   : > { %v4190_v36 = vsel %vm1925_vm1, %v4188_v53, %v14205_v21  ;;  %v14208_v1 = vrot.slane %v14207_v59, 1  ;;  %v14210_v19 = vrot.slane %v14209_v4, 1  ;;  %v5267_v15 = vmax.f32 %v5249_v55, 0.0 }
 0x37d   : > { %v4243_v37 = vadd.f32 %v4190_v36, %v4125_v34  ;;  %v14211_v62 = vrot.slane %v11815_v63, 1  ;;  %v14213_v57 = vrot.slane %v14212_v20, 1  ;;  %v4050_v46 = vmul.f32 %v6772_v9, %v9057_v44 }
 0x37e   : > { %v3860_v48 = vsel %vm724_vm0, %v14210_v19, %v14208_v1  ;;  %v5265_v45 = vmax.f32 %v5247_v49, 0.0  ;;  %v5266_v30 = vmax.f32 %v5248_v5, 0.0  ;;  %v4888_v29 = vmul.f32 %v6772_v9, %v8599_v35 }
 0x37f   : > { %v4910_v28 = vsel %vm724_vm0, %v14213_v57, %v14211_v62  ;;  %v4261_v39 = vmax.f32 %v3121_v38, %v4243_v37  ;;  %v5667_v22 = vpack.c.bf16 %v5267_v15, %v5267_v15  ;;  %v14215_v7 = vrot.slane %v14214_v3, 2  ;;  %v14220_v37 = vld [vmem:[#allocation238_spill] sm:$0xff]  ;;  %v14223_v57 = vld [vmem:[#allocation43_spill] sm:$0xff] }
 0x380   : > { %v4830_v26 = vrot.slane %v14216_v54, 2  ;;  %v4832_v40 = vrot.slane %v14217_v0, 2  ;;  %v5665_v6 = vpack.c.bf16 %v5265_v45, %v5265_v45  ;;  %v5666_v58 = vpack.c.bf16 %v5266_v30, %v5266_v30  ;;  %v14228_v45 = vld [vmem:[#allocation25_spill] sm:$0xff] }
 0x381   : > { %v5021_v63 = vsel %vm1925_vm1, %v5019_v33, %v14215_v7  ;;  %v5117_v53 = vmul.f32 %v6772_v9, %v13735_v27  ;;  %v6771_v17 = vunpack.i.l.bf16 %v6770_v14  ;;  %v3897_v38 = vadd.f32 %v3860_v48, %v3653_v42  ;;  %5358 = vst.msk [vmem:[%s11859_s29 + $0x38] sm:$0xf] %vm5343_vm2, %v5667_v22  ;;  %v14219_v14 = vld [vmem:[#allocation16_spill] sm:$0xff] }
 0x382   : > { %v4963_v60 = vadd.f32 %v4910_v28, %v14218_v12  ;;  %v4105_v13 = vrot.slane %v4050_v46, 1  ;;  %v5099_v32 = vmul.f32 %v5097_v11, %v13735_v27  ;;  %5356 = vst.msk [vmem:[%s11859_s29 + $0x30] sm:$0xf] %vm5343_vm2, %v5665_v6  ;;  %5357 = vst.msk [vmem:[%s11859_s29 + $0x34] sm:$0xf] %vm5343_vm2, %v5666_v58  ;;  %v4943_v31 = vrot.slane %v4888_v29, 1 }
 0x383   : > { %v4049_v34 = vmul.f32 %v6771_v17, %v9057_v44  ;;  %v4887_v55 = vmul.f32 %v6771_v17, %v8599_v35  ;;  %v5116_v23 = vmul.f32 %v6771_v17, %v13735_v27  ;;  %v3898_v42 = vadd.f32 %v14219_v14, %v3654_v10  ;;  %v14221_v44 = vld [vmem:[#allocation99_spill] sm:$0xff]  ;;  %v14225_v28 = vld [vmem:[#allocation46_spill] sm:$0xff] }
 0x384   : > { %v5074_v21 = vadd.f32 %v5021_v63, %v4963_v60  ;;  %v4833_v36 = vsel %vm1925_vm1, %v4830_v26, %v4832_v40  ;;  %v5137_v33 = vrot.slane %v5099_v32, 2  ;;  %v5172_v9 = vrot.slane %v5117_v53, 2  ;;  %v14232_v40 = vld [vmem:[#allocation231_spill] sm:$0xff]  ;;  %v14235_v53 = vld [vmem:[#allocation266_spill] sm:$0xff] }
 0x385   : > { %v4103_v25 = vrot.slane %v4049_v34, 1  ;;  %v4831_v49 = vsel %vm1925_vm1, %v4828_v24, %v4830_v26  ;;  %v4941_v5 = vrot.slane %v4887_v55, 1  ;;  %v4869_v1 = vadd.f32 %v4833_v36, %v14221_v44  ;;  %v14233_v6 = vld [vmem:[#allocation103_spill] sm:$0xff]  ;;  %v14236_v17 = vld [vmem:[#allocation178_spill] sm:$0xff] }
 0x386   : > { %v4868_v59 = vadd.f32 %v4831_v49, %v14220_v37  ;;  %v5170_v35 = vrot.slane %v5116_v23, 2  ;;  %v14222_v27 = vrot.slane %v11830_v41, 2  ;;  %v14224_v41 = vrot.slane %v14223_v57, 2 }
 0x387   : > { %v4104_v4 = vsel %vm724_vm0, %v4101_v2, %v4103_v25  ;;  %v4106_v19 = vsel %vm724_vm0, %v4103_v25, %v4105_v13  ;;  %v4942_v51 = vsel %vm724_vm0, %v4939_v16, %v4941_v5  ;;  %v4944_v24 = vsel %vm724_vm0, %v4941_v5, %v4943_v31 }
 0x388   : > { %v5139_v10 = vsel %vm1925_vm1, %v5137_v33, %v14222_v27  ;;  %v4141_v48 = vadd.f32 %v4104_v4, %v3897_v38  ;;  %v4142_v15 = vadd.f32 %v4106_v19, %v3898_v42  ;;  %v4979_v62 = vadd.f32 %v4942_v51, %v4868_v59 }
 0x389   : > { %v4980_v20 = vadd.f32 %v4944_v24, %v4869_v1  ;;  %v14226_v46 = vrot.slane %v14225_v28, 2  ;;  %v14227_v2 = vrot.slane %v14194_v47, 2  ;;  %v14229_v30 = vrot.slane %v14228_v45, 2 }
 0x38a   : > { %v14231_v29 = vrot.slane %v11720_v56, 2  ;;  %v5192_v22 = vadd.f32 %v5139_v10, %v5074_v21  ;;  %v4260_v7 = vadd.f32 %v12172_v50, %v4142_v15  ;;  %v5171_v47 = vsel %vm1925_vm1, %v5168_v18, %v5170_v35 }
 0x38b   : > { %v5055_v8 = vsel %vm1925_vm1, %v14226_v46, %v14224_v41  ;;  %v4222_v52 = vsel %vm1925_vm1, %v14229_v30, %v14227_v2  ;;  %v14230_v16 = vmov %v14226_v46  ;;  %v5173_v26 = vsel %vm1925_vm1, %v5170_v35, %v5172_v9 }
 0x38c   : > { %v5053_v11 = vsel %vm1925_vm1, %v14231_v29, %v14230_v16  ;;  %v4259_v3 = vadd.f32 %v4222_v52, %v4141_v48  ;;  %v5091_v54 = vadd.f32 %v5055_v8, %v4980_v20  ;;  %v5210_v0 = vmax.f32 %v4261_v39, %v5192_v22 }
 0x38d   : > { %v5090_v63 = vadd.f32 %v5053_v11, %v4979_v62  ;;  %v14234_v58 = vmax.f32 %v14232_v40, %v14233_v6  ;;  %v14237_v38 = vmax.f32 %v14235_v53, %v14236_v17 }
 0x38e   : > { %v5209_v60 = vadd.f32 %v5173_v26, %v5091_v54  ;;  %v5235_v43 = vadd.f32 %v11820_v61, %v5210_v0 }
 0x38f   : > { %v4277_v56 = vmax.f32 %v14234_v58, %v4259_v3  ;;  %v4278_v12 = vmax.f32 %v14237_v38, %v4260_v7  ;;  %v5208_v50 = vadd.f32 %v5171_v47, %v5090_v63 }
 0x390   : > { %v5253_v32 = vmax.f32 %v5235_v43, 0.0 }
 0x391   : > { %v5226_v13 = vmax.f32 %v4277_v56, %v5208_v50  ;;  %v5227_v18 = vmax.f32 %v4278_v12, %v5209_v60 }
 0x392   : > { %v5653_v34 = vpack.c.bf16 %v5253_v32, %v5253_v32 }
 0x393   : > { %v5251_v31 = vadd.f32 %v11820_v61, %v5226_v13  ;;  %v5252_v39 = vadd.f32 %v11820_v61, %v5227_v18 }
 0x394   : > { %5344 = vst.msk [vmem:[%s11859_s29] sm:$0xf] %vm5343_vm2, %v5653_v34 }
 0x395   : > { %v5269_v55 = vmax.f32 %v5251_v31, 0.0  ;;  %v5270_v23 = vmax.f32 %v5252_v39, 0.0 }
 0x397   : > { %v5669_v14 = vpack.c.bf16 %v5269_v55, %v5269_v55  ;;  %v5670_v42 = vpack.c.bf16 %v5270_v23, %v5270_v23 }
 0x399   : > { %5360 = vst.msk [vmem:[%s11859_s29 + $0x40] sm:$0xf] %vm5343_vm2, %v5669_v14  ;;  %5361 = vst.msk [vmem:[%s11859_s29 + $0x44] sm:$0xf] %vm5343_vm2, %v5670_v42 }
 0x39a PF: > { %s13_s14 = sadd.s32 1, %s6795_s14   ;;  %s14238_s12 = smov %s6791_s13 }
 0x39b   : > { %p10_p5 = scmp.ge.s32.totalorder %s13_s14, 4   ;;  %s14239_s13 = smov %s14241_s15 }
 0x39d   :  { %12 = sbr.rel (!%p10_p5) target bundleno = 2 (0x2), region = 65 }

</bundles_post_ra>
